<compile_context>
chip_gen: v7x
topology: tpu7x:2x2x1
jax: 0.10.0
libtpu: 0.0.40
codegen_flags: <defaults>
</compile_context>

<pallas_src>
import functools

import jax
import jax.numpy as jnp
from jax.experimental import pallas as pl
from jax.experimental.pallas import tpu as pltpu


# --------------------------------------------------------------------------
# Pallas kernel: one (batch, row-tile) step of reflection-padded 7x7 conv
# with fused bias + tanh.  In-kernel reflect pad, im2col into VMEM scratch,
# single big-K MXU dot.
# --------------------------------------------------------------------------
def _outconv7x7_kernel(x_ref, w_ref, b_ref, o_ref, pad_ref, patches_ref,
                       *, TH, H, W, Cin, Cout):
    # x_ref:       (1, H, W, Cin)     bf16  unpadded image (resident per batch)
    # w_ref:       (49*Cin, Cout)     bf16  weights, (dy, dx, cin) flattened on K
    # b_ref:       (1, Cout)          f32   bias
    # o_ref:       (1, TH, W, Cout)   f32   output row tile
    # pad_ref:     (H+6, W+6, Cin)    bf16  reflection-padded image scratch
    # patches_ref: (TH*W, 49*Cin)     bf16  im2col scratch
    r = pl.program_id(1)

    # Build the reflection-padded image once per batch element; the scratch
    # persists across the (sequential, "arbitrary") row-tile axis.
    @pl.when(r == 0)
    def _build_padded():
        img = x_ref[0]                                    # (H, W, Cin) bf16
        # Center.
        pad_ref[3:3 + H, 3:3 + W, :] = img
        # Column reflection: padded cols [0,1,2] <- src cols [3,2,1];
        #                    padded cols [W+3..W+5] <- src cols [W-2,W-3,W-4].
        for j in range(3):
            pad_ref[3:3 + H, j:j + 1, :] = img[:, 3 - j:4 - j, :]
            pad_ref[3:3 + H, W + 3 + j:W + 4 + j, :] = img[:, W - 2 - j:W - 1 - j, :]
        # Row reflection: copy already column-padded rows.
        for i in range(3):
            pad_ref[i:i + 1, :, :] = pad_ref[6 - i:7 - i, :, :]
            pad_ref[H + 3 + i:H + 4 + i, :, :] = pad_ref[H + 1 - i:H + 2 - i, :, :]

    # Rows needed for this output tile (TH output rows -> TH+6 padded rows).
    row0 = pl.multiple_of(r * TH, TH)
    slab = pad_ref[pl.ds(row0, TH + 6), :, :]             # (TH+6, W+6, Cin) bf16

    # im2col: column block (dy*7+dx) of the patch matrix holds the shifted patch.
    for dy in range(7):
        for dx in range(7):
            k0 = (dy * 7 + dx) * Cin
            patches_ref[:, k0:k0 + Cin] = (
                slab[dy:dy + TH, dx:dx + W, :].reshape(TH * W, Cin))

    # Single large-K matmul on the MXU, f32 accumulation; fused bias + tanh.
    acc = jnp.dot(patches_ref[...], w_ref[...],
                  preferred_element_type=jnp.float32)     # (TH*W, Cout) f32
    acc = acc + b_ref[...]
    o_ref[0] = jnp.tanh(acc).reshape(TH, W, Cout).astype(o_ref.dtype)


def outconv(x_nchw, w_hwio, b, *, interpret=False):
    """Outconv forward: reflection-pad 3, 7x7 conv (stride 1, VALID), tanh.

    x_nchw: (N, Cin, H, W) float
    w_hwio: (7, 7, Cin, Cout) float
    b:      (Cout,) float
    returns (N, Cout, H, W) float32
    """
    N, Cin, H, W = x_nchw.shape
    Cout = w_hwio.shape[-1]

    # NCHW -> NHWC, bf16 for the MXU.  Reflection padding happens in-kernel.
    x = jnp.transpose(x_nchw, (0, 2, 3, 1)).astype(jnp.bfloat16)

    # Weights flattened (dy, dx, cin) -> K, cast to bf16 for the MXU.
    w2d = w_hwio.reshape(49 * Cin, Cout).astype(jnp.bfloat16)
    b2d = b.reshape(1, Cout).astype(jnp.float32)

    # Row tile: largest divisor of H with TH*W <= 1024 rows of im2col.
    TH = 1
    for d in range(H, 0, -1):
        if H % d == 0 and d * W <= 1024:
            TH = d
            break

    kernel = functools.partial(_outconv7x7_kernel,
                               TH=TH, H=H, W=W, Cin=Cin, Cout=Cout)
    out_nhwc = pl.pallas_call(
        kernel,
        out_shape=jax.ShapeDtypeStruct((N, H, W, Cout), jnp.float32),
        grid_spec=pltpu.PrefetchScalarGridSpec(
            num_scalar_prefetch=0,
            grid=(N, H // TH),
            in_specs=[
                # Image: block index depends only on n -> fetched once per batch
                # element and kept resident across the row-tile axis.
                pl.BlockSpec((1, H, W, Cin), lambda n, r: (n, 0, 0, 0)),
                pl.BlockSpec((49 * Cin, Cout), lambda n, r: (0, 0)),
                pl.BlockSpec((1, Cout), lambda n, r: (0, 0)),
            ],
            out_specs=pl.BlockSpec((1, TH, W, Cout), lambda n, r: (n, r, 0, 0)),
            scratch_shapes=[
                pltpu.VMEM((H + 6, W + 6, Cin), jnp.bfloat16),   # padded image
                pltpu.VMEM((TH * W, 49 * Cin), jnp.bfloat16),    # im2col patches
            ],
        ),
        compiler_params=pltpu.CompilerParams(
            # Row axis must stay sequential: the padded-image scratch is built
            # at r == 0 and reused by later row tiles of the same batch element.
            dimension_semantics=("parallel", "arbitrary"),
            vmem_limit_bytes=64 * 1024 * 1024,
        ),
        interpret=interpret,
    )(x, w2d, b2d)

    return jnp.transpose(out_nhwc, (0, 3, 1, 2))  # NHWC -> NCHW


if __name__ == "__main__":
    key = jax.random.PRNGKey(0)
    kx, kw, kb = jax.random.split(key, 3)

    # Small shapes consistent with Outconv (NCHW input; e.g. in_ch=32 -> out_ch=3).
    N, Cin, Cout, H, W = 2, 32, 3, 16, 16
    x = jax.random.normal(kx, (N, Cin, H, W), jnp.float32)
    std = (2.0 / (49.0 * Cin)) ** 0.5
    w = std * jax.random.normal(kw, (7, 7, Cin, Cout), jnp.float32)
    b = 0.01 * jax.random.normal(kb, (Cout,), jnp.float32)

    out = outconv(x, w, b)
    jax.block_until_ready(out)
    assert out.shape == (N, Cout, H, W)

    # Pure-JAX reference: reflect pad + 7x7 VALID conv + bias + tanh.
    x_nhwc = jnp.transpose(x, (0, 2, 3, 1))
    xp_ref = jnp.pad(x_nhwc, ((0, 0), (3, 3), (3, 3), (0, 0)), mode="reflect")
    ref = jnp.tanh(
        jax.lax.conv_general_dilated(
            xp_ref, w, window_strides=(1, 1), padding="VALID",
            dimension_numbers=("NHWC", "HWIO", "NHWC")) + b)
    ref = jnp.transpose(ref, (0, 3, 1, 2))

    max_err = float(jnp.max(jnp.abs(out - ref)))
    assert max_err < 5e-2, f"max abs err too large: {max_err}"
    print("KERNEL_OK")
</pallas_src>

<mosaic_0001>
module attributes {stable_mosaic.version = 11 : i64} {
  func.func @_outconv7x7_kernel(%arg0: i32, %arg1: i32, %arg2: memref<1x16x16x32xbf16, #tpu.memory_space<vmem>>, %arg3: memref<1568x3xbf16, #tpu.memory_space<vmem>>, %arg4: memref<1x3xf32, #tpu.memory_space<vmem>>, %arg5: memref<1x16x16x3xf32, #tpu.memory_space<vmem>>, %arg6: memref<22x22x32xbf16, #tpu.memory_space<vmem>>, %arg7: memref<256x1568xbf16, #tpu.memory_space<vmem>>) attributes {dimension_semantics = [#tpu.dimension_semantics<parallel>, #tpu.dimension_semantics<arbitrary>], iteration_bounds = array<i64: 2, 1>, scalar_prefetch = 0 : i64, scratch_operands = 2 : i64, tpu.core_type = #tpu.core_type<tc>, window_params = [{transform_indices = @transform_0, window_bounds = array<i64: 1, 16, 16, 32>}, {pipeline_mode = #tpu.pipeline_mode<synchronous>, transform_indices = @transform_1, window_bounds = array<i64: 1568, 3>}, {pipeline_mode = #tpu.pipeline_mode<synchronous>, transform_indices = @transform_2, window_bounds = array<i64: 1, 3>}, {transform_indices = @transform_3, window_bounds = array<i64: 1, 16, 16, 3>}]} {
    %c0_i32 = arith.constant 0 : i32
    %0 = arith.cmpi eq, %arg1, %c0_i32 : i32
    %1 = arith.extui %0 : i1 to i32
    %c0_i32_0 = arith.constant 0 : i32
    %2 = arith.cmpi ne, %1, %c0_i32_0 : i32
    scf.if %2 {
      %c0_62 = arith.constant 0 : index
      %c0_63 = arith.constant 0 : index
      %c0_64 = arith.constant 0 : index
      %c0_65 = arith.constant 0 : index
      %165 = vector.load %arg2[%c0_62, %c0_63, %c0_64, %c0_65] : memref<1x16x16x32xbf16, #tpu.memory_space<vmem>>, vector<1x16x16x32xbf16>
      %166 = vector.shape_cast %165 : vector<1x16x16x32xbf16> to vector<16x16x32xbf16>
      %c3 = arith.constant 3 : index
      %c3_66 = arith.constant 3 : index
      %c0_67 = arith.constant 0 : index
      %167 = vector.load %arg6[%c3, %c3_66, %c0_67] : memref<22x22x32xbf16, #tpu.memory_space<vmem>>, vector<16x16x32xbf16>
      tpu.vector_store %arg6[%c3, %c3_66, %c0_67], %166 {strides = array<i32>} : memref<22x22x32xbf16, #tpu.memory_space<vmem>>, vector<16x16x32xbf16>,
      %168 = vector.extract_strided_slice %166 {offsets = [0, 3, 0], sizes = [16, 1, 32], strides = [1, 1, 1]} : vector<16x16x32xbf16> to vector<16x1x32xbf16>
      %c3_68 = arith.constant 3 : index
      %c0_69 = arith.constant 0 : index
      %c0_70 = arith.constant 0 : index
      %169 = vector.load %arg6[%c3_68, %c0_69, %c0_70] : memref<22x22x32xbf16, #tpu.memory_space<vmem>>, vector<16x1x32xbf16>
      tpu.vector_store %arg6[%c3_68, %c0_69, %c0_70], %168 {strides = array<i32>} : memref<22x22x32xbf16, #tpu.memory_space<vmem>>, vector<16x1x32xbf16>,
      %170 = vector.extract_strided_slice %166 {offsets = [0, 14, 0], sizes = [16, 1, 32], strides = [1, 1, 1]} : vector<16x16x32xbf16> to vector<16x1x32xbf16>
      %c3_71 = arith.constant 3 : index
      %c19 = arith.constant 19 : index
      %c0_72 = arith.constant 0 : index
      %171 = vector.load %arg6[%c3_71, %c19, %c0_72] : memref<22x22x32xbf16, #tpu.memory_space<vmem>>, vector<16x1x32xbf16>
      tpu.vector_store %arg6[%c3_71, %c19, %c0_72], %170 {strides = array<i32>} : memref<22x22x32xbf16, #tpu.memory_space<vmem>>, vector<16x1x32xbf16>,
      %172 = vector.extract_strided_slice %166 {offsets = [0, 2, 0], sizes = [16, 1, 32], strides = [1, 1, 1]} : vector<16x16x32xbf16> to vector<16x1x32xbf16>
      %c3_73 = arith.constant 3 : index
      %c1 = arith.constant 1 : index
      %c0_74 = arith.constant 0 : index
      %173 = vector.load %arg6[%c3_73, %c1, %c0_74] : memref<22x22x32xbf16, #tpu.memory_space<vmem>>, vector<16x1x32xbf16>
      tpu.vector_store %arg6[%c3_73, %c1, %c0_74], %172 {strides = array<i32>} : memref<22x22x32xbf16, #tpu.memory_space<vmem>>, vector<16x1x32xbf16>,
      %174 = vector.extract_strided_slice %166 {offsets = [0, 13, 0], sizes = [16, 1, 32], strides = [1, 1, 1]} : vector<16x16x32xbf16> to vector<16x1x32xbf16>
      %c3_75 = arith.constant 3 : index
      %c20 = arith.constant 20 : index
      %c0_76 = arith.constant 0 : index
      %175 = vector.load %arg6[%c3_75, %c20, %c0_76] : memref<22x22x32xbf16, #tpu.memory_space<vmem>>, vector<16x1x32xbf16>
      tpu.vector_store %arg6[%c3_75, %c20, %c0_76], %174 {strides = array<i32>} : memref<22x22x32xbf16, #tpu.memory_space<vmem>>, vector<16x1x32xbf16>,
      %176 = vector.extract_strided_slice %166 {offsets = [0, 1, 0], sizes = [16, 1, 32], strides = [1, 1, 1]} : vector<16x16x32xbf16> to vector<16x1x32xbf16>
      %c3_77 = arith.constant 3 : index
      %c2 = arith.constant 2 : index
      %c0_78 = arith.constant 0 : index
      %177 = vector.load %arg6[%c3_77, %c2, %c0_78] : memref<22x22x32xbf16, #tpu.memory_space<vmem>>, vector<16x1x32xbf16>
      tpu.vector_store %arg6[%c3_77, %c2, %c0_78], %176 {strides = array<i32>} : memref<22x22x32xbf16, #tpu.memory_space<vmem>>, vector<16x1x32xbf16>,
      %178 = vector.extract_strided_slice %166 {offsets = [0, 12, 0], sizes = [16, 1, 32], strides = [1, 1, 1]} : vector<16x16x32xbf16> to vector<16x1x32xbf16>
      %c3_79 = arith.constant 3 : index
      %c21 = arith.constant 21 : index
      %c0_80 = arith.constant 0 : index
      %179 = vector.load %arg6[%c3_79, %c21, %c0_80] : memref<22x22x32xbf16, #tpu.memory_space<vmem>>, vector<16x1x32xbf16>
      tpu.vector_store %arg6[%c3_79, %c21, %c0_80], %178 {strides = array<i32>} : memref<22x22x32xbf16, #tpu.memory_space<vmem>>, vector<16x1x32xbf16>,
      %c6 = arith.constant 6 : index
      %c0_81 = arith.constant 0 : index
      %c0_82 = arith.constant 0 : index
      %180 = vector.load %arg6[%c6, %c0_81, %c0_82] : memref<22x22x32xbf16, #tpu.memory_space<vmem>>, vector<1x22x32xbf16>
      %c0_83 = arith.constant 0 : index
      %c0_84 = arith.constant 0 : index
      %c0_85 = arith.constant 0 : index
      %181 = vector.load %arg6[%c0_83, %c0_84, %c0_85] : memref<22x22x32xbf16, #tpu.memory_space<vmem>>, vector<1x22x32xbf16>
      tpu.vector_store %arg6[%c0_83, %c0_84, %c0_85], %180 {strides = array<i32>} : memref<22x22x32xbf16, #tpu.memory_space<vmem>>, vector<1x22x32xbf16>,
      %c17 = arith.constant 17 : index
      %c0_86 = arith.constant 0 : index
      %c0_87 = arith.constant 0 : index
      %182 = vector.load %arg6[%c17, %c0_86, %c0_87] : memref<22x22x32xbf16, #tpu.memory_space<vmem>>, vector<1x22x32xbf16>
      %c19_88 = arith.constant 19 : index
      %c0_89 = arith.constant 0 : index
      %c0_90 = arith.constant 0 : index
      %183 = vector.load %arg6[%c19_88, %c0_89, %c0_90] : memref<22x22x32xbf16, #tpu.memory_space<vmem>>, vector<1x22x32xbf16>
      tpu.vector_store %arg6[%c19_88, %c0_89, %c0_90], %182 {strides = array<i32>} : memref<22x22x32xbf16, #tpu.memory_space<vmem>>, vector<1x22x32xbf16>,
      %c5 = arith.constant 5 : index
      %c0_91 = arith.constant 0 : index
      %c0_92 = arith.constant 0 : index
      %184 = vector.load %arg6[%c5, %c0_91, %c0_92] : memref<22x22x32xbf16, #tpu.memory_space<vmem>>, vector<1x22x32xbf16>
      %c1_93 = arith.constant 1 : index
      %c0_94 = arith.constant 0 : index
      %c0_95 = arith.constant 0 : index
      %185 = vector.load %arg6[%c1_93, %c0_94, %c0_95] : memref<22x22x32xbf16, #tpu.memory_space<vmem>>, vector<1x22x32xbf16>
      tpu.vector_store %arg6[%c1_93, %c0_94, %c0_95], %184 {strides = array<i32>} : memref<22x22x32xbf16, #tpu.memory_space<vmem>>, vector<1x22x32xbf16>,
      %c16 = arith.constant 16 : index
      %c0_96 = arith.constant 0 : index
      %c0_97 = arith.constant 0 : index
      %186 = vector.load %arg6[%c16, %c0_96, %c0_97] : memref<22x22x32xbf16, #tpu.memory_space<vmem>>, vector<1x22x32xbf16>
      %c20_98 = arith.constant 20 : index
      %c0_99 = arith.constant 0 : index
      %c0_100 = arith.constant 0 : index
      %187 = vector.load %arg6[%c20_98, %c0_99, %c0_100] : memref<22x22x32xbf16, #tpu.memory_space<vmem>>, vector<1x22x32xbf16>
      tpu.vector_store %arg6[%c20_98, %c0_99, %c0_100], %186 {strides = array<i32>} : memref<22x22x32xbf16, #tpu.memory_space<vmem>>, vector<1x22x32xbf16>,
      %c4 = arith.constant 4 : index
      %c0_101 = arith.constant 0 : index
      %c0_102 = arith.constant 0 : index
      %188 = vector.load %arg6[%c4, %c0_101, %c0_102] : memref<22x22x32xbf16, #tpu.memory_space<vmem>>, vector<1x22x32xbf16>
      %c2_103 = arith.constant 2 : index
      %c0_104 = arith.constant 0 : index
      %c0_105 = arith.constant 0 : index
      %189 = vector.load %arg6[%c2_103, %c0_104, %c0_105] : memref<22x22x32xbf16, #tpu.memory_space<vmem>>, vector<1x22x32xbf16>
      tpu.vector_store %arg6[%c2_103, %c0_104, %c0_105], %188 {strides = array<i32>} : memref<22x22x32xbf16, #tpu.memory_space<vmem>>, vector<1x22x32xbf16>,
      %c15 = arith.constant 15 : index
      %c0_106 = arith.constant 0 : index
      %c0_107 = arith.constant 0 : index
      %190 = vector.load %arg6[%c15, %c0_106, %c0_107] : memref<22x22x32xbf16, #tpu.memory_space<vmem>>, vector<1x22x32xbf16>
      %c21_108 = arith.constant 21 : index
      %c0_109 = arith.constant 0 : index
      %c0_110 = arith.constant 0 : index
      %191 = vector.load %arg6[%c21_108, %c0_109, %c0_110] : memref<22x22x32xbf16, #tpu.memory_space<vmem>>, vector<1x22x32xbf16>
      tpu.vector_store %arg6[%c21_108, %c0_109, %c0_110], %190 {strides = array<i32>} : memref<22x22x32xbf16, #tpu.memory_space<vmem>>, vector<1x22x32xbf16>,
    } else {
    }
    %c16_i32 = arith.constant 16 : i32
    %3 = arith.muli %arg1, %c16_i32 : i32
    %4 = tpu.assume_multiple %3, 16 : i32
    %5 = arith.index_cast %4 : i32 to index
    %c0 = arith.constant 0 : index
    %c0_1 = arith.constant 0 : index
    %6 = vector.load %arg6[%5, %c0, %c0_1] : memref<22x22x32xbf16, #tpu.memory_space<vmem>>, vector<22x22x32xbf16>
    %7 = vector.extract_strided_slice %6 {offsets = [0, 0, 0], sizes = [16, 16, 32], strides = [1, 1, 1]} : vector<22x22x32xbf16> to vector<16x16x32xbf16>
    %8 = vector.shape_cast %7 : vector<16x16x32xbf16> to vector<256x32xbf16>
    %c0_2 = arith.constant 0 : index
    %c0_3 = arith.constant 0 : index
    %9 = vector.load %arg7[%c0_2, %c0_3] : memref<256x1568xbf16, #tpu.memory_space<vmem>>, vector<256x32xbf16>
    tpu.vector_store %arg7[%c0_2, %c0_3], %8 {strides = array<i32>} : memref<256x1568xbf16, #tpu.memory_space<vmem>>, vector<256x32xbf16>,
    %10 = vector.extract_strided_slice %6 {offsets = [0, 1, 0], sizes = [16, 16, 32], strides = [1, 1, 1]} : vector<22x22x32xbf16> to vector<16x16x32xbf16>
    %11 = vector.shape_cast %10 : vector<16x16x32xbf16> to vector<256x32xbf16>
    %c0_4 = arith.constant 0 : index
    %c32 = arith.constant 32 : index
    %12 = vector.load %arg7[%c0_4, %c32] : memref<256x1568xbf16, #tpu.memory_space<vmem>>, vector<256x32xbf16>
    tpu.vector_store %arg7[%c0_4, %c32], %11 {strides = array<i32>} : memref<256x1568xbf16, #tpu.memory_space<vmem>>, vector<256x32xbf16>,
    %13 = vector.extract_strided_slice %6 {offsets = [0, 2, 0], sizes = [16, 16, 32], strides = [1, 1, 1]} : vector<22x22x32xbf16> to vector<16x16x32xbf16>
    %14 = vector.shape_cast %13 : vector<16x16x32xbf16> to vector<256x32xbf16>
    %c0_5 = arith.constant 0 : index
    %c64 = arith.constant 64 : index
    %15 = vector.load %arg7[%c0_5, %c64] : memref<256x1568xbf16, #tpu.memory_space<vmem>>, vector<256x32xbf16>
    tpu.vector_store %arg7[%c0_5, %c64], %14 {strides = array<i32>} : memref<256x1568xbf16, #tpu.memory_space<vmem>>, vector<256x32xbf16>,
    %16 = vector.extract_strided_slice %6 {offsets = [0, 3, 0], sizes = [16, 16, 32], strides = [1, 1, 1]} : vector<22x22x32xbf16> to vector<16x16x32xbf16>
    %17 = vector.shape_cast %16 : vector<16x16x32xbf16> to vector<256x32xbf16>
    %c0_6 = arith.constant 0 : index
    %c96 = arith.constant 96 : index
    %18 = vector.load %arg7[%c0_6, %c96] : memref<256x1568xbf16, #tpu.memory_space<vmem>>, vector<256x32xbf16>
    tpu.vector_store %arg7[%c0_6, %c96], %17 {strides = array<i32>} : memref<256x1568xbf16, #tpu.memory_space<vmem>>, vector<256x32xbf16>,
    %19 = vector.extract_strided_slice %6 {offsets = [0, 4, 0], sizes = [16, 16, 32], strides = [1, 1, 1]} : vector<22x22x32xbf16> to vector<16x16x32xbf16>
    %20 = vector.shape_cast %19 : vector<16x16x32xbf16> to vector<256x32xbf16>
    %c0_7 = arith.constant 0 : index
    %c128 = arith.constant 128 : index
    %21 = vector.load %arg7[%c0_7, %c128] : memref<256x1568xbf16, #tpu.memory_space<vmem>>, vector<256x32xbf16>
    tpu.vector_store %arg7[%c0_7, %c128], %20 {strides = array<i32>} : memref<256x1568xbf16, #tpu.memory_space<vmem>>, vector<256x32xbf16>,
    %22 = vector.extract_strided_slice %6 {offsets = [0, 5, 0], sizes = [16, 16, 32], strides = [1, 1, 1]} : vector<22x22x32xbf16> to vector<16x16x32xbf16>
    %23 = vector.shape_cast %22 : vector<16x16x32xbf16> to vector<256x32xbf16>
    %c0_8 = arith.constant 0 : index
    %c160 = arith.constant 160 : index
    %24 = vector.load %arg7[%c0_8, %c160] : memref<256x1568xbf16, #tpu.memory_space<vmem>>, vector<256x32xbf16>
    tpu.vector_store %arg7[%c0_8, %c160], %23 {strides = array<i32>} : memref<256x1568xbf16, #tpu.memory_space<vmem>>, vector<256x32xbf16>,
    %25 = vector.extract_strided_slice %6 {offsets = [0, 6, 0], sizes = [16, 16, 32], strides = [1, 1, 1]} : vector<22x22x32xbf16> to vector<16x16x32xbf16>
    %26 = vector.shape_cast %25 : vector<16x16x32xbf16> to vector<256x32xbf16>
    %c0_9 = arith.constant 0 : index
    %c192 = arith.constant 192 : index
    %27 = vector.load %arg7[%c0_9, %c192] : memref<256x1568xbf16, #tpu.memory_space<vmem>>, vector<256x32xbf16>
    tpu.vector_store %arg7[%c0_9, %c192], %26 {strides = array<i32>} : memref<256x1568xbf16, #tpu.memory_space<vmem>>, vector<256x32xbf16>,
    %28 = vector.extract_strided_slice %6 {offsets = [1, 0, 0], sizes = [16, 16, 32], strides = [1, 1, 1]} : vector<22x22x32xbf16> to vector<16x16x32xbf16>
    %29 = vector.shape_cast %28 : vector<16x16x32xbf16> to vector<256x32xbf16>
    %c0_10 = arith.constant 0 : index
    %c224 = arith.constant 224 : index
    %30 = vector.load %arg7[%c0_10, %c224] : memref<256x1568xbf16, #tpu.memory_space<vmem>>, vector<256x32xbf16>
    tpu.vector_store %arg7[%c0_10, %c224], %29 {strides = array<i32>} : memref<256x1568xbf16, #tpu.memory_space<vmem>>, vector<256x32xbf16>,
    %31 = vector.extract_strided_slice %6 {offsets = [1, 1, 0], sizes = [16, 16, 32], strides = [1, 1, 1]} : vector<22x22x32xbf16> to vector<16x16x32xbf16>
    %32 = vector.shape_cast %31 : vector<16x16x32xbf16> to vector<256x32xbf16>
    %c0_11 = arith.constant 0 : index
    %c256 = arith.constant 256 : index
    %33 = vector.load %arg7[%c0_11, %c256] : memref<256x1568xbf16, #tpu.memory_space<vmem>>, vector<256x32xbf16>
    tpu.vector_store %arg7[%c0_11, %c256], %32 {strides = array<i32>} : memref<256x1568xbf16, #tpu.memory_space<vmem>>, vector<256x32xbf16>,
    %34 = vector.extract_strided_slice %6 {offsets = [1, 2, 0], sizes = [16, 16, 32], strides = [1, 1, 1]} : vector<22x22x32xbf16> to vector<16x16x32xbf16>
    %35 = vector.shape_cast %34 : vector<16x16x32xbf16> to vector<256x32xbf16>
    %c0_12 = arith.constant 0 : index
    %c288 = arith.constant 288 : index
    %36 = vector.load %arg7[%c0_12, %c288] : memref<256x1568xbf16, #tpu.memory_space<vmem>>, vector<256x32xbf16>
    tpu.vector_store %arg7[%c0_12, %c288], %35 {strides = array<i32>} : memref<256x1568xbf16, #tpu.memory_space<vmem>>, vector<256x32xbf16>,
    %37 = vector.extract_strided_slice %6 {offsets = [1, 3, 0], sizes = [16, 16, 32], strides = [1, 1, 1]} : vector<22x22x32xbf16> to vector<16x16x32xbf16>
    %38 = vector.shape_cast %37 : vector<16x16x32xbf16> to vector<256x32xbf16>
    %c0_13 = arith.constant 0 : index
    %c320 = arith.constant 320 : index
    %39 = vector.load %arg7[%c0_13, %c320] : memref<256x1568xbf16, #tpu.memory_space<vmem>>, vector<256x32xbf16>
    tpu.vector_store %arg7[%c0_13, %c320], %38 {strides = array<i32>} : memref<256x1568xbf16, #tpu.memory_space<vmem>>, vector<256x32xbf16>,
    %40 = vector.extract_strided_slice %6 {offsets = [1, 4, 0], sizes = [16, 16, 32], strides = [1, 1, 1]} : vector<22x22x32xbf16> to vector<16x16x32xbf16>
    %41 = vector.shape_cast %40 : vector<16x16x32xbf16> to vector<256x32xbf16>
    %c0_14 = arith.constant 0 : index
    %c352 = arith.constant 352 : index
    %42 = vector.load %arg7[%c0_14, %c352] : memref<256x1568xbf16, #tpu.memory_space<vmem>>, vector<256x32xbf16>
    tpu.vector_store %arg7[%c0_14, %c352], %41 {strides = array<i32>} : memref<256x1568xbf16, #tpu.memory_space<vmem>>, vector<256x32xbf16>,
    %43 = vector.extract_strided_slice %6 {offsets = [1, 5, 0], sizes = [16, 16, 32], strides = [1, 1, 1]} : vector<22x22x32xbf16> to vector<16x16x32xbf16>
    %44 = vector.shape_cast %43 : vector<16x16x32xbf16> to vector<256x32xbf16>
    %c0_15 = arith.constant 0 : index
    %c384 = arith.constant 384 : index
    %45 = vector.load %arg7[%c0_15, %c384] : memref<256x1568xbf16, #tpu.memory_space<vmem>>, vector<256x32xbf16>
    tpu.vector_store %arg7[%c0_15, %c384], %44 {strides = array<i32>} : memref<256x1568xbf16, #tpu.memory_space<vmem>>, vector<256x32xbf16>,
    %46 = vector.extract_strided_slice %6 {offsets = [1, 6, 0], sizes = [16, 16, 32], strides = [1, 1, 1]} : vector<22x22x32xbf16> to vector<16x16x32xbf16>
    %47 = vector.shape_cast %46 : vector<16x16x32xbf16> to vector<256x32xbf16>
    %c0_16 = arith.constant 0 : index
    %c416 = arith.constant 416 : index
    %48 = vector.load %arg7[%c0_16, %c416] : memref<256x1568xbf16, #tpu.memory_space<vmem>>, vector<256x32xbf16>
    tpu.vector_store %arg7[%c0_16, %c416], %47 {strides = array<i32>} : memref<256x1568xbf16, #tpu.memory_space<vmem>>, vector<256x32xbf16>,
    %49 = vector.extract_strided_slice %6 {offsets = [2, 0, 0], sizes = [16, 16, 32], strides = [1, 1, 1]} : vector<22x22x32xbf16> to vector<16x16x32xbf16>
    %50 = vector.shape_cast %49 : vector<16x16x32xbf16> to vector<256x32xbf16>
    %c0_17 = arith.constant 0 : index
    %c448 = arith.constant 448 : index
    %51 = vector.load %arg7[%c0_17, %c448] : memref<256x1568xbf16, #tpu.memory_space<vmem>>, vector<256x32xbf16>
    tpu.vector_store %arg7[%c0_17, %c448], %50 {strides = array<i32>} : memref<256x1568xbf16, #tpu.memory_space<vmem>>, vector<256x32xbf16>,
    %52 = vector.extract_strided_slice %6 {offsets = [2, 1, 0], sizes = [16, 16, 32], strides = [1, 1, 1]} : vector<22x22x32xbf16> to vector<16x16x32xbf16>
    %53 = vector.shape_cast %52 : vector<16x16x32xbf16> to vector<256x32xbf16>
    %c0_18 = arith.constant 0 : index
    %c480 = arith.constant 480 : index
    %54 = vector.load %arg7[%c0_18, %c480] : memref<256x1568xbf16, #tpu.memory_space<vmem>>, vector<256x32xbf16>
    tpu.vector_store %arg7[%c0_18, %c480], %53 {strides = array<i32>} : memref<256x1568xbf16, #tpu.memory_space<vmem>>, vector<256x32xbf16>,
    %55 = vector.extract_strided_slice %6 {offsets = [2, 2, 0], sizes = [16, 16, 32], strides = [1, 1, 1]} : vector<22x22x32xbf16> to vector<16x16x32xbf16>
    %56 = vector.shape_cast %55 : vector<16x16x32xbf16> to vector<256x32xbf16>
    %c0_19 = arith.constant 0 : index
    %c512 = arith.constant 512 : index
    %57 = vector.load %arg7[%c0_19, %c512] : memref<256x1568xbf16, #tpu.memory_space<vmem>>, vector<256x32xbf16>
    tpu.vector_store %arg7[%c0_19, %c512], %56 {strides = array<i32>} : memref<256x1568xbf16, #tpu.memory_space<vmem>>, vector<256x32xbf16>,
    %58 = vector.extract_strided_slice %6 {offsets = [2, 3, 0], sizes = [16, 16, 32], strides = [1, 1, 1]} : vector<22x22x32xbf16> to vector<16x16x32xbf16>
    %59 = vector.shape_cast %58 : vector<16x16x32xbf16> to vector<256x32xbf16>
    %c0_20 = arith.constant 0 : index
    %c544 = arith.constant 544 : index
    %60 = vector.load %arg7[%c0_20, %c544] : memref<256x1568xbf16, #tpu.memory_space<vmem>>, vector<256x32xbf16>
    tpu.vector_store %arg7[%c0_20, %c544], %59 {strides = array<i32>} : memref<256x1568xbf16, #tpu.memory_space<vmem>>, vector<256x32xbf16>,
    %61 = vector.extract_strided_slice %6 {offsets = [2, 4, 0], sizes = [16, 16, 32], strides = [1, 1, 1]} : vector<22x22x32xbf16> to vector<16x16x32xbf16>
    %62 = vector.shape_cast %61 : vector<16x16x32xbf16> to vector<256x32xbf16>
    %c0_21 = arith.constant 0 : index
    %c576 = arith.constant 576 : index
    %63 = vector.load %arg7[%c0_21, %c576] : memref<256x1568xbf16, #tpu.memory_space<vmem>>, vector<256x32xbf16>
    tpu.vector_store %arg7[%c0_21, %c576], %62 {strides = array<i32>} : memref<256x1568xbf16, #tpu.memory_space<vmem>>, vector<256x32xbf16>,
    %64 = vector.extract_strided_slice %6 {offsets = [2, 5, 0], sizes = [16, 16, 32], strides = [1, 1, 1]} : vector<22x22x32xbf16> to vector<16x16x32xbf16>
    %65 = vector.shape_cast %64 : vector<16x16x32xbf16> to vector<256x32xbf16>
    %c0_22 = arith.constant 0 : index
    %c608 = arith.constant 608 : index
    %66 = vector.load %arg7[%c0_22, %c608] : memref<256x1568xbf16, #tpu.memory_space<vmem>>, vector<256x32xbf16>
    tpu.vector_store %arg7[%c0_22, %c608], %65 {strides = array<i32>} : memref<256x1568xbf16, #tpu.memory_space<vmem>>, vector<256x32xbf16>,
    %67 = vector.extract_strided_slice %6 {offsets = [2, 6, 0], sizes = [16, 16, 32], strides = [1, 1, 1]} : vector<22x22x32xbf16> to vector<16x16x32xbf16>
    %68 = vector.shape_cast %67 : vector<16x16x32xbf16> to vector<256x32xbf16>
    %c0_23 = arith.constant 0 : index
    %c640 = arith.constant 640 : index
    %69 = vector.load %arg7[%c0_23, %c640] : memref<256x1568xbf16, #tpu.memory_space<vmem>>, vector<256x32xbf16>
    tpu.vector_store %arg7[%c0_23, %c640], %68 {strides = array<i32>} : memref<256x1568xbf16, #tpu.memory_space<vmem>>, vector<256x32xbf16>,
    %70 = vector.extract_strided_slice %6 {offsets = [3, 0, 0], sizes = [16, 16, 32], strides = [1, 1, 1]} : vector<22x22x32xbf16> to vector<16x16x32xbf16>
    %71 = vector.shape_cast %70 : vector<16x16x32xbf16> to vector<256x32xbf16>
    %c0_24 = arith.constant 0 : index
    %c672 = arith.constant 672 : index
    %72 = vector.load %arg7[%c0_24, %c672] : memref<256x1568xbf16, #tpu.memory_space<vmem>>, vector<256x32xbf16>
    tpu.vector_store %arg7[%c0_24, %c672], %71 {strides = array<i32>} : memref<256x1568xbf16, #tpu.memory_space<vmem>>, vector<256x32xbf16>,
    %73 = vector.extract_strided_slice %6 {offsets = [3, 1, 0], sizes = [16, 16, 32], strides = [1, 1, 1]} : vector<22x22x32xbf16> to vector<16x16x32xbf16>
    %74 = vector.shape_cast %73 : vector<16x16x32xbf16> to vector<256x32xbf16>
    %c0_25 = arith.constant 0 : index
    %c704 = arith.constant 704 : index
    %75 = vector.load %arg7[%c0_25, %c704] : memref<256x1568xbf16, #tpu.memory_space<vmem>>, vector<256x32xbf16>
    tpu.vector_store %arg7[%c0_25, %c704], %74 {strides = array<i32>} : memref<256x1568xbf16, #tpu.memory_space<vmem>>, vector<256x32xbf16>,
    %76 = vector.extract_strided_slice %6 {offsets = [3, 2, 0], sizes = [16, 16, 32], strides = [1, 1, 1]} : vector<22x22x32xbf16> to vector<16x16x32xbf16>
    %77 = vector.shape_cast %76 : vector<16x16x32xbf16> to vector<256x32xbf16>
    %c0_26 = arith.constant 0 : index
    %c736 = arith.constant 736 : index
    %78 = vector.load %arg7[%c0_26, %c736] : memref<256x1568xbf16, #tpu.memory_space<vmem>>, vector<256x32xbf16>
    tpu.vector_store %arg7[%c0_26, %c736], %77 {strides = array<i32>} : memref<256x1568xbf16, #tpu.memory_space<vmem>>, vector<256x32xbf16>,
    %79 = vector.extract_strided_slice %6 {offsets = [3, 3, 0], sizes = [16, 16, 32], strides = [1, 1, 1]} : vector<22x22x32xbf16> to vector<16x16x32xbf16>
    %80 = vector.shape_cast %79 : vector<16x16x32xbf16> to vector<256x32xbf16>
    %c0_27 = arith.constant 0 : index
    %c768 = arith.constant 768 : index
    %81 = vector.load %arg7[%c0_27, %c768] : memref<256x1568xbf16, #tpu.memory_space<vmem>>, vector<256x32xbf16>
    tpu.vector_store %arg7[%c0_27, %c768], %80 {strides = array<i32>} : memref<256x1568xbf16, #tpu.memory_space<vmem>>, vector<256x32xbf16>,
    %82 = vector.extract_strided_slice %6 {offsets = [3, 4, 0], sizes = [16, 16, 32], strides = [1, 1, 1]} : vector<22x22x32xbf16> to vector<16x16x32xbf16>
    %83 = vector.shape_cast %82 : vector<16x16x32xbf16> to vector<256x32xbf16>
    %c0_28 = arith.constant 0 : index
    %c800 = arith.constant 800 : index
    %84 = vector.load %arg7[%c0_28, %c800] : memref<256x1568xbf16, #tpu.memory_space<vmem>>, vector<256x32xbf16>
    tpu.vector_store %arg7[%c0_28, %c800], %83 {strides = array<i32>} : memref<256x1568xbf16, #tpu.memory_space<vmem>>, vector<256x32xbf16>,
    %85 = vector.extract_strided_slice %6 {offsets = [3, 5, 0], sizes = [16, 16, 32], strides = [1, 1, 1]} : vector<22x22x32xbf16> to vector<16x16x32xbf16>
    %86 = vector.shape_cast %85 : vector<16x16x32xbf16> to vector<256x32xbf16>
    %c0_29 = arith.constant 0 : index
    %c832 = arith.constant 832 : index
    %87 = vector.load %arg7[%c0_29, %c832] : memref<256x1568xbf16, #tpu.memory_space<vmem>>, vector<256x32xbf16>
    tpu.vector_store %arg7[%c0_29, %c832], %86 {strides = array<i32>} : memref<256x1568xbf16, #tpu.memory_space<vmem>>, vector<256x32xbf16>,
    %88 = vector.extract_strided_slice %6 {offsets = [3, 6, 0], sizes = [16, 16, 32], strides = [1, 1, 1]} : vector<22x22x32xbf16> to vector<16x16x32xbf16>
    %89 = vector.shape_cast %88 : vector<16x16x32xbf16> to vector<256x32xbf16>
    %c0_30 = arith.constant 0 : index
    %c864 = arith.constant 864 : index
    %90 = vector.load %arg7[%c0_30, %c864] : memref<256x1568xbf16, #tpu.memory_space<vmem>>, vector<256x32xbf16>
    tpu.vector_store %arg7[%c0_30, %c864], %89 {strides = array<i32>} : memref<256x1568xbf16, #tpu.memory_space<vmem>>, vector<256x32xbf16>,
    %91 = vector.extract_strided_slice %6 {offsets = [4, 0, 0], sizes = [16, 16, 32], strides = [1, 1, 1]} : vector<22x22x32xbf16> to vector<16x16x32xbf16>
    %92 = vector.shape_cast %91 : vector<16x16x32xbf16> to vector<256x32xbf16>
    %c0_31 = arith.constant 0 : index
    %c896 = arith.constant 896 : index
    %93 = vector.load %arg7[%c0_31, %c896] : memref<256x1568xbf16, #tpu.memory_space<vmem>>, vector<256x32xbf16>
    tpu.vector_store %arg7[%c0_31, %c896], %92 {strides = array<i32>} : memref<256x1568xbf16, #tpu.memory_space<vmem>>, vector<256x32xbf16>,
    %94 = vector.extract_strided_slice %6 {offsets = [4, 1, 0], sizes = [16, 16, 32], strides = [1, 1, 1]} : vector<22x22x32xbf16> to vector<16x16x32xbf16>
    %95 = vector.shape_cast %94 : vector<16x16x32xbf16> to vector<256x32xbf16>
    %c0_32 = arith.constant 0 : index
    %c928 = arith.constant 928 : index
    %96 = vector.load %arg7[%c0_32, %c928] : memref<256x1568xbf16, #tpu.memory_space<vmem>>, vector<256x32xbf16>
    tpu.vector_store %arg7[%c0_32, %c928], %95 {strides = array<i32>} : memref<256x1568xbf16, #tpu.memory_space<vmem>>, vector<256x32xbf16>,
    %97 = vector.extract_strided_slice %6 {offsets = [4, 2, 0], sizes = [16, 16, 32], strides = [1, 1, 1]} : vector<22x22x32xbf16> to vector<16x16x32xbf16>
    %98 = vector.shape_cast %97 : vector<16x16x32xbf16> to vector<256x32xbf16>
    %c0_33 = arith.constant 0 : index
    %c960 = arith.constant 960 : index
    %99 = vector.load %arg7[%c0_33, %c960] : memref<256x1568xbf16, #tpu.memory_space<vmem>>, vector<256x32xbf16>
    tpu.vector_store %arg7[%c0_33, %c960], %98 {strides = array<i32>} : memref<256x1568xbf16, #tpu.memory_space<vmem>>, vector<256x32xbf16>,
    %100 = vector.extract_strided_slice %6 {offsets = [4, 3, 0], sizes = [16, 16, 32], strides = [1, 1, 1]} : vector<22x22x32xbf16> to vector<16x16x32xbf16>
    %101 = vector.shape_cast %100 : vector<16x16x32xbf16> to vector<256x32xbf16>
    %c0_34 = arith.constant 0 : index
    %c992 = arith.constant 992 : index
    %102 = vector.load %arg7[%c0_34, %c992] : memref<256x1568xbf16, #tpu.memory_space<vmem>>, vector<256x32xbf16>
    tpu.vector_store %arg7[%c0_34, %c992], %101 {strides = array<i32>} : memref<256x1568xbf16, #tpu.memory_space<vmem>>, vector<256x32xbf16>,
    %103 = vector.extract_strided_slice %6 {offsets = [4, 4, 0], sizes = [16, 16, 32], strides = [1, 1, 1]} : vector<22x22x32xbf16> to vector<16x16x32xbf16>
    %104 = vector.shape_cast %103 : vector<16x16x32xbf16> to vector<256x32xbf16>
    %c0_35 = arith.constant 0 : index
    %c1024 = arith.constant 1024 : index
    %105 = vector.load %arg7[%c0_35, %c1024] : memref<256x1568xbf16, #tpu.memory_space<vmem>>, vector<256x32xbf16>
    tpu.vector_store %arg7[%c0_35, %c1024], %104 {strides = array<i32>} : memref<256x1568xbf16, #tpu.memory_space<vmem>>, vector<256x32xbf16>,
    %106 = vector.extract_strided_slice %6 {offsets = [4, 5, 0], sizes = [16, 16, 32], strides = [1, 1, 1]} : vector<22x22x32xbf16> to vector<16x16x32xbf16>
    %107 = vector.shape_cast %106 : vector<16x16x32xbf16> to vector<256x32xbf16>
    %c0_36 = arith.constant 0 : index
    %c1056 = arith.constant 1056 : index
    %108 = vector.load %arg7[%c0_36, %c1056] : memref<256x1568xbf16, #tpu.memory_space<vmem>>, vector<256x32xbf16>
    tpu.vector_store %arg7[%c0_36, %c1056], %107 {strides = array<i32>} : memref<256x1568xbf16, #tpu.memory_space<vmem>>, vector<256x32xbf16>,
    %109 = vector.extract_strided_slice %6 {offsets = [4, 6, 0], sizes = [16, 16, 32], strides = [1, 1, 1]} : vector<22x22x32xbf16> to vector<16x16x32xbf16>
    %110 = vector.shape_cast %109 : vector<16x16x32xbf16> to vector<256x32xbf16>
    %c0_37 = arith.constant 0 : index
    %c1088 = arith.constant 1088 : index
    %111 = vector.load %arg7[%c0_37, %c1088] : memref<256x1568xbf16, #tpu.memory_space<vmem>>, vector<256x32xbf16>
    tpu.vector_store %arg7[%c0_37, %c1088], %110 {strides = array<i32>} : memref<256x1568xbf16, #tpu.memory_space<vmem>>, vector<256x32xbf16>,
    %112 = vector.extract_strided_slice %6 {offsets = [5, 0, 0], sizes = [16, 16, 32], strides = [1, 1, 1]} : vector<22x22x32xbf16> to vector<16x16x32xbf16>
    %113 = vector.shape_cast %112 : vector<16x16x32xbf16> to vector<256x32xbf16>
    %c0_38 = arith.constant 0 : index
    %c1120 = arith.constant 1120 : index
    %114 = vector.load %arg7[%c0_38, %c1120] : memref<256x1568xbf16, #tpu.memory_space<vmem>>, vector<256x32xbf16>
    tpu.vector_store %arg7[%c0_38, %c1120], %113 {strides = array<i32>} : memref<256x1568xbf16, #tpu.memory_space<vmem>>, vector<256x32xbf16>,
    %115 = vector.extract_strided_slice %6 {offsets = [5, 1, 0], sizes = [16, 16, 32], strides = [1, 1, 1]} : vector<22x22x32xbf16> to vector<16x16x32xbf16>
    %116 = vector.shape_cast %115 : vector<16x16x32xbf16> to vector<256x32xbf16>
    %c0_39 = arith.constant 0 : index
    %c1152 = arith.constant 1152 : index
    %117 = vector.load %arg7[%c0_39, %c1152] : memref<256x1568xbf16, #tpu.memory_space<vmem>>, vector<256x32xbf16>
    tpu.vector_store %arg7[%c0_39, %c1152], %116 {strides = array<i32>} : memref<256x1568xbf16, #tpu.memory_space<vmem>>, vector<256x32xbf16>,
    %118 = vector.extract_strided_slice %6 {offsets = [5, 2, 0], sizes = [16, 16, 32], strides = [1, 1, 1]} : vector<22x22x32xbf16> to vector<16x16x32xbf16>
    %119 = vector.shape_cast %118 : vector<16x16x32xbf16> to vector<256x32xbf16>
    %c0_40 = arith.constant 0 : index
    %c1184 = arith.constant 1184 : index
    %120 = vector.load %arg7[%c0_40, %c1184] : memref<256x1568xbf16, #tpu.memory_space<vmem>>, vector<256x32xbf16>
    tpu.vector_store %arg7[%c0_40, %c1184], %119 {strides = array<i32>} : memref<256x1568xbf16, #tpu.memory_space<vmem>>, vector<256x32xbf16>,
    %121 = vector.extract_strided_slice %6 {offsets = [5, 3, 0], sizes = [16, 16, 32], strides = [1, 1, 1]} : vector<22x22x32xbf16> to vector<16x16x32xbf16>
    %122 = vector.shape_cast %121 : vector<16x16x32xbf16> to vector<256x32xbf16>
    %c0_41 = arith.constant 0 : index
    %c1216 = arith.constant 1216 : index
    %123 = vector.load %arg7[%c0_41, %c1216] : memref<256x1568xbf16, #tpu.memory_space<vmem>>, vector<256x32xbf16>
    tpu.vector_store %arg7[%c0_41, %c1216], %122 {strides = array<i32>} : memref<256x1568xbf16, #tpu.memory_space<vmem>>, vector<256x32xbf16>,
    %124 = vector.extract_strided_slice %6 {offsets = [5, 4, 0], sizes = [16, 16, 32], strides = [1, 1, 1]} : vector<22x22x32xbf16> to vector<16x16x32xbf16>
    %125 = vector.shape_cast %124 : vector<16x16x32xbf16> to vector<256x32xbf16>
    %c0_42 = arith.constant 0 : index
    %c1248 = arith.constant 1248 : index
    %126 = vector.load %arg7[%c0_42, %c1248] : memref<256x1568xbf16, #tpu.memory_space<vmem>>, vector<256x32xbf16>
    tpu.vector_store %arg7[%c0_42, %c1248], %125 {strides = array<i32>} : memref<256x1568xbf16, #tpu.memory_space<vmem>>, vector<256x32xbf16>,
    %127 = vector.extract_strided_slice %6 {offsets = [5, 5, 0], sizes = [16, 16, 32], strides = [1, 1, 1]} : vector<22x22x32xbf16> to vector<16x16x32xbf16>
    %128 = vector.shape_cast %127 : vector<16x16x32xbf16> to vector<256x32xbf16>
    %c0_43 = arith.constant 0 : index
    %c1280 = arith.constant 1280 : index
    %129 = vector.load %arg7[%c0_43, %c1280] : memref<256x1568xbf16, #tpu.memory_space<vmem>>, vector<256x32xbf16>
    tpu.vector_store %arg7[%c0_43, %c1280], %128 {strides = array<i32>} : memref<256x1568xbf16, #tpu.memory_space<vmem>>, vector<256x32xbf16>,
    %130 = vector.extract_strided_slice %6 {offsets = [5, 6, 0], sizes = [16, 16, 32], strides = [1, 1, 1]} : vector<22x22x32xbf16> to vector<16x16x32xbf16>
    %131 = vector.shape_cast %130 : vector<16x16x32xbf16> to vector<256x32xbf16>
    %c0_44 = arith.constant 0 : index
    %c1312 = arith.constant 1312 : index
    %132 = vector.load %arg7[%c0_44, %c1312] : memref<256x1568xbf16, #tpu.memory_space<vmem>>, vector<256x32xbf16>
    tpu.vector_store %arg7[%c0_44, %c1312], %131 {strides = array<i32>} : memref<256x1568xbf16, #tpu.memory_space<vmem>>, vector<256x32xbf16>,
    %133 = vector.extract_strided_slice %6 {offsets = [6, 0, 0], sizes = [16, 16, 32], strides = [1, 1, 1]} : vector<22x22x32xbf16> to vector<16x16x32xbf16>
    %134 = vector.shape_cast %133 : vector<16x16x32xbf16> to vector<256x32xbf16>
    %c0_45 = arith.constant 0 : index
    %c1344 = arith.constant 1344 : index
    %135 = vector.load %arg7[%c0_45, %c1344] : memref<256x1568xbf16, #tpu.memory_space<vmem>>, vector<256x32xbf16>
    tpu.vector_store %arg7[%c0_45, %c1344], %134 {strides = array<i32>} : memref<256x1568xbf16, #tpu.memory_space<vmem>>, vector<256x32xbf16>,
    %136 = vector.extract_strided_slice %6 {offsets = [6, 1, 0], sizes = [16, 16, 32], strides = [1, 1, 1]} : vector<22x22x32xbf16> to vector<16x16x32xbf16>
    %137 = vector.shape_cast %136 : vector<16x16x32xbf16> to vector<256x32xbf16>
    %c0_46 = arith.constant 0 : index
    %c1376 = arith.constant 1376 : index
    %138 = vector.load %arg7[%c0_46, %c1376] : memref<256x1568xbf16, #tpu.memory_space<vmem>>, vector<256x32xbf16>
    tpu.vector_store %arg7[%c0_46, %c1376], %137 {strides = array<i32>} : memref<256x1568xbf16, #tpu.memory_space<vmem>>, vector<256x32xbf16>,
    %139 = vector.extract_strided_slice %6 {offsets = [6, 2, 0], sizes = [16, 16, 32], strides = [1, 1, 1]} : vector<22x22x32xbf16> to vector<16x16x32xbf16>
    %140 = vector.shape_cast %139 : vector<16x16x32xbf16> to vector<256x32xbf16>
    %c0_47 = arith.constant 0 : index
    %c1408 = arith.constant 1408 : index
    %141 = vector.load %arg7[%c0_47, %c1408] : memref<256x1568xbf16, #tpu.memory_space<vmem>>, vector<256x32xbf16>
    tpu.vector_store %arg7[%c0_47, %c1408], %140 {strides = array<i32>} : memref<256x1568xbf16, #tpu.memory_space<vmem>>, vector<256x32xbf16>,
    %142 = vector.extract_strided_slice %6 {offsets = [6, 3, 0], sizes = [16, 16, 32], strides = [1, 1, 1]} : vector<22x22x32xbf16> to vector<16x16x32xbf16>
    %143 = vector.shape_cast %142 : vector<16x16x32xbf16> to vector<256x32xbf16>
    %c0_48 = arith.constant 0 : index
    %c1440 = arith.constant 1440 : index
    %144 = vector.load %arg7[%c0_48, %c1440] : memref<256x1568xbf16, #tpu.memory_space<vmem>>, vector<256x32xbf16>
    tpu.vector_store %arg7[%c0_48, %c1440], %143 {strides = array<i32>} : memref<256x1568xbf16, #tpu.memory_space<vmem>>, vector<256x32xbf16>,
    %145 = vector.extract_strided_slice %6 {offsets = [6, 4, 0], sizes = [16, 16, 32], strides = [1, 1, 1]} : vector<22x22x32xbf16> to vector<16x16x32xbf16>
    %146 = vector.shape_cast %145 : vector<16x16x32xbf16> to vector<256x32xbf16>
    %c0_49 = arith.constant 0 : index
    %c1472 = arith.constant 1472 : index
    %147 = vector.load %arg7[%c0_49, %c1472] : memref<256x1568xbf16, #tpu.memory_space<vmem>>, vector<256x32xbf16>
    tpu.vector_store %arg7[%c0_49, %c1472], %146 {strides = array<i32>} : memref<256x1568xbf16, #tpu.memory_space<vmem>>, vector<256x32xbf16>,
    %148 = vector.extract_strided_slice %6 {offsets = [6, 5, 0], sizes = [16, 16, 32], strides = [1, 1, 1]} : vector<22x22x32xbf16> to vector<16x16x32xbf16>
    %149 = vector.shape_cast %148 : vector<16x16x32xbf16> to vector<256x32xbf16>
    %c0_50 = arith.constant 0 : index
    %c1504 = arith.constant 1504 : index
    %150 = vector.load %arg7[%c0_50, %c1504] : memref<256x1568xbf16, #tpu.memory_space<vmem>>, vector<256x32xbf16>
    tpu.vector_store %arg7[%c0_50, %c1504], %149 {strides = array<i32>} : memref<256x1568xbf16, #tpu.memory_space<vmem>>, vector<256x32xbf16>,
    %151 = vector.extract_strided_slice %6 {offsets = [6, 6, 0], sizes = [16, 16, 32], strides = [1, 1, 1]} : vector<22x22x32xbf16> to vector<16x16x32xbf16>
    %152 = vector.shape_cast %151 : vector<16x16x32xbf16> to vector<256x32xbf16>
    %c0_51 = arith.constant 0 : index
    %c1536 = arith.constant 1536 : index
    %153 = vector.load %arg7[%c0_51, %c1536] : memref<256x1568xbf16, #tpu.memory_space<vmem>>, vector<256x32xbf16>
    tpu.vector_store %arg7[%c0_51, %c1536], %152 {strides = array<i32>} : memref<256x1568xbf16, #tpu.memory_space<vmem>>, vector<256x32xbf16>,
    %c0_52 = arith.constant 0 : index
    %c0_53 = arith.constant 0 : index
    %154 = vector.load %arg7[%c0_52, %c0_53] : memref<256x1568xbf16, #tpu.memory_space<vmem>>, vector<256x1568xbf16>
    %c0_54 = arith.constant 0 : index
    %c0_55 = arith.constant 0 : index
    %155 = vector.load %arg3[%c0_54, %c0_55] : memref<1568x3xbf16, #tpu.memory_space<vmem>>, vector<1568x3xbf16>
    %cst = arith.constant dense<0.000000e+00> : vector<256x3xf32>
    %156 = tpu.matmul %154, %155, %cst {dimension_numbers = #tpu.dot_dimension_numbers<[1], [0], [0], [1], [0, 0, 1, 1], [], []>} : vector<256x1568xbf16>, vector<1568x3xbf16>, vector<256x3xf32> -> vector<256x3xf32>
    %c0_56 = arith.constant 0 : index
    %c0_57 = arith.constant 0 : index
    %157 = vector.load %arg4[%c0_56, %c0_57] : memref<1x3xf32, #tpu.memory_space<vmem>>, vector<1x3xf32>
    %158 = vector.broadcast %157 : vector<1x3xf32> to vector<256x3xf32>
    %159 = arith.addf %156, %158 : vector<256x3xf32>
    %160 = math.tanh %159 : vector<256x3xf32>
    %161 = vector.shape_cast %160 : vector<256x3xf32> to vector<16x16x3xf32>
    %c0_58 = arith.constant 0 : index
    %c0_59 = arith.constant 0 : index
    %c0_60 = arith.constant 0 : index
    %c0_61 = arith.constant 0 : index
    %162 = vector.load %arg5[%c0_58, %c0_59, %c0_60, %c0_61] : memref<1x16x16x3xf32, #tpu.memory_space<vmem>>, vector<1x16x16x3xf32>
    %163 = vector.shape_cast %162 : vector<1x16x16x3xf32> to vector<16x16x3xf32>
    %164 = vector.shape_cast %161 : vector<16x16x3xf32> to vector<1x16x16x3xf32>
    tpu.vector_store %arg5[%c0_58, %c0_59, %c0_60, %c0_61], %164 {strides = array<i32>} : memref<1x16x16x3xf32, #tpu.memory_space<vmem>>, vector<1x16x16x3xf32>,
    return
  }
  func.func @transform_0(%arg0: i32, %arg1: i32) -> (i32, i32, i32, i32) {
    %c0_i32 = arith.constant 0 : i32
    %c0_i32_0 = arith.constant 0 : i32
    %c0_i32_1 = arith.constant 0 : i32
    %c0_i32_2 = arith.constant 0 : i32
    return %arg0, %c0_i32, %c0_i32_0, %c0_i32_1 : i32, i32, i32, i32
  }
  func.func @transform_1(%arg0: i32, %arg1: i32) -> (i32, i32) {
    %c0_i32 = arith.constant 0 : i32
    %c0_i32_0 = arith.constant 0 : i32
    %c0_i32_1 = arith.constant 0 : i32
    return %c0_i32, %c0_i32_0 : i32, i32
  }
  func.func @transform_2(%arg0: i32, %arg1: i32) -> (i32, i32) {
    %c0_i32 = arith.constant 0 : i32
    %c0_i32_0 = arith.constant 0 : i32
    %c0_i32_1 = arith.constant 0 : i32
    return %c0_i32, %c0_i32_0 : i32, i32
  }
  func.func @transform_3(%arg0: i32, %arg1: i32) -> (i32, i32, i32, i32) {
    %c0_i32 = arith.constant 0 : i32
    %c0_i32_0 = arith.constant 0 : i32
    %c0_i32_1 = arith.constant 0 : i32
    return %arg0, %arg1, %c0_i32, %c0_i32_0 : i32, i32, i32, i32
  }
}

</mosaic_0001>

<bundles_post_ra>
// kernel: tpu_custom_call.1
= control target key start
LH: loop header
LB: loop body
LE: loop exit
PB: predicated region body
PF: predicated region fallthrough
CT: control target
= control target key end

     0   :  { %8 = vsyncpa [#allocation5], 0  ;;  %s15298_s0 = inlined_call_operand.hbm [shape: bf16[2,16,16,32], index: 0, kind: input, shape index: {}]   ;;  %s15299_s1 = inlined_call_operand.hbm [shape: bf16[1568,3], index: 1, kind: input, shape index: {}]   ;;  %s15300_s2 = inlined_call_operand.hbm [shape: f32[1,3], index: 2, kind: input, shape index: {}]   ;;  %s15301_s3 = inlined_call_operand.hbm [shape: f32[2,16,16,3], index: 3, kind: output, shape index: {}]  }
   0x1   :  { %10 = vsyncpa [#allocation5 + $0x1], 0 }
   0x2   :  { %11 = vsyncpa [#allocation8], 0 }
   0x3   :  { %12 = vsyncpa [#allocation6], 0 }
   0x4   :  { %14 = vsyncpa [#allocation6 + $0x1], 0  ;;  %s9728_s12 = smov 0   ;;  %s9730_s13 = smov 0  }
   0x5   :  { %s9732_s14 = smov 0   ;;  %s9734_s15 = smov 0  }
   0x6   :  { %s9736_s16 = smov 0   ;;  %s9738_s17 = smov 0  }
   0x7 LB: > { %s8026_s18 = sadd.s32 4294967295, %s9695_s17   ;;  %s8027_s19 = sadd.s32 4294967294, %s9695_s17   ;;  %s9695_s17 = sphi %s9738_s17, %s20_s17   ;;  %s9691_s16 = sphi %s9736_s16, %s16810_s16   ;;  %s9687_s15 = sphi %s9734_s15, %s16809_s15   ;;  %s9683_s14 = sphi %s9732_s14, %s16808_s14   ;;  %s9679_s13 = sphi %s9730_s13, %s16807_s13   ;;  %s9675_s12 = sphi %s9728_s12, %s16806_s12  }
   0x8   : > { %p52_p0 = scmp.ne.s32.totalorder %s9679_s13, %s9675_s12  ;;  %p9762_p1 = scmp.eq.s32.totalorder %s8026_s18, 0 }
   0x9   : > { %p9766_p2 = scmp.eq.s32.totalorder %s8026_s18, 1  ;;  %p126_p3 = scmp.eq.s32.totalorder %s8027_s19, 1 }
   0xa   : > { %s15736_s20 = scalar_select %p9762_p1, 1, 0 }
   0xb   : > { %p9772_p4 = por %p9762_p1, %p52_p0  ;;  %p8028_p5 = scmp.ge.s32.totalorder %s9695_s17, 1 }
   0xc   : > { %p9777_p6 = por %p126_p3, %p52_p0  ;;  %p133_p7 = scmp.lt.s32.totalorder %s9695_s17, 3 }
   0xd   : > { %s15738_s22 = scalar_select %p9772_p4, 1, 0 }
   0xe   : > { %s15739_s23 = scalar_select %p9777_p6, 1, 0 }
   0xf   : > { %p9782_p8 = pnand %p8028_p5, %p133_p7  ;;  %s9697_s25 = smov [#allocation7]  }
  0x10   : > { %s145_s26 = sshll.u32 %s9697_s25, 4  ;;  %s9698_s28 = smov [#allocation9]   ;;  %s9786_s26 = int_to_ptr.vmem [resolvable:$true] %s145_s26 }
  0x11   : > { %p9200_p9 = pneg %p9782_p8  ;;  %s159_s29 = sshll.u32 %s9698_s28, 4  ;;  %s9797_s29 = int_to_ptr.vmem [resolvable:$true] %s159_s29 }
  0x12   : > { %s9523_s5 = scalar_lea.hbm %s15299_s1, 12544 }
  0x13   : > { %p9793_p11 = pnand %p9200_p9, %p9762_p1  ;;  %p9524_p12 = scmp.ne.s32.totalorder %s15299_s1, %s9523_s5 }
  0x14   : > { %p9530_p5 = scmp.lt.u32.totalorder %s9523_s5, %s15299_s1 }
  0x15   : > { %p9525_p13 = pneg %p9793_p11 }
  0x17   : > { %p9526_p0 = pnand %p9525_p13, %p9524_p12 }
  0x19   : > { %p9527_p3 = pneg %p9526_p0 }
  0x1b   : > { %p9532_p7 = pnand %p9530_p5, %p9527_p3 }
  0x1d   : > { %9535 = shalt.err (!%p9532_p7)
}
  0x1e   : > { %s9536_s10 = scalar_lea.vmem %s9786_s26, 12544  ;;  %p9544_p1 = scmp.lt.s32.totalorder %s9786_s26, %s9786_s26 }
  0x1f   : > { %p9537_p9 = scmp.ne.s32.totalorder %s9786_s26, %s9536_s10  ;;  %p9545_p12 = scmp.lt.s32.totalorder %s9536_s10, %s9536_s10 }
  0x21   : > { %p9539_p10 = pnand %p9537_p9, %p9525_p13  ;;  %p9546_p0 = por %p9545_p12, %p9544_p1 }
  0x23   : > { %p9540_p6 = pneg %p9539_p10 }
  0x25   : > { %p9547_p4 = pnand %p9546_p0, %p9540_p6 }
  0x27   : > { %9550 = shalt.err (!%p9547_p4)
}
  0x28   : > { %s9699_s11 = smov 64   ;;  %s9700_s18 = smov 4  }
  0x29   : > { %9203 = dma.hbm_to_vmem [thread:$0]  (!%p9793_p11), %s15299_s1, 12544, %s9786_s26, [#allocation8], %s9699_s11, %s9699_s11, %s9700_s18  }
  0x2a   : > { %s9551_s4 = scalar_lea.hbm %s15300_s2, 16 }
  0x2b   : > { %p9552_p1 = scmp.ne.s32.totalorder %s15300_s2, %s9551_s4  ;;  %p9558_p10 = scmp.lt.u32.totalorder %s9551_s4, %s15300_s2 }
  0x2d   : > { %p9554_p4 = pnand %p9552_p1, %p9525_p13 }
  0x2f   : > { %p9555_p6 = pneg %p9554_p4 }
  0x31   : > { %p9560_p3 = pnand %p9558_p10, %p9555_p6 }
  0x33   : > { %9563 = shalt.err (!%p9560_p3)
}
  0x34   : > { %s9564_s26 = scalar_lea.vmem %s9797_s29, 16  ;;  %s9571_s9 = scalar_lea.vmem %s9797_s29, 32 }
  0x35   : > { %p9565_p5 = scmp.ne.s32.totalorder %s9797_s29, %s9564_s26  ;;  %p9572_p12 = scmp.lt.s32.totalorder %s9797_s29, %s9797_s29 }
  0x36   : > { %p9573_p0 = scmp.lt.s32.totalorder %s9571_s9, %s9564_s26 }
  0x37   : > { %p9567_p7 = pnand %p9565_p5, %p9525_p13 }
  0x38   : > { %p9574_p1 = por %p9573_p0, %p9572_p12 }
  0x39   : > { %p9568_p9 = pneg %p9567_p7 }
  0x3b   : > { %p9575_p4 = pnand %p9574_p1, %p9568_p9 }
  0x3d   : > { %9578 = shalt.err (!%p9575_p4)
}
  0x3e   : > { %9206 = dma.hbm_to_vmem [thread:$0]  (!%p9793_p11), %s15300_s2, 16, %s9797_s29, [#allocation8]  }
  0x3f   : > { %s32_s25 = sadd.s32 1, %s9691_s16  ;;  %s39_s28 = sadd.s32 1, %s9683_s14 }
  0x40   : > { %p34_p13 = scmp.ge.s32.totalorder %s32_s25, 2  ;;  %p46_p6 = scmp.ne.s32.totalorder %s9683_s14, %s9679_s13 }
  0x41   : > { %p47_p10 = scmp.eq.s32.totalorder %s9695_s17, 0  ;;  %p9217_p3 = scmp.lt.s32.totalorder %s9695_s17, 2 }
  0x42   : > { %s16812_s25 = smov (%p34_p13, %s32_s25), 0  ;;  %p9865_p7 = por %p9766_p2, %p46_p6 }
  0x43   : > { %p48_p5 = por %p47_p10, %p46_p6  ;;  %s36_s30 = ssub.s32 %s9691_s16, %s16812_s25 }
  0x44   : > { %s15742_s27 = scalar_select %p9865_p7, 1, 0 }
  0x45   : > { %s170_s4 = sand.u32 1, %s9683_s14   ;;  %p37_p9 = scmp.eq.s32.totalorder %s36_s30, 0 }
  0x46   : > { %s8032_s29 = sshll.u32 %s170_s4, 7  ;;  %s8444_s5 = sshll.u32 %s9691_s16, 11 }
  0x47   : > { %s9874_s6 = scalar_select %p37_p9, %s9683_s14, %s39_s28  }
  0x48   : > { %s9879_s26 = scalar_lea.hbm %s15298_s0, %s8444_s5  ;;  %s174_s21 = scalar_lea.vmem [#allocation4], %s8032_s29 }
  0x49   : > { %s181_s9 = sshll.u32 %s174_s21, 4  ;;  %p9883_p2 = pnand %p9217_p3, %p48_p5  ;;  %s9887_s9 = int_to_ptr.vmem [resolvable:$true] %s181_s9 }
  0x4a   : > { %s9889_s19 = scalar_lea.sflag [#allocation5], %s170_s4  ;;  %s9579_s28 = scalar_lea.hbm %s9879_s26, 2048 }
  0x4b   : > { %p9580_p11 = scmp.ne.s32.totalorder %s9879_s26, %s9579_s28  ;;  %p9581_p12 = pneg %p9883_p2 }
  0x4c   : > { %s9584_s5 = scalar_lea.hbm %s15298_s0, 4096  ;;  %p9585_p4 = scmp.lt.u32.totalorder %s9879_s26, %s15298_s0 }
  0x4d   : > { %p9582_p0 = pnand %p9581_p12, %p9580_p11  ;;  %p9586_p13 = scmp.lt.u32.totalorder %s9584_s5, %s9579_s28 }
  0x4e   : > { %p9588_p10 = scmp.lt.u32.totalorder %s9579_s28, %s9879_s26 }
  0x4f   : > { %p9583_p1 = pneg %p9582_p0  ;;  %p9587_p6 = por %p9586_p13, %p9585_p4 }
  0x51   : > { %p9589_p3 = por %p9588_p10, %p9587_p6 }
  0x53   : > { %p9590_p5 = pnand %p9589_p3, %p9583_p1 }
  0x55   : > { %9593 = shalt.err (!%p9590_p5)
}
  0x56   : > { %s9594_s4 = scalar_lea.vmem %s9887_s9, 2048  ;;  %s9701_s21 = smov [#allocation4]  }
  0x57   : > { %p9595_p9 = scmp.ne.s32.totalorder %s9887_s9, %s9594_s4  ;;  %s9599_s30 = sshll.u32 %s9701_s21, 4  ;;  %s9600_s30 = int_to_ptr.vmem [resolvable:$false] %s9599_s30 }
  0x58   : > { %s9601_s29 = scalar_lea.vmem %s9600_s30, 4096  ;;  %p9602_p7 = scmp.lt.s32.totalorder %s9887_s9, %s9600_s30 }
  0x59   : > { %p9597_p11 = pnand %p9595_p9, %p9581_p12  ;;  %p9603_p4 = scmp.lt.s32.totalorder %s9601_s29, %s9594_s4 }
  0x5b   : > { %p9598_p0 = pneg %p9597_p11  ;;  %p9604_p13 = por %p9603_p4, %p9602_p7 }
  0x5d   : > { %p9605_p6 = pnand %p9604_p13, %p9598_p0 }
  0x5f   : > { %9608 = shalt.err (!%p9605_p6)
}
  0x60   : > { %9210 = dma.hbm_to_vmem [thread:$0]  (!%p9883_p2), %s9879_s26, 2048, %s9887_s9, %s9889_s19, %s9699_s11, %s9699_s11, %s9700_s18  }
  0x61   : > { %193 = sbr.rel (%p9782_p8) target bundleno = 1569 (0x621), region = 32 }
  0x68   : > { %s9923_s28 = sand.u32 1, %s9679_s13   ;;  %p15744_p7 = scmp.ne.s32.totalorder %s15738_s22, 0 }
  0x69   : > { %s8036_s5 = sshll.u32 %s9923_s28, 7  ;;  %s196_s7 = scalar_lea.sflag [#allocation5], %s9923_s28 }
  0x6a   : > { %s9927_s8 = scalar_lea.vmem [#allocation4], %s8036_s5 }
  0x6b   : > { %9662 = dma.done.wait (%p15744_p7), %s196_s7, 2048  }
  0x6c   : > { %9664 = vsyncadd (%p15744_p7), %s196_s7, 4294965248  ;;  %p15745_p2 = scmp.ne.s32.totalorder %s15736_s20, 0 }
  0x6e   : > { %9666 = dma.done.wait (%p15745_p2), [#allocation8], 12560  }
  0x6f   : > { %9668 = vsyncadd (%p15745_p2), [#allocation8], 4294954736  ;;  %vm268_vm0 = vsmask.f32 1280  ;;  %vm269_vm1 = vsmask.f32 5392 }
  0x70   : > { %vm624_vm2 = vcmask 257025   ;;  %vm625_vm3 = vsmask.f32 7942  ;;  %vm1085_vm4 = vcmask 256002   ;;  %vm15306_vm5 = vsmask.f32 2304 }
  0x71   : > { %vm15529_vm6 = vcmask 257024   ;;  %vm632_vm7 = vcmask 254976   ;;  %vm790_vm8 = vcmask 253952   ;;  %vm791_vm9 = vsmask.f32 256  ;;  %vm9945_vm12 = vmand %vm1085_vm4, %vm15306_vm5  ;;  %s9702_s20 = smov 64  }
  0x72   : > { %v238_v0 = vld [vmem:[%s9927_s8 + $0x8] sm:$0xf]  ;;  %v239_v1 = vld [vmem:[%s9927_s8 + $0xc] sm:$0xf]  ;;  %vm1233_vm10 = vsmask.f32 7946  ;;  %vm9953_vm14 = vmand %vm790_vm8, %vm791_vm9 }
  0x73   : > { %v9939_v2 = vshrl.u32 %v238_v0, 16  ;;  %v294_v3 = vshll.u32 %v238_v0, 16  ;;  %v300_v4 = vshrl.u32 %v239_v1, 16  ;;  %v9941_v5 = vshll.u32 %v239_v1, 16  ;;  %v637_v7 = vld [vmem:[#allocation2 + $0x30] sm:$0xe]  ;;  %vm9960_vm15 = vmand %vm624_vm2, %vm625_vm3 }
  0x74   : > { %vm987_vm11 = vsmask.f32 7938  ;;  %v15746_v6 = vmov 0  ;;  %v796_v8 = vld [vmem:[#allocation2 + $0x30] sm:$0x1]  ;;  %vm889_vm13 = vcmask 254977   ;;  %vm9973_vm9 = vmor %vm268_vm0, %vm269_vm1 }
  0x75   : > { %v15747_v6 = vsel %vm9945_vm12, 4294967295, %v15746_v6  ;;  %v1091_v9 = vld [vmem:[#allocation2 + $0x38] sm:$0x4]  ;;  %v293_v10 = vrot.slane %v9939_v2, 6  ;;  %v296_v11 = vrot.slane %v294_v3, 7  ;;  %v302_v12 = vrot.slane %v300_v4, 6  ;;  %vm9982_vm2 = vmand %vm632_vm7, %vm268_vm0 }
  0x76   : > { %15748 = vst [vmem:[#allocation14_spill] sm:$0xff] %v15747_v6  ;;  %v305_v13 = vrot.slane %v9941_v5, 7  ;;  %v15749_v14 = vmov 0  ;;  %v236_v15 = vld [vmem:[%s9927_s8] sm:$0xf]  ;;  %v15752_v16 = vmov 0  ;;  %v1092_v20 = vsel %vm9945_vm12, %v300_v4, %v1091_v9  ;;  %vm10007_vm1 = vmand %vm1085_vm4, %vm1233_vm10 }
  0x77   : > { %v15750_v14 = vsel %vm9953_vm14, 4294967295, %v15749_v14  ;;  %v15753_v16 = vsel %vm9960_vm15, 4294967295, %v15752_v16  ;;  %v8041_v17 = vrot.slane %v9939_v2, 9  ;;  %v8057_v18 = vrot.slane %v9941_v5, 10  ;;  %v237_v21 = vld [vmem:[%s9927_s8 + $0x4] sm:$0xf]  ;;  %vm10020_vm4 = vmand %vm790_vm8, %vm987_vm11 }
  0x78   : > { %15751 = vst [vmem:[#allocation15_spill] sm:$0xff] %v15750_v14  ;;  %15754 = vst [vmem:[#allocation16_spill] sm:$0xff] %v15753_v16  ;;  %v9966_v19 = vrot.slane %v294_v3, 9  ;;  %v15755_v22 = vmov 0  ;;  %v297_v23 = vor.u32 %v296_v11, %v293_v10  ;;  %v306_v24 = vor.u32 %v305_v13, %v302_v12  ;;  %v641_v25 = vld [vmem:[#allocation2 + $0x38] sm:$0x3] }
  0x79   : > { %v15756_v22 = vsel %vm9973_vm9, 4294967295, %v15755_v22  ;;  %1093 = vst [vmem:[#allocation2 + $0x38] sm:$0x4] %v1092_v20  ;;  %v1137_v26 = vrot.slane %v9939_v2, 7  ;;  %v9978_v27 = vshrl.u32 %v236_v15, 16  ;;  %v15758_v28 = vmov 0  ;;  %vm10030_vm5 = vmand %vm889_vm13, %vm268_vm0 }
  0x7a   : > { %15757 = vst [vmem:[#allocation17_spill] sm:$0xff] %v15756_v22  ;;  %v15759_v28 = vsel %vm9982_vm2, 4294967295, %v15758_v28  ;;  %v797_v29 = vsel %vm9953_vm14, %v8041_v17, %v796_v8  ;;  %v275_v30 = vshll.u32 %v236_v15, 16  ;;  %v281_v31 = vshrl.u32 %v237_v21, 16  ;;  %v793_v33 = vld [vmem:[#allocation2 + $0x24] sm:$0x1]  ;;  %vm10046_vm0 = vmand %vm889_vm13, %vm625_vm3 }
  0x7b   : > { %15760 = vst [vmem:[#allocation18_spill] sm:$0xff] %v15759_v28  ;;  %v9988_v32 = vshll.u32 %v237_v21, 16  ;;  %v298_v34 = vrot.slane %v297_v23, 4  ;;  %v308_v35 = vrot.slane %v306_v24, 4  ;;  %v638_v36 = vsel %vm9960_vm15, %v297_v23, %v637_v7  ;;  %798 = vst [vmem:[#allocation2 + $0x30] sm:$0x1] %v797_v29 }
  0x7c   : > { %v274_v37 = vrot.slane %v9978_v27, 6  ;;  %v1088_v38 = vld [vmem:[#allocation2 + $0x2c] sm:$0x4]  ;;  %639 = vst [vmem:[#allocation2 + $0x30] sm:$0xe] %v638_v36  ;;  %v277_v39 = vrot.slane %v275_v30, 7 }
  0x7d   : > { %v283_v40 = vrot.slane %v281_v31, 6  ;;  %v286_v41 = vrot.slane %v9988_v32, 7  ;;  %v8040_v42 = vrot.slane %v9978_v27, 9  ;;  %v242_v43 = vld [vmem:[%s9927_s8 + $0x18] sm:$0xf]  ;;  %v307_v44 = vsel %vm9973_vm9, %v298_v34, %v306_v24  ;;  %s9703_s22 = smov 32  }
  0x7e   : > { %v642_v45 = vsel %vm9982_vm2, %v308_v35, %v641_v25  ;;  %v627_v46 = vld [vmem:[#allocation2 + $0x24] sm:$0xe]  ;;  %v8056_v47 = vrot.slane %v9988_v32, 10  ;;  %v10001_v48 = vrot.slane %v275_v30, 9  ;;  %640 = vst.msk [vmem:[#allocation2 + $0x34] sm:$0xf] %vm15529_vm6, %v307_v44  ;;  %v278_v51 = vor.u32 %v277_v39, %v274_v37 }
  0x7f   : > { %v243_v49 = vld [vmem:[%s9927_s8 + $0x1c] sm:$0xf]  ;;  %643 = vst [vmem:[#allocation2 + $0x38] sm:$0x3] %v642_v45  ;;  %v15761_v50 = vmov 0  ;;  %v287_v52 = vor.u32 %v286_v41, %v283_v40  ;;  %v794_v54 = vsel %vm9953_vm14, %v8040_v42, %v793_v33  ;;  %v1089_v55 = vsel %vm9945_vm12, %v281_v31, %v1088_v38  ;;  %s9704_s24 = smov 96  }
  0x80   : > { %v15762_v50 = vsel %vm10007_vm1, 4294967295, %v15761_v50  ;;  %v634_v53 = vld [vmem:[#allocation2 + $0x2c] sm:$0x3]  ;;  %795 = vst [vmem:[#allocation2 + $0x24] sm:$0x1] %v794_v54  ;;  %v1136_v56 = vrot.slane %v9978_v27, 7  ;;  %v628_v1 = vsel %vm9960_vm15, %v278_v51, %v627_v46 }
  0x81   : > { %15763 = vst [vmem:[#allocation19_spill] sm:$0xff] %v15762_v50  ;;  %1090 = vst [vmem:[#allocation2 + $0x2c] sm:$0x4] %v1089_v55  ;;  %v10016_v57 = vshrl.u32 %v242_v43, 16  ;;  %v332_v58 = vshll.u32 %v242_v43, 16  ;;  %v338_v59 = vshrl.u32 %v243_v49, 16 }
  0x82   : > { %v802_v60 = vld [vmem:[#allocation2 + $0x48] sm:$0x1]  ;;  %v15764_v61 = vmov 0  ;;  %v1238_v62 = vld [vmem:[#allocation2 + $0x38] sm:$0x4]  ;;  %vm2030_vm7 = vcmask 1042432  }
  0x83   : > { %v15765_v61 = vsel %vm10020_vm4, 4294967295, %v15764_v61  ;;  %vm2031_vm10 = vcmask 1046532   ;;  %v279_v63 = vrot.slane %v278_v51, 4  ;;  %v289_v0 = vrot.slane %v287_v52, 4  ;;  %629 = vst [vmem:[#allocation2 + $0x24] sm:$0xe] %v628_v1 }
  0x84   : > { %15766 = vst [vmem:[#allocation20_spill] sm:$0xff] %v15765_v61  ;;  %v10026_v3 = vshll.u32 %v243_v49, 16  ;;  %v15767_v4 = vmov 0  ;;  %v1239_v7 = vsel %vm10007_vm1, %v9941_v5, %v1238_v62  ;;  %v331_v8 = vrot.slane %v10016_v57, 6  ;;  %v1097_v11 = vld [vmem:[#allocation2 + $0x50] sm:$0x4]  ;;  %vm10108_vm3 = vmor %vm2030_vm7, %vm2031_vm10 }
  0x85   : > { %v15768_v4 = vsel %vm10030_vm5, 4294967295, %v15767_v4  ;;  %v334_v9 = vrot.slane %v332_v58, 7  ;;  %v340_v10 = vrot.slane %v338_v59, 6  ;;  %v992_v12 = vld [vmem:[#allocation2 + $0x30] sm:$0x1]  ;;  %v288_v13 = vsel %vm9973_vm9, %v279_v63, %v287_v52  ;;  %s8039_s11 = sshll.u32 %s9923_s28, 8 }
  0x86   : > { %15769 = vst [vmem:[#allocation21_spill] sm:$0xff] %v15768_v4  ;;  %1240 = vst [vmem:[#allocation2 + $0x38] sm:$0x4] %v1239_v7  ;;  %v635_v15 = vsel %vm9982_vm2, %v289_v0, %v634_v53  ;;  %v343_v17 = vrot.slane %v10026_v3, 7  ;;  %v651_v20 = vld [vmem:[#allocation2 + $0x48] sm:$0xe]  ;;  %v993_v24 = vsel %vm10020_vm4, %v9966_v19, %v992_v12  ;;  %v1098_v36 = vsel %vm9945_vm12, %v338_v59, %v1097_v11 }
  0x87   : > { %v8043_v21 = vrot.slane %v10016_v57, 9  ;;  %v15770_v23 = vmov 0  ;;  %v1172_v25 = vld [vmem:[#allocation2 + $0x30] sm:$0x2]  ;;  %631 = vst.msk [vmem:[#allocation2 + $0x28] sm:$0xf] %vm15529_vm6, %v288_v13  ;;  %v335_v29 = vor.u32 %v334_v9, %v331_v8 }
  0x88   : > { %v15771_v23 = vsel %vm10046_vm0, 4294967295, %v15770_v23  ;;  %636 = vst [vmem:[#allocation2 + $0x2c] sm:$0x3] %v635_v15  ;;  %v8059_v30 = vrot.slane %v10026_v3, 10  ;;  %v10055_v31 = vrot.slane %v332_v58, 9  ;;  %v1173_v33 = vsel %vm10030_vm5, %v1137_v26, %v1172_v25  ;;  %s15149_s18 = scalar_lea.vmem [#allocation10], %s8039_s11 }
  0x89   : > { %15772 = vst [vmem:[#allocation22_spill] sm:$0xff] %v15771_v23  ;;  %994 = vst [vmem:[#allocation2 + $0x30] sm:$0x1] %v993_v24  ;;  %v344_v34 = vor.u32 %v343_v17, %v340_v10  ;;  %v655_v35 = vld [vmem:[#allocation2 + $0x50] sm:$0x3]  ;;  %v803_v19 = vsel %vm9953_vm14, %v8043_v21, %v802_v60  ;;  %v336_v41 = vrot.slane %v335_v29, 4  ;;  %v652_v2 = vsel %vm9960_vm15, %v335_v29, %v651_v20 }
  0x8a   : > { %v10066_v37 = vld [vmem:[%s9927_s8 + $0x10] sm:$0xf]  ;;  %v241_v38 = vld [vmem:[%s9927_s8 + $0x14] sm:$0xf]  ;;  %1174 = vst [vmem:[#allocation2 + $0x30] sm:$0x2] %v1173_v33 }
  0x8b   : > { %v894_v39 = vld [vmem:[#allocation2 + $0x38] sm:$0x2]  ;;  %v10069_v40 = vld [vmem:[#allocation2 + $0x34] sm:$0xf]  ;;  %804 = vst [vmem:[#allocation2 + $0x48] sm:$0x1] %v803_v19  ;;  %v345_v5 = vsel %vm9973_vm9, %v336_v41, %v344_v34 }
  0x8c   : > { %1099 = vst [vmem:[#allocation2 + $0x50] sm:$0x4] %v1098_v36  ;;  %v1139_v26 = vrot.slane %v10016_v57, 7  ;;  %v895_v42 = vsel %vm10046_vm0, %v8057_v18, %v894_v39  ;;  %v2063_v43 = vrot.slane %v10069_v40, 5  ;;  %v989_v44 = vld [vmem:[#allocation2 + $0x24] sm:$0x1] }
  0x8d   : > { %v1235_v45 = vld [vmem:[#allocation2 + $0x2c] sm:$0x4]  ;;  %v346_v46 = vrot.slane %v344_v34, 4  ;;  %653 = vst [vmem:[#allocation2 + $0x48] sm:$0xe] %v652_v2  ;;  %v990_v49 = vsel %vm10020_vm4, %v10001_v48, %v989_v44  ;;  %v10088_v18 = vshrl.u32 %v10066_v37, 16 }
  0x8e   : > { %896 = vst [vmem:[#allocation2 + $0x38] sm:$0x2] %v895_v42  ;;  %v1236_v51 = vsel %vm10007_vm1, %v9988_v32, %v1235_v45  ;;  %v799_v52 = vld [vmem:[#allocation2 + $0x3c] sm:$0x1]  ;;  %v1094_v53 = vld [vmem:[#allocation2 + $0x44] sm:$0x4] }
  0x8f   : > { %v2065_v54 = vrot.slane %v2063_v43, 4  ;;  %991 = vst [vmem:[#allocation2 + $0x24] sm:$0x1] %v990_v49  ;;  %v1169_v55 = vld [vmem:[#allocation2 + $0x24] sm:$0x2]  ;;  %v656_v48 = vsel %vm9982_vm2, %v346_v46, %v655_v35  ;;  %v313_v57 = vshll.u32 %v10066_v37, 16 }
  0x90   : > { %1237 = vst [vmem:[#allocation2 + $0x2c] sm:$0x4] %v1236_v51  ;;  %654 = vst.msk [vmem:[#allocation2 + $0x4c] sm:$0xf] %vm15529_vm6, %v345_v5  ;;  %v319_v58 = vshrl.u32 %v241_v38, 16  ;;  %v1170_v59 = vsel %vm10030_vm5, %v1136_v56, %v1169_v55  ;;  %v312_v60 = vrot.slane %v10088_v18, 6 }
  0x91   : > { %657 = vst [vmem:[#allocation2 + $0x50] sm:$0x3] %v656_v48  ;;  %v10099_v62 = vshll.u32 %v241_v38, 16  ;;  %v8042_v63 = vrot.slane %v10088_v18, 9  ;;  %v891_v0 = vld [vmem:[#allocation2 + $0x2c] sm:$0x2] }
  0x92   : > { %1171 = vst [vmem:[#allocation2 + $0x24] sm:$0x2] %v1170_v59  ;;  %v10102_v1 = vld [vmem:[#allocation2 + $0x28] sm:$0xf]  ;;  %v315_v7 = vrot.slane %v313_v57, 7  ;;  %v321_v8 = vrot.slane %v319_v58, 6  ;;  %v1095_v9 = vsel %vm9945_vm12, %v319_v58, %v1094_v53  ;;  %v892_v56 = vsel %vm10046_vm0, %v8056_v47, %v891_v0 }
  0x93   : > { %v15773_v27 = vmov 0  ;;  %v2056_v10 = vrot.slane %v10102_v1, 5  ;;  %v324_v11 = vrot.slane %v10099_v62, 7  ;;  %v644_v12 = vld [vmem:[#allocation2 + $0x3c] sm:$0xe]  ;;  %v800_v13 = vsel %vm9953_vm14, %v8042_v63, %v799_v52  ;;  %s8445_s26 = sshll.u32 %s9687_s15, 12 }
  0x94   : > { %v15774_v27 = vsel %vm10108_vm3, 4294967295, %v15773_v27  ;;  %1096 = vst [vmem:[#allocation2 + $0x44] sm:$0x4] %v1095_v9  ;;  %v10120_v15 = vld [vmem:[#allocation2 + $0x30] sm:$0xf]  ;;  %v316_v21 = vor.u32 %v315_v7, %v312_v60  ;;  %v8058_v2 = vrot.slane %v10099_v62, 10  ;;  %s15243_s4 = scalar_lea.hbm %s15301_s3, %s8445_s26 }
  0x95   : > { %15775 = vst [vmem:[#allocation23_spill] sm:$0xff] %v15774_v27  ;;  %893 = vst [vmem:[#allocation2 + $0x2c] sm:$0x2] %v892_v56  ;;  %v998_v17 = vld [vmem:[#allocation2 + $0x48] sm:$0x1]  ;;  %v8140_v32 = vrot.slane %v10120_v15, 9  ;;  %v325_v36 = vor.u32 %v324_v11, %v321_v8 }
  0x96   : > { %v1244_v20 = vld [vmem:[#allocation2 + $0x50] sm:$0x4]  ;;  %801 = vst [vmem:[#allocation2 + $0x3c] sm:$0x1] %v800_v13  ;;  %v2058_v47 = vrot.slane %v2056_v10, 4  ;;  %v999_v24 = vsel %vm10020_vm4, %v10055_v31, %v998_v17  ;;  %v317_v19 = vrot.slane %v316_v21, 4  ;;  %v645_v37 = vsel %vm9960_vm15, %v316_v21, %v644_v12 }
  0x97   : > { %v1178_v25 = vld [vmem:[#allocation2 + $0x48] sm:$0x2]  ;;  %v1245_v29 = vsel %vm10007_vm1, %v10026_v3, %v1244_v20  ;;  %v648_v33 = vld [vmem:[#allocation2 + $0x44] sm:$0x3]  ;;  %v10129_v34 = vld [vmem:[#allocation2 + $0x38] sm:$0x7]  ;;  %v2064_v31 = vsel %vm10108_vm3, %v8140_v32, %v2063_v43 }
  0x98   : > { %1000 = vst [vmem:[#allocation2 + $0x48] sm:$0x1] %v999_v24  ;;  %v1179_v35 = vsel %vm10030_vm5, %v1139_v26, %v1178_v25  ;;  %1246 = vst [vmem:[#allocation2 + $0x50] sm:$0x4] %v1245_v29  ;;  %v246_v38 = vld [vmem:[%s9927_s8 + $0x28] sm:$0xf]  ;;  %v326_v45 = vsel %vm9973_vm9, %v317_v19, %v325_v36 }
  0x99   : > { %v2066_v39 = vrot.slane %v10129_v34, 5  ;;  %1180 = vst [vmem:[#allocation2 + $0x48] sm:$0x2] %v1179_v35  ;;  %v10139_v41 = vld [vmem:[#allocation2 + $0x4c] sm:$0xf]  ;;  %v8074_v26 = vrot.slane %v313_v57, 9 }
  0x9a   : > { %646 = vst [vmem:[#allocation2 + $0x3c] sm:$0xe] %v645_v37  ;;  %v900_v42 = vld [vmem:[#allocation2 + $0x50] sm:$0x2]  ;;  %v2077_v44 = vrot.slane %v10139_v41, 5  ;;  %v327_v46 = vrot.slane %v325_v36, 4 }
  0x9b   : > { %v1138_v49 = vrot.slane %v10088_v18, 7  ;;  %v2067_v43 = vsel %vm10108_vm3, %v2065_v54, %v2066_v39  ;;  %v10148_v51 = vld [vmem:[#allocation2 + $0x24] sm:$0xf]  ;;  %v901_v5 = vsel %vm10046_vm0, %v8059_v30, %v900_v42  ;;  %647 = vst.msk [vmem:[#allocation2 + $0x40] sm:$0xf] %vm15529_vm6, %v326_v45  ;;  %v10156_v53 = vshrl.u32 %v246_v38, 16 }
  0x9c   : > { %v247_v52 = vld [vmem:[%s9927_s8 + $0x2c] sm:$0xf]  ;;  %v370_v55 = vshll.u32 %v246_v38, 16  ;;  %v10158_v48 = vcombine.low %v2064_v31, %v2067_v43  ;;  %v8139_v18 = vrot.slane %v10148_v51, 9  ;;  %902 = vst [vmem:[#allocation2 + $0x50] sm:$0x2] %v901_v5  ;;  %v649_v54 = vsel %vm9982_vm2, %v327_v46, %v648_v33 }
  0x9d   : > { %v10161_v57 = vrot.slane %v2077_v44, 4  ;;  %v1241_v3 = vld [vmem:[#allocation2 + $0x44] sm:$0x4]  ;;  %v1103_v58 = vld [vmem:[#allocation2 + $0x68] sm:$0x4]  ;;  %v369_v63 = vrot.slane %v10156_v53, 6 }
  0x9e   : > { %15776 = vst [vmem:[#allocation24_spill] sm:$0xff] %v10158_v48  ;;  %v10165_v59 = vld [vmem:[#allocation2 + $0x2c] sm:$0x7]  ;;  %650 = vst [vmem:[#allocation2 + $0x44] sm:$0x3] %v649_v54  ;;  %v1242_v60 = vsel %vm10007_vm1, %v10099_v62, %v1241_v3  ;;  %v372_v0 = vrot.slane %v370_v55, 7  ;;  %2201 = vrot.lane.b32.xlu0 %v10158_v48, %s9702_s20  ;;  %v2057_v7 = vsel %vm10108_vm3, %v8139_v18, %v2056_v10 }
  0x9f   : > { %v995_v30 = vld [vmem:[#allocation2 + $0x3c] sm:$0x1]  ;;  %v2059_v8 = vrot.slane %v10165_v59, 5  ;;  %1243 = vst [vmem:[#allocation2 + $0x44] sm:$0x4] %v1242_v60  ;;  %v376_v56 = vshrl.u32 %v247_v52, 16 }
  0xa0   : > { %v996_v9 = vsel %vm10020_vm4, %v8074_v26, %v995_v30  ;;  %v665_v11 = vld [vmem:[#allocation2 + $0x60] sm:$0xe]  ;;  %v808_v12 = vld [vmem:[#allocation2 + $0x60] sm:$0x1]  ;;  %v373_v13 = vor.u32 %v372_v0, %v369_v63  ;;  %v10178_v17 = vshll.u32 %v247_v52, 16  ;;  %v8045_v20 = vrot.slane %v10156_v53, 9 }
  0xa1   : > { %997 = vst [vmem:[#allocation2 + $0x3c] sm:$0x1] %v996_v9  ;;  %v10181_v21 = vrot.slane %v370_v55, 9  ;;  %v244_v32 = vld [vmem:[%s9927_s8 + $0x20] sm:$0xf]  ;;  %v2060_v10 = vsel %vm10108_vm3, %v2058_v47, %v2059_v8  ;;  %v378_v29 = vrot.slane %v376_v56, 6  ;;  %v1104_v33 = vsel %vm9945_vm12, %v376_v56, %v1103_v58 }
  0xa2   : > { %v10186_v24 = vld [vmem:[#allocation2 + $0x48] sm:$0xf]  ;;  %v1175_v25 = vld [vmem:[#allocation2 + $0x3c] sm:$0x2]  ;;  %v1141_v35 = vrot.slane %v10156_v53, 7  ;;  %v10191_v19 = vcombine.low %v2057_v7, %v2060_v10  ;;  %v374_v38 = vrot.slane %v373_v13, 4  ;;  %v666_v26 = vsel %vm9960_vm15, %v373_v13, %v665_v11 }
  0xa3   : > { %v8142_v36 = vrot.slane %v10186_v24, 9  ;;  %v1176_v37 = vsel %vm10030_vm5, %v1138_v49, %v1175_v25  ;;  %1105 = vst [vmem:[#allocation2 + $0x68] sm:$0x4] %v1104_v33  ;;  %v245_v31 = vld [vmem:[%s9927_s8 + $0x24] sm:$0xf]  ;;  %v381_v39 = vrot.slane %v10178_v17, 7  ;;  %v809_v42 = vsel %vm9953_vm14, %v8045_v20, %v808_v12 }
  0xa4   : > { %15777 = vst [vmem:[#allocation25_spill] sm:$0xff] %v10191_v19  ;;  %1177 = vst [vmem:[#allocation2 + $0x3c] sm:$0x2] %v1176_v37  ;;  %v10197_v47 = vld [vmem:[#allocation2 + $0x40] sm:$0xf]  ;;  %v8061_v45 = vrot.slane %v10178_v17, 10  ;;  %2199 = vrot.lane.b32.xlu1 %v10191_v19, %s9702_s20 }
  0xa5   : > { %v10207_v46 = vld [vmem:[#allocation2 + $0x50] sm:$0x7]  ;;  %v2078_v49 = vsel %vm10108_vm3, %v8142_v36, %v2077_v44  ;;  %v2070_v43 = vrot.slane %v10197_v47, 5  ;;  %667 = vst [vmem:[#allocation2 + $0x60] sm:$0xe] %v666_v26  ;;  %v10212_v52 = vshrl.u32 %v244_v32, 16  ;;  %v382_v3 = vor.u32 %v381_v39, %v378_v29 }
  0xa6   : > { %v669_v5 = vld [vmem:[#allocation2 + $0x68] sm:$0x3]  ;;  %810 = vst [vmem:[#allocation2 + $0x60] sm:$0x1] %v809_v42  ;;  %v351_v55 = vshll.u32 %v244_v32, 16  ;;  %v2080_v18 = vrot.slane %v10207_v46, 5 }
  0xa7   : > { %v897_v54 = vld [vmem:[#allocation2 + $0x44] sm:$0x2]  ;;  %v357_v58 = vshrl.u32 %v245_v31, 16  ;;  %v10215_v30 = vshll.u32 %v245_v31, 16  ;;  %v10221_v60 = vrot.slane %v2070_v43, 4  ;;  %v350_v63 = vrot.slane %v10212_v52, 6 }
  0xa8   : > { %v898_v44 = vsel %vm10046_vm0, %v8058_v2, %v897_v54  ;;  %v353_v0 = vrot.slane %v351_v55, 7  ;;  %v1100_v7 = vld [vmem:[#allocation2 + $0x5c] sm:$0x4]  ;;  %v2081_v8 = vsel %vm10108_vm3, %v10161_v57, %v2080_v18  ;;  %v383_v9 = vsel %vm9973_vm9, %v374_v38, %v382_v3  ;;  %v658_v62 = vld [vmem:[#allocation2 + $0x54] sm:$0xe]  ;;  %s7921_s9 = sshll.u32 %s15149_s18, 4  ;;  %s15245_s9 = int_to_ptr.vmem [resolvable:$true] %s7921_s9 }
  0xa9   : > { %899 = vst [vmem:[#allocation2 + $0x44] sm:$0x2] %v898_v44  ;;  %v384_v56 = vrot.slane %v382_v3, 4  ;;  %v359_v11 = vrot.slane %v357_v58, 6  ;;  %vm1514_vm8 = vsmask.f32 3328  ;;  %v10229_v2 = vcombine.low %v2078_v49, %v2081_v8 }
  0xaa   : > { %vm1515_vm11 = vsmask.f32 7440  ;;  %668 = vst.msk [vmem:[#allocation2 + $0x64] sm:$0xf] %vm15529_vm6, %v383_v9  ;;  %v354_v12 = vor.u32 %v353_v0, %v350_v63  ;;  %v362_v13 = vrot.slane %v10215_v30, 7  ;;  %v8044_v20 = vrot.slane %v10212_v52, 9 }
  0xab   : > { %15778 = vst [vmem:[#allocation26_spill] sm:$0xff] %v10229_v2  ;;  %v805_v32 = vld [vmem:[#allocation2 + $0x54] sm:$0x1]  ;;  %v670_v57 = vsel %vm9982_vm2, %v384_v56, %v669_v5  ;;  %v1250_v10 = vld [vmem:[#allocation2 + $0x68] sm:$0x4]  ;;  %v8060_v25 = vrot.slane %v10215_v30, 10  ;;  %v1101_v33 = vsel %vm9945_vm12, %v357_v58, %v1100_v7  ;;  %2205 = vrot.lane.b32.xlu0 %v10229_v2, %s9702_s20  ;;  %vm10318_vm13 = vmor %vm1514_vm8, %vm1515_vm11 }
  0xac   : > { %v10237_v29 = vrot.slane %v351_v55, 9  ;;  %v10243_v36 = vld [vmem:[#allocation2 + $0x3c] sm:$0xf]  ;;  %671 = vst [vmem:[#allocation2 + $0x68] sm:$0x3] %v670_v57  ;;  %v1251_v37 = vsel %vm10007_vm1, %v10178_v17, %v1250_v10  ;;  %v355_v38 = vrot.slane %v354_v12, 4  ;;  %v363_v31 = vor.u32 %v362_v13, %v359_v11 }
  0xad   : > { %v659_v39 = vsel %vm9960_vm15, %v354_v12, %v658_v62  ;;  %v662_v26 = vld [vmem:[#allocation2 + $0x5c] sm:$0x3]  ;;  %1102 = vst [vmem:[#allocation2 + $0x5c] sm:$0x4] %v1101_v33  ;;  %v8141_v42 = vrot.slane %v10243_v36, 9  ;;  %v806_v55 = vsel %vm9953_vm14, %v8044_v20, %v805_v32  ;;  %v1140_v18 = vrot.slane %v10212_v52, 7 }
  0xae   : > { %v1004_v49 = vld [vmem:[#allocation2 + $0x60] sm:$0x1]  ;;  %v1184_v5 = vld [vmem:[#allocation2 + $0x60] sm:$0x2]  ;;  %1252 = vst [vmem:[#allocation2 + $0x68] sm:$0x4] %v1251_v37  ;;  %v364_v58 = vsel %vm9973_vm9, %v355_v38, %v363_v31 }
  0xaf   : > { %660 = vst [vmem:[#allocation2 + $0x54] sm:$0xe] %v659_v39  ;;  %v1005_v54 = vsel %vm10020_vm4, %v10181_v21, %v1004_v49  ;;  %v1185_v3 = vsel %vm10030_vm5, %v1141_v35, %v1184_v5  ;;  %v365_v44 = vrot.slane %v363_v31, 4  ;;  %807 = vst [vmem:[#allocation2 + $0x54] sm:$0x1] %v806_v55  ;;  %v2071_v63 = vsel %vm10108_vm3, %v8141_v42, %v2070_v43  ;;  %s7905_s21 = scalar_lea.sflag [#allocation6], %s9923_s28 }
  0xb0   : > { %1006 = vst [vmem:[#allocation2 + $0x60] sm:$0x1] %v1005_v54  ;;  %1186 = vst [vmem:[#allocation2 + $0x60] sm:$0x2] %v1185_v3  ;;  %v10267_v52 = vshrl.u32 %v10120_v15, 16  ;;  %v10270_v53 = vshll.u32 %v10120_v15, 16 }
  0xb1   : > { %661 = vst.msk [vmem:[#allocation2 + $0x58] sm:$0xf] %vm15529_vm6, %v364_v58  ;;  %v10273_v21 = vshll.u32 %v10069_v40, 16  ;;  %v10275_v35 = vld [vmem:[#allocation2 + $0x44] sm:$0x7]  ;;  %v663_v0 = vsel %vm9982_vm2, %v365_v44, %v662_v26  ;;  %v10280_v43 = vshrl.u32 %v10069_v40, 16 }
  0xb2   : > { %15779 = vst [vmem:[#allocation27_spill] sm:$0xff] %v10267_v52  ;;  %15780 = vst [vmem:[#allocation28_spill] sm:$0xff] %v10270_v53  ;;  %v10283_v7 = vshll.u32 %v10129_v34, 16  ;;  %v10286_v8 = vshrl.u32 %v10148_v51, 16  ;;  %v2073_v15 = vrot.slane %v10275_v35, 5  ;;  %v1616_v56 = vrot.slane %v10267_v52, 4 }
  0xb3   : > { %15781 = vst [vmem:[#allocation29_spill] sm:$0xff] %v10273_v21  ;;  %15782 = vst [vmem:[#allocation30_spill] sm:$0xff] %v10280_v43  ;;  %v10289_v9 = vld [vmem:[#allocation2 + $0x64] sm:$0xf]  ;;  %v1619_v11 = vrot.slane %v10270_v53, 5  ;;  %v1625_v62 = vrot.slane %v10273_v21, 5 }
  0xb4   : > { %15783 = vst [vmem:[#allocation31_spill] sm:$0xff] %v10283_v7  ;;  %15784 = vst [vmem:[#allocation32_spill] sm:$0xff] %v10286_v8  ;;  %v2091_v40 = vrot.slane %v10289_v9, 5  ;;  %v1629_v12 = vrot.slane %v10280_v43, 4  ;;  %v1635_v34 = vrot.slane %v10283_v7, 5  ;;  %v1592_v13 = vrot.slane %v10286_v8, 4 }
  0xb5   : > { %664 = vst [vmem:[#allocation2 + $0x5c] sm:$0x3] %v663_v0  ;;  %v2074_v20 = vsel %vm10108_vm3, %v10221_v60, %v2073_v15  ;;  %v906_v32 = vld [vmem:[#allocation2 + $0x68] sm:$0x2]  ;;  %v1247_v57 = vld [vmem:[#allocation2 + $0x5c] sm:$0x4]  ;;  %v1620_v10 = vor.u32 %v1619_v11, %v1616_v56 }
  0xb6   : > { %v10302_v33 = vshll.u32 %v10148_v51, 16  ;;  %v10305_v37 = vshll.u32 %v10102_v1, 16  ;;  %v10307_v38 = vcombine.low %v2071_v63, %v2074_v20  ;;  %v907_v31 = vsel %vm10046_vm0, %v8061_v45, %v906_v32  ;;  %v1181_v26 = vld [vmem:[#allocation2 + $0x54] sm:$0x2]  ;;  %v1001_v42 = vld [vmem:[#allocation2 + $0x54] sm:$0x1] }
  0xb7   : > { %v2093_v39 = vrot.slane %v2091_v40, 4  ;;  %v1248_v60 = vsel %vm10007_vm1, %v10215_v30, %v1247_v57  ;;  %v15788_v51 = vmov 0  ;;  %908 = vst [vmem:[#allocation2 + $0x68] sm:$0x2] %v907_v31  ;;  %v1182_v17 = vsel %vm10030_vm5, %v1140_v18, %v1181_v26  ;;  %v10327_v55 = vld [vmem:[#allocation2 + $0x60] sm:$0xf] }
  0xb8   : > { %15785 = vst [vmem:[#allocation33_spill] sm:$0xff] %v10302_v33  ;;  %15786 = vst [vmem:[#allocation34_spill] sm:$0xff] %v10305_v37  ;;  %v15789_v51 = vsel %vm10318_vm13, 4294967295, %v15788_v51  ;;  %v1621_v49 = vrot.slane %v1620_v10, 4  ;;  %v1630_v45 = vor.u32 %v1629_v12, %v1625_v62  ;;  %v1595_v5 = vrot.slane %v10302_v33, 5  ;;  %2203 = vrot.lane.b32.xlu1 %v10307_v38, %s9702_s20  ;;  %s9609_s30 = scalar_lea.vmem %s15245_s9, 4096 }
  0xb9   : > { %15787 = vst [vmem:[#allocation35_spill] sm:$0xff] %v10307_v38  ;;  %15790 = vst [vmem:[#allocation36_spill] sm:$0xff] %v15789_v51  ;;  %v1002_v54 = vsel %vm10020_vm4, %v10237_v29, %v1001_v42  ;;  %v10332_v3 = vld [vmem:[#allocation2 + $0x58] sm:$0xf]  ;;  %v1601_v58 = vrot.slane %v10305_v37, 5  ;;  %v10336_v18 = vshrl.u32 %v10102_v1, 16  ;;  %p9610_p8 = scmp.ne.s32.totalorder %s15245_s9, %s9609_s30 }
  0xba   : > { %1249 = vst [vmem:[#allocation2 + $0x5c] sm:$0x4] %v1248_v60  ;;  %1183 = vst [vmem:[#allocation2 + $0x54] sm:$0x2] %v1182_v17  ;;  %v8144_v44 = vrot.slane %v10327_v55, 9  ;;  %v2084_v63 = vrot.slane %v10332_v3, 5  ;;  %v1626_v0 = vsel %vm10318_vm13, %v1621_v49, %v1625_v62  ;;  %v1596_v11 = vor.u32 %v1595_v5, %v1592_v13 }
  0xbb   : > { %15791 = vst [vmem:[#allocation37_spill] sm:$0xff] %v10336_v18  ;;  %1003 = vst [vmem:[#allocation2 + $0x54] sm:$0x1] %v1002_v54  ;;  %v1631_v15 = vrot.slane %v1630_v45, 4  ;;  %v1605_v29 = vrot.slane %v10336_v18, 4  ;;  %v10344_v12 = vshll.u32 %v10165_v59, 16 }
  0xbc   : > { %v903_v56 = vld [vmem:[#allocation2 + $0x5c] sm:$0x2]  ;;  %v10347_v20 = vshrl.u32 %v10186_v24, 16  ;;  %v2092_v1 = vsel %vm10108_vm3, %v8144_v44, %v2091_v40  ;;  %v2086_v62 = vrot.slane %v2084_v63, 4  ;;  %v1597_v59 = vrot.slane %v1596_v11, 4  ;;  %p16803_p12 = scmp.ne.s32.totalorder %s15742_s27, 0 }
  0xbd   : > { %15792 = vst [vmem:[#allocation38_spill] sm:$0xff] %v10344_v12  ;;  %v904_v32 = vsel %vm10046_vm0, %v8060_v25, %v903_v56  ;;  %v1636_v13 = vsel %vm10318_vm13, %v1631_v15, %v1635_v34  ;;  %v1606_v10 = vor.u32 %v1605_v29, %v1601_v58  ;;  %v1611_v31 = vrot.slane %v10344_v12, 5  ;;  %s9705_s15 = smov [#allocation10]  }
  0xbe   : > { %15793 = vst [vmem:[#allocation39_spill] sm:$0xff] %v10347_v20  ;;  %905 = vst [vmem:[#allocation2 + $0x5c] sm:$0x2] %v904_v32  ;;  %v10357_v57 = vcombine.low %v1626_v0, %v1636_v13  ;;  %v1664_v26 = vrot.slane %v10347_v20, 4  ;;  %v10362_v40 = vshll.u32 %v10186_v24, 16  ;;  %v10365_v30 = vshll.u32 %v10139_v41, 16  ;;  %p9611_p1 = pnand %p9610_p8, %p16803_p12 }
  0xbf   : > { %v10368_v25 = vshrl.u32 %v10139_v41, 16  ;;  %v1361_v60 = vld [vmem:[#allocation2 + $0x68] sm:$0x7]  ;;  %v1602_v34 = vsel %vm10318_vm13, %v1597_v59, %v1601_v58  ;;  %v1607_v42 = vrot.slane %v1606_v10, 4  ;;  %v10373_v17 = vshll.u32 %v10207_v46, 16  ;;  %s9613_s29 = sshll.u32 %s9705_s15, 4  ;;  %s9614_s29 = int_to_ptr.vmem [resolvable:$false] %s9613_s29 }
  0xc0   : > { %15794 = vst [vmem:[#allocation40_spill] sm:$0xff] %v10357_v57  ;;  %15795 = vst [vmem:[#allocation41_spill] sm:$0xff] %v10362_v40  ;;  %v10376_v49 = vshrl.u32 %v10243_v36, 16  ;;  %v2094_v45 = vrot.slane %v1361_v60, 5  ;;  %v1667_v24 = vrot.slane %v10362_v40, 5  ;;  %v1673_v5 = vrot.slane %v10365_v30, 5  ;;  %p9612_p10 = pneg %p9611_p1  ;;  %p9616_p3 = scmp.lt.s32.totalorder %s15245_s9, %s9614_s29 }
  0xc1   : > { %15796 = vst [vmem:[#allocation42_spill] sm:$0xff] %v10365_v30  ;;  %15797 = vst [vmem:[#allocation43_spill] sm:$0xff] %v10368_v25  ;;  %v1677_v54 = vrot.slane %v10368_v25, 4  ;;  %v1612_v44 = vsel %vm10318_vm13, %v1607_v42, %v1611_v31  ;;  %v1683_v58 = vrot.slane %v10373_v17, 5  ;;  %v10386_v46 = vshll.u32 %v10243_v36, 16  ;;  %s9615_s5 = scalar_lea.vmem %s9614_s29, 8192 }
  0xc2   : > { %15798 = vst [vmem:[#allocation44_spill] sm:$0xff] %v10373_v17  ;;  %15799 = vst [vmem:[#allocation45_spill] sm:$0xff] %v10376_v49  ;;  %v1356_v41 = vld [vmem:[#allocation2 + $0x54] sm:$0xf]  ;;  %v1640_v0 = vrot.slane %v10376_v49, 4  ;;  %v2095_v15 = vsel %vm10108_vm3, %v2093_v39, %v2094_v45  ;;  %v10390_v11 = vcombine.low %v1602_v34, %v1612_v44  ;;  %v1668_v29 = vor.u32 %v1667_v24, %v1664_v26  ;;  %p9617_p5 = scmp.lt.s32.totalorder %s9615_s5, %s9609_s30 }
  0xc3   : > { %15800 = vst [vmem:[#allocation46_spill] sm:$0xff] %v10386_v46  ;;  %v8143_v56 = vrot.slane %v1356_v41, 9  ;;  %v10392_v32 = vcombine.low %v2092_v1, %v2095_v15  ;;  %v1678_v13 = vor.u32 %v1677_v54, %v1673_v5  ;;  %v1643_v59 = vrot.slane %v10386_v46, 5  ;;  %v257_v25 = vld [vmem:[%s9927_s8 + $0x54] sm:$0xf] }
  0xc4   : > { %15801 = vst [vmem:[#allocation47_spill] sm:$0xff] %v10390_v11  ;;  %v10396_v10 = vshll.u32 %v10197_v47, 16  ;;  %v1669_v42 = vrot.slane %v1668_v29, 4  ;;  %v10401_v2 = vshrl.u32 %v10197_v47, 16  ;;  %v10404_v39 = vshll.u32 %v10275_v35, 16  ;;  %p9618_p9 = por %p9617_p5, %p9616_p3 }
  0xc5   : > { %15802 = vst [vmem:[#allocation48_spill] sm:$0xff] %v10392_v32  ;;  %v1358_v31 = vld [vmem:[#allocation2 + $0x5c] sm:$0x7]  ;;  %v2085_v36 = vsel %vm10108_vm3, %v8143_v56, %v2084_v63  ;;  %2209 = vrot.lane.b32.xlu0 %v10392_v32, %s9702_s20  ;;  %v1679_v26 = vrot.slane %v1678_v13, 4  ;;  %v1644_v34 = vor.u32 %v1643_v59, %v1640_v0  ;;  %v10414_v47 = vshrl.u32 %v10327_v55, 16 }
  0xc6   : > { %15803 = vst [vmem:[#allocation49_spill] sm:$0xff] %v10396_v10  ;;  %15804 = vst [vmem:[#allocation50_spill] sm:$0xff] %v10401_v2  ;;  %v2087_v1 = vrot.slane %v1358_v31, 5  ;;  %v1649_v45 = vrot.slane %v10396_v10, 5  ;;  %v1674_v24 = vsel %vm10318_vm13, %v1669_v42, %v1673_v5  ;;  %v1653_v63 = vrot.slane %v10401_v2, 4  ;;  %p9619_p11 = pnand %p9618_p9, %p9612_p10 }
  0xc7   : > { %15805 = vst [vmem:[#allocation51_spill] sm:$0xff] %v10404_v39  ;;  %v1659_v54 = vrot.slane %v10404_v39, 5  ;;  %15806 = vst [vmem:[#allocation52_spill] sm:$0xff] %v10414_v47  ;;  %v1684_v44 = vsel %vm10318_vm13, %v1679_v26, %v1683_v58  ;;  %v1645_v0 = vrot.slane %v1644_v34, 4  ;;  %v10421_v15 = vshll.u32 %v10327_v55, 16 }
  0xc8   : > { %v2088_v35 = vsel %vm10108_vm3, %v2086_v62, %v2087_v1  ;;  %v10425_v5 = vcombine.low %v1674_v24, %v1684_v44  ;;  %v1654_v29 = vor.u32 %v1653_v63, %v1649_v45  ;;  %v1712_v13 = vrot.slane %v10414_v47, 4  ;;  %v1284_v44 = vld [vmem:[#allocation2 + $0x48] sm:$0xf]  ;;  %v1285_v32 = vld [vmem:[#allocation2 + $0x4c] sm:$0xf] }
  0xc9   : > { %15807 = vst [vmem:[#allocation53_spill] sm:$0xff] %v10421_v15  ;;  %v10423_v56 = vcombine.low %v2085_v36, %v2088_v35  ;;  %1957 = vrot.lane.b32.xlu0 %v10357_v57, %s9703_s22  ;;  %v1650_v62 = vsel %vm10318_vm13, %v1645_v0, %v1649_v45  ;;  %v1715_v58 = vrot.slane %v10421_v15, 5  ;;  %v10434_v55 = vshll.u32 %v10289_v9, 16  ;;  %v250_v36 = vld [vmem:[%s9927_s8 + $0x38] sm:$0xf] }
  0xca   : > { %15809 = vst [vmem:[#allocation55_spill] sm:$0xff] %v10425_v5  ;;  %v10437_v59 = vshrl.u32 %v10289_v9, 16  ;;  %v1655_v42 = vrot.slane %v1654_v29, 4  ;;  %v10442_v1 = vshll.u32 %v1361_v60, 16  ;;  %v10444_v26 = vshrl.u32 %v1356_v41, 16 }
  0xcb   : > { %15808 = vst [vmem:[#allocation54_spill] sm:$0xff] %v10423_v56  ;;  %15810 = vst [vmem:[#allocation56_spill] sm:$0xff] %v10434_v55  ;;  %2207 = vrot.lane.b32.xlu1 %v10423_v56, %s9702_s20  ;;  %v10446_v34 = vshll.u32 %v1356_v41, 16  ;;  %v251_v45 = vld [vmem:[%s9927_s8 + $0x3c] sm:$0xf]  ;;  %v1716_v24 = vor.u32 %v1715_v58, %v1712_v13  ;;  %v1721_v63 = vrot.slane %v10434_v55, 5 }
  0xcc   : > { %15811 = vst [vmem:[#allocation57_spill] sm:$0xff] %v10437_v59  ;;  %15812 = vst [vmem:[#allocation58_spill] sm:$0xff] %v10442_v1  ;;  %v1725_v35 = vrot.slane %v10437_v59, 4  ;;  %v10452_v9 = vshll.u32 %v10332_v3, 16  ;;  %v1660_v0 = vsel %vm10318_vm13, %v1655_v42, %v1659_v54  ;;  %v1731_v60 = vrot.slane %v10442_v1, 5 }
  0xcd   : > { %15813 = vst [vmem:[#allocation59_spill] sm:$0xff] %v10444_v26  ;;  %15814 = vst [vmem:[#allocation60_spill] sm:$0xff] %v10446_v34  ;;  %v1688_v29 = vrot.slane %v10444_v26, 4  ;;  %v1691_v41 = vrot.slane %v10446_v34, 5  ;;  %1961 = vrot.lane.b32.xlu0 %v10425_v5, %s9703_s22  ;;  %v10462_v13 = vcombine.low %v1650_v62, %v1660_v0  ;;  %v1717_v58 = vrot.slane %v1716_v24, 4 }
  0xce   : > { %15815 = vst [vmem:[#allocation61_spill] sm:$0xff] %v10452_v9  ;;  %1287 = vst.msk [vmem:[#allocation2] sm:$0xf] %vm15529_vm6, %v1284_v44  ;;  %v1726_v56 = vor.u32 %v1725_v35, %v1721_v63  ;;  %v1697_v38 = vrot.slane %v10452_v9, 5  ;;  %v10469_v42 = vshrl.u32 %v10332_v3, 16  ;;  %v10471_v48 = vshll.u32 %v1358_v31, 16 }
  0xcf   : > { %15816 = vst [vmem:[#allocation62_spill] sm:$0xff] %v10462_v13  ;;  %1288 = vst.msk [vmem:[#allocation2 + $0x4] sm:$0xf] %vm15529_vm6, %v1285_v32  ;;  %1955 = vrot.lane.b32.xlu1 %v10390_v11, %s9703_s22  ;;  %v1692_v54 = vor.u32 %v1691_v41, %v1688_v29  ;;  %v10473_v44 = vshrl.u32 %v250_v36, 16  ;;  %v1722_v62 = vsel %vm10318_vm13, %v1717_v58, %v1721_v63  ;;  %v408_v35 = vshll.u32 %v250_v36, 16 }
  0xd0   : > { %15817 = vst [vmem:[#allocation63_spill] sm:$0xff] %v10469_v42  ;;  %15818 = vst [vmem:[#allocation64_spill] sm:$0xff] %v10471_v48  ;;  %v1727_v24 = vrot.slane %v1726_v56, 4  ;;  %v414_v0 = vshrl.u32 %v251_v45, 16  ;;  %v1701_v32 = vrot.slane %v10469_v42, 4  ;;  %v1707_v5 = vrot.slane %v10471_v48, 5 }
  0xd1   : > { %v1693_v19 = vrot.slane %v1692_v54, 4  ;;  %v407_v29 = vrot.slane %v10473_v44, 6  ;;  %v679_v3 = vld [vmem:[#allocation2 + $0x78] sm:$0xe]  ;;  %v814_v41 = vld [vmem:[#allocation2 + $0x78] sm:$0x1] }
  0xd2   : > { %v1732_v31 = vsel %vm10318_vm13, %v1727_v24, %v1731_v60  ;;  %v410_v57 = vrot.slane %v408_v35, 7  ;;  %v416_v11 = vrot.slane %v414_v0, 6  ;;  %v10482_v63 = vshll.u32 %v251_v45, 16  ;;  %v1109_v56 = vld [vmem:[#allocation2 + $0x80] sm:$0x4] }
  0xd3   : > { %1959 = vrot.lane.b32.xlu1 %v10462_v13, %s9703_s22  ;;  %v10486_v36 = vcombine.low %v1722_v62, %v1732_v31  ;;  %v1698_v58 = vsel %vm10318_vm13, %v1693_v19, %v1697_v38  ;;  %v1702_v54 = vor.u32 %v1701_v32, %v1697_v38  ;;  %v8047_v1 = vrot.slane %v10473_v44, 9  ;;  %v248_v55 = vld [vmem:[%s9927_s8 + $0x30] sm:$0xf]  ;;  %v1316_v59 = vld [vmem:[#allocation2 + $0x30] sm:$0xf] }
  0xd4   : > { %v411_v60 = vor.u32 %v410_v57, %v407_v29  ;;  %v419_v24 = vrot.slane %v10482_v63, 7  ;;  %v10494_v15 = vrot.slane %v408_v35, 9  ;;  %v249_v47 = vld [vmem:[%s9927_s8 + $0x34] sm:$0xf]  ;;  %1320 = vst.msk [vmem:[#allocation2 + $0x18] sm:$0xf] %vm15529_vm6, %v1316_v59  ;;  %v1110_v57 = vsel %vm9945_vm12, %v414_v0, %v1109_v56 }
  0xd5   : > { %15819 = vst [vmem:[#allocation65_spill] sm:$0xff] %v10486_v36  ;;  %1965 = vrot.lane.b32.xlu0 %v10486_v36, %s9703_s22  ;;  %v1703_v62 = vrot.slane %v1702_v54, 4  ;;  %v683_v19 = vld [vmem:[#allocation2 + $0x80] sm:$0x3]  ;;  %v815_v38 = vsel %vm9953_vm14, %v8047_v1, %v814_v41  ;;  %v1317_v29 = vld [vmem:[#allocation2 + $0x34] sm:$0xf] }
  0xd6   : > { %v412_v35 = vrot.slane %v411_v60, 4  ;;  %v420_v31 = vor.u32 %v419_v24, %v416_v11  ;;  %v680_v59 = vsel %vm9960_vm15, %v411_v60, %v679_v3  ;;  %816 = vst [vmem:[#allocation2 + $0x78] sm:$0x1] %v815_v38  ;;  %1111 = vst [vmem:[#allocation2 + $0x80] sm:$0x4] %v1110_v57  ;;  %v10507_v45 = vshrl.u32 %v248_v55, 16 }
  0xd7   : > { %v811_v54 = vld [vmem:[#allocation2 + $0x6c] sm:$0x1]  ;;  %v1106_v36 = vld [vmem:[#allocation2 + $0x74] sm:$0x4]  ;;  %1321 = vst.msk [vmem:[#allocation2 + $0x1c] sm:$0xf] %vm15529_vm6, %v1317_v29  ;;  %v1708_v0 = vsel %vm10318_vm13, %v1703_v62, %v1707_v5 }
  0xd8   : > { %v1300_v1 = vld [vmem:[#allocation2 + $0x3c] sm:$0xf]  ;;  %681 = vst [vmem:[#allocation2 + $0x78] sm:$0xe] %v680_v59  ;;  %v389_v41 = vshll.u32 %v248_v55, 16  ;;  %v395_v56 = vshrl.u32 %v249_v47, 16  ;;  %v10518_v60 = vcombine.low %v1698_v58, %v1708_v0  ;;  %v421_v38 = vsel %vm9973_vm9, %v412_v35, %v420_v31 }
  0xd9   : > { %v10512_v11 = vshll.u32 %v249_v47, 16  ;;  %v10515_v24 = vld [vmem:[%s9927_s8 + $0x48] sm:$0xf]  ;;  %v1301_v3 = vld [vmem:[#allocation2 + $0x40] sm:$0xf]  ;;  %v422_v57 = vrot.slane %v420_v31, 4 }
  0xda   : > { %1304 = vst.msk [vmem:[#allocation2 + $0xc] sm:$0xf] %vm15529_vm6, %v1300_v1  ;;  %15820 = vst [vmem:[#allocation66_spill] sm:$0xff] %v10518_v60  ;;  %v388_v29 = vrot.slane %v10507_v45, 6  ;;  %v672_v32 = vld [vmem:[#allocation2 + $0x6c] sm:$0xe]  ;;  %1963 = vrot.lane.b32.xlu1 %v10518_v60, %s9703_s22  ;;  %v1107_v1 = vsel %vm9945_vm12, %v395_v56, %v1106_v36 }
  0xdb   : > { %v255_v5 = vld [vmem:[%s9927_s8 + $0x4c] sm:$0xf]  ;;  %1305 = vst.msk [vmem:[#allocation2 + $0x10] sm:$0xf] %vm15529_vm6, %v1301_v3  ;;  %682 = vst.msk [vmem:[#allocation2 + $0x7c] sm:$0xf] %vm15529_vm6, %v421_v38  ;;  %v684_v58 = vsel %vm9982_vm2, %v422_v57, %v683_v19 }
  0xdc   : > { %v391_v47 = vrot.slane %v389_v41, 7  ;;  %v397_v55 = vrot.slane %v395_v56, 6  ;;  %v400_v62 = vrot.slane %v10512_v11, 7  ;;  %v8046_v59 = vrot.slane %v10507_v45, 9  ;;  %685 = vst [vmem:[#allocation2 + $0x80] sm:$0x3] %v684_v58 }
  0xdd   : > { %v10533_v31 = vrot.slane %v389_v41, 9  ;;  %v676_v38 = vld [vmem:[#allocation2 + $0x74] sm:$0x3]  ;;  %1108 = vst [vmem:[#allocation2 + $0x74] sm:$0x4] %v1107_v1  ;;  %v10541_v19 = vshrl.u32 %v10515_v24, 16 }
  0xde   : > { %v392_v0 = vor.u32 %v391_v47, %v388_v29  ;;  %v401_v3 = vor.u32 %v400_v62, %v397_v55  ;;  %v812_v13 = vsel %vm9953_vm14, %v8046_v59, %v811_v54  ;;  %v446_v41 = vshll.u32 %v10515_v24, 16  ;;  %v1010_v36 = vld [vmem:[#allocation2 + $0x78] sm:$0x1]  ;;  %v1256_v56 = vld [vmem:[#allocation2 + $0x80] sm:$0x4] }
  0xdf   : > { %813 = vst [vmem:[#allocation2 + $0x6c] sm:$0x1] %v812_v13  ;;  %v452_v57 = vshrl.u32 %v255_v5, 16  ;;  %v10544_v35 = vshll.u32 %v255_v5, 16  ;;  %v1011_v54 = vsel %vm10020_vm4, %v10494_v15, %v1010_v36  ;;  %v1190_v13 = vld [vmem:[#allocation2 + $0x78] sm:$0x2]  ;;  %v1257_v62 = vsel %vm10007_vm1, %v10482_v63, %v1256_v56 }
  0xe0   : > { %v393_v29 = vrot.slane %v392_v0, 4  ;;  %v403_v47 = vrot.slane %v401_v3, 4  ;;  %v673_v55 = vsel %vm9960_vm15, %v392_v0, %v672_v32  ;;  %v445_v24 = vrot.slane %v10541_v19, 6  ;;  %v1115_v59 = vld [vmem:[#allocation2 + $0x98] sm:$0x4] }
  0xe1   : > { %674 = vst [vmem:[#allocation2 + $0x6c] sm:$0xe] %v673_v55  ;;  %v448_v5 = vrot.slane %v446_v41, 7  ;;  %1012 = vst [vmem:[#allocation2 + $0x78] sm:$0x1] %v1011_v54  ;;  %v15821_v58 = vrot.slane %v10473_v44, 7 }
  0xe2   : > { %1258 = vst [vmem:[#allocation2 + $0x80] sm:$0x4] %v1257_v62  ;;  %v402_v15 = vsel %vm9973_vm9, %v393_v29, %v401_v3  ;;  %v677_v1 = vsel %vm9982_vm2, %v403_v47, %v676_v38  ;;  %v454_v0 = vrot.slane %v452_v57, 6  ;;  %v693_v36 = vld [vmem:[#allocation2 + $0x90] sm:$0xe]  ;;  %v457_v54 = vrot.slane %v10544_v35, 7 }
  0xe3   : > { %v1191_v32 = vsel %vm10030_vm5, %v15821_v58, %v1190_v13  ;;  %v820_v56 = vld [vmem:[#allocation2 + $0x90] sm:$0x1]  ;;  %v1366_v55 = vld [vmem:[#allocation2 + $0x7c] sm:$0xf]  ;;  %675 = vst.msk [vmem:[#allocation2 + $0x70] sm:$0xf] %vm15529_vm6, %v402_v15  ;;  %v449_v44 = vor.u32 %v448_v5, %v445_v24  ;;  %v1116_v15 = vsel %vm9945_vm12, %v452_v57, %v1115_v59 }
  0xe4   : > { %1192 = vst [vmem:[#allocation2 + $0x78] sm:$0x2] %v1191_v32  ;;  %678 = vst [vmem:[#allocation2 + $0x74] sm:$0x3] %v677_v1  ;;  %v8049_v13 = vrot.slane %v10541_v19, 9  ;;  %v10571_v38 = vshll.u32 %v1366_v55, 16  ;;  %v458_v48 = vor.u32 %v457_v54, %v454_v0 }
  0xe5   : > { %v10568_v3 = vld [vmem:[%s9927_s8 + $0x40] sm:$0xf]  ;;  %v253_v29 = vld [vmem:[%s9927_s8 + $0x44] sm:$0xf]  ;;  %v10573_v47 = vshrl.u32 %v1366_v55, 16  ;;  %v10575_v32 = vrot.slane %v446_v41, 9  ;;  %v694_v62 = vsel %vm9960_vm15, %v449_v44, %v693_v36 }
  0xe6   : > { %15822 = vst [vmem:[#allocation67_spill] sm:$0xff] %v10571_v38  ;;  %v697_v58 = vld [vmem:[#allocation2 + $0x98] sm:$0x3]  ;;  %v10580_v24 = vld [vmem:[%s9927_s8 + $0x58] sm:$0xf]  ;;  %v450_v60 = vrot.slane %v449_v44, 4  ;;  %v821_v9 = vsel %vm9953_vm14, %v8049_v13, %v820_v56 }
  0xe7   : > { %15823 = vst [vmem:[#allocation68_spill] sm:$0xff] %v10573_v47  ;;  %v912_v5 = vld [vmem:[#allocation2 + $0x80] sm:$0x2]  ;;  %v1253_v1 = vld [vmem:[#allocation2 + $0x74] sm:$0x4]  ;;  %v15824_v41 = vrot.slane %v10482_v63, 10 }
  0xe8   : > { %1117 = vst [vmem:[#allocation2 + $0x98] sm:$0x4] %v1116_v15  ;;  %v1112_v55 = vld [vmem:[#allocation2 + $0x8c] sm:$0x4]  ;;  %v15350_v57 = vrot.slane %v10571_v38, 5  ;;  %v1773_v59 = vrot.slane %v10573_v47, 4  ;;  %v1254_v0 = vsel %vm10007_vm1, %v10512_v11, %v1253_v1  ;;  %v459_v63 = vsel %vm9973_vm9, %v450_v60, %v458_v48 }
  0xe9   : > { %v913_v42 = vsel %vm10046_vm0, %v15824_v41, %v912_v5  ;;  %v1007_v34 = vld [vmem:[#allocation2 + $0x6c] sm:$0x1]  ;;  %695 = vst [vmem:[#allocation2 + $0x90] sm:$0xe] %v694_v62  ;;  %822 = vst [vmem:[#allocation2 + $0x90] sm:$0x1] %v821_v9 }
  0xea   : > { %914 = vst [vmem:[#allocation2 + $0x80] sm:$0x2] %v913_v42  ;;  %v1008_v36 = vsel %vm10020_vm4, %v10533_v31, %v1007_v34  ;;  %1255 = vst [vmem:[#allocation2 + $0x74] sm:$0x4] %v1254_v0  ;;  %v460_v56 = vrot.slane %v458_v48, 4  ;;  %v1145_v44 = vrot.slane %v10541_v19, 7  ;;  %v10603_v54 = vor.u32 %v1773_v59, %v15350_v57 }
  0xeb   : > { %1009 = vst [vmem:[#allocation2 + $0x6c] sm:$0x1] %v1008_v36  ;;  %v1187_v13 = vld [vmem:[#allocation2 + $0x6c] sm:$0x2]  ;;  %696 = vst.msk [vmem:[#allocation2 + $0x94] sm:$0xf] %vm15529_vm6, %v459_v63 }
  0xec   : > { %v10607_v9 = vshrl.u32 %v10568_v3, 16  ;;  %v15349_v34 = vshll.u32 %v10568_v3, 16  ;;  %v433_v42 = vshrl.u32 %v253_v29, 16  ;;  %v15825_v31 = vrot.slane %v10507_v45, 7  ;;  %v10621_v15 = vld [vmem:[#allocation2 + $0x78] sm:$0xf] }
  0xed   : > { %v698_v60 = vsel %vm9982_vm2, %v460_v56, %v697_v58  ;;  %v10616_v19 = vshll.u32 %v253_v29, 16  ;;  %v10619_v62 = vshrl.u32 %v10580_v24, 16  ;;  %v1775_v5 = vrot.slane %v10603_v54, 4  ;;  %v909_v1 = vld [vmem:[#allocation2 + $0x74] sm:$0x2] }
  0xee   : > { %v1188_v48 = vsel %vm10030_vm5, %v15825_v31, %v1187_v13  ;;  %699 = vst [vmem:[#allocation2 + $0x98] sm:$0x3] %v698_v60  ;;  %v426_v45 = vrot.slane %v10607_v9, 6  ;;  %v1113_v41 = vsel %vm9945_vm12, %v433_v42, %v1112_v55  ;;  %v10628_v59 = vshrl.u32 %v10621_v15, 16  ;;  %v10637_v36 = vld [vmem:[#allocation2 + $0x70] sm:$0xf] }
  0xef   : > { %1189 = vst [vmem:[#allocation2 + $0x6c] sm:$0x2] %v1188_v48  ;;  %v10631_v29 = vshll.u32 %v10621_v15, 16  ;;  %v15828_v58 = vrot.slane %v10512_v11, 10  ;;  %v429_v63 = vrot.slane %v15349_v34, 7  ;;  %v10642_v55 = vshll.u32 %v10637_v36, 16 }
  0xf0   : > { %15826 = vst [vmem:[#allocation69_spill] sm:$0xff] %v10628_v59  ;;  %v686_v56 = vld [vmem:[#allocation2 + $0x84] sm:$0xe]  ;;  %1114 = vst [vmem:[#allocation2 + $0x8c] sm:$0x4] %v1113_v41  ;;  %v10645_v54 = vshrl.u32 %v10637_v36, 16 }
  0xf1   : > { %15827 = vst [vmem:[#allocation70_spill] sm:$0xff] %v10631_v29  ;;  %v910_v0 = vsel %vm10046_vm0, %v15828_v58, %v909_v1  ;;  %15829 = vst [vmem:[#allocation71_spill] sm:$0xff] %v10642_v55  ;;  %v1262_v13 = vld [vmem:[#allocation2 + $0x98] sm:$0x4]  ;;  %v435_v31 = vrot.slane %v433_v42, 6  ;;  %v438_v11 = vrot.slane %v10616_v19, 7 }
  0xf2   : > { %911 = vst [vmem:[#allocation2 + $0x74] sm:$0x2] %v910_v0  ;;  %15830 = vst [vmem:[#allocation72_spill] sm:$0xff] %v10645_v54  ;;  %v1760_v48 = vrot.slane %v10628_v59, 4  ;;  %v1763_v60 = vrot.slane %v10631_v29, 5  ;;  %v1263_v41 = vsel %vm10007_vm1, %v10544_v35, %v1262_v13  ;;  %v430_v0 = vor.u32 %v429_v63, %v426_v45 }
  0xf3   : > { %v1016_v1 = vld [vmem:[#allocation2 + $0x90] sm:$0x1]  ;;  %v1196_v58 = vld [vmem:[#allocation2 + $0x90] sm:$0x2]  ;;  %v10653_v34 = vld [vmem:[#allocation2 + $0x80] sm:$0x7]  ;;  %v439_v13 = vor.u32 %v438_v11, %v435_v31 }
  0xf4   : > { %v15363_v57 = vrot.slane %v10642_v55, 5  ;;  %v1749_v47 = vrot.slane %v10645_v54, 4  ;;  %v1017_v42 = vsel %vm10020_vm4, %v10575_v32, %v1016_v1  ;;  %v1197_v29 = vsel %vm10030_vm5, %v1145_v44, %v1196_v58  ;;  %1264 = vst [vmem:[#allocation2 + $0x98] sm:$0x4] %v1263_v41  ;;  %v10665_v45 = vld [vmem:[#allocation2 + $0x94] sm:$0xf] }
  0xf5   : > { %v1764_v59 = vor.u32 %v1763_v60, %v1760_v48  ;;  %v10663_v26 = vshll.u32 %v10653_v34, 16  ;;  %1018 = vst [vmem:[#allocation2 + $0x90] sm:$0x1] %v1017_v42  ;;  %1198 = vst [vmem:[#allocation2 + $0x90] sm:$0x2] %v1197_v29  ;;  %v431_v63 = vrot.slane %v430_v0, 4  ;;  %v687_v44 = vsel %vm9960_vm15, %v430_v0, %v686_v56 }
  0xf6   : > { %v1750_v54 = vor.u32 %v1749_v47, %v15363_v57  ;;  %v10670_v17 = vshll.u32 %v10665_v45, 16  ;;  %v10673_v32 = vshrl.u32 %v10665_v45, 16  ;;  %v10678_v29 = vld [vmem:[#allocation2 + $0x6c] sm:$0xf]  ;;  %v918_v1 = vld [vmem:[#allocation2 + $0x98] sm:$0x2] }
  0xf7   : > { %15831 = vst [vmem:[#allocation73_spill] sm:$0xff] %v10663_v26  ;;  %v1765_v48 = vrot.slane %v1764_v59, 4  ;;  %v1779_v60 = vrot.slane %v10663_v26, 5  ;;  %v440_v31 = vsel %vm9973_vm9, %v431_v63, %v439_v13  ;;  %688 = vst [vmem:[#allocation2 + $0x84] sm:$0xe] %v687_v44  ;;  %v10683_v47 = vshrl.u32 %v10678_v29, 16 }
  0xf8   : > { %15832 = vst [vmem:[#allocation74_spill] sm:$0xff] %v10670_v17  ;;  %15833 = vst [vmem:[#allocation75_spill] sm:$0xff] %v10673_v32  ;;  %v10686_v11 = vshll.u32 %v10678_v29, 16  ;;  %v1751_v58 = vrot.slane %v1750_v54, 4  ;;  %v15836_v41 = vrot.slane %v10544_v35, 10  ;;  %v15837_v0 = vrot.slane %v10571_v38, 5 }
  0xf9   : > { %15834 = vst [vmem:[#allocation76_spill] sm:$0xff] %v10683_v47  ;;  %689 = vst.msk [vmem:[#allocation2 + $0x88] sm:$0xf] %vm15529_vm6, %v440_v31  ;;  %v690_v56 = vld [vmem:[#allocation2 + $0x8c] sm:$0x3]  ;;  %v1780_v63 = vsel %vm10318_vm13, %v1775_v5, %v1779_v60  ;;  %v15374_v54 = vrot.slane %v10670_v17, 5 }
  0xfa   : > { %15835 = vst [vmem:[#allocation77_spill] sm:$0xff] %v10686_v11  ;;  %v919_v59 = vsel %vm10046_vm0, %v15836_v41, %v918_v1  ;;  %v1770_v42 = vsel %vm10318_vm13, %v1765_v48, %v15837_v0  ;;  %v10699_v44 = vld [vmem:[#allocation2 + $0x74] sm:$0x7]  ;;  %v1821_v35 = vrot.slane %v10673_v32, 4  ;;  %v817_v57 = vld [vmem:[#allocation2 + $0x84] sm:$0x1] }
  0xfb   : > { %920 = vst [vmem:[#allocation2 + $0x98] sm:$0x2] %v919_v59  ;;  %v1259_v1 = vld [vmem:[#allocation2 + $0x8c] sm:$0x4]  ;;  %v10703_v31 = vcombine.low %v1770_v42, %v1780_v63  ;;  %v1736_v41 = vrot.slane %v10683_v47, 4  ;;  %v1739_v26 = vrot.slane %v10686_v11, 5 }
  0xfc   : > { %v10708_v48 = vshll.u32 %v10699_v44, 16  ;;  %v1822_v5 = vor.u32 %v1821_v35, %v15374_v54  ;;  %v441_v60 = vrot.slane %v439_v13, 4  ;;  %v8048_v59 = vrot.slane %v10607_v9, 9  ;;  %v10717_v38 = vld [vmem:[#allocation2 + $0x90] sm:$0xf] }
  0xfd   : > { %15838 = vst [vmem:[#allocation78_spill] sm:$0xff] %v10703_v31  ;;  %v8064_v0 = vrot.slane %v10616_v19, 10  ;;  %1969 = vrot.lane.b32.xlu0 %v10703_v31, %s9703_s22  ;;  %v1740_v42 = vor.u32 %v1739_v26, %v1736_v41  ;;  %v15840_v11 = vshll.u32 %v10568_v3, 16  ;;  %v1144_v32 = vrot.slane %v10607_v9, 7  ;;  %v10725_v35 = vld [vmem:[%s9927_s8 + $0x5c] sm:$0xf] }
  0xfe   : > { %15839 = vst [vmem:[#allocation79_spill] sm:$0xff] %v10708_v48  ;;  %v1755_v63 = vrot.slane %v10708_v48, 5  ;;  %v10728_v13 = vshrl.u32 %v10717_v38, 16  ;;  %v10731_v54 = vshll.u32 %v10717_v38, 16  ;;  %v1823_v31 = vrot.slane %v1822_v5, 4 }
  0xff   : > { %v10721_v47 = vrot.slane %v15840_v11, 9  ;;  %v691_v26 = vsel %vm9982_vm2, %v441_v60, %v690_v56  ;;  %v1741_v41 = vrot.slane %v1740_v42, 4  ;;  %v818_v9 = vsel %vm9953_vm14, %v8048_v59, %v817_v57  ;;  %v1193_v11 = vld [vmem:[#allocation2 + $0x84] sm:$0x2] }
 0x100   : > { %15841 = vst [vmem:[#allocation80_spill] sm:$0xff] %v10728_v13  ;;  %15842 = vst [vmem:[#allocation81_spill] sm:$0xff] %v10731_v54  ;;  %v1756_v3 = vsel %vm10318_vm13, %v1751_v58, %v1755_v63  ;;  %v1260_v48 = vsel %vm10007_vm1, %v10616_v19, %v1259_v1  ;;  %v1808_v30 = vrot.slane %v10728_v13, 4  ;;  %v1811_v5 = vrot.slane %v10731_v54, 5  ;;  %v10746_v60 = vld [vmem:[#allocation2 + $0x88] sm:$0xf] }
 0x101   : > { %692 = vst [vmem:[#allocation2 + $0x8c] sm:$0x3] %v691_v26  ;;  %819 = vst [vmem:[#allocation2 + $0x84] sm:$0x1] %v818_v9  ;;  %v1194_v56 = vsel %vm10030_vm5, %v1144_v32, %v1193_v11  ;;  %v483_v58 = vrot.slane %v10619_v62, 6  ;;  %v15843_v57 = vrot.slane %v10642_v55, 5 }
 0x102   : > { %1261 = vst [vmem:[#allocation2 + $0x8c] sm:$0x4] %v1260_v48  ;;  %v10753_v42 = vld [vmem:[#allocation2 + $0x98] sm:$0x7]  ;;  %1195 = vst [vmem:[#allocation2 + $0x84] sm:$0x2] %v1194_v56  ;;  %v1812_v26 = vor.u32 %v1811_v5, %v1808_v30 }
 0x103   : > { %v1746_v59 = vsel %vm10318_vm13, %v1741_v41, %v15843_v57  ;;  %v10756_v19 = vshll.u32 %v10746_v60, 16  ;;  %v10759_v1 = vshrl.u32 %v10746_v60, 16  ;;  %v484_v32 = vshll.u32 %v10580_v24, 16  ;;  %v826_v48 = vld [vmem:[#allocation2 + $0xa8] sm:$0x1] }
 0x104   : > { %v10762_v63 = vcombine.low %v1746_v59, %v1756_v3  ;;  %v10765_v9 = vshll.u32 %v10753_v42, 16  ;;  %v490_v41 = vshrl.u32 %v10725_v35, 16  ;;  %v10771_v55 = vshll.u32 %v10725_v35, 16  ;;  %v707_v24 = vld [vmem:[#allocation2 + $0xa8] sm:$0xe] }
 0x105   : > { %15844 = vst [vmem:[#allocation82_spill] sm:$0xff] %v10756_v19  ;;  %15845 = vst [vmem:[#allocation83_spill] sm:$0xff] %v10759_v1  ;;  %v15405_v11 = vrot.slane %v10756_v19, 5  ;;  %v1797_v56 = vrot.slane %v10759_v1, 4  ;;  %v486_v57 = vrot.slane %v484_v32, 7  ;;  %v1813_v3 = vrot.slane %v1812_v26, 4 }
 0x106   : > { %15846 = vst [vmem:[#allocation84_spill] sm:$0xff] %v10762_v63  ;;  %15847 = vst [vmem:[#allocation85_spill] sm:$0xff] %v10765_v9  ;;  %v1121_v54 = vld [vmem:[#allocation2 + $0xb0] sm:$0x4]  ;;  %1967 = vrot.lane.b32.xlu1 %v10762_v63, %s9703_s22  ;;  %v1827_v30 = vrot.slane %v10765_v9, 5  ;;  %v492_v5 = vrot.slane %v490_v41, 6 }
 0x107   : > { %v8051_v59 = vrot.slane %v10619_v62, 9  ;;  %v256_v13 = vld [vmem:[%s9927_s8 + $0x50] sm:$0xf]  ;;  %v10781_v1 = vor.u32 %v1797_v56, %v15405_v11  ;;  %v487_v40 = vor.u32 %v486_v57, %v483_v58  ;;  %v495_v35 = vrot.slane %v10771_v55, 7  ;;  %v1286_v56 = vld [vmem:[#allocation2 + $0x50] sm:$0x7] }
 0x108   : > { %v15848_v39 = vrot.slane %v10670_v17, 5  ;;  %v1828_v63 = vsel %vm10318_vm13, %v1823_v31, %v1827_v30  ;;  %v915_v9 = vld [vmem:[#allocation2 + $0x8c] sm:$0x2]  ;;  %v10793_v2 = vrot.slane %v484_v32, 9  ;;  %v1318_v58 = vld [vmem:[#allocation2 + $0x38] sm:$0x7] }
 0x109   : > { %v827_v10 = vsel %vm9953_vm14, %v8051_v59, %v826_v48  ;;  %v916_v11 = vsel %vm10046_vm0, %v8064_v0, %v915_v9  ;;  %v1013_v20 = vld [vmem:[#allocation2 + $0x84] sm:$0x1]  ;;  %v496_v32 = vor.u32 %v495_v35, %v492_v5  ;;  %v708_v48 = vsel %vm9960_vm15, %v487_v40, %v707_v24  ;;  %v823_v0 = vld [vmem:[#allocation2 + $0x9c] sm:$0x1]  ;;  %v1118_v9 = vld [vmem:[#allocation2 + $0xa4] sm:$0x4] }
 0x10a   : > { %v1818_v26 = vsel %vm10318_vm13, %v1813_v3, %v15848_v39  ;;  %v488_v39 = vrot.slane %v487_v40, 4  ;;  %v711_v3 = vld [vmem:[#allocation2 + $0xb0] sm:$0x3]  ;;  %828 = vst [vmem:[#allocation2 + $0xa8] sm:$0x1] %v827_v10  ;;  %v1014_v31 = vsel %vm10020_vm4, %v10721_v47, %v1013_v20  ;;  %v1147_v10 = vrot.slane %v10619_v62, 7 }
 0x10b   : > { %v10795_v57 = vcombine.low %v1818_v26, %v1828_v63  ;;  %917 = vst [vmem:[#allocation2 + $0x8c] sm:$0x2] %v916_v11  ;;  %v1122_v63 = vsel %vm9945_vm12, %v490_v41, %v1121_v54  ;;  %v1302_v30 = vld [vmem:[#allocation2 + $0x44] sm:$0x7]  ;;  %1015 = vst [vmem:[#allocation2 + $0x84] sm:$0x1] %v1014_v31 }
 0x10c   : > { %709 = vst [vmem:[#allocation2 + $0xa8] sm:$0xe] %v708_v48  ;;  %1123 = vst [vmem:[#allocation2 + $0xb0] sm:$0x4] %v1122_v63  ;;  %v10810_v20 = vshrl.u32 %v256_v13, 16  ;;  %v465_v47 = vshll.u32 %v256_v13, 16  ;;  %v497_v41 = vsel %vm9973_vm9, %v488_v39, %v496_v32 }
 0x10d   : > { %15849 = vst [vmem:[#allocation86_spill] sm:$0xff] %v10795_v57  ;;  %1973 = vrot.lane.b32.xlu0 %v10795_v57, %s9703_s22  ;;  %v471_v11 = vshrl.u32 %v257_v25, 16  ;;  %v10812_v5 = vld [vmem:[#allocation2] sm:$0xf]  ;;  %v10814_v40 = vld [vmem:[#allocation2 + $0x4] sm:$0xf] }
 0x10e   : > { %v10817_v54 = vld [vmem:[%s9927_s8 + $0x60] sm:$0xf]  ;;  %v498_v24 = vrot.slane %v496_v32, 4  ;;  %v10821_v59 = vshll.u32 %v257_v25, 16  ;;  %v700_v35 = vld [vmem:[#allocation2 + $0x9c] sm:$0xe] }
 0x10f   : > { %vm15511_vm7 = vcmask 256000   ;;  %710 = vst.msk [vmem:[#allocation2 + $0xac] sm:$0xf] %vm15529_vm6, %v497_v41  ;;  %v464_v62 = vrot.slane %v10810_v20, 6  ;;  %v467_v13 = vrot.slane %v465_v47, 7  ;;  %v473_v26 = vrot.slane %v471_v11, 6 }
 0x110   : > { %v8050_v31 = vrot.slane %v10810_v20, 9  ;;  %1290 = vst.msk [vmem:[#allocation2 + $0x8] sm:$0x7] %vm15511_vm7, %v1286_v56  ;;  %1322 = vst.msk [vmem:[#allocation2 + $0x20] sm:$0x7] %vm15511_vm7, %v1318_v58  ;;  %v712_v25 = vsel %vm9982_vm2, %v498_v24, %v711_v3  ;;  %v476_v39 = vrot.slane %v10821_v59, 7  ;;  %v1119_v56 = vsel %vm9945_vm12, %v471_v11, %v1118_v9 }
 0x111   : > { %1306 = vst.msk [vmem:[#allocation2 + $0x14] sm:$0x7] %vm15511_vm7, %v1302_v30  ;;  %v10833_v48 = vrot.slane %v465_v47, 9  ;;  %713 = vst [vmem:[#allocation2 + $0xb0] sm:$0x3] %v712_v25  ;;  %v468_v63 = vor.u32 %v467_v13, %v464_v62  ;;  %v8136_v3 = vrot.slane %v10812_v5, 9 }
 0x112   : > { %v704_v41 = vld [vmem:[#allocation2 + $0xa4] sm:$0x3]  ;;  %v824_v17 = vsel %vm9953_vm14, %v8050_v31, %v823_v0  ;;  %v1022_v30 = vld [vmem:[#allocation2 + $0xa8] sm:$0x1]  ;;  %v477_v57 = vor.u32 %v476_v39, %v473_v26  ;;  %1120 = vst [vmem:[#allocation2 + $0xa4] sm:$0x4] %v1119_v56 }
 0x113   : > { %825 = vst [vmem:[#allocation2 + $0x9c] sm:$0x1] %v824_v17  ;;  %v2035_v47 = vrot.slane %v10814_v40, 5  ;;  %v10843_v24 = vshrl.u32 %v10817_v54, 16  ;;  %v10845_v62 = vld [vmem:[#allocation2 + $0x8c] sm:$0x7]  ;;  %v1023_v0 = vsel %vm10020_vm4, %v10793_v2, %v1022_v30  ;;  %v701_v11 = vsel %vm9960_vm15, %v468_v63, %v700_v35 }
 0x114   : > { %v469_v9 = vrot.slane %v468_v63, 4  ;;  %v10853_v13 = vld [vmem:[#allocation2 + $0x84] sm:$0xf]  ;;  %v10856_v26 = vshll.u32 %v10845_v62, 16  ;;  %1024 = vst [vmem:[#allocation2 + $0xa8] sm:$0x1] %v1023_v0 }
 0x115   : > { %v1202_v31 = vld [vmem:[#allocation2 + $0xa8] sm:$0x2]  ;;  %v479_v25 = vrot.slane %v477_v57, 4  ;;  %702 = vst [vmem:[#allocation2 + $0x9c] sm:$0xe] %v701_v11  ;;  %v10860_v39 = vsel %vm10108_vm3, %v8136_v3, %v2035_v47  ;;  %v10863_v2 = vshrl.u32 %v10853_v13, 16 }
 0x116   : > { %15850 = vst [vmem:[#allocation87_spill] sm:$0xff] %v10856_v26  ;;  %v10866_v35 = vshll.u32 %v10853_v13, 16  ;;  %v1203_v63 = vsel %vm10030_vm5, %v1147_v10, %v1202_v31  ;;  %v1268_v56 = vld [vmem:[#allocation2 + $0xb0] sm:$0x4]  ;;  %v478_v30 = vsel %vm9973_vm9, %v469_v9, %v477_v57  ;;  %v10872_v0 = vld [vmem:[#allocation2 + $0xc] sm:$0xf] }
 0x117   : > { %15851 = vst [vmem:[#allocation88_spill] sm:$0xff] %v10863_v2  ;;  %v1803_v11 = vrot.slane %v10856_v26, 5  ;;  %1204 = vst [vmem:[#allocation2 + $0xa8] sm:$0x2] %v1203_v63  ;;  %v1269_v3 = vsel %vm10007_vm1, %v10771_v55, %v1268_v56  ;;  %v10878_v32 = vld [vmem:[#allocation2 + $0xac] sm:$0xf]  ;;  %v705_v10 = vsel %vm9982_vm2, %v479_v25, %v704_v41 }
 0x118   : > { %15852 = vst [vmem:[#allocation89_spill] sm:$0xff] %v10866_v35  ;;  %703 = vst.msk [vmem:[#allocation2 + $0xa0] sm:$0xf] %vm15529_vm6, %v478_v30  ;;  %v10883_v31 = vld [vmem:[#allocation2 + $0x8] sm:$0x7]  ;;  %v2037_v58 = vrot.slane %v2035_v47, 4 }
 0x119   : > { %v261_v57 = vld [vmem:[%s9927_s8 + $0x64] sm:$0xf]  ;;  %v1784_v9 = vrot.slane %v10863_v2, 4  ;;  %v1787_v17 = vrot.slane %v10866_v35, 5  ;;  %1270 = vst [vmem:[#allocation2 + $0xb0] sm:$0x4] %v1269_v3 }
 0x11a   : > { %v10889_v63 = vshll.u32 %v10878_v32, 16  ;;  %v10892_v56 = vshrl.u32 %v10878_v32, 16  ;;  %706 = vst [vmem:[#allocation2 + $0xa4] sm:$0x3] %v705_v10  ;;  %v714_v30 = vld [vmem:[#allocation2 + $0xb4] sm:$0xe] }
 0x11b   : > { %v10894_v26 = vld [vmem:[#allocation2 + $0x10] sm:$0xf]  ;;  %v2038_v25 = vrot.slane %v10883_v31, 5  ;;  %v502_v47 = vrot.slane %v10843_v24, 6  ;;  %v15855_v2 = vshll.u32 %v10817_v54, 16  ;;  %v1788_v35 = vor.u32 %v1787_v17, %v1784_v9 }
 0x11c   : > { %15853 = vst [vmem:[#allocation90_spill] sm:$0xff] %v10889_v63  ;;  %15854 = vst [vmem:[#allocation91_spill] sm:$0xff] %v10892_v56  ;;  %v924_v41 = vld [vmem:[#allocation2 + $0xb0] sm:$0x2]  ;;  %v10902_v3 = vcombine.low %v10872_v0, %v10894_v26  ;;  %v15857_v49 = vrot.slane %v10771_v55, 10  ;;  %v15432_v7 = vrot.slane %v10889_v63, 5 }
 0x11d   : > { %v505_v46 = vrot.slane %v15855_v2, 7  ;;  %v1869_v21 = vrot.slane %v10892_v56, 4  ;;  %v1019_v43 = vld [vmem:[#allocation2 + $0x9c] sm:$0x1]  ;;  %v1265_v53 = vld [vmem:[#allocation2 + $0xa4] sm:$0x4] }
 0x11e   : > { %15856 = vst [vmem:[#allocation92_spill] sm:$0xff] %v10902_v3  ;;  %v925_v10 = vsel %vm10046_vm0, %v15857_v49, %v924_v41  ;;  %v15858_v52 = vrot.slane %v10781_v1, 4  ;;  %v1020_v17 = vsel %vm10020_vm4, %v10833_v48, %v1019_v43  ;;  %v1266_v49 = vsel %vm10007_vm1, %v10821_v59, %v1265_v53  ;;  %v1124_v9 = vld [vmem:[#allocation2 + $0xbc] sm:$0x4]  ;;  %v1199_v1 = vld [vmem:[#allocation2 + $0x9c] sm:$0x2] }
 0x11f   : > { %926 = vst [vmem:[#allocation2 + $0xb0] sm:$0x2] %v925_v10  ;;  %v506_v55 = vor.u32 %v505_v46, %v502_v47  ;;  %v1789_v41 = vrot.slane %v1788_v35, 4  ;;  %v10922_v56 = vor.u32 %v1869_v21, %v15432_v7  ;;  %1021 = vst [vmem:[#allocation2 + $0x9c] sm:$0x1] %v1020_v17  ;;  %v15859_v43 = vrot.slane %v10810_v20, 7 }
 0x120   : > { %v1804_v2 = vsel %vm10318_vm13, %v15858_v52, %v1803_v11  ;;  %1267 = vst [vmem:[#allocation2 + $0xa4] sm:$0x4] %v1266_v49  ;;  %v10926_v52 = vsel %vm10108_vm3, %v2037_v58, %v2038_v25  ;;  %v509_v11 = vshrl.u32 %v261_v57, 16  ;;  %v10932_v48 = vshll.u32 %v261_v57, 16  ;;  %v829_v35 = vld [vmem:[#allocation2 + $0xb4] sm:$0x1] }
 0x121   : > { %v1200_v53 = vsel %vm10030_vm5, %v15859_v43, %v1199_v1  ;;  %v507_v46 = vrot.slane %v506_v55, 4  ;;  %v715_v21 = vsel %vm9960_vm15, %v506_v55, %v714_v30  ;;  %v15860_v47 = vrot.slane %v10756_v19, 5  ;;  %v10940_v58 = vld [vmem:[#allocation2 + $0xa8] sm:$0xf]  ;;  %v10943_v20 = vld [vmem:[#allocation2 + $0xa0] sm:$0xf] }
 0x122   : > { %v1871_v25 = vrot.slane %v10922_v56, 4  ;;  %1201 = vst [vmem:[#allocation2 + $0x9c] sm:$0x2] %v1200_v53  ;;  %v511_v17 = vrot.slane %v509_v11, 6  ;;  %716 = vst [vmem:[#allocation2 + $0xb4] sm:$0xe] %v715_v21  ;;  %v1125_v57 = vsel %vm9945_vm12, %v509_v11, %v1124_v9 }
 0x123   : > { %v1794_v10 = vsel %vm10318_vm13, %v1789_v41, %v15860_v47  ;;  %v10947_v49 = vld [vmem:[#allocation2 + $0x18] sm:$0xf]  ;;  %v10952_v55 = vshrl.u32 %v10940_v58, 16  ;;  %v10955_v41 = vshll.u32 %v10940_v58, 16  ;;  %v921_v1 = vld [vmem:[#allocation2 + $0xa4] sm:$0x2] }
 0x124   : > { %15861 = vst [vmem:[#allocation93_spill] sm:$0xff] %v10947_v49  ;;  %v10949_v30 = vcombine.low %v1794_v10, %v1804_v2  ;;  %v10958_v56 = vshll.u32 %v10943_v20, 16  ;;  %1126 = vst [vmem:[#allocation2 + $0xbc] sm:$0x4] %v1125_v57  ;;  %v10960_v43 = vld [vmem:[#allocation2 + $0x1c] sm:$0xf] }
 0x125   : > { %15863 = vst [vmem:[#allocation95_spill] sm:$0xff] %v10952_v55  ;;  %15864 = vst [vmem:[#allocation96_spill] sm:$0xff] %v10955_v41  ;;  %v15866_v53 = vrot.slane %v10821_v59, 10  ;;  %v10967_v2 = vshrl.u32 %v10943_v20, 16  ;;  %v514_v11 = vrot.slane %v10932_v48, 7  ;;  %v8052_v21 = vrot.slane %v10843_v24, 9 }
 0x126   : > { %15862 = vst [vmem:[#allocation94_spill] sm:$0xff] %v10949_v30  ;;  %15865 = vst [vmem:[#allocation97_spill] sm:$0xff] %v10958_v56  ;;  %1971 = vrot.lane.b32.xlu1 %v10949_v30, %s9703_s22  ;;  %v1856_v47 = vrot.slane %v10952_v55, 4  ;;  %v1859_v10 = vrot.slane %v10955_v41, 5  ;;  %v15446_v59 = vrot.slane %v10958_v56, 5  ;;  %v15868_v6 = vshll.u32 %v10817_v54, 16 }
 0x127   : > { %v922_v9 = vsel %vm10046_vm0, %v15866_v53, %v921_v1  ;;  %15867 = vst [vmem:[#allocation98_spill] sm:$0xff] %v10967_v2  ;;  %v718_v57 = vld [vmem:[#allocation2 + $0xbc] sm:$0x3]  ;;  %v10977_v53 = vld [vmem:[#allocation2 + $0xb0] sm:$0x7]  ;;  %v1845_v7 = vrot.slane %v10967_v2, 4  ;;  %v515_v19 = vor.u32 %v514_v11, %v511_v17  ;;  %v830_v16 = vsel %vm9953_vm14, %v8052_v21, %v829_v35 }
 0x128   : > { %923 = vst [vmem:[#allocation2 + $0xa4] sm:$0x2] %v922_v9  ;;  %v8084_v3 = vrot.slane %v15868_v6, 9  ;;  %v1860_v55 = vor.u32 %v1859_v10, %v1856_v47  ;;  %v10985_v41 = vshll.u32 %v10977_v53, 16  ;;  %831 = vst [vmem:[#allocation2 + $0xb4] sm:$0x1] %v830_v16  ;;  %v8152_v16 = vcombine.low %v10860_v39, %v10926_v52 }
 0x129   : > { %v1148_v9 = vrot.slane %v10843_v24, 7  ;;  %v8138_v1 = vrot.slane %v10947_v49, 9  ;;  %v1846_v30 = vor.u32 %v1845_v7, %v15446_v59  ;;  %v516_v17 = vsel %vm9973_vm9, %v507_v46, %v515_v19  ;;  %v10993_v35 = vld [vmem:[#allocation2 + $0x20] sm:$0x7]  ;;  %v10997_v47 = vld [vmem:[#allocation2 + $0x9c] sm:$0xf] }
 0x12a   : > { %15869 = vst [vmem:[#allocation99_spill] sm:$0xff] %v10985_v41  ;;  %v517_v11 = vrot.slane %v515_v19, 4  ;;  %v2049_v6 = vrot.slane %v10960_v43, 5  ;;  %v1861_v54 = vrot.slane %v1860_v55, 4  ;;  %v1875_v21 = vrot.slane %v10985_v41, 5 }
 0x12b   : > { %717 = vst.msk [vmem:[#allocation2 + $0xb8] sm:$0xf] %vm15529_vm6, %v516_v17  ;;  %v1205_v24 = vld [vmem:[#allocation2 + $0xb4] sm:$0x2]  ;;  %v11006_v19 = vcombine.low %v10940_v58, %v10878_v32  ;;  %v11009_v46 = vshrl.u32 %v10997_v47, 16  ;;  %v11012_v55 = vshll.u32 %v10997_v47, 16 }
 0x12c   : > { %v11002_v7 = vld [vmem:[#allocation2 + $0x14] sm:$0x7]  ;;  %v1847_v10 = vrot.slane %v1846_v30, 4  ;;  %v719_v59 = vsel %vm9982_vm2, %v517_v11, %v718_v57  ;;  %v1271_v39 = vld [vmem:[#allocation2 + $0xbc] sm:$0x4]  ;;  %v15873_v52 = vrot.slane %v10889_v63, 5  ;;  %v1876_v14 = vsel %vm10318_vm13, %v1871_v25, %v1875_v21 }
 0x12d   : > { %15870 = vst [vmem:[#allocation100_spill] sm:$0xff] %v11006_v19  ;;  %15871 = vst [vmem:[#allocation101_spill] sm:$0xff] %v11009_v46  ;;  %v1206_v41 = vsel %vm10030_vm5, %v1148_v9, %v1205_v24  ;;  %v1272_v30 = vsel %vm10007_vm1, %v10932_v48, %v1271_v39  ;;  %v1832_v11 = vrot.slane %v11009_v46, 4  ;;  %v1835_v28 = vrot.slane %v11012_v55, 5 }
 0x12e   : > { %15872 = vst [vmem:[#allocation102_spill] sm:$0xff] %v11012_v55  ;;  %v1866_v17 = vsel %vm10318_vm13, %v1861_v54, %v15873_v52  ;;  %720 = vst [vmem:[#allocation2 + $0xbc] sm:$0x3] %v719_v59  ;;  %v2050_v25 = vsel %vm10108_vm3, %v8138_v1, %v2049_v6  ;;  %v2051_v9 = vrot.slane %v2049_v6, 4  ;;  %v2052_v54 = vrot.slane %v10993_v35, 5 }
 0x12f   : > { %v11027_v2 = vcombine.low %v1866_v17, %v1876_v14  ;;  %v11029_v57 = vld [vmem:[#allocation2 + $0xa4] sm:$0x7]  ;;  %1207 = vst [vmem:[#allocation2 + $0xb4] sm:$0x2] %v1206_v41  ;;  %1273 = vst [vmem:[#allocation2 + $0xbc] sm:$0x4] %v1272_v30  ;;  %v1836_v21 = vor.u32 %v1835_v28, %v1832_v11 }
 0x130   : > { %v11036_v59 = vshll.u32 %v11029_v57, 16  ;;  %v8137_v14 = vrot.slane %v10872_v0, 9  ;;  %v1025_v24 = vld [vmem:[#allocation2 + $0xb4] sm:$0x1]  ;;  %v2042_v39 = vrot.slane %v10894_v26, 5  ;;  %v2045_v41 = vrot.slane %v11002_v7, 5 }
 0x131   : > { %15874 = vst [vmem:[#allocation103_spill] sm:$0xff] %v11027_v2  ;;  %1977 = vrot.lane.b32.xlu0 %v11027_v2, %s9703_s22  ;;  %v11045_v52 = vshrl.u32 %v10812_v5, 16  ;;  %v1026_v6 = vsel %vm10020_vm4, %v8084_v3, %v1025_v24  ;;  %v2053_v17 = vsel %vm10108_vm3, %v2051_v9, %v2052_v54  ;;  %v11053_v30 = vshll.u32 %v10812_v5, 16 }
 0x132   : > { %15875 = vst [vmem:[#allocation104_spill] sm:$0xff] %v11036_v59  ;;  %v1851_v1 = vrot.slane %v11036_v59, 5  ;;  %v1837_v28 = vrot.slane %v1836_v21, 4  ;;  %1027 = vst [vmem:[#allocation2 + $0xb4] sm:$0x1] %v1026_v6  ;;  %v11057_v4 = vcombine.low %v2050_v25, %v2053_v17  ;;  %v2043_v50 = vsel %vm10108_vm3, %v8137_v14, %v2042_v39 }
 0x133   : > { %v11055_v11 = vld [vmem:[#allocation2 + $0xb8] sm:$0xf]  ;;  %v2044_v63 = vrot.slane %v2042_v39, 4  ;;  %v1520_v5 = vrot.slane %v11045_v52, 4  ;;  %v15879_v54 = vrot.slane %v10958_v56, 5  ;;  %v11079_v24 = vshll.u32 %v10814_v40, 16 }
 0x134   : > { %15876 = vst [vmem:[#allocation105_spill] sm:$0xff] %v11057_v4  ;;  %v1852_v61 = vsel %vm10318_vm13, %v1847_v10, %v1851_v1  ;;  %v11064_v3 = vshll.u32 %v11055_v11, 16  ;;  %v11067_v9 = vshrl.u32 %v11055_v11, 16  ;;  %v1523_v10 = vrot.slane %v11053_v30, 5 }
 0x135   : > { %v1842_v25 = vsel %vm10318_vm13, %v1837_v28, %v15879_v54  ;;  %2193 = vrot.lane.b32.xlu0 %v8152_v16, %s9702_s20  ;;  %v927_v14 = vld [vmem:[#allocation2 + $0xbc] sm:$0x2]  ;;  %v2046_v21 = vsel %vm10108_vm3, %v2044_v63, %v2045_v41  ;;  %v15881_v1 = vrot.slane %v10932_v48, 10  ;;  %v1529_v41 = vrot.slane %v11079_v24, 5 }
 0x136   : > { %15877 = vst [vmem:[#allocation106_spill] sm:$0xff] %v11064_v3  ;;  %15878 = vst [vmem:[#allocation107_spill] sm:$0xff] %v11067_v9  ;;  %v11081_v39 = vcombine.low %v1842_v25, %v1852_v61  ;;  %v1889_v17 = vrot.slane %v11064_v3, 5  ;;  %v1893_v16 = vrot.slane %v11067_v9, 4  ;;  %v11089_v28 = vcombine.low %v2043_v50, %v2046_v21 }
 0x137   : > { %v928_v6 = vsel %vm10046_vm0, %v15881_v1, %v927_v14  ;;  %v1524_v63 = vor.u32 %v1523_v10, %v1520_v5  ;;  %v11093_v54 = vshrl.u32 %v10814_v40, 16  ;;  %v11098_v48 = vshll.u32 %v10883_v31, 16 }
 0x138   : > { %15880 = vst [vmem:[#allocation108_spill] sm:$0xff] %v11081_v39  ;;  %929 = vst [vmem:[#allocation2 + $0xbc] sm:$0x2] %v928_v6  ;;  %1975 = vrot.lane.b32.xlu1 %v11081_v39, %s9703_s22  ;;  %v1894_v61 = vor.u32 %v1893_v16, %v1889_v17  ;;  %v8145_v25 = vrot.slane %v10678_v29, 9  ;;  %v2098_v14 = vrot.slane %v10637_v36, 5  ;;  %v2101_v40 = vrot.slane %v10699_v44, 5 }
 0x139   : > { %15882 = vst [vmem:[#allocation109_spill] sm:$0xff] %v11089_v28  ;;  %2197 = vrot.lane.b32.xlu0 %v11057_v4, %s9702_s20  ;;  %v1525_v50 = vrot.slane %v1524_v63, 4  ;;  %v1533_v5 = vrot.slane %v11093_v54, 4  ;;  %v11107_v21 = vshrl.u32 %v10872_v0, 16  ;;  %v11109_v10 = vld [vmem:[#allocation2 + $0xb4] sm:$0xf] }
 0x13a   : > { %v1895_v1 = vrot.slane %v1894_v61, 4  ;;  %v1539_v6 = vrot.slane %v11098_v48, 5  ;;  %v2099_v29 = vsel %vm10108_vm3, %v8145_v25, %v2098_v14  ;;  %v2100_v36 = vrot.slane %v2098_v14, 4 }
 0x13b   : > { %v11115_v16 = vshrl.u32 %v11109_v10, 16  ;;  %v11118_v63 = vshll.u32 %v11109_v10, 16  ;;  %v1530_v44 = vsel %vm10318_vm13, %v1525_v50, %v1529_v41  ;;  %v1534_v23 = vor.u32 %v1533_v5, %v1529_v41 }
 0x13c   : > { %v2102_v3 = vsel %vm10108_vm3, %v2100_v36, %v2101_v40  ;;  %v1544_v61 = vrot.slane %v11107_v21, 4  ;;  %v11126_v9 = vshll.u32 %v10872_v0, 16  ;;  %v11129_v25 = vshll.u32 %v10894_v26, 16 }
 0x13d   : > { %15883 = vst [vmem:[#allocation110_spill] sm:$0xff] %v11115_v16  ;;  %15884 = vst [vmem:[#allocation111_spill] sm:$0xff] %v11118_v63  ;;  %v1880_v14 = vrot.slane %v11115_v16, 4  ;;  %v1883_v59 = vrot.slane %v11118_v63, 5  ;;  %v1535_v56 = vrot.slane %v1534_v23, 4  ;;  %v11133_v55 = vcombine.low %v2099_v29, %v2102_v3 }
 0x13e   : > { %v1547_v41 = vrot.slane %v11126_v9, 5  ;;  %v1553_v5 = vrot.slane %v11129_v25, 5  ;;  %v11140_v40 = vshrl.u32 %v10894_v26, 16  ;;  %v11143_v0 = vshll.u32 %v11002_v7, 16 }
 0x13f   : > { %15885 = vst [vmem:[#allocation112_spill] sm:$0xff] %v11133_v55  ;;  %v11135_v50 = vld [vmem:[#allocation2 + $0xbc] sm:$0x7]  ;;  %v1884_v36 = vor.u32 %v1883_v59, %v1880_v14  ;;  %v1540_v23 = vsel %vm10318_vm13, %v1535_v56, %v1539_v6  ;;  %v11151_v3 = vshrl.u32 %v10947_v49, 16  ;;  %v11158_v14 = vshll.u32 %v10947_v49, 16 }
 0x140   : > { %v11146_v16 = vshll.u32 %v11135_v50, 16  ;;  %v8120_v29 = vcombine.low %v1530_v44, %v1540_v23  ;;  %v1548_v63 = vor.u32 %v1547_v41, %v1544_v61  ;;  %v1557_v46 = vrot.slane %v11140_v40, 4 }
 0x141   : > { %v1563_v26 = vrot.slane %v11143_v0, 5  ;;  %v1885_v22 = vrot.slane %v1884_v36, 4  ;;  %v1568_v59 = vrot.slane %v11151_v3, 4  ;;  %v11162_v4 = vshll.u32 %v10960_v43, 16 }
 0x142   : > { %15886 = vst [vmem:[#allocation113_spill] sm:$0xff] %v11146_v16  ;;  %v1899_v19 = vrot.slane %v11146_v16, 5  ;;  %1949 = vrot.lane.b32.xlu0 %v8120_v29, %s9703_s22  ;;  %v1549_v56 = vrot.slane %v1548_v63, 4  ;;  %v1558_v6 = vor.u32 %v1557_v46, %v1553_v5  ;;  %v11165_v44 = vshrl.u32 %v10960_v43, 16 }
 0x143   : > { %v1890_v61 = vsel %vm10318_vm13, %v1885_v22, %v1889_v17  ;;  %v1571_v36 = vrot.slane %v11158_v14, 5  ;;  %v11173_v23 = vshll.u32 %v10993_v35, 16  ;;  %v1577_v16 = vrot.slane %v11162_v4, 5 }
 0x144   : > { %v1900_v41 = vsel %vm10318_vm13, %v1895_v1, %v1899_v19  ;;  %v1554_v46 = vsel %vm10318_vm13, %v1549_v56, %v1553_v5  ;;  %v1559_v63 = vrot.slane %v1558_v6, 4  ;;  %v1581_v39 = vrot.slane %v11165_v44, 4  ;;  %v9443_v1 = vld [vmem:[#allocation2 + $0x7c] sm:$0xf] }
 0x145   : > { %v11175_v29 = vcombine.low %v1890_v61, %v1900_v41  ;;  %v1572_v2 = vor.u32 %v1571_v36, %v1568_v59  ;;  %v1587_v22 = vrot.slane %v11173_v23, 5  ;;  %v8146_v19 = vrot.slane %v10621_v15, 9 }
 0x146   : > { %v1564_v17 = vsel %vm10318_vm13, %v1559_v63, %v1563_v26  ;;  %v2105_v61 = vrot.slane %v9443_v1, 5  ;;  %v2108_v5 = vrot.slane %v10653_v34, 5  ;;  %v8147_v56 = vrot.slane %v10853_v13, 9 }
 0x147   : > { %15887 = vst [vmem:[#allocation114_spill] sm:$0xff] %v11175_v29  ;;  %1979 = vrot.lane.b32.xlu1 %v11175_v29, %s9703_s22  ;;  %v11189_v6 = vcombine.low %v1554_v46, %v1564_v17  ;;  %v1573_v59 = vrot.slane %v1572_v2, 4  ;;  %v1582_v41 = vor.u32 %v1581_v39, %v1577_v16  ;;  %v2112_v36 = vrot.slane %v10746_v60, 5 }
 0x148   : > { %v2106_v15 = vsel %vm10108_vm3, %v8146_v19, %v2105_v61  ;;  %v2107_v49 = vrot.slane %v2105_v61, 4  ;;  %v2115_v29 = vrot.slane %v10845_v62, 5  ;;  %v8148_v26 = vrot.slane %v10717_v38, 9 }
 0x149   : > { %vm2259_vm10 = vsmask.f32 6416  ;;  %1951 = vrot.lane.b32.xlu0 %v11189_v6, %s9703_s22  ;;  %v1578_v34 = vsel %vm10318_vm13, %v1573_v59, %v1577_v16  ;;  %v1583_v13 = vrot.slane %v1582_v41, 4  ;;  %v2113_v2 = vsel %vm10108_vm3, %v8147_v56, %v2112_v36 }
 0x14a   : > { %v2114_v60 = vrot.slane %v2112_v36, 4  ;;  %v2109_v62 = vsel %vm10108_vm3, %v2107_v49, %v2108_v5  ;;  %v2119_v38 = vrot.slane %v10665_v45, 5  ;;  %v2122_v39 = vrot.slane %v10753_v42, 5 }
 0x14b   : > { %2195 = vrot.lane.b32.xlu1 %v11089_v28, %s9702_s20  ;;  %v8149_v46 = vrot.slane %v10997_v47, 9  ;;  %v1588_v16 = vsel %vm10318_vm13, %v1583_v13, %v1587_v22  ;;  %v11211_v63 = vcombine.low %v2106_v15, %v2109_v62  ;;  %v2126_v17 = vrot.slane %v10943_v20, 5  ;;  %v9446_v28 = vld [vmem:[#allocation2 + $0x44] sm:$0x7] }
 0x14c   : > { %v2116_v19 = vsel %vm10108_vm3, %v2114_v60, %v2115_v29  ;;  %v11216_v1 = vcombine.low %v1578_v34, %v1588_v16  ;;  %v2120_v45 = vsel %vm10108_vm3, %v8148_v26, %v2119_v38  ;;  %v2121_v42 = vrot.slane %v2119_v38, 4 }
 0x14d   : > { %15888 = vst [vmem:[#allocation115_spill] sm:$0xff] %v11211_v63  ;;  %v11218_v61 = vcombine.low %v2113_v2, %v2116_v19  ;;  %2213 = vrot.lane.b32.xlu0 %v11211_v63, %s9702_s20  ;;  %v2127_v49 = vsel %vm10108_vm3, %v8149_v46, %v2126_v17  ;;  %v2128_v47 = vrot.slane %v2126_v17, 4  ;;  %v2129_v22 = vrot.slane %v11029_v57, 5 }
 0x14e   : > { %15889 = vst [vmem:[#allocation116_spill] sm:$0xff] %v11216_v1  ;;  %v8150_v29 = vrot.slane %v10940_v58, 9  ;;  %v2123_v20 = vsel %vm10108_vm3, %v2121_v42, %v2122_v39  ;;  %v2133_v5 = vrot.slane %v10878_v32, 5  ;;  %v2136_v56 = vrot.slane %v10977_v53, 5 }
 0x14f   : > { %15890 = vst [vmem:[#allocation117_spill] sm:$0xff] %v11218_v61  ;;  %2211 = vrot.lane.b32.xlu1 %v11133_v55, %s9702_s20  ;;  %v8151_v59 = vrot.slane %v11109_v10, 9  ;;  %v11235_v41 = vcombine.low %v2120_v45, %v2123_v20  ;;  %v2130_v36 = vsel %vm10108_vm3, %v2128_v47, %v2129_v22  ;;  %v2140_v57 = vrot.slane %v11055_v11, 5 }
 0x150   : > { %v2143_v58 = vrot.slane %v11135_v50, 5  ;;  %v11241_v15 = vcombine.low %v2127_v49, %v2130_v36  ;;  %v2134_v26 = vsel %vm10108_vm3, %v8150_v29, %v2133_v5  ;;  %v2135_v34 = vrot.slane %v2133_v5, 4 }
 0x151   : > { %15891 = vst [vmem:[#allocation118_spill] sm:$0xff] %v11235_v41  ;;  %v2261_v32 = vrot.slane %v11045_v52, 5  ;;  %2217 = vrot.lane.b32.xlu0 %v11235_v41, %s9702_s20  ;;  %v2141_v53 = vsel %vm10108_vm3, %v8151_v59, %v2140_v57  ;;  %v2142_v10 = vrot.slane %v2140_v57, 4  ;;  %v2262_v13 = vrot.slane %v11053_v30, 6 }
 0x152   : > { %15892 = vst [vmem:[#allocation119_spill] sm:$0xff] %v11241_v15  ;;  %v2265_v11 = vrot.slane %v11093_v54, 5  ;;  %v2137_v50 = vsel %vm10108_vm3, %v2135_v34, %v2136_v56  ;;  %v2266_v2 = vrot.slane %v11079_v24, 6  ;;  %v15498_v60 = vshrl.u32 %v10883_v31, 16 }
 0x153   : > { %1953 = vrot.lane.b32.xlu1 %v11216_v1, %s9703_s22  ;;  %v2273_v62 = vrot.slane %v11098_v48, 6  ;;  %v11259_v38 = vcombine.low %v2134_v26, %v2137_v50  ;;  %v2144_v39 = vsel %vm10108_vm3, %v2142_v10, %v2143_v58  ;;  %v2263_v46 = vor.u32 %v2262_v13, %v2261_v32 }
 0x154   : > { %v2276_v16 = vrot.slane %v11107_v21, 5  ;;  %vm15894_vm8 = vsmask.f32 2304  ;;  %v15895_v19 = vmov 0  ;;  %v11270_v17 = vcombine.low %v2141_v53, %v2144_v39 }
 0x155   : > { %15893 = vst [vmem:[#allocation120_spill] sm:$0xff] %v11259_v38  ;;  %vm11266_vm11 = vmor %vm15894_vm8, %vm2259_vm10  ;;  %v2267_v45 = vor.u32 %v2266_v2, %v2265_v11  ;;  %v2272_v42 = vrot.slane %v15498_v60, 5  ;;  %v2277_v49 = vrot.slane %v11126_v9, 6  ;;  %2221 = vrot.lane.b32.xlu0 %v11259_v38, %s9702_s20  ;;  %v2264_v47 = vrot.slane %v2263_v46, 4 }
 0x156   : > { %v15896_v19 = vsel %vm11266_vm11, 4294967295, %v15895_v19  ;;  %15898 = vst [vmem:[#allocation122_spill] sm:$0xff] %v11270_v17  ;;  %v2280_v22 = vrot.slane %v11140_v40, 5  ;;  %v2281_v29 = vrot.slane %v11129_v25, 6  ;;  %v15496_v20 = vshrl.u32 %v11002_v7, 16 }
 0x157   : > { %15897 = vst [vmem:[#allocation121_spill] sm:$0xff] %v15896_v19  ;;  %2215 = vrot.lane.b32.xlu1 %v11218_v61, %s9702_s20  ;;  %v2269_v5 = vrot.slane %v2267_v45, 4  ;;  %v2274_v56 = vor.u32 %v2273_v62, %v2272_v42  ;;  %v2278_v59 = vor.u32 %v2277_v49, %v2276_v16  ;;  %v2288_v36 = vrot.slane %v11143_v0, 6 }
 0x158   : > { %v2268_v57 = vsel %vm11266_vm11, %v2264_v47, %v2267_v45  ;;  %v2282_v58 = vor.u32 %v2281_v29, %v2280_v22  ;;  %v2287_v26 = vrot.slane %v15496_v20, 5  ;;  %v2291_v34 = vrot.slane %v11151_v3, 5 }
 0x159   : > { %v2275_v32 = vsel %vm11266_vm11, %v2269_v5, %v2274_v56  ;;  %v2279_v53 = vrot.slane %v2278_v59, 4  ;;  %v2292_v10 = vrot.slane %v11158_v14, 6  ;;  %v2295_v13 = vrot.slane %v11165_v44, 5 }
 0x15a   : > { %v8168_v11 = vcombine.low %v2268_v57, %v2275_v32  ;;  %v2284_v50 = vrot.slane %v2282_v58, 4  ;;  %v2289_v2 = vor.u32 %v2288_v36, %v2287_v26  ;;  %v2296_v62 = vrot.slane %v11162_v4, 6  ;;  %v11310_v26 = vld [vmem:[#allocation2 + $0x2c] sm:$0x7] }
 0x15b   : > { %2219 = vrot.lane.b32.xlu1 %v11241_v15, %s9702_s20  ;;  %v2283_v39 = vsel %vm11266_vm11, %v2279_v53, %v2282_v58  ;;  %v2293_v46 = vor.u32 %v2292_v10, %v2291_v34  ;;  %v15495_v16 = vshrl.u32 %v10993_v35, 16  ;;  %v2303_v45 = vrot.slane %v11173_v23, 6  ;;  %15900 = vst [vmem:[#allocation124_spill] sm:$0xff] %v11310_v26 }
 0x15c   : > { %2549 = vrot.lane.b32.xlu0 %v8168_v11, %s9704_s24  ;;  %v2290_v42 = vsel %vm11266_vm11, %v2284_v50, %v2289_v2  ;;  %v2297_v49 = vor.u32 %v2296_v62, %v2295_v13  ;;  %v2306_v47 = vrot.slane %v10286_v8, 5  ;;  %v2307_v22 = vrot.slane %v10302_v33, 6  ;;  %v15901_v13 = vld [vmem:[#allocation27_spill] sm:$0xff]  ;;  %v15962_v33 = vld [vmem:[#allocation26_spill] sm:$0xff] }
 0x15d   : > { %v11304_v29 = vcombine.low %v2283_v39, %v2290_v42  ;;  %v2294_v5 = vrot.slane %v2293_v46, 4  ;;  %v2302_v56 = vrot.slane %v15495_v16, 5  ;;  %v2310_v59 = vrot.slane %v10336_v18, 5  ;;  %v15902_v39 = vld [vmem:[#allocation28_spill] sm:$0xff]  ;;  %v15904_v16 = vld [vmem:[#allocation29_spill] sm:$0xff]  ;;  %v15961_v18 = vld [vmem:[#allocation35_spill] sm:$0xff] }
 0x15e   : > { %v2299_v36 = vrot.slane %v2297_v49, 4  ;;  %v2308_v57 = vor.u32 %v2307_v22, %v2306_v47  ;;  %v2311_v58 = vrot.slane %v10305_v37, 6  ;;  %v15497_v34 = vshrl.u32 %v11310_v26, 16  ;;  %v15903_v47 = vld [vmem:[#allocation30_spill] sm:$0xff]  ;;  %v15959_v26 = vld [vmem:[#allocation25_spill] sm:$0xff]  ;;  %v15960_v37 = vld [vmem:[#allocation24_spill] sm:$0xff] }
 0x15f   : > { %15899 = vst [vmem:[#allocation123_spill] sm:$0xff] %v11304_v29  ;;  %2223 = vrot.lane.b32.xlu1 %v11270_v17, %s9702_s20  ;;  %v2298_v32 = vsel %vm11266_vm11, %v2294_v5, %v2297_v49  ;;  %v2304_v53 = vor.u32 %v2303_v45, %v2302_v56  ;;  %v2318_v10 = vrot.slane %v10344_v12, 6  ;;  %v2321_v11 = vrot.slane %v15901_v13, 5  ;;  %v11326_v49 = vld [vmem:[#allocation2 + $0x38] sm:$0x7]  ;;  %v9280_v13 = vld [vmem:[#allocation7] sm:$0xff]  }
 0x160   : > { %v2309_v50 = vrot.slane %v2308_v57, 4  ;;  %v2312_v2 = vor.u32 %v2311_v58, %v2310_v59  ;;  %v2317_v62 = vrot.slane %v15497_v34, 5  ;;  %v2322_v46 = vrot.slane %v15902_v39, 6  ;;  %15905 = vst [vmem:[#allocation125_spill] sm:$0xff] %v11326_v49  ;;  %v15907_v34 = vld [vmem:[#allocation31_spill] sm:$0xff]  ;;  %v15963_v8 = vld [vmem:[#allocation54_spill] sm:$0xff] }
 0x161   : > { %v2305_v42 = vsel %vm11266_vm11, %v2299_v36, %v2304_v53  ;;  %v2325_v22 = vrot.slane %v15903_v47, 5  ;;  %v2326_v20 = vrot.slane %v15904_v16, 6  ;;  %v15503_v45 = vshrl.u32 %v11326_v49, 16  ;;  %v15919_v16 = vld [vmem:[#allocation93_spill] sm:$0xff]  ;;  %v11397_v12 = vld [vmem:[#allocation2 + $0x68] sm:$0x7] }
 0x162   : > { %v11329_v5 = vcombine.low %v2298_v32, %v2305_v42  ;;  %v2313_v56 = vsel %vm11266_vm11, %v2309_v50, %v2312_v2  ;;  %v2314_v59 = vrot.slane %v2312_v2, 4  ;;  %v2319_v57 = vor.u32 %v2318_v10, %v2317_v62  ;;  %v15908_v42 = vld [vmem:[#allocation45_spill] sm:$0xff]  ;;  %v15909_v2 = vld [vmem:[#allocation46_spill] sm:$0xff]  ;;  %15934 = vst [vmem:[#allocation132_spill] sm:$0xff] %v11397_v12 }
 0x163   : > { %2551 = vrot.lane.b32.xlu1 %v11304_v29, %s9704_s24  ;;  %v2323_v58 = vor.u32 %v2322_v46, %v2321_v11  ;;  %v2327_v36 = vor.u32 %v2326_v20, %v2325_v22  ;;  %v2332_v53 = vrot.slane %v15503_v45, 5  ;;  %v2333_v60 = vrot.slane %v15907_v34, 6  ;;  %v15910_v62 = vld [vmem:[#allocation50_spill] sm:$0xff]  ;;  %v15912_v45 = vld [vmem:[#allocation49_spill] sm:$0xff] }
 0x164   : > { %15906 = vst [vmem:[#allocation126_spill] sm:$0xff] %v11329_v5  ;;  %2553 = vrot.lane.b32.xlu0 %v11329_v5, %s9704_s24  ;;  %v2320_v32 = vsel %vm11266_vm11, %v2314_v59, %v2319_v57  ;;  %v2336_v50 = vrot.slane %v15908_v42, 5  ;;  %v2337_v10 = vrot.slane %v15909_v2, 6  ;;  %v2340_v27 = vrot.slane %v15910_v62, 5  ;;  %v15913_v5 = vld [vmem:[#allocation51_spill] sm:$0xff]  ;;  %v15918_v2 = vld [vmem:[#allocation42_spill] sm:$0xff] }
 0x165   : > { %v11345_v51 = vcombine.low %v2313_v56, %v2320_v32  ;;  %v2324_v20 = vrot.slane %v2323_v58, 4  ;;  %v2329_v11 = vrot.slane %v2327_v36, 4  ;;  %v2334_v46 = vor.u32 %v2333_v60, %v2332_v53  ;;  %v15914_v57 = vld [vmem:[#allocation39_spill] sm:$0xff]  ;;  %v15915_v32 = vld [vmem:[#allocation41_spill] sm:$0xff] }
 0x166   : > { %v2338_v22 = vor.u32 %v2337_v10, %v2336_v50  ;;  %v2341_v29 = vrot.slane %v15912_v45, 6  ;;  %v2345_v34 = vshrl.u32 %v9446_v28, 16  ;;  %v2348_v49 = vrot.slane %v15913_v5, 6  ;;  %v15917_v5 = vld [vmem:[#allocation43_spill] sm:$0xff] }
 0x167   : > { %15911 = vst [vmem:[#allocation127_spill] sm:$0xff] %v11345_v51  ;;  %2555 = vrot.lane.b32.xlu1 %v11345_v51, %s9704_s24  ;;  %v2328_v59 = vsel %vm11266_vm11, %v2324_v20, %v2327_v36  ;;  %v2335_v56 = vsel %vm11266_vm11, %v2329_v11, %v2334_v46  ;;  %v2351_v58 = vrot.slane %v15914_v57, 5  ;;  %v2352_v60 = vrot.slane %v15915_v32, 6  ;;  %v15923_v32 = vld [vmem:[#allocation60_spill] sm:$0xff] }
 0x168   : > { %v11357_v53 = vcombine.low %v2328_v59, %v2335_v56  ;;  %v2339_v50 = vrot.slane %v2338_v22, 4  ;;  %v2342_v10 = vor.u32 %v2341_v29, %v2340_v27  ;;  %v2347_v28 = vrot.slane %v2345_v34, 5  ;;  %v9447_v22 = vld [vmem:[#allocation2 + $0x50] sm:$0x7] }
 0x169   : > { %v2353_v45 = vor.u32 %v2352_v60, %v2351_v58  ;;  %v2355_v62 = vrot.slane %v15917_v5, 5  ;;  %v2356_v42 = vrot.slane %v15918_v2, 6  ;;  %v11363_v36 = vcombine.low %v15919_v16, %v10960_v43  ;;  %v15920_v56 = vld [vmem:[#allocation44_spill] sm:$0xff]  ;;  %v15921_v60 = vld [vmem:[#allocation59_spill] sm:$0xff] }
 0x16a   : > { %15916 = vst [vmem:[#allocation128_spill] sm:$0xff] %v11357_v53  ;;  %2557 = vrot.lane.b32.xlu0 %v11357_v53, %s9704_s24  ;;  %v2343_v20 = vsel %vm11266_vm11, %v2339_v50, %v2342_v10  ;;  %v2344_v11 = vrot.slane %v2342_v10, 4  ;;  %v2349_v46 = vor.u32 %v2348_v49, %v2347_v28  ;;  %v2360_v27 = vshrl.u32 %v9447_v22, 16  ;;  %v15926_v28 = vld [vmem:[#allocation61_spill] sm:$0xff] }
 0x16b   : > { %v2354_v29 = vrot.slane %v2353_v45, 4  ;;  %v2357_v59 = vor.u32 %v2356_v42, %v2355_v62  ;;  %v2363_v58 = vrot.slane %v15920_v56, 6  ;;  %v2366_v2 = vrot.slane %v15921_v60, 5  ;;  %v15925_v45 = vld [vmem:[#allocation63_spill] sm:$0xff]  ;;  %v9448_v60 = vld [vmem:[#allocation2 + $0x5c] sm:$0x7] }
 0x16c   : > { %v2350_v43 = vsel %vm11266_vm11, %v2344_v11, %v2349_v46  ;;  %v11373_v16 = vrot.slane %v2345_v34, 6  ;;  %v2362_v5 = vrot.slane %v2360_v27, 5  ;;  %v2367_v57 = vrot.slane %v15923_v32, 6  ;;  %v15927_v34 = vld [vmem:[#allocation64_spill] sm:$0xff] }
 0x16d   : > { %v11376_v47 = vcombine.low %v2343_v20, %v2350_v43  ;;  %v2358_v49 = vsel %vm11266_vm11, %v2354_v29, %v2357_v59  ;;  %v2359_v50 = vrot.slane %v2357_v59, 4  ;;  %v2370_v42 = vrot.slane %v15925_v45, 5  ;;  %v15928_v46 = vld [vmem:[#allocation52_spill] sm:$0xff]  ;;  %v15929_v43 = vld [vmem:[#allocation53_spill] sm:$0xff] }
 0x16e   : > { %15922 = vst [vmem:[#allocation93_spill] sm:$0xff] %v11373_v16  ;;  %v2364_v62 = vor.u32 %v2363_v58, %v2362_v5  ;;  %v2368_v10 = vor.u32 %v2367_v57, %v2366_v2  ;;  %v2371_v22 = vrot.slane %v15926_v28, 6  ;;  %v2375_v56 = vshrl.u32 %v9448_v60, 16  ;;  %v15930_v16 = vld [vmem:[#allocation57_spill] sm:$0xff]  ;;  %v15933_v45 = vld [vmem:[#allocation56_spill] sm:$0xff] }
 0x16f   : > { %15924 = vst [vmem:[#allocation129_spill] sm:$0xff] %v11376_v47  ;;  %2559 = vrot.lane.b32.xlu1 %v11376_v47, %s9704_s24  ;;  %v2378_v11 = vrot.slane %v15927_v34, 6  ;;  %v2381_v20 = vrot.slane %v15928_v46, 5  ;;  %v2382_v32 = vrot.slane %v15929_v43, 6  ;;  %v2385_v29 = vrot.slane %v15930_v16, 5  ;;  %v9279_v34 = vld [vmem:[#allocation7 + $0x40] sm:$0xff]  }
 0x170   : > { %v2365_v59 = vsel %vm11266_vm11, %v2359_v50, %v2364_v62  ;;  %v2369_v5 = vrot.slane %v2368_v10, 4  ;;  %v2372_v2 = vor.u32 %v2371_v22, %v2370_v42  ;;  %v2377_v57 = vrot.slane %v2375_v56, 5  ;;  %v15935_v42 = vld [vmem:[#allocation58_spill] sm:$0xff]  ;;  %9172 = vmatprep.subr.bf16.mxu1 %v9279_v34  ;;  %8446 = vmatprep.subr.bf16.mxu0 %v9279_v34  ;;  %v15941_v10 = vld [vmem:[#allocation75_spill] sm:$0xff] }
 0x171   : > { %v11390_v58 = vcombine.low %v2358_v49, %v2365_v59  ;;  %v11392_v60 = vrot.slane %v2360_v27, 6  ;;  %v2383_v28 = vor.u32 %v2382_v32, %v2381_v20  ;;  %v2386_v39 = vrot.slane %v15933_v45, 6  ;;  %v11403_v62 = vld [vmem:[#allocation2 + $0x98] sm:$0x7]  ;;  %v15937_v59 = vld [vmem:[#allocation80_spill] sm:$0xff]  ;;  %9180 = vmatpush3.bf16.msra.mxu1 %v9280_v13  ;;  %8447 = vmatpush3.bf16.msra.mxu0 %v9280_v13 }
 0x172   : > { %v2373_v43 = vsel %vm11266_vm11, %v2369_v5, %v2372_v2  ;;  %v2374_v46 = vrot.slane %v2372_v2, 4  ;;  %v2379_v16 = vor.u32 %v2378_v11, %v2377_v57  ;;  %v15510_v50 = vshrl.u32 %v11397_v12, 16  ;;  %v11413_v2 = vpop.permute.xlu0 %2201  ;;  %v15940_v57 = vld [vmem:[#allocation81_spill] sm:$0xff]  ;;  %v15942_v45 = vld [vmem:[#allocation74_spill] sm:$0xff]  ;;  %v15964_v12 = vld [vmem:[#allocation48_spill] sm:$0xff] }
 0x173   : > { %15931 = vst [vmem:[#allocation130_spill] sm:$0xff] %v11390_v58  ;;  %15932 = vst [vmem:[#allocation131_spill] sm:$0xff] %v11392_v60  ;;  %2561 = vrot.lane.b32.xlu0 %v11390_v58, %s9704_s24  ;;  %v2384_v49 = vrot.slane %v2383_v28, 4  ;;  %v2387_v27 = vor.u32 %v2386_v39, %v2385_v29  ;;  %v2393_v32 = vrot.slane %v15935_v42, 6  ;;  %v11408_v11 = vrot.slane %v2375_v56, 6  ;;  %v11422_v56 = vld [vmem:[#allocation7 + $0x48] sm:$0xff]  }
 0x174   : > { %v2380_v22 = vsel %vm11266_vm11, %v2374_v46, %v2379_v16  ;;  %v2392_v20 = vrot.slane %v15510_v50, 5  ;;  %v2968_v5 = vrot.slane %v15937_v59, 6  ;;  %15938 = vst [vmem:[#allocation80_spill] sm:$0xff] %v11413_v2  ;;  %v2969_v16 = vrot.slane %v15940_v57, 7  ;;  %v11424_v46 = vld [vmem:[#allocation7 + $0x8] sm:$0xff]   ;;  %9173 = vmatprep.subr.bf16.mxu1 %v11422_v56  ;;  %v15956_v60 = vld [vmem:[#allocation103_spill] sm:$0xff]  ;;  %8448 = vmatprep.subr.bf16.mxu0 %v11422_v56 }
 0x175   : > { %15936 = vst [vmem:[#allocation133_spill] sm:$0xff] %v11408_v11  ;;  %v11415_v39 = vcombine.low %v2373_v43, %v2380_v22  ;;  %v11419_v28 = vsel %vm11266_vm11, %v2384_v49, %v2387_v27  ;;  %v2389_v29 = vrot.slane %v2387_v27, 4  ;;  %v2972_v42 = vrot.slane %v15941_v10, 6  ;;  %v15944_v27 = vld [vmem:[#allocation85_spill] sm:$0xff]  ;;  %v15953_v22 = vld [vmem:[#allocation94_spill] sm:$0xff]  ;;  %9181 = vmatpush3.bf16.msra.mxu1 %v11424_v46  ;;  %8449 = vmatpush3.bf16.msra.mxu0 %v11424_v46 }
 0x176   : > { %v2394_v50 = vor.u32 %v2393_v32, %v2392_v20  ;;  %v2973_v11 = vrot.slane %v15942_v45, 7  ;;  %v15943_v34 = vshrl.u32 %v11403_v62, 16  ;;  %v11434_v49 = vor.u32 %v2969_v16, %v2968_v5  ;;  %v11444_v20 = vld [vmem:[#allocation2 + $0x90] sm:$0xf]  ;;  %v15945_v5 = vld [vmem:[#allocation47_spill] sm:$0xff] }
 0x177   : > { %15939 = vst [vmem:[#allocation134_spill] sm:$0xff] %v11415_v39  ;;  %2563 = vrot.lane.b32.xlu1 %v11415_v39, %s9704_s24  ;;  %vm15665_vm10 = vcmask 261120   ;;  %vm3132_vm8 = vcmask 1040384   ;;  %vm3133_vm7 = vcmask 1044484   ;;  %v15946_v16 = vld [vmem:[#allocation40_spill] sm:$0xff]  ;;  %v15958_v2 = vld [vmem:[#allocation105_spill] sm:$0xff] }
 0x178   : > { %v11430_v43 = vrot.slane %v15943_v34, 6  ;;  %v11440_v13 = vsel %vm11266_vm11, %v2389_v29, %v2394_v50  ;;  %v11442_v32 = vor.u32 %v2973_v11, %v2972_v42  ;;  %3471 = vst.msk [vmem:[#allocation3 + $0x10] sm:$0xff] %vm15665_vm10, %v11189_v6  ;;  %3472 = vst.msk [vmem:[#allocation3 + $0x78] sm:$0xff] %vm15665_vm10, %v11216_v1  ;;  %v15947_v50 = vld [vmem:[#allocation62_spill] sm:$0xff]  ;;  %v15948_v42 = vld [vmem:[#allocation55_spill] sm:$0xff]  ;;  %vm2615_vm3 = vcmask 1045508  }
 0x179   : > { %3473 = vst.msk [vmem:[#allocation3 + $0xe0] sm:$0xff] %vm15665_vm10, %v15945_v5  ;;  %3474 = vst.msk [vmem:[#allocation3 + $0x148] sm:$0xff] %vm15665_vm10, %v15946_v16  ;;  %v15949_v11 = vld [vmem:[#allocation66_spill] sm:$0xff]  ;;  %v15950_v29 = vld [vmem:[#allocation65_spill] sm:$0xff] }
 0x17a   : > { %3475 = vst.msk [vmem:[#allocation3 + $0x1b0] sm:$0xff] %vm15665_vm10, %v15947_v50  ;;  %3476 = vst.msk [vmem:[#allocation3 + $0x218] sm:$0xff] %vm15665_vm10, %v15948_v42  ;;  %v15951_v6 = vld [vmem:[#allocation84_spill] sm:$0xff]  ;;  %v15952_v34 = vld [vmem:[#allocation78_spill] sm:$0xff] }
 0x17b   : > { %3477 = vst.msk [vmem:[#allocation3 + $0x280] sm:$0xff] %vm15665_vm10, %v15949_v11  ;;  %3478 = vst.msk [vmem:[#allocation3 + $0x2e8] sm:$0xff] %vm15665_vm10, %v15950_v29  ;;  %v15954_v16 = vld [vmem:[#allocation86_spill] sm:$0xff]  ;;  %v15955_v5 = vld [vmem:[#allocation108_spill] sm:$0xff] }
 0x17c   : > { %3479 = vst.msk [vmem:[#allocation3 + $0x350] sm:$0xff] %vm15665_vm10, %v15951_v6  ;;  %3480 = vst.msk [vmem:[#allocation3 + $0x3b8] sm:$0xff] %vm15665_vm10, %v15952_v34  ;;  %v15957_v1 = vld [vmem:[#allocation114_spill] sm:$0xff] }
 0x17d   : > { %3481 = vst.msk [vmem:[#allocation3 + $0x420] sm:$0xff] %vm15665_vm10, %v15953_v22  ;;  %3482 = vst.msk [vmem:[#allocation3 + $0x488] sm:$0xff] %vm15665_vm10, %v15954_v16 }
 0x17e   : > { %3483 = vst.msk [vmem:[#allocation3 + $0x4f0] sm:$0xff] %vm15665_vm10, %v15955_v5  ;;  %3484 = vst.msk [vmem:[#allocation3 + $0x558] sm:$0xff] %vm15665_vm10, %v15956_v60 }
 0x17f   : > { %3485 = vst.msk [vmem:[#allocation3 + $0x5c0] sm:$0xff] %vm15665_vm10, %v15957_v1  ;;  %4027 = vst.msk [vmem:[#allocation3 + $0x20] sm:$0xff] %vm15665_vm10, %v15958_v2 }
 0x180   : > { %4028 = vst.msk [vmem:[#allocation3 + $0x88] sm:$0xff] %vm15665_vm10, %v15959_v26  ;;  %4029 = vst.msk [vmem:[#allocation3 + $0xf0] sm:$0xff] %vm15665_vm10, %v15960_v37  ;;  %v263_v37 = vld [vmem:[%s9927_s8 + $0x6c] sm:$0xf] }
 0x181   : > { %4030 = vst.msk [vmem:[#allocation3 + $0x158] sm:$0xff] %vm15665_vm10, %v15961_v18  ;;  %4031 = vst.msk [vmem:[#allocation3 + $0x1c0] sm:$0xff] %vm15665_vm10, %v15962_v33 }
 0x182   : > { %4032 = vst.msk [vmem:[#allocation3 + $0x228] sm:$0xff] %vm15665_vm10, %v15963_v8  ;;  %4033 = vst.msk [vmem:[#allocation3 + $0x290] sm:$0xff] %vm15665_vm10, %v15964_v12 }
 0x183   : > { %4034 = vst.msk [vmem:[#allocation3 + $0x2f8] sm:$0xff] %vm15665_vm10, %v11133_v55  ;;  %4035 = vst.msk [vmem:[#allocation3 + $0x360] sm:$0xff] %vm15665_vm10, %v11211_v63 }
 0x184   : > { %4036 = vst.msk [vmem:[#allocation3 + $0x3c8] sm:$0xff] %vm15665_vm10, %v11218_v61  ;;  %4037 = vst.msk [vmem:[#allocation3 + $0x430] sm:$0xff] %vm15665_vm10, %v11235_v41 }
 0x185   : > { %4038 = vst.msk [vmem:[#allocation3 + $0x498] sm:$0xff] %vm15665_vm10, %v11241_v15  ;;  %4039 = vst.msk [vmem:[#allocation3 + $0x500] sm:$0xff] %vm15665_vm10, %v11259_v38 }
 0x186   : > { %4040 = vst.msk [vmem:[#allocation3 + $0x568] sm:$0xff] %vm15665_vm10, %v11270_v17  ;;  %4590 = vst.msk [vmem:[#allocation3 + $0x30] sm:$0xff] %vm15665_vm10, %v11345_v51 }
 0x187   : > { %4591 = vst.msk [vmem:[#allocation3 + $0x98] sm:$0xff] %vm15665_vm10, %v11357_v53  ;;  %4592 = vst.msk [vmem:[#allocation3 + $0x100] sm:$0xff] %vm15665_vm10, %v11376_v47 }
 0x188   : > { %4593 = vst.msk [vmem:[#allocation3 + $0x168] sm:$0xff] %vm15665_vm10, %v11390_v58  ;;  %4594 = vst.msk [vmem:[#allocation3 + $0x1d0] sm:$0xff] %vm15665_vm10, %v11415_v39  ;;  %v11610_v39 = vpop.permute.xlu1 %2199 }
 0x189   : > { %5175 = vst.msk [vmem:[#allocation3 + $0x48] sm:$0xff] %vm15665_vm10, %v15947_v50  ;;  %5176 = vst.msk [vmem:[#allocation3 + $0xb0] sm:$0xff] %vm15665_vm10, %v15948_v42  ;;  %v262_v50 = vld [vmem:[%s9927_s8 + $0x68] sm:$0xf] }
 0x18a   : > { %5177 = vst.msk [vmem:[#allocation3 + $0x118] sm:$0xff] %vm15665_vm10, %v15949_v11  ;;  %5178 = vst.msk [vmem:[#allocation3 + $0x180] sm:$0xff] %vm15665_vm10, %v15950_v29  ;;  %v9286_v11 = vld [vmem:[#allocation7 + $0x18] sm:$0xff]  }
 0x18b   : > { %5179 = vst.msk [vmem:[#allocation3 + $0x1e8] sm:$0xff] %vm15665_vm10, %v15951_v6  ;;  %5180 = vst.msk [vmem:[#allocation3 + $0x250] sm:$0xff] %vm15665_vm10, %v15952_v34  ;;  %v11596_v34 = vpop.permute.xlu0 %2205  ;;  %v15974_v6 = vrot.slane %v11444_v20, 11  ;;  %v15975_v20 = vshrl.u32 %v11403_v62, 16 }
 0x18c   : > { %5181 = vst.msk [vmem:[#allocation3 + $0x2b8] sm:$0xff] %vm15665_vm10, %v15953_v22  ;;  %5182 = vst.msk [vmem:[#allocation3 + $0x320] sm:$0xff] %vm15665_vm10, %v15954_v16  ;;  %v11581_v16 = vld [vmem:[#allocation2 + $0x94] sm:$0xf]  ;;  %v9284_v22 = vld [vmem:[#allocation7 + $0x10] sm:$0xff]  }
 0x18d   : > { %5183 = vst.msk [vmem:[#allocation3 + $0x388] sm:$0xff] %vm15665_vm10, %v15955_v5  ;;  %5184 = vst.msk [vmem:[#allocation3 + $0x3f0] sm:$0xff] %vm15665_vm10, %v15956_v60  ;;  %v15966_v60 = vld [vmem:[#allocation100_spill] sm:$0xff]  ;;  %v3221_v56 = vrot.slane %v11581_v16, 7 }
 0x18e   : > { %5185 = vst.msk [vmem:[#allocation3 + $0x458] sm:$0xff] %vm15665_vm10, %v15957_v1  ;;  %5491 = vst.msk [vmem:[#allocation3 + $0x58] sm:$0xff] %vm15665_vm10, %v15962_v33  ;;  %v15965_v1 = vld [vmem:[#allocation92_spill] sm:$0xff] }
 0x18f   : > { %5492 = vst.msk [vmem:[#allocation3 + $0xc0] sm:$0xff] %vm15665_vm10, %v15963_v8  ;;  %5493 = vst.msk [vmem:[#allocation3 + $0x128] sm:$0xff] %vm15665_vm10, %v15964_v12  ;;  %v3223_v29 = vrot.slane %v3221_v56, 4  ;;  %v15984_v33 = vld [vmem:[#allocation104_spill] sm:$0xff] }
 0x190   : > { %5494 = vst.msk [vmem:[#allocation3 + $0x190] sm:$0xff] %vm15665_vm10, %v11133_v55  ;;  %5495 = vst.msk [vmem:[#allocation3 + $0x1f8] sm:$0xff] %vm15665_vm10, %v11211_v63  ;;  %v2441_v63 = vrot.slane %v15937_v59, 5  ;;  %v2442_v59 = vrot.slane %v15940_v57, 6  ;;  %v2991_v47 = vrot.slane %v15984_v33, 7 }
 0x191   : > { %5496 = vst.msk [vmem:[#allocation3 + $0x260] sm:$0xff] %vm15665_vm10, %v11218_v61  ;;  %5497 = vst.msk [vmem:[#allocation3 + $0x2c8] sm:$0xff] %vm15665_vm10, %v11235_v41  ;;  %v15969_v41 = vmov 0  ;;  %v9283_v61 = vld [vmem:[#allocation7 + $0x50] sm:$0xff]  }
 0x192   : > { %5498 = vst.msk [vmem:[#allocation3 + $0x330] sm:$0xff] %vm15665_vm10, %v11241_v15  ;;  %5499 = vst.msk [vmem:[#allocation3 + $0x398] sm:$0xff] %vm15665_vm10, %v11259_v38  ;;  %v11569_v38 = vcombine.low %v11419_v28, %v11440_v13  ;;  %v15968_v15 = vrot.slane %v15944_v27, 7  ;;  %v2976_v28 = vrot.slane %v11442_v32, 4  ;;  %v11587_v13 = vld [vmem:[#allocation2 + $0xa0] sm:$0xf]  ;;  %9174 = vmatprep.subr.bf16.mxu1 %v9283_v61  ;;  %8450 = vmatprep.subr.bf16.mxu0 %v9283_v61 }
 0x193   : > { %5500 = vst.msk [vmem:[#allocation3 + $0x400] sm:$0xff] %vm15665_vm10, %v11270_v17  ;;  %1499 = vst.msk [vmem:[#allocation3 + $0x68] sm:$0xff] %vm15665_vm10, %v15965_v1  ;;  %v2971_v17 = vrot.slane %v11434_v49, 4  ;;  %v3224_v49 = vrot.slane %v11403_v62, 7  ;;  %9182 = vmatpush3.bf16.msra.mxu1 %v9284_v22  ;;  %8451 = vmatpush3.bf16.msra.mxu0 %v9284_v22  ;;  %v2813_v62 = vrot.slane %v11053_v30, 7  ;;  %v15978_v61 = vshrl.u32 %v10883_v31, 16 }
 0x194   : > { %1512 = vst.msk [vmem:[#allocation3 + $0x5b0] sm:$0xff] %vm15665_vm10, %v15966_v60  ;;  %4853 = vst.msk [vmem:[#allocation3 + $0x448] sm:$0xff] %vm15665_vm10, %v15966_v60  ;;  %v2979_v5 = vor.u32 %v15968_v15, %v11430_v43  ;;  %v11589_v15 = vld [vmem:[#allocation2 + $0x9c] sm:$0xf]  ;;  %2565 = vrot.lane.b32.xlu0 %v11569_v38, %s9704_s24  ;;  %v2822_v22 = vrot.slane %v11098_v48, 7  ;;  %v9287_v31 = vld [vmem:[#allocation7 + $0x60] sm:$0xff]  }
 0x195   : > { %1500 = vst.msk [vmem:[#allocation3 + $0xd0] sm:$0xff] %vm15665_vm10, %v11363_v36  ;;  %15967 = vst [vmem:[#allocation81_spill] sm:$0xff] %v11569_v38  ;;  %v11593_v43 = vcombine.low %v11589_v15, %v11587_v13  ;;  %v2975_v55 = vsel %vm9973_vm9, %v2971_v17, %v11442_v32  ;;  %v2445_v17 = vrot.slane %v15941_v10, 5  ;;  %v2446_v32 = vrot.slane %v15942_v45, 6 }
 0x196   : > { %vm11577_vm6 = vmor %vm3132_vm8, %vm3133_vm7  ;;  %4595 = vst.msk [vmem:[#allocation3 + $0x238] sm:$0xff] %vm15665_vm10, %v11569_v38  ;;  %v2980_v8 = vsel %vm9973_vm9, %v2976_v28, %v2979_v5  ;;  %v2453_v28 = vrot.slane %v15944_v27, 6  ;;  %v9285_v38 = vld [vmem:[#allocation7 + $0x58] sm:$0xff]   ;;  %v2812_v45 = vrot.slane %v11045_v52, 6  ;;  %v2821_v27 = vrot.slane %v15978_v61, 6 }
 0x197   : > { %v15970_v41 = vsel %vm11577_vm6, 4294967295, %v15969_v41  ;;  %15972 = vst [vmem:[#allocation74_spill] sm:$0xff] %v11593_v43  ;;  %v3222_v12 = vsel %vm11577_vm6, %v15974_v6, %v3221_v56  ;;  %1511 = vst.msk [vmem:[#allocation3 + $0x548] sm:$0xff] %vm15665_vm10, %v11593_v43  ;;  %v2452_v6 = vrot.slane %v15975_v20, 5  ;;  %v11622_v57 = vcombine.low %v2975_v55, %v2980_v8  ;;  %9175 = vmatprep.subr.bf16.mxu1 %v9285_v38  ;;  %v11658_v20 = vpop.permute.xlu1 %2203  ;;  %v15981_v61 = vld [vmem:[#allocation102_spill] sm:$0xff] }
 0x198   : > { %15971 = vst [vmem:[#allocation75_spill] sm:$0xff] %v15970_v41  ;;  %4852 = vst.msk [vmem:[#allocation3 + $0x3e0] sm:$0xff] %vm15665_vm10, %v11593_v43  ;;  %v3225_v5 = vsel %vm11577_vm6, %v3223_v29, %v3224_v49  ;;  %v2443_v56 = vor.u32 %v2442_v59, %v2441_v63  ;;  %v2447_v10 = vor.u32 %v2446_v32, %v2445_v17  ;;  %v2816_v63 = vrot.slane %v11093_v54, 6  ;;  %v11648_v54 = vpop.permute.xlu0 %2209  ;;  %v11652_v49 = vld [vmem:[#allocation2] sm:$0xf] }
 0x199   : > { %15976 = vst [vmem:[#allocation85_spill] sm:$0xff] %v11622_v57  ;;  %v11627_v58 = vcombine.low %v3222_v12, %v3225_v5  ;;  %3092 = vrot.lane.b32.xlu1 %v11622_v57, %s9703_s22  ;;  %3761 = vst.msk [vmem:[#allocation3 + $0x490] sm:$0xff] %vm15665_vm10, %v11622_v57  ;;  %v2454_v55 = vor.u32 %v2453_v28, %v2452_v6  ;;  %v2817_v12 = vrot.slane %v11079_v24, 7  ;;  %9183 = vmatpush3.bf16.msra.mxu1 %v9286_v11  ;;  %v11655_v17 = vld [vmem:[#allocation2 + $0x4] sm:$0xf]  ;;  %v9288_v6 = vld [vmem:[#allocation7 + $0x20] sm:$0xff]  }
 0x19a   : > { %5341 = vst.msk [vmem:[#allocation3 + $0x328] sm:$0xff] %vm15665_vm10, %v11622_v57  ;;  %v2444_v8 = vrot.slane %v2443_v56, 4  ;;  %v2449_v52 = vrot.slane %v2447_v10, 4  ;;  %v2814_v30 = vor.u32 %v2813_v62, %v2812_v45  ;;  %v8232_v59 = vrot.slane %v11652_v49, 11  ;;  %8452 = vmatprep.subr.bf16.mxu0 %v9285_v38  ;;  %v9457_v28 = vld [vmem:[#allocation2 + $0x8] sm:$0x7]  ;;  %9176 = vmatprep.subr.bf16.mxu1 %v9287_v31 }
 0x19b   : > { %15977 = vst [vmem:[#allocation105_spill] sm:$0xff] %v11627_v58  ;;  %5655 = vst.msk [vmem:[#allocation3 + $0x2d0] sm:$0xff] %vm15665_vm10, %v11627_v58  ;;  %3319 = vrot.lane.b32.xlu0 %v11627_v58, %s9702_s20  ;;  %v2818_v29 = vor.u32 %v2817_v12, %v2816_v63  ;;  %v3137_v32 = vrot.slane %v11655_v17, 7  ;;  %v2823_v56 = vor.u32 %v2822_v22, %v2821_v27  ;;  %8453 = vmatpush3.bf16.msra.mxu0 %v9286_v11  ;;  %vm15673_vm7 = vcmask 523520  }
 0x19c   : > { %4315 = vst.msk [vmem:[#allocation3 + $0x438] sm:$0xff] %vm15665_vm10, %v11627_v58  ;;  %v2448_v24 = vsel %vm11266_vm11, %v2444_v8, %v2447_v10  ;;  %v2455_v48 = vsel %vm11266_vm11, %v2449_v52, %v2454_v55  ;;  %v2815_v5 = vrot.slane %v2814_v30, 4  ;;  %v3140_v10 = vrot.slane %v9457_v28, 7  ;;  %v9458_v55 = vld [vmem:[#allocation2 + $0xa4] sm:$0x7]  ;;  %v15980_v52 = vld [vmem:[#allocation101_spill] sm:$0xff]  ;;  %8454 = vmatprep.subr.bf16.mxu0 %v9287_v31  ;;  %v11682_v58 = vpop.permute.xlu0 %1957 }
 0x19d   : > { %3388 = vrot.lane.b32.xlu1 %v11593_v43, %s9704_s24  ;;  %v11664_v45 = vcombine.low %v2448_v24, %v2455_v48  ;;  %v2820_v62 = vrot.slane %v2818_v29, 4  ;;  %v3138_v8 = vsel %vm11577_vm6, %v8232_v59, %v3137_v32  ;;  %v3139_v63 = vrot.slane %v3137_v32, 4  ;;  %9184 = vmatpush3.bf16.msra.mxu1 %v9288_v6  ;;  %v15982_v24 = vld [vmem:[#allocation98_spill] sm:$0xff]  ;;  %v15983_v59 = vld [vmem:[#allocation97_spill] sm:$0xff] }
 0x19e   : > { %v2819_v38 = vsel %vm9973_vm9, %v2815_v5, %v2818_v29  ;;  %v2465_v12 = vshrl.u32 %v9458_v55, 16  ;;  %v2981_v30 = vrot.slane %v15980_v52, 6  ;;  %v2982_v11 = vrot.slane %v15981_v61, 7  ;;  %v9289_v48 = vld [vmem:[#allocation7 + $0x68] sm:$0xff]  }
 0x19f   : > { %15979 = vst [vmem:[#allocation92_spill] sm:$0xff] %v11664_v45  ;;  %2573 = vrot.lane.b32.xlu0 %v11664_v45, %s9704_s24  ;;  %4599 = vst.msk [vmem:[#allocation3 + $0x3d8] sm:$0xff] %vm15665_vm10, %v11664_v45  ;;  %v2824_v27 = vsel %vm9973_vm9, %v2820_v62, %v2823_v56  ;;  %v3141_v22 = vsel %vm11577_vm6, %v3139_v63, %v3140_v10  ;;  %v2985_v29 = vrot.slane %v15982_v24, 6  ;;  %v2986_v32 = vrot.slane %v15983_v59, 7  ;;  %v9290_v5 = vld [vmem:[#allocation7 + $0x28] sm:$0xff]   ;;  %v11687_v62 = vpop.permute.xlu1 %2207 }
 0x1a0   : > { %v8216_v28 = vcombine.low %v2819_v38, %v2824_v27  ;;  %v8248_v31 = vcombine.low %v3138_v8, %v3141_v22  ;;  %v2983_v57 = vor.u32 %v2982_v11, %v2981_v30  ;;  %v2990_v43 = vrot.slane %v2465_v12, 6  ;;  %8455 = vmatpush3.bf16.msra.mxu0 %v9288_v6  ;;  %9177 = vmatprep.subr.bf16.mxu1 %v9289_v48  ;;  %v9291_v27 = vld [vmem:[#allocation7 + $0x70] sm:$0xff]  }
 0x1a1   : > { %v2987_v45 = vor.u32 %v2986_v32, %v2985_v29  ;;  %v8245_v56 = vrot.slane %v11589_v15, 11  ;;  %v3228_v10 = vrot.slane %v11587_v13, 7  ;;  %8456 = vmatprep.subr.bf16.mxu0 %v9289_v48  ;;  %v3231_v8 = vrot.slane %v9458_v55, 7  ;;  %9185 = vmatpush3.bf16.msra.mxu1 %v9290_v5  ;;  %v9292_v22 = vld [vmem:[#allocation7 + $0x30] sm:$0xff]  }
 0x1a2   : > { %3068 = vrot.lane.b32.xlu1 %v8216_v28, %s9703_s22  ;;  %v2984_v63 = vrot.slane %v2983_v57, 4  ;;  %v2456_v38 = vrot.slane %v15980_v52, 5  ;;  %v2457_v30 = vrot.slane %v15981_v61, 6  ;;  %v2992_v11 = vor.u32 %v2991_v47, %v2990_v43  ;;  %9178 = vmatprep.subr.bf16.mxu1 %v9291_v27 }
 0x1a3   : > { %3295 = vrot.lane.b32.xlu0 %v8248_v31, %s9702_s20  ;;  %v2989_v6 = vrot.slane %v2987_v45, 4  ;;  %v3229_v13 = vsel %vm11577_vm6, %v8245_v56, %v3228_v10  ;;  %v3230_v15 = vrot.slane %v3228_v10, 4  ;;  %v2460_v55 = vrot.slane %v15982_v24, 5  ;;  %v11715_v56 = vpop.permute.xlu1 %1955  ;;  %v9293_v10 = vld [vmem:[#allocation7 + $0x78] sm:$0xff]  }
 0x1a4   : > { %v2988_v29 = vsel %vm9973_vm9, %v2984_v63, %v2987_v45  ;;  %v2458_v57 = vor.u32 %v2457_v30, %v2456_v38  ;;  %v2461_v52 = vrot.slane %v15983_v59, 6  ;;  %8457 = vmatpush3.bf16.msra.mxu0 %v9290_v5  ;;  %v2467_v43 = vrot.slane %v2465_v12, 5  ;;  %v11710_v5 = vpop.permute.xlu0 %1961 }
 0x1a5   : > { %v2993_v61 = vsel %vm9973_vm9, %v2989_v6, %v2992_v11  ;;  %v3232_v47 = vsel %vm11577_vm6, %v3230_v15, %v3231_v8  ;;  %v2468_v32 = vrot.slane %v15984_v33, 6  ;;  %8458 = vmatprep.subr.bf16.mxu0 %v9291_v27  ;;  %9186 = vmatpush3.bf16.msra.mxu1 %v9292_v22  ;;  %v2825_v31 = vrot.slane %v11107_v21, 6  ;;  %v11733_v6 = vld [vmem:[#allocation2 + $0xc] sm:$0xf]  ;;  %v11743_v27 = vld [vmem:[#allocation2 + $0x14] sm:$0x7] }
 0x1a6   : > { %3364 = vrot.lane.b32.xlu1 %v15965_v1, %s9704_s24  ;;  %v11706_v45 = vcombine.low %v2988_v29, %v2993_v61  ;;  %v11708_v24 = vcombine.low %v3229_v13, %v3232_v47  ;;  %v2459_v59 = vrot.slane %v2458_v57, 4  ;;  %v2462_v48 = vor.u32 %v2461_v52, %v2460_v55  ;;  %v9294_v1 = vld [vmem:[#allocation7 + $0x38] sm:$0xff]   ;;  %v11736_v13 = vld [vmem:[#allocation2 + $0x10] sm:$0xf]  ;;  %9179 = vmatprep.subr.bf16.mxu1 %v9293_v10 }
 0x1a7   : > { %v2469_v28 = vor.u32 %v2468_v32, %v2467_v43  ;;  %v2826_v12 = vrot.slane %v11126_v9, 7  ;;  %v2829_v33 = vrot.slane %v11140_v40, 6  ;;  %v2830_v40 = vrot.slane %v11129_v25, 7  ;;  %v15989_v32 = vld [vmem:[#allocation95_spill] sm:$0xff] }
 0x1a8   : > { %15985 = vst [vmem:[#allocation17_spill] sm:$0xff] %v11706_v45  ;;  %15986 = vst [vmem:[#allocation101_spill] sm:$0xff] %v11708_v24  ;;  %3094 = vrot.lane.b32.xlu0 %v11706_v45, %s9703_s22  ;;  %v2463_v9 = vsel %vm11266_vm11, %v2459_v59, %v2462_v48  ;;  %v2464_v21 = vrot.slane %v2462_v48, 4  ;;  %v15987_v63 = vshrl.u32 %v11002_v7, 16  ;;  %8459 = vmatpush3.bf16.msra.mxu0 %v9292_v22  ;;  %v2835_v30 = vrot.slane %v11143_v0, 7  ;;  %v15990_v48 = vld [vmem:[#allocation96_spill] sm:$0xff] }
 0x1a9   : > { %3762 = vst.msk [vmem:[#allocation3 + $0x4f8] sm:$0xff] %vm15665_vm10, %v11706_v45  ;;  %5342 = vst.msk [vmem:[#allocation3 + $0x390] sm:$0xff] %vm15665_vm10, %v11706_v45  ;;  %v2827_v38 = vor.u32 %v2826_v12, %v2825_v31  ;;  %v8233_v11 = vrot.slane %v11733_v6, 11  ;;  %v3144_v15 = vrot.slane %v11736_v13, 7  ;;  %8460 = vmatprep.subr.bf16.mxu0 %v9293_v10  ;;  %v2831_v25 = vor.u32 %v2830_v40, %v2829_v33  ;;  %v9462_v22 = vld [vmem:[#allocation2 + $0xb0] sm:$0x7]  ;;  %v11754_v31 = vpop.permute.xlu0 %1965 }
 0x1aa   : > { %5656 = vst.msk [vmem:[#allocation3 + $0x338] sm:$0xff] %vm15665_vm10, %v11708_v24  ;;  %4316 = vst.msk [vmem:[#allocation3 + $0x4a0] sm:$0xff] %vm15665_vm10, %v11708_v24  ;;  %v2834_v8 = vrot.slane %v15987_v63, 6  ;;  %3321 = vrot.lane.b32.xlu1 %v11708_v24, %s9702_s20  ;;  %v2470_v7 = vsel %vm11266_vm11, %v2464_v21, %v2469_v28  ;;  %v3147_v0 = vrot.slane %v11743_v27, 7  ;;  %v2480_v29 = vshrl.u32 %v9462_v22, 16  ;;  %9187 = vmatpush3.bf16.msra.mxu1 %v9294_v1  ;;  %v15991_v33 = vld [vmem:[#allocation91_spill] sm:$0xff]  ;;  %v11762_v63 = vpop.permute.xlu1 %1959 }
 0x1ab   : > { %v11746_v57 = vcombine.low %v2463_v9, %v2470_v7  ;;  %v2828_v55 = vrot.slane %v2827_v38, 4  ;;  %v3145_v61 = vsel %vm11577_vm6, %v8233_v11, %v3144_v15  ;;  %v2833_v47 = vrot.slane %v2831_v25, 4  ;;  %v15992_v9 = vld [vmem:[#allocation90_spill] sm:$0xff] }
 0x1ac   : > { %v2836_v52 = vor.u32 %v2835_v30, %v2834_v8  ;;  %3390 = vrot.lane.b32.xlu0 %v15966_v60, %s9704_s24  ;;  %v3146_v43 = vrot.slane %v3144_v15, 4  ;;  %v2994_v59 = vrot.slane %v15989_v32, 6  ;;  %v2995_v28 = vrot.slane %v15990_v48, 7  ;;  %8461 = vmatpush3.bf16.msra.mxu0 %v9294_v1  ;;  %v15993_v30 = vld [vmem:[#allocation99_spill] sm:$0xff] }
 0x1ad   : > { %15988 = vst [vmem:[#allocation102_spill] sm:$0xff] %v11746_v57  ;;  %4600 = vst.msk [vmem:[#allocation3 + $0x440] sm:$0xff] %vm15665_vm10, %v11746_v57  ;;  %v2832_v12 = vsel %vm9973_vm9, %v2828_v55, %v2831_v25  ;;  %v2998_v10 = vrot.slane %v15991_v33, 6  ;;  %v2999_v21 = vrot.slane %v15992_v9, 7  ;;  %v3003_v40 = vrot.slane %v2480_v29, 6 }
 0x1ae   : > { %2575 = vrot.lane.b32.xlu1 %v11746_v57, %s9704_s24  ;;  %v2837_v8 = vsel %vm9973_vm9, %v2833_v47, %v2836_v52  ;;  %v3148_v1 = vsel %vm11577_vm6, %v3146_v43, %v3147_v0  ;;  %v2996_v38 = vor.u32 %v2995_v28, %v2994_v59  ;;  %v3004_v11 = vrot.slane %v15993_v30, 7  ;;  %v11773_v55 = vld [vmem:[#allocation2 + $0xa8] sm:$0xf]  ;;  %v11776_v57 = vld [vmem:[#allocation2 + $0xac] sm:$0xf] }
 0x1af   : > { %v8217_v15 = vcombine.low %v2832_v12, %v2837_v8  ;;  %v11771_v7 = vcombine.low %v3145_v61, %v3148_v1  ;;  %v3000_v25 = vor.u32 %v2999_v21, %v2998_v10  ;;  %15994 = vst [vmem:[#allocation98_spill] sm:$0xff] %v11773_v55  ;;  %v8246_v45 = vrot.slane %v11773_v55, 11  ;;  %15995 = vst [vmem:[#allocation97_spill] sm:$0xff] %v11776_v57  ;;  %v11781_v43 = vld [vmem:[#allocation2 + $0xb8] sm:$0xf]  ;;  %v11798_v8 = vpop.permute.xlu0 %1969 }
 0x1b0   : > { %v2997_v60 = vrot.slane %v2996_v38, 4  ;;  %v3005_v24 = vor.u32 %v3004_v11, %v3003_v40  ;;  %v3235_v52 = vrot.slane %v11776_v57, 7  ;;  %v3238_v47 = vrot.slane %v9462_v22, 7  ;;  %v11783_v61 = vld [vmem:[#allocation2 + $0xb4] sm:$0xf]  ;;  %v11807_v38 = vpop.permute.xlu1 %1963 }
 0x1b1   : > { %3070 = vrot.lane.b32.xlu0 %v8217_v15, %s9703_s22  ;;  %3750 = vst.msk [vmem:[#allocation3 + $0x18] sm:$0xff] %vm15665_vm10, %v8217_v15  ;;  %v3002_v0 = vrot.slane %v3000_v25, 4  ;;  %v11787_v59 = vcombine.low %v11783_v61, %v11781_v43  ;;  %v2471_v28 = vrot.slane %v15989_v32, 5  ;;  %v2472_v12 = vrot.slane %v15990_v48, 6  ;;  %v12038_v57 = vld [vmem:[#allocation2 + $0x2c] sm:$0x7] }
 0x1b2   : > { %3297 = vrot.lane.b32.xlu1 %v11771_v7, %s9702_s20  ;;  %v3001_v22 = vsel %vm9973_vm9, %v2997_v60, %v3000_v25  ;;  %v3236_v10 = vsel %vm11577_vm6, %v8246_v45, %v3235_v52  ;;  %v3237_v21 = vrot.slane %v3235_v52, 4  ;;  %v2475_v40 = vrot.slane %v15991_v33, 5 }
 0x1b3   : > { %15996 = vst [vmem:[#allocation104_spill] sm:$0xff] %v11787_v59  ;;  %v3006_v1 = vsel %vm9973_vm9, %v3002_v0, %v3005_v24  ;;  %1513 = vst.msk [vmem:[#allocation3 + $0x618] sm:$0xff] %vm15665_vm10, %v11787_v59  ;;  %v2473_v32 = vor.u32 %v2472_v12, %v2471_v28  ;;  %v2476_v60 = vrot.slane %v15992_v9, 6  ;;  %v2482_v48 = vrot.slane %v2480_v29, 5 }
 0x1b4   : > { %4854 = vst.msk [vmem:[#allocation3 + $0x4b0] sm:$0xff] %vm15665_vm10, %v11787_v59  ;;  %v11809_v45 = vcombine.low %v3001_v22, %v3006_v1  ;;  %v3239_v33 = vsel %vm11577_vm6, %v3237_v21, %v3238_v47  ;;  %v2483_v11 = vrot.slane %v15993_v30, 6  ;;  %v2838_v24 = vrot.slane %v11151_v3, 6 }
 0x1b5   : > { %3366 = vrot.lane.b32.xlu0 %v11363_v36, %s9704_s24  ;;  %v11817_v15 = vcombine.low %v3236_v10, %v3239_v33  ;;  %v2474_v25 = vrot.slane %v2473_v32, 4  ;;  %v2477_v52 = vor.u32 %v2476_v60, %v2475_v40  ;;  %v2839_v29 = vrot.slane %v11158_v14, 7  ;;  %v11843_v40 = vld [vmem:[#allocation2 + $0x20] sm:$0x7]  ;;  %v11846_v32 = vpop.permute.xlu0 %1973  ;;  %v11852_v33 = vld [vmem:[#allocation2 + $0x28] sm:$0xf] }
 0x1b6   : > { %15997 = vst [vmem:[#allocation95_spill] sm:$0xff] %v11809_v45  ;;  %3096 = vrot.lane.b32.xlu1 %v11809_v45, %s9703_s22  ;;  %3763 = vst.msk [vmem:[#allocation3 + $0x560] sm:$0xff] %vm15665_vm10, %v11809_v45  ;;  %v2484_v9 = vor.u32 %v2483_v11, %v2482_v48  ;;  %v2842_v3 = vrot.slane %v11165_v44, 6  ;;  %v2843_v30 = vrot.slane %v11162_v4, 7  ;;  %v15999_v47 = vshrl.u32 %v10993_v35, 16 }
 0x1b7   : > { %15998 = vst [vmem:[#allocation96_spill] sm:$0xff] %v11817_v15  ;;  %5343 = vst.msk [vmem:[#allocation3 + $0x3f8] sm:$0xff] %vm15665_vm10, %v11809_v45  ;;  %v2478_v14 = vsel %vm11266_vm11, %v2474_v25, %v2477_v52  ;;  %v2479_v28 = vrot.slane %v2477_v52, 4  ;;  %v2840_v12 = vor.u32 %v2839_v29, %v2838_v24  ;;  %v2848_v22 = vrot.slane %v11173_v23, 7  ;;  %v11837_v44 = vld [vmem:[#allocation2 + $0x18] sm:$0xf]  ;;  %v11860_v25 = vpop.permute.xlu1 %1967 }
 0x1b8   : > { %v2847_v0 = vrot.slane %v15999_v47, 6  ;;  %5657 = vst.msk [vmem:[#allocation3 + $0x3a0] sm:$0xff] %vm15665_vm10, %v11817_v15  ;;  %4317 = vst.msk [vmem:[#allocation3 + $0x508] sm:$0xff] %vm15665_vm10, %v11817_v15  ;;  %v2844_v10 = vor.u32 %v2843_v30, %v2842_v3  ;;  %v8234_v4 = vrot.slane %v11837_v44, 11  ;;  %v11840_v35 = vld [vmem:[#allocation2 + $0x1c] sm:$0xf] }
 0x1b9   : > { %v3151_v21 = vrot.slane %v11840_v35, 7  ;;  %v3154_v1 = vrot.slane %v11843_v40, 7  ;;  %3323 = vrot.lane.b32.xlu0 %v11817_v15, %s9702_s20  ;;  %v2485_v23 = vsel %vm11266_vm11, %v2479_v28, %v2484_v9  ;;  %v2841_v60 = vrot.slane %v2840_v12, 4  ;;  %v11854_v11 = vld [vmem:[#allocation2 + $0x24] sm:$0xf]  ;;  %v16003_v28 = vld [vmem:[#allocation110_spill] sm:$0xff]  ;;  %v1978_v51 = vpop.permute.xlu0 %1977 }
 0x1ba   : > { %v2849_v48 = vor.u32 %v2848_v22, %v2847_v0  ;;  %v11858_v24 = vcombine.low %v11854_v11, %v11852_v33  ;;  %3392 = vrot.lane.b32.xlu1 %v11787_v59, %s9704_s24  ;;  %v11864_v52 = vcombine.low %v2478_v14, %v2485_v23  ;;  %v2846_v29 = vrot.slane %v2844_v10, 4  ;;  %v11872_v47 = vld [vmem:[#allocation2 + $0xbc] sm:$0x7]  ;;  %v16004_v14 = vld [vmem:[#allocation111_spill] sm:$0xff]  ;;  %2012 = vst.msk [vmem:[#allocation3 + $0x5b0] sm:$0xff] %vm15673_vm7, %v1978_v51 }
 0x1bb   : > { %v3152_v9 = vsel %vm11577_vm6, %v8234_v4, %v3151_v21  ;;  %v3153_v3 = vrot.slane %v3151_v21, 4  ;;  %v2845_v30 = vsel %vm9973_vm9, %v2841_v60, %v2844_v10  ;;  %16002 = vst [vmem:[#allocation99_spill] sm:$0xff] %v11872_v47  ;;  %v3007_v12 = vrot.slane %v16003_v28, 6  ;;  %v16005_v21 = vld [vmem:[#allocation107_spill] sm:$0xff]  ;;  %v16006_v60 = vld [vmem:[#allocation106_spill] sm:$0xff]  ;;  %4908 = vst.msk [vmem:[#allocation3 + $0x448] sm:$0xff] %vm15673_vm7, %v1978_v51 }
 0x1bc   : > { %16000 = vst [vmem:[#allocation91_spill] sm:$0xff] %v11858_v24  ;;  %16001 = vst [vmem:[#allocation90_spill] sm:$0xff] %v11864_v52  ;;  %v3008_v22 = vrot.slane %v16004_v14, 7  ;;  %v2850_v4 = vsel %vm9973_vm9, %v2846_v29, %v2849_v48  ;;  %v3011_v23 = vrot.slane %v16005_v21, 6  ;;  %v3012_v45 = vrot.slane %v16006_v60, 7  ;;  %v16010_v29 = vld [vmem:[#allocation113_spill] sm:$0xff] }
 0x1bd   : > { %1501 = vst.msk [vmem:[#allocation3 + $0x138] sm:$0xff] %vm15665_vm10, %v11858_v24  ;;  %4601 = vst.msk [vmem:[#allocation3 + $0x4a8] sm:$0xff] %vm15665_vm10, %v11864_v52  ;;  %v3155_v10 = vsel %vm11577_vm6, %v3153_v3, %v3154_v1  ;;  %2577 = vrot.lane.b32.xlu0 %v11864_v52, %s9704_s24  ;;  %v11887_v0 = vcombine.low %v2845_v30, %v2850_v4  ;;  %v16009_v18 = vshrl.u32 %v11872_v47, 16  ;;  %v3017_v53 = vrot.slane %v16010_v29, 7  ;;  %v11913_v30 = vpop.permute.xlu1 %1971  ;;  %v11955_v26 = vpop.permute.xlu0 %2193 }
 0x1be   : > { %v11889_v59 = vcombine.low %v3152_v9, %v3155_v10  ;;  %v3009_v15 = vor.u32 %v3008_v22, %v3007_v12  ;;  %v3013_v48 = vor.u32 %v3012_v45, %v3011_v23  ;;  %v8247_v1 = vrot.slane %v11783_v61, 11  ;;  %v11905_v9 = vld [vmem:[#allocation2 + $0x34] sm:$0xf]  ;;  %v11907_v61 = vld [vmem:[#allocation2 + $0x30] sm:$0xf]  ;;  %2001 = vst.msk [vmem:[#allocation3 + $0x138] sm:$0xff] %vm15673_vm7, %v11715_v56 }
 0x1bf   : > { %16007 = vst [vmem:[#allocation110_spill] sm:$0xff] %v11887_v0  ;;  %v3016_v42 = vrot.slane %v16009_v18, 6  ;;  %v3242_v3 = vrot.slane %v11781_v43, 7  ;;  %3072 = vrot.lane.b32.xlu1 %v11887_v0, %s9703_s22  ;;  %3751 = vst.msk [vmem:[#allocation3 + $0x80] sm:$0xff] %vm15665_vm10, %v11887_v0  ;;  %v3245_v45 = vrot.slane %v11872_v47, 7  ;;  %v11911_v43 = vcombine.low %v11907_v61, %v11905_v9  ;;  %v16011_v23 = vld [vmem:[#allocation132_spill] sm:$0xff] }
 0x1c0   : > { %16008 = vst [vmem:[#allocation111_spill] sm:$0xff] %v11889_v59  ;;  %4305 = vst.msk [vmem:[#allocation3 + $0x28] sm:$0xff] %vm15665_vm10, %v11889_v59  ;;  %v3010_v18 = vrot.slane %v3009_v15, 4  ;;  %v3015_v12 = vrot.slane %v3013_v48, 4  ;;  %v528_v56 = vshrl.u32 %v263_v37, 16  ;;  %vm16023_vm8 = vcmask 257024  }
 0x1c1   : > { %v3018_v22 = vor.u32 %v3017_v53, %v3016_v42  ;;  %v3243_v4 = vsel %vm11577_vm6, %v8247_v1, %v3242_v3  ;;  %v3244_v10 = vrot.slane %v3242_v3, 4  ;;  %3299 = vrot.lane.b32.xlu0 %v11889_v59, %s9702_s20  ;;  %1502 = vst.msk [vmem:[#allocation3 + $0x1a0] sm:$0xff] %vm15665_vm10, %v11911_v43  ;;  %4843 = vst.msk [vmem:[#allocation3 + $0x38] sm:$0xff] %vm15665_vm10, %v11911_v43  ;;  %v11929_v53 = vshrl.u32 %v262_v50, 16  ;;  %v721_v0 = vld [vmem:[#allocation2 + $0xc0] sm:$0xe] }
 0x1c2   : > { %v3014_v15 = vsel %vm9973_vm9, %v3010_v18, %v3013_v48  ;;  %v522_v42 = vshll.u32 %v262_v50, 16  ;;  %v16012_v1 = vshrl.u32 %v16011_v23, 16  ;;  %2002 = vst.msk [vmem:[#allocation3 + $0x1a0] sm:$0xff] %vm15673_vm7, %v11682_v58  ;;  %4898 = vst.msk [vmem:[#allocation3 + $0x38] sm:$0xff] %vm15673_vm7, %v11682_v58  ;;  %v11943_v18 = vshll.u32 %v263_v37, 16 }
 0x1c3   : > { %v3019_v51 = vsel %vm9973_vm9, %v3015_v12, %v3018_v22  ;;  %v3246_v48 = vsel %vm11577_vm6, %v3244_v10, %v3245_v45  ;;  %v1127_v50 = vld [vmem:[#allocation2 + $0xc8] sm:$0x4]  ;;  %3368 = vrot.lane.b32.xlu1 %v11858_v24, %s9704_s24  ;;  %v521_v12 = vrot.slane %v11929_v53, 6  ;;  %v832_v45 = vld [vmem:[#allocation2 + $0xc0] sm:$0x1]  ;;  %v530_v10 = vrot.slane %v528_v56, 6  ;;  %v1976_v24 = vpop.permute.xlu1 %1975 }
 0x1c4   : > { %v11933_v3 = vrot.slane %v16012_v1, 6  ;;  %16014 = vst [vmem:[#allocation106_spill] sm:$0xff] %v11943_v18  ;;  %v11947_v23 = vcombine.low %v3014_v15, %v3019_v51  ;;  %v11949_v1 = vcombine.low %v3243_v4, %v3246_v48  ;;  %v524_v22 = vrot.slane %v522_v42, 7  ;;  %2011 = vst.msk [vmem:[#allocation3 + $0x548] sm:$0xff] %vm15673_vm7, %v1976_v24 }
 0x1c5   : > { %v533_v52 = vrot.slane %v11943_v18, 7  ;;  %v8053_v58 = vrot.slane %v11929_v53, 9  ;;  %v2486_v37 = vrot.slane %v16003_v28, 5  ;;  %v11967_v15 = vrot.slane %v522_v42, 9  ;;  %4907 = vst.msk [vmem:[#allocation3 + $0x3e0] sm:$0xff] %vm15673_vm7, %v1976_v24 }
 0x1c6   : > { %16013 = vst [vmem:[#allocation107_spill] sm:$0xff] %v11933_v3  ;;  %16015 = vst [vmem:[#allocation113_spill] sm:$0xff] %v11947_v23  ;;  %3098 = vrot.lane.b32.xlu0 %v11947_v23, %s9703_s22  ;;  %v525_v4 = vor.u32 %v524_v22, %v521_v12  ;;  %v1128_v51 = vsel %vm9945_vm12, %v528_v56, %v1127_v50  ;;  %v2490_v59 = vrot.slane %v16005_v21, 5  ;;  %v2491_v12 = vrot.slane %v16006_v60, 6 }
 0x1c7   : > { %16016 = vst [vmem:[#allocation132_spill] sm:$0xff] %v11949_v1  ;;  %3764 = vst.msk [vmem:[#allocation3 + $0x5c8] sm:$0xff] %vm15665_vm10, %v11947_v23  ;;  %v534_v3 = vor.u32 %v533_v52, %v530_v10  ;;  %v833_v55 = vsel %vm9953_vm14, %v8053_v58, %v832_v45  ;;  %3325 = vrot.lane.b32.xlu1 %v11949_v1, %s9702_s20  ;;  %v725_v52 = vld [vmem:[#allocation2 + $0xc8] sm:$0x3]  ;;  %v16020_v22 = vshrl.u32 %v11872_v47, 16  ;;  %v2498_v24 = vrot.slane %v16010_v29, 6 }
 0x1c8   : > { %5344 = vst.msk [vmem:[#allocation3 + $0x460] sm:$0xff] %vm15665_vm10, %v11947_v23  ;;  %5658 = vst.msk [vmem:[#allocation3 + $0x408] sm:$0xff] %vm15665_vm10, %v11949_v1  ;;  %v2487_v23 = vrot.slane %v16004_v14, 6  ;;  %v526_v42 = vrot.slane %v525_v4, 4  ;;  %v722_v50 = vsel %vm9960_vm15, %v525_v4, %v721_v0  ;;  %v9295_v45 = vld [vmem:[#allocation7 + $0xc0] sm:$0xff]   ;;  %v2492_v60 = vor.u32 %v2491_v12, %v2490_v59  ;;  %v16025_v59 = vld [vmem:[#allocation33_spill] sm:$0xff] }
 0x1c9   : > { %4318 = vst.msk [vmem:[#allocation3 + $0x570] sm:$0xff] %vm15665_vm10, %v11949_v1  ;;  %1129 = vst [vmem:[#allocation2 + $0xc8] sm:$0x4] %v1128_v51  ;;  %v2497_v14 = vrot.slane %v16020_v22, 5  ;;  %v536_v21 = vrot.slane %v534_v3, 4  ;;  %v16022_v29 = vld [vmem:[#allocation32_spill] sm:$0xff]  ;;  %8558 = vmatprep.subr.bf16.mxu1 %v9295_v45 }
 0x1ca   : > { %834 = vst [vmem:[#allocation2 + $0xc0] sm:$0x1] %v833_v55  ;;  %723 = vst [vmem:[#allocation2 + $0xc0] sm:$0xe] %v722_v50  ;;  %v2488_v10 = vor.u32 %v2487_v23, %v2486_v37  ;;  %v11986_v58 = vld [vmem:[#allocation2 + $0x4c] sm:$0xf]  ;;  %v535_v55 = vsel %vm9973_vm9, %v526_v42, %v534_v3  ;;  %v12013_v42 = vpop.permute.xlu0 %2197 }
 0x1cb   : > { %v11988_v51 = vld [vmem:[#allocation2 + $0x48] sm:$0xf]  ;;  %v11996_v4 = vld [vmem:[#allocation2 + $0x40] sm:$0xf]  ;;  %v11998_v22 = vld [vmem:[#allocation2 + $0x3c] sm:$0xf]  ;;  %v726_v48 = vsel %vm9982_vm2, %v536_v21, %v725_v52  ;;  %v2499_v28 = vor.u32 %v2498_v24, %v2497_v14 }
 0x1cc   : > { %v11992_v0 = vcombine.low %v11988_v51, %v11986_v58  ;;  %v12002_v23 = vcombine.low %v11998_v22, %v11996_v4  ;;  %v2851_v37 = vrot.slane %v16022_v29, 6  ;;  %724 = vst.msk [vmem:[#allocation2 + $0xc4] sm:$0xf] %vm16023_vm8, %v535_v55  ;;  %v2489_v1 = vrot.slane %v2488_v10, 4  ;;  %727 = vst [vmem:[#allocation2 + $0xc8] sm:$0x3] %v726_v48 }
 0x1cd   : > { %v2852_v3 = vrot.slane %v16025_v59, 7  ;;  %v2494_v12 = vrot.slane %v2492_v60, 4  ;;  %v16026_v52 = vld [vmem:[#allocation37_spill] sm:$0xff]  ;;  %v16027_v45 = vld [vmem:[#allocation34_spill] sm:$0xff]  ;;  %v16028_v10 = vld [vmem:[#allocation124_spill] sm:$0xff]  ;;  %v8235_v50 = vrot.slane %v11854_v11, 11 }
 0x1ce   : > { %16021 = vst [vmem:[#allocation135_spill] sm:$0xff] %v11992_v0  ;;  %1504 = vst.msk [vmem:[#allocation3 + $0x270] sm:$0xff] %vm15665_vm10, %v11992_v0  ;;  %v2855_v14 = vrot.slane %v16026_v52, 6  ;;  %v2856_v21 = vrot.slane %v16027_v45, 7  ;;  %v16029_v24 = vshrl.u32 %v16028_v10, 16  ;;  %v2493_v55 = vsel %vm11266_vm11, %v2489_v1, %v2492_v60  ;;  %v16030_v29 = vld [vmem:[#allocation38_spill] sm:$0xff] }
 0x1cf   : > { %4845 = vst.msk [vmem:[#allocation3 + $0x108] sm:$0xff] %vm15665_vm10, %v11992_v0  ;;  %1503 = vst.msk [vmem:[#allocation3 + $0x208] sm:$0xff] %vm15665_vm10, %v12002_v23  ;;  %v2861_v59 = vrot.slane %v16030_v29, 7  ;;  %v2500_v45 = vsel %vm11266_vm11, %v2494_v12, %v2499_v28  ;;  %v3161_v1 = vrot.slane %v12038_v57, 7  ;;  %v16034_v47 = vrot.slane %v11929_v53, 7  ;;  %v16050_v0 = vld [vmem:[#allocation125_spill] sm:$0xff] }
 0x1d0   : > { %2004 = vst.msk [vmem:[#allocation3 + $0x270] sm:$0xff] %vm15673_vm7, %v11710_v5  ;;  %4900 = vst.msk [vmem:[#allocation3 + $0x108] sm:$0xff] %vm15673_vm7, %v11710_v5  ;;  %v2860_v48 = vrot.slane %v16029_v24, 6  ;;  %v2853_v5 = vor.u32 %v2852_v3, %v2851_v37  ;;  %v1274_v52 = vld [vmem:[#allocation2 + $0xc8] sm:$0x4]  ;;  %v2857_v10 = vor.u32 %v2856_v21, %v2855_v14  ;;  %v3158_v24 = vrot.slane %v11852_v33, 7 }
 0x1d1   : > { %4844 = vst.msk [vmem:[#allocation3 + $0xa0] sm:$0xff] %vm15665_vm10, %v12002_v23  ;;  %v1028_v60 = vld [vmem:[#allocation2 + $0xc0] sm:$0x1]  ;;  %v12044_v37 = vcombine.low %v2493_v55, %v2500_v45  ;;  %v1208_v12 = vld [vmem:[#allocation2 + $0xc0] sm:$0x2]  ;;  %vm2614_vm8 = vcmask 1041408  }
 0x1d2   : > { %2003 = vst.msk [vmem:[#allocation3 + $0x208] sm:$0xff] %vm15673_vm7, %v11762_v63  ;;  %4899 = vst.msk [vmem:[#allocation3 + $0xa0] sm:$0xff] %vm15673_vm7, %v11762_v63  ;;  %v1275_v63 = vsel %vm10007_vm1, %v11943_v18, %v1274_v52  ;;  %v2854_v3 = vrot.slane %v2853_v5, 4  ;;  %v2862_v29 = vor.u32 %v2861_v59, %v2860_v48  ;;  %v1029_v28 = vsel %vm10020_vm4, %v11967_v15, %v1028_v60  ;;  %v12061_v48 = vld [vmem:[#allocation2 + $0x64] sm:$0xf]  ;;  %v12077_v52 = vpop.permute.xlu0 %1949 }
 0x1d3   : > { %16032 = vst [vmem:[#allocation32_spill] sm:$0xff] %v12044_v37  ;;  %1276 = vst [vmem:[#allocation2 + $0xc8] sm:$0x4] %v1275_v63  ;;  %v2859_v14 = vrot.slane %v2857_v10, 4  ;;  %v3159_v21 = vsel %vm11577_vm6, %v8235_v50, %v3158_v24  ;;  %v3160_v19 = vrot.slane %v3158_v24, 4  ;;  %v1209_v55 = vsel %vm10030_vm5, %v16034_v47, %v1208_v12  ;;  %2579 = vrot.lane.b32.xlu1 %v12044_v37, %s9704_s24 }
 0x1d4   : > { %1030 = vst [vmem:[#allocation2 + $0xc0] sm:$0x1] %v1029_v28  ;;  %4602 = vst.msk [vmem:[#allocation3 + $0x510] sm:$0xff] %vm15665_vm10, %v12044_v37  ;;  %v2858_v15 = vsel %vm9973_vm9, %v2854_v3, %v2857_v10  ;;  %v12063_v5 = vld [vmem:[#allocation2 + $0x60] sm:$0xf] }
 0x1d5   : > { %v12067_v50 = vcombine.low %v12063_v5, %v12061_v48  ;;  %v12069_v53 = vld [vmem:[#allocation2 + $0x58] sm:$0xf]  ;;  %v12071_v47 = vld [vmem:[#allocation2 + $0x54] sm:$0xf]  ;;  %1210 = vst [vmem:[#allocation2 + $0xc0] sm:$0x2] %v1209_v55  ;;  %v2863_v45 = vsel %vm9973_vm9, %v2859_v14, %v2862_v29  ;;  %v3162_v10 = vsel %vm11577_vm6, %v3160_v19, %v3161_v1  ;;  %vm12167_vm1 = vmor %vm2614_vm8, %vm2615_vm3 }
 0x1d6   : > { %v12075_v59 = vcombine.low %v12071_v47, %v12069_v53  ;;  %v12083_v24 = vld [vmem:[#allocation2 + $0x7c] sm:$0xf]  ;;  %v12085_v60 = vld [vmem:[#allocation2 + $0x78] sm:$0xf]  ;;  %v12091_v3 = vld [vmem:[#allocation2 + $0x70] sm:$0xf]  ;;  %v12099_v29 = vcombine.low %v2858_v15, %v2863_v45  ;;  %v12101_v14 = vcombine.low %v3159_v21, %v3162_v10  ;;  %v1980_v45 = vpop.permute.xlu1 %1979 }
 0x1d7   : > { %16036 = vst [vmem:[#allocation33_spill] sm:$0xff] %v12067_v50  ;;  %v12089_v63 = vcombine.low %v12085_v60, %v12083_v24  ;;  %v12093_v28 = vld [vmem:[#allocation2 + $0x6c] sm:$0xf]  ;;  %1506 = vst.msk [vmem:[#allocation3 + $0x340] sm:$0xff] %vm15665_vm10, %v12067_v50  ;;  %v12111_v19 = vld [vmem:[#allocation2 + $0x90] sm:$0xf] }
 0x1d8   : > { %v12097_v12 = vcombine.low %v12093_v28, %v12091_v3  ;;  %16039 = vst [vmem:[#allocation124_spill] sm:$0xff] %v12101_v14  ;;  %4847 = vst.msk [vmem:[#allocation3 + $0x1d8] sm:$0xff] %vm15665_vm10, %v12067_v50  ;;  %v12115_v1 = vcombine.low %v12111_v19, %v11581_v16  ;;  %v12117_v21 = vld [vmem:[#allocation2 + $0x88] sm:$0xf]  ;;  %v12119_v55 = vld [vmem:[#allocation2 + $0x84] sm:$0xf]  ;;  %3301 = vrot.lane.b32.xlu1 %v12101_v14, %s9702_s20 }
 0x1d9   : > { %16037 = vst [vmem:[#allocation37_spill] sm:$0xff] %v12089_v63  ;;  %1505 = vst.msk [vmem:[#allocation3 + $0x2d8] sm:$0xff] %vm15665_vm10, %v12075_v59  ;;  %v12123_v15 = vcombine.low %v12119_v55, %v12117_v21  ;;  %v8185_v16 = vrot.slane %v11733_v6, 10  ;;  %v16044_v6 = vmov 0  ;;  %v16048_v37 = vld [vmem:[#allocation30_spill] sm:$0xff]  ;;  %v3165_v50 = vrot.slane %v11905_v9, 7 }
 0x1da   : > { %16038 = vst [vmem:[#allocation34_spill] sm:$0xff] %v12097_v12  ;;  %4846 = vst.msk [vmem:[#allocation3 + $0x170] sm:$0xff] %vm15665_vm10, %v12075_v59  ;;  %v16045_v6 = vsel %vm12167_vm1, 4294967295, %v16044_v6  ;;  %v2868_v56 = vrot.slane %v16048_v37, 6  ;;  %vm15670_vm3 = vcmask 785920   ;;  %vm15666_vm8 = vcmask 1048320  }
 0x1db   : > { %16040 = vst [vmem:[#allocation38_spill] sm:$0xff] %v12115_v1  ;;  %16041 = vst [vmem:[#allocation136_spill] sm:$0xff] %v12117_v21  ;;  %v1952_v21 = vpop.permute.xlu0 %1951 }
 0x1dc   : > { %16042 = vst [vmem:[#allocation137_spill] sm:$0xff] %v12119_v55  ;;  %16043 = vst [vmem:[#allocation138_spill] sm:$0xff] %v12123_v15  ;;  %3776 = vrot.lane.b32.xlu1 %v11771_v7, %s9703_s22  ;;  %v2633_v7 = vrot.slane %v11840_v35, 6  ;;  %v16056_v35 = vld [vmem:[#allocation46_spill] sm:$0xff] }
 0x1dd   : > { %2006 = vst.msk [vmem:[#allocation3 + $0x340] sm:$0xff] %vm15673_vm7, %v11754_v31  ;;  %4902 = vst.msk [vmem:[#allocation3 + $0x1d8] sm:$0xff] %vm15673_vm7, %v11754_v31  ;;  %v2626_v31 = vrot.slane %v11736_v13, 6  ;;  %v2629_v13 = vrot.slane %v11743_v27, 6 }
 0x1de   : > { %2005 = vst.msk [vmem:[#allocation3 + $0x2d8] sm:$0xff] %vm15673_vm7, %v11807_v38  ;;  %4901 = vst.msk [vmem:[#allocation3 + $0x170] sm:$0xff] %vm15673_vm7, %v11807_v38 }
 0x1df   : > { %1508 = vst.msk [vmem:[#allocation3 + $0x410] sm:$0xff] %vm15665_vm10, %v12089_v63  ;;  %4849 = vst.msk [vmem:[#allocation3 + $0x2a8] sm:$0xff] %vm15665_vm10, %v12089_v63  ;;  %v2627_v27 = vsel %vm12167_vm1, %v8185_v16, %v2626_v31  ;;  %v2628_v37 = vrot.slane %v2626_v31, 4  ;;  %v16052_v63 = vld [vmem:[#allocation31_spill] sm:$0xff]  ;;  %v12195_v16 = vld [vmem:[#allocation2 + $0x38] sm:$0x7] }
 0x1e0   : > { %1507 = vst.msk [vmem:[#allocation3 + $0x3a8] sm:$0xff] %vm15665_vm10, %v12097_v12  ;;  %4848 = vst.msk [vmem:[#allocation3 + $0x240] sm:$0xff] %vm15665_vm10, %v12097_v12  ;;  %v2874_v12 = vrot.slane %v16052_v63, 7  ;;  %v3168_v31 = vrot.slane %v12195_v16, 7  ;;  %v1383_v63 = vld [vmem:[#allocation2 + $0xc0] sm:$0xf]  ;;  %3845 = vrot.lane.b32.xlu1 %v11363_v36, %s9702_s20 }
 0x1e1   : > { %3752 = vst.msk [vmem:[#allocation3 + $0xe8] sm:$0xff] %vm15665_vm10, %v12099_v29  ;;  %4306 = vst.msk [vmem:[#allocation3 + $0x90] sm:$0xff] %vm15665_vm10, %v12101_v14 }
 0x1e2   : > { %2008 = vst.msk [vmem:[#allocation3 + $0x410] sm:$0xff] %vm15673_vm7, %v11798_v8  ;;  %4904 = vst.msk [vmem:[#allocation3 + $0x2a8] sm:$0xff] %vm15673_vm7, %v11798_v8  ;;  %v16046_v8 = vld [vmem:[#allocation27_spill] sm:$0xff] }
 0x1e3   : > { %2007 = vst.msk [vmem:[#allocation3 + $0x3a8] sm:$0xff] %vm15673_vm7, %v11860_v25  ;;  %4903 = vst.msk [vmem:[#allocation3 + $0x240] sm:$0xff] %vm15673_vm7, %v11860_v25  ;;  %v2864_v38 = vrot.slane %v16046_v8, 6  ;;  %v16047_v25 = vld [vmem:[#allocation28_spill] sm:$0xff]  ;;  %v16049_v8 = vld [vmem:[#allocation29_spill] sm:$0xff] }
 0x1e4   : > { %1510 = vst.msk [vmem:[#allocation3 + $0x4e0] sm:$0xff] %vm15665_vm10, %v12115_v1  ;;  %4851 = vst.msk [vmem:[#allocation3 + $0x378] sm:$0xff] %vm15665_vm10, %v12115_v1  ;;  %v2865_v10 = vrot.slane %v16047_v25, 7  ;;  %v2869_v25 = vrot.slane %v16049_v8, 7  ;;  %v1384_v1 = vld [vmem:[#allocation2 + $0xc4] sm:$0xf]  ;;  %v2196_v8 = vpop.permute.xlu1 %2195 }
 0x1e5   : > { %1509 = vst.msk [vmem:[#allocation3 + $0x478] sm:$0xff] %vm15665_vm10, %v12123_v15  ;;  %4850 = vst.msk [vmem:[#allocation3 + $0x310] sm:$0xff] %vm15665_vm10, %v12123_v15 }
 0x1e6   : > { %2013 = vst.msk [vmem:[#allocation3 + $0x618] sm:$0xff] %vm15673_vm7, %v1980_v45  ;;  %4909 = vst.msk [vmem:[#allocation3 + $0x4b0] sm:$0xff] %vm15673_vm7, %v1980_v45  ;;  %v16051_v45 = vshrl.u32 %v16050_v0, 16  ;;  %v2866_v15 = vor.u32 %v2865_v10, %v2864_v38  ;;  %v2870_v55 = vor.u32 %v2869_v25, %v2868_v56  ;;  %v8104_v0 = vcombine.low %v11652_v49, %v11655_v17  ;;  %v16054_v17 = vld [vmem:[#allocation80_spill] sm:$0xff] }
 0x1e7   : > { %2010 = vst.msk [vmem:[#allocation3 + $0x4e0] sm:$0xff] %vm15673_vm7, %v11846_v32  ;;  %4906 = vst.msk [vmem:[#allocation3 + $0x378] sm:$0xff] %vm15673_vm7, %v11846_v32  ;;  %v8236_v32 = vrot.slane %v11907_v61, 11  ;;  %v3167_v25 = vrot.slane %v3165_v50, 4 }
 0x1e8   : > { %2009 = vst.msk [vmem:[#allocation3 + $0x478] sm:$0xff] %vm15673_vm7, %v11913_v30  ;;  %4905 = vst.msk [vmem:[#allocation3 + $0x310] sm:$0xff] %vm15673_vm7, %v11913_v30  ;;  %v2873_v18 = vrot.slane %v16051_v45, 6  ;;  %v2630_v30 = vsel %vm12167_vm1, %v2628_v37, %v2629_v13  ;;  %v2867_v10 = vrot.slane %v2866_v15, 4  ;;  %v12207_v13 = vcombine.low %v1383_v63, %v1384_v1  ;;  %v12277_v63 = vld [vmem:[#allocation2 + $0x44] sm:$0x7] }
 0x1e9   : > { %1999 = vst.msk [vmem:[#allocation3 + $0x68] sm:$0xff] %vm15673_vm7, %v1952_v21  ;;  %v12203_v38 = vcombine.low %v2627_v27, %v2630_v30  ;;  %v3166_v56 = vsel %vm11577_vm6, %v8236_v32, %v3165_v50  ;;  %v2872_v37 = vrot.slane %v2870_v55, 4  ;;  %v2214_v50 = vpop.permute.xlu0 %2213  ;;  %v2635_v1 = vrot.slane %v2633_v7, 4  ;;  %v16060_v27 = vld [vmem:[#allocation49_spill] sm:$0xff]  ;;  %v16061_v30 = vld [vmem:[#allocation51_spill] sm:$0xff] }
 0x1ea   : > { %v2875_v45 = vor.u32 %v2874_v12, %v2873_v18  ;;  %16053 = vst [vmem:[#allocation27_spill] sm:$0xff] %v12207_v13  ;;  %1498 = vst.msk [vmem:[#allocation3] sm:$0xff] %vm15665_vm10, %v8104_v0  ;;  %v2871_v49 = vsel %vm9973_vm9, %v2867_v10, %v2870_v55  ;;  %v2636_v18 = vrot.slane %v11843_v40, 6  ;;  %3394 = vrot.lane.b32.xlu0 %v12207_v13, %s9704_s24  ;;  %v2878_v40 = vrot.slane %v16056_v35, 7  ;;  %v16059_v55 = vld [vmem:[#allocation50_spill] sm:$0xff] }
 0x1eb   : > { %2794 = vst.msk [vmem:[#allocation3 + $0x70] sm:$0xff] %vm15665_vm10, %v12203_v38  ;;  %4855 = vst.msk [vmem:[#allocation3 + $0x518] sm:$0xff] %vm15665_vm10, %v12207_v13  ;;  %v2881_v15 = vrot.slane %v16059_v55, 6  ;;  %v2882_v32 = vrot.slane %v16060_v27, 7  ;;  %v3172_v0 = vrot.slane %v11996_v4, 7  ;;  %v3175_v10 = vrot.slane %v12277_v63, 7 }
 0x1ec   : > { %1998 = vst.msk [vmem:[#allocation3] sm:$0xff] %vm15673_vm7, %v12077_v52  ;;  %v2637_v36 = vsel %vm12167_vm1, %v2635_v1, %v2636_v18  ;;  %v16065_v1 = vld [vmem:[#allocation41_spill] sm:$0xff] }
 0x1ed   : > { %2245 = vst.msk [vmem:[#allocation3 + $0x138] sm:$0xff] %vm15670_vm3, %v11610_v39  ;;  %2246 = vst.msk [vmem:[#allocation3 + $0x1a0] sm:$0xff] %vm15670_vm3, %v16054_v17  ;;  %v8186_v39 = vrot.slane %v11837_v44, 10 }
 0x1ee   : > { %2247 = vst.msk [vmem:[#allocation3 + $0x208] sm:$0xff] %vm15670_vm3, %v11658_v20  ;;  %2248 = vst.msk [vmem:[#allocation3 + $0x270] sm:$0xff] %vm15670_vm3, %v11596_v34  ;;  %3074 = vrot.lane.b32.xlu0 %v12099_v29, %s9703_s22 }
 0x1ef   : > { %2249 = vst.msk [vmem:[#allocation3 + $0x2d8] sm:$0xff] %vm15670_vm3, %v11687_v62  ;;  %2250 = vst.msk [vmem:[#allocation3 + $0x340] sm:$0xff] %vm15670_vm3, %v11648_v54 }
 0x1f0   : > { %4937 = vst.msk [vmem:[#allocation3 + $0x38] sm:$0xff] %vm15670_vm3, %v16054_v17  ;;  %4938 = vst.msk [vmem:[#allocation3 + $0xa0] sm:$0xff] %vm15670_vm3, %v11658_v20  ;;  %v2212_v20 = vpop.permute.xlu1 %2211  ;;  %v16062_v17 = vld [vmem:[#allocation93_spill] sm:$0xff] }
 0x1f1   : > { %4939 = vst.msk [vmem:[#allocation3 + $0x108] sm:$0xff] %vm15670_vm3, %v11596_v34  ;;  %4940 = vst.msk [vmem:[#allocation3 + $0x170] sm:$0xff] %vm15670_vm3, %v11687_v62  ;;  %v2876_v34 = vsel %vm9973_vm9, %v2872_v37, %v2875_v45  ;;  %v16055_v62 = vld [vmem:[#allocation45_spill] sm:$0xff]  ;;  %v2218_v45 = vpop.permute.xlu0 %2217 }
 0x1f2   : > { %4941 = vst.msk [vmem:[#allocation3 + $0x1d8] sm:$0xff] %vm15670_vm3, %v11648_v54  ;;  %2243 = vst.msk [vmem:[#allocation3 + $0x68] sm:$0xff] %vm15670_vm3, %v2196_v8  ;;  %v3169_v54 = vsel %vm11577_vm6, %v3167_v25, %v3168_v31  ;;  %v2877_v44 = vrot.slane %v16055_v62, 6  ;;  %v12258_v52 = vcombine.low %v2871_v49, %v2876_v34  ;;  %v2887_v31 = vrot.slane %v16061_v30, 7  ;;  %3370 = vrot.lane.b32.xlu0 %v11911_v43, %s9704_s24 }
 0x1f3   : > { %2242 = vst.msk [vmem:[#allocation3] sm:$0xff] %vm15670_vm3, %v11955_v26  ;;  %2252 = vst.msk [vmem:[#allocation3 + $0x410] sm:$0xff] %vm15670_vm3, %v2214_v50  ;;  %v12260_v12 = vcombine.low %v3166_v56, %v3169_v54  ;;  %v2634_v26 = vsel %vm12167_vm1, %v8186_v39, %v2633_v7  ;;  %v8237_v8 = vrot.slane %v11998_v22, 11  ;;  %v2883_v49 = vor.u32 %v2882_v32, %v2881_v15  ;;  %v16063_v7 = vld [vmem:[#allocation116_spill] sm:$0xff] }
 0x1f4   : > { %4943 = vst.msk [vmem:[#allocation3 + $0x2a8] sm:$0xff] %vm15670_vm3, %v2214_v50  ;;  %16057 = vst [vmem:[#allocation28_spill] sm:$0xff] %v12258_v52  ;;  %v2879_v21 = vor.u32 %v2878_v40, %v2877_v44  ;;  %v1954_v56 = vpop.permute.xlu1 %1953  ;;  %v12282_v37 = vcombine.low %v2634_v26, %v2637_v36  ;;  %v2888_v39 = vor.u32 %v2887_v31, %v16062_v17  ;;  %3936 = vrot.lane.b32.xlu1 %v16063_v7, %s9704_s24  ;;  %v16064_v26 = vld [vmem:[#allocation39_spill] sm:$0xff]  ;;  %v16069_v36 = vld [vmem:[#allocation42_spill] sm:$0xff] }
 0x1f5   : > { %16058 = vst [vmem:[#allocation30_spill] sm:$0xff] %v12260_v12  ;;  %2251 = vst.msk [vmem:[#allocation3 + $0x3a8] sm:$0xff] %vm15670_vm3, %v2212_v20  ;;  %v3173_v18 = vsel %vm11577_vm6, %v8237_v8, %v3172_v0  ;;  %v3174_v50 = vrot.slane %v3172_v0, 4  ;;  %v8187_v34 = vrot.slane %v11854_v11, 10  ;;  %v2640_v62 = vrot.slane %v11852_v33, 6  ;;  %v2222_v40 = vpop.permute.xlu0 %2221  ;;  %v16070_v0 = vld [vmem:[#allocation44_spill] sm:$0xff] }
 0x1f6   : > { %4942 = vst.msk [vmem:[#allocation3 + $0x240] sm:$0xff] %vm15670_vm3, %v2212_v20  ;;  %v2880_v25 = vrot.slane %v2879_v21, 4  ;;  %2254 = vst.msk [vmem:[#allocation3 + $0x4e0] sm:$0xff] %vm15670_vm3, %v2218_v45  ;;  %v2885_v20 = vrot.slane %v2883_v49, 4  ;;  %v2643_v44 = vrot.slane %v12038_v57, 6  ;;  %v2890_v11 = vrot.slane %v16064_v26, 6 }
 0x1f7   : > { %3753 = vst.msk [vmem:[#allocation3 + $0x150] sm:$0xff] %vm15665_vm10, %v12258_v52  ;;  %4307 = vst.msk [vmem:[#allocation3 + $0xf8] sm:$0xff] %vm15665_vm10, %v12260_v12  ;;  %v3176_v35 = vsel %vm11577_vm6, %v3174_v50, %v3175_v10  ;;  %v2891_v21 = vrot.slane %v16065_v1, 7  ;;  %v2641_v57 = vsel %vm12167_vm1, %v8187_v34, %v2640_v62  ;;  %v2642_v32 = vrot.slane %v2640_v62, 4  ;;  %v16072_v50 = vld [vmem:[#allocation131_spill] sm:$0xff] }
 0x1f8   : > { %4945 = vst.msk [vmem:[#allocation3 + $0x378] sm:$0xff] %vm15670_vm3, %v2218_v45  ;;  %v2884_v54 = vsel %vm9973_vm9, %v2880_v25, %v2883_v49  ;;  %v2216_v15 = vpop.permute.xlu1 %2215  ;;  %v2889_v27 = vsel %vm9973_vm9, %v2885_v20, %v2888_v39  ;;  %v12310_v33 = vcombine.low %v3173_v18, %v3176_v35  ;;  %2256 = vst.msk [vmem:[#allocation3 + $0x5b0] sm:$0xff] %vm15670_vm3, %v2222_v40  ;;  %3076 = vrot.lane.b32.xlu1 %v12258_v52, %s9703_s22  ;;  %v12330_v49 = vld [vmem:[#allocation2 + $0x50] sm:$0x7] }
 0x1f9   : > { %2000 = vst.msk [vmem:[#allocation3 + $0xd0] sm:$0xff] %vm15673_vm7, %v1954_v56  ;;  %v12320_v30 = vcombine.low %v2884_v54, %v2889_v27  ;;  %v2892_v31 = vor.u32 %v2891_v21, %v2890_v11  ;;  %v2895_v8 = vrot.slane %v16069_v36, 7  ;;  %v2900_v10 = vrot.slane %v16070_v0, 7  ;;  %v16073_v54 = vld [vmem:[#allocation109_spill] sm:$0xff]  ;;  %v2550_v11 = vpop.permute.xlu0 %2549  ;;  %v9496_v0 = vld [vmem:[#allocation2] sm:$0xf] }
 0x1fa   : > { %2244 = vst.msk [vmem:[#allocation3 + $0xd0] sm:$0xff] %vm15670_vm3, %v12013_v42  ;;  %v16066_v42 = vld [vmem:[#allocation43_spill] sm:$0xff]  ;;  %16067 = vst [vmem:[#allocation29_spill] sm:$0xff] %v12310_v33  ;;  %v2644_v45 = vsel %vm12167_vm1, %v2642_v32, %v2643_v44  ;;  %v8238_v56 = vrot.slane %v11988_v51, 11  ;;  %v3179_v25 = vrot.slane %v11986_v58, 7  ;;  %v3182_v17 = vrot.slane %v12330_v49, 7  ;;  %3498 = vrot.lane.b32.xlu0 %v16073_v54, %s9703_s22 }
 0x1fb   : > { %2795 = vst.msk [vmem:[#allocation3 + $0xd8] sm:$0xff] %vm15665_vm10, %v12282_v37  ;;  %v2894_v55 = vrot.slane %v16066_v42, 6  ;;  %16068 = vst [vmem:[#allocation125_spill] sm:$0xff] %v12320_v30  ;;  %v12337_v39 = vcombine.low %v2641_v57, %v2644_v45  ;;  %v2893_v7 = vrot.slane %v2892_v31, 4  ;;  %v2901_v34 = vor.u32 %v2900_v10, %v16072_v50  ;;  %v9495_v42 = vld [vmem:[#allocation2 + $0x98] sm:$0x7] }
 0x1fc   : > { %4947 = vst.msk [vmem:[#allocation3 + $0x448] sm:$0xff] %vm15670_vm3, %v2222_v40  ;;  %2253 = vst.msk [vmem:[#allocation3 + $0x478] sm:$0xff] %vm15670_vm3, %v2216_v15  ;;  %v2220_v20 = vpop.permute.xlu1 %2219  ;;  %v3180_v62 = vsel %vm11577_vm6, %v8238_v56, %v3179_v25  ;;  %v3181_v44 = vrot.slane %v3179_v25, 4  ;;  %v8196_v35 = vrot.slane %v12111_v19, 10  ;;  %v9494_v40 = vld [vmem:[#allocation2 + $0x94] sm:$0xf]  ;;  %3372 = vrot.lane.b32.xlu1 %v12002_v23, %s9704_s24 }
 0x1fd   : > { %4944 = vst.msk [vmem:[#allocation3 + $0x310] sm:$0xff] %vm15670_vm3, %v2216_v15  ;;  %16071 = vst [vmem:[#allocation31_spill] sm:$0xff] %v12337_v39  ;;  %v2896_v18 = vor.u32 %v2895_v8, %v2894_v55  ;;  %v2703_v26 = vrot.slane %v9494_v40, 6  ;;  %v2706_v55 = vrot.slane %v9495_v42, 6  ;;  %v8188_v19 = vrot.slane %v11907_v61, 10  ;;  %v16075_v10 = vld [vmem:[#allocation123_spill] sm:$0xff] }
 0x1fe   : > { %4308 = vst.msk [vmem:[#allocation3 + $0x160] sm:$0xff] %vm15665_vm10, %v12310_v33  ;;  %3754 = vst.msk [vmem:[#allocation3 + $0x1b8] sm:$0xff] %vm15665_vm10, %v12320_v30  ;;  %v3183_v15 = vsel %vm11577_vm6, %v3181_v44, %v3182_v17  ;;  %v2647_v32 = vrot.slane %v11905_v9, 6  ;;  %v2650_v8 = vrot.slane %v12195_v16, 6  ;;  %v8184_v61 = vrot.slane %v9496_v0, 10  ;;  %3580 = vrot.lane.b32.xlu0 %v16075_v10, %s9702_s20  ;;  %v16078_v54 = vld [vmem:[#allocation59_spill] sm:$0xff]  ;;  %v2554_v0 = vpop.permute.xlu0 %2553 }
 0x1ff   : > { %5334 = vst.msk [vmem:[#allocation3 + $0x50] sm:$0xff] %vm15665_vm10, %v12320_v30  ;;  %2796 = vst.msk [vmem:[#allocation3 + $0x140] sm:$0xff] %vm15665_vm10, %v12337_v39  ;;  %v2897_v1 = vsel %vm9973_vm9, %v2893_v7, %v2896_v18  ;;  %v2898_v21 = vrot.slane %v2896_v18, 4  ;;  %v2704_v27 = vsel %vm12167_vm1, %v8196_v35, %v2703_v26  ;;  %v2705_v57 = vrot.slane %v2703_v26, 4  ;;  %v9497_v7 = vld [vmem:[#allocation2 + $0x4] sm:$0xf] }
 0x200   : > { %2255 = vst.msk [vmem:[#allocation3 + $0x548] sm:$0xff] %vm15670_vm3, %v2220_v20  ;;  %4946 = vst.msk [vmem:[#allocation3 + $0x3e0] sm:$0xff] %vm15670_vm3, %v2220_v20  ;;  %v12362_v36 = vcombine.low %v3180_v62, %v3183_v15  ;;  %v2224_v45 = vpop.permute.xlu1 %2223  ;;  %v2648_v9 = vsel %vm12167_vm1, %v8188_v19, %v2647_v32  ;;  %v2649_v17 = vrot.slane %v2647_v32, 4  ;;  %3500 = vrot.lane.b32.xlu1 %v15958_v2, %s9703_s22  ;;  %v2619_v18 = vrot.slane %v9497_v7, 6  ;;  %v9498_v50 = vld [vmem:[#allocation2 + $0x8] sm:$0x7] }
 0x201   : > { %2598 = vst.msk [vmem:[#allocation3] sm:$0xff] %vm15666_vm8, %v2550_v11  ;;  %v2902_v31 = vsel %vm9973_vm9, %v2898_v21, %v2901_v34  ;;  %v2707_v25 = vsel %vm12167_vm1, %v2705_v57, %v2706_v55  ;;  %v2622_v34 = vrot.slane %v9498_v50, 6  ;;  %v2903_v20 = vrot.slane %v16078_v54, 6  ;;  %v16079_v62 = vld [vmem:[#allocation60_spill] sm:$0xff]  ;;  %v16080_v35 = vld [vmem:[#allocation63_spill] sm:$0xff]  ;;  %v16081_v26 = vld [vmem:[#allocation61_spill] sm:$0xff] }
 0x202   : > { %16074 = vst [vmem:[#allocation80_spill] sm:$0xff] %v12362_v36  ;;  %v12367_v56 = vcombine.low %v2897_v1, %v2902_v31  ;;  %2257 = vst.msk [vmem:[#allocation3 + $0x618] sm:$0xff] %vm15670_vm3, %v2224_v45  ;;  %v12381_v16 = vcombine.low %v2704_v27, %v2707_v25  ;;  %v2651_v2 = vsel %vm12167_vm1, %v2649_v17, %v2650_v8  ;;  %v2904_v44 = vrot.slane %v16079_v62, 7  ;;  %v16083_v55 = vld [vmem:[#allocation64_spill] sm:$0xff]  ;;  %v16084_v8 = vld [vmem:[#allocation126_spill] sm:$0xff] }
 0x203   : > { %4948 = vst.msk [vmem:[#allocation3 + $0x4b0] sm:$0xff] %vm15670_vm3, %v2224_v45  ;;  %v2907_v40 = vrot.slane %v16080_v35, 6  ;;  %v2908_v11 = vrot.slane %v16081_v26, 7  ;;  %v12397_v1 = vcombine.low %v2648_v9, %v2651_v2  ;;  %v2620_v21 = vsel %vm12167_vm1, %v8184_v61, %v2619_v18  ;;  %3654 = vrot.lane.b32.xlu0 %v12203_v38, %s9704_s24  ;;  %v16085_v61 = vld [vmem:[#allocation133_spill] sm:$0xff]  ;;  %v12416_v45 = vld [vmem:[#allocation2 + $0x5c] sm:$0x7] }
 0x204   : > { %16076 = vst [vmem:[#allocation45_spill] sm:$0xff] %v12367_v56  ;;  %5649 = vst.msk [vmem:[#allocation3 + $0x60] sm:$0xff] %vm15665_vm10, %v12362_v36  ;;  %v2621_v42 = vrot.slane %v2619_v18, 4  ;;  %v2913_v19 = vrot.slane %v16083_v55, 7  ;;  %v2552_v15 = vpop.permute.xlu1 %2551  ;;  %v2905_v27 = vor.u32 %v2904_v44, %v2903_v20  ;;  %v8239_v32 = vrot.slane %v12071_v47, 11  ;;  %3582 = vrot.lane.b32.xlu1 %v16084_v8, %s9702_s20 }
 0x205   : > { %4309 = vst.msk [vmem:[#allocation3 + $0x1c8] sm:$0xff] %vm15665_vm10, %v12362_v36  ;;  %16077 = vst [vmem:[#allocation46_spill] sm:$0xff] %v12381_v16  ;;  %v2909_v57 = vor.u32 %v2908_v11, %v2907_v40  ;;  %v3186_v31 = vrot.slane %v12069_v53, 7  ;;  %v3189_v25 = vrot.slane %v12416_v45, 7  ;;  %v9500_v9 = vld [vmem:[#allocation2 + $0x9c] sm:$0xf] }
 0x206   : > { %3755 = vst.msk [vmem:[#allocation3 + $0x220] sm:$0xff] %vm15665_vm10, %v12367_v56  ;;  %5335 = vst.msk [vmem:[#allocation3 + $0xb8] sm:$0xff] %vm15665_vm10, %v12367_v56  ;;  %v2623_v38 = vsel %vm12167_vm1, %v2621_v42, %v2622_v34  ;;  %v2914_v10 = vor.u32 %v2913_v19, %v16085_v61  ;;  %v8197_v17 = vrot.slane %v9500_v9, 10  ;;  %v2906_v18 = vrot.slane %v2905_v27, 4  ;;  %v9501_v2 = vld [vmem:[#allocation2 + $0xa0] sm:$0xf] }
 0x207   : > { %2805 = vst.msk [vmem:[#allocation3 + $0x4e8] sm:$0xff] %vm15665_vm10, %v12381_v16  ;;  %5021 = vst.msk [vmem:[#allocation3 + $0x380] sm:$0xff] %vm15665_vm10, %v12381_v16  ;;  %v8200_v7 = vcombine.low %v2620_v21, %v2623_v38  ;;  %v2911_v50 = vrot.slane %v2909_v57, 4  ;;  %v3187_v54 = vsel %vm11577_vm6, %v8239_v32, %v3186_v31  ;;  %v3188_v20 = vrot.slane %v3186_v31, 4  ;;  %v9502_v34 = vld [vmem:[#allocation2 + $0xa4] sm:$0x7]  ;;  %3303 = vrot.lane.b32.xlu0 %v12260_v12, %s9702_s20  ;;  %v2558_v31 = vpop.permute.xlu0 %2557 }
 0x208   : > { %16082 = vst [vmem:[#allocation50_spill] sm:$0xff] %v12397_v1  ;;  %2599 = vst.msk [vmem:[#allocation3 + $0x68] sm:$0xff] %vm15666_vm8, %v2552_v15  ;;  %v2710_v62 = vrot.slane %v9501_v2, 6  ;;  %v2713_v44 = vrot.slane %v9502_v34, 6  ;;  %v8189_v35 = vrot.slane %v11998_v22, 10  ;;  %v2556_v40 = vpop.permute.xlu1 %2555  ;;  %v2910_v26 = vsel %vm9973_vm9, %v2906_v18, %v2909_v57  ;;  %3656 = vrot.lane.b32.xlu1 %v12282_v37, %s9704_s24  ;;  %v16088_v57 = vld [vmem:[#allocation52_spill] sm:$0xff] }
 0x209   : > { %2797 = vst.msk [vmem:[#allocation3 + $0x1a8] sm:$0xff] %vm15665_vm10, %v12397_v1  ;;  %5013 = vst.msk [vmem:[#allocation3 + $0x40] sm:$0xff] %vm15665_vm10, %v12397_v1  ;;  %v2915_v11 = vsel %vm9973_vm9, %v2911_v50, %v2914_v10  ;;  %v2654_v21 = vrot.slane %v11996_v4, 6  ;;  %v2657_v42 = vrot.slane %v12277_v63, 6  ;;  %v3190_v55 = vsel %vm11577_vm6, %v3188_v20, %v3189_v25  ;;  %v16089_v38 = vld [vmem:[#allocation53_spill] sm:$0xff]  ;;  %v16091_v9 = vld [vmem:[#allocation56_spill] sm:$0xff] }
 0x20a   : > { %2600 = vst.msk [vmem:[#allocation3 + $0xd0] sm:$0xff] %vm15666_vm8, %v2554_v0  ;;  %2601 = vst.msk [vmem:[#allocation3 + $0x138] sm:$0xff] %vm15666_vm8, %v2556_v40  ;;  %v12435_v22 = vcombine.low %v2910_v26, %v2915_v11  ;;  %v2711_v19 = vsel %vm12167_vm1, %v8197_v17, %v2710_v62  ;;  %v2712_v15 = vrot.slane %v2710_v62, 4  ;;  %v12441_v27 = vcombine.low %v3187_v54, %v3190_v55  ;;  %v16090_v10 = vld [vmem:[#allocation57_spill] sm:$0xff]  ;;  %v16094_v54 = vld [vmem:[#allocation58_spill] sm:$0xff] }
 0x20b   : > { %2793 = vst.msk [vmem:[#allocation3 + $0x8] sm:$0xff] %vm15665_vm10, %v8200_v7  ;;  %v2655_v4 = vsel %vm12167_vm1, %v8189_v35, %v2654_v21  ;;  %v2656_v63 = vrot.slane %v2654_v21, 4  ;;  %v2916_v32 = vrot.slane %v16088_v57, 6  ;;  %v2917_v61 = vrot.slane %v16089_v38, 7  ;;  %v16092_v7 = vld [vmem:[#allocation111_spill] sm:$0xff]  ;;  %v16095_v2 = vld [vmem:[#allocation98_spill] sm:$0xff] }
 0x20c   : > { %16086 = vst [vmem:[#allocation49_spill] sm:$0xff] %v12435_v22  ;;  %16087 = vst [vmem:[#allocation51_spill] sm:$0xff] %v12441_v27  ;;  %v2714_v0 = vsel %vm12167_vm1, %v2712_v15, %v2713_v44  ;;  %v2920_v25 = vrot.slane %v16090_v10, 6  ;;  %v2921_v17 = vrot.slane %v16091_v9, 7  ;;  %3778 = vrot.lane.b32.xlu0 %v16092_v7, %s9703_s22  ;;  %v2926_v20 = vrot.slane %v16094_v54, 7  ;;  %3305 = vrot.lane.b32.xlu1 %v12310_v33, %s9702_s20  ;;  %v16096_v40 = vld [vmem:[#allocation97_spill] sm:$0xff] }
 0x20d   : > { %3756 = vst.msk [vmem:[#allocation3 + $0x288] sm:$0xff] %vm15665_vm10, %v12435_v22  ;;  %5336 = vst.msk [vmem:[#allocation3 + $0x120] sm:$0xff] %vm15665_vm10, %v12435_v22  ;;  %v12463_v18 = vcombine.low %v2711_v19, %v2714_v0  ;;  %v2658_v50 = vsel %vm12167_vm1, %v2656_v63, %v2657_v42  ;;  %v8198_v62 = vrot.slane %v16095_v2, 10  ;;  %v2918_v44 = vor.u32 %v2917_v61, %v2916_v32  ;;  %v16097_v11 = vld [vmem:[#allocation107_spill] sm:$0xff]  ;;  %v9503_v42 = vld [vmem:[#allocation2 + $0xb0] sm:$0x7]  ;;  %v2560_v0 = vpop.permute.xlu1 %2559 }
 0x20e   : > { %2602 = vst.msk [vmem:[#allocation3 + $0x1a0] sm:$0xff] %vm15666_vm8, %v2558_v31  ;;  %4983 = vst.msk [vmem:[#allocation3 + $0x38] sm:$0xff] %vm15666_vm8, %v2558_v31  ;;  %v12471_v34 = vcombine.low %v2655_v4, %v2658_v50  ;;  %v2922_v35 = vor.u32 %v2921_v17, %v2920_v25  ;;  %v2717_v26 = vrot.slane %v16096_v40, 6  ;;  %v2927_v21 = vor.u32 %v2926_v20, %v16097_v11  ;;  %v16098_v31 = vld [vmem:[#allocation91_spill] sm:$0xff] }
 0x20f   : > { %5650 = vst.msk [vmem:[#allocation3 + $0xc8] sm:$0xff] %vm15665_vm10, %v12441_v27  ;;  %4310 = vst.msk [vmem:[#allocation3 + $0x230] sm:$0xff] %vm15665_vm10, %v12441_v27  ;;  %v2720_v55 = vrot.slane %v9503_v42, 6  ;;  %v8240_v19 = vrot.slane %v12063_v5, 11  ;;  %v3193_v15 = vrot.slane %v12061_v48, 7  ;;  %v2919_v4 = vrot.slane %v2918_v44, 4 }
 0x210   : > { %16093 = vst [vmem:[#allocation93_spill] sm:$0xff] %v12463_v18  ;;  %2806 = vst.msk [vmem:[#allocation3 + $0x550] sm:$0xff] %vm15665_vm10, %v12463_v18  ;;  %v2924_v63 = vrot.slane %v2922_v35, 4  ;;  %v2718_v57 = vsel %vm12167_vm1, %v8198_v62, %v2717_v26  ;;  %v2719_v32 = vrot.slane %v2717_v26, 4  ;;  %3847 = vrot.lane.b32.xlu0 %v16098_v31, %s9702_s20  ;;  %v12491_v10 = vld [vmem:[#allocation2 + $0x68] sm:$0x7]  ;;  %3780 = vrot.lane.b32.xlu1 %v12101_v14, %s9703_s22 }
 0x211   : > { %5022 = vst.msk [vmem:[#allocation3 + $0x3e8] sm:$0xff] %vm15665_vm10, %v12463_v18  ;;  %2798 = vst.msk [vmem:[#allocation3 + $0x210] sm:$0xff] %vm15665_vm10, %v12471_v34  ;;  %v3194_v38 = vsel %vm11577_vm6, %v8240_v19, %v3193_v15  ;;  %v3195_v61 = vrot.slane %v3193_v15, 4  ;;  %v3196_v25 = vrot.slane %v12491_v10, 7  ;;  %v8190_v9 = vrot.slane %v11988_v51, 10 }
 0x212   : > { %5014 = vst.msk [vmem:[#allocation3 + $0xa8] sm:$0xff] %vm15665_vm10, %v12471_v34  ;;  %v2923_v17 = vsel %vm9973_vm9, %v2919_v4, %v2922_v35  ;;  %v2928_v7 = vsel %vm9973_vm9, %v2924_v63, %v2927_v21  ;;  %v2721_v50 = vsel %vm12167_vm1, %v2719_v32, %v2720_v55  ;;  %v2661_v54 = vrot.slane %v11986_v58, 6  ;;  %v9505_v26 = vld [vmem:[#allocation2 + $0xb4] sm:$0xf]  ;;  %v16102_v21 = vld [vmem:[#allocation47_spill] sm:$0xff]  ;;  %v2562_v58 = vpop.permute.xlu0 %2561  ;;  %v16104_v63 = vld [vmem:[#allocation76_spill] sm:$0xff] }
 0x213   : > { %2603 = vst.msk [vmem:[#allocation3 + $0x208] sm:$0xff] %vm15666_vm8, %v2560_v0  ;;  %4984 = vst.msk [vmem:[#allocation3 + $0xa0] sm:$0xff] %vm15666_vm8, %v2560_v0  ;;  %v12506_v20 = vcombine.low %v2923_v17, %v2928_v7  ;;  %v12508_v51 = vcombine.low %v2718_v57, %v2721_v50  ;;  %v3197_v2 = vsel %vm11577_vm6, %v3195_v61, %v3196_v25  ;;  %v2664_v62 = vrot.slane %v12330_v49, 6  ;;  %v9506_v49 = vld [vmem:[#allocation2 + $0xb8] sm:$0xf]  ;;  %v16103_v55 = vld [vmem:[#allocation99_spill] sm:$0xff] }
 0x214   : > { %v12513_v44 = vcombine.low %v3194_v38, %v3197_v2  ;;  %v2662_v35 = vsel %vm12167_vm1, %v8190_v9, %v2661_v54  ;;  %v2663_v40 = vrot.slane %v2661_v54, 4  ;;  %v8199_v11 = vrot.slane %v9505_v26, 10  ;;  %3938 = vrot.lane.b32.xlu0 %v16102_v21, %s9704_s24  ;;  %v12528_v15 = vld [vmem:[#allocation2 + $0x74] sm:$0x7]  ;;  %3849 = vrot.lane.b32.xlu1 %v11911_v43, %s9702_s20  ;;  %2604 = vst.msk [vmem:[#allocation3 + $0x270] sm:$0xff] %vm15666_vm8, %v2562_v58  ;;  %v16106_v61 = vld [vmem:[#allocation72_spill] sm:$0xff] }
 0x215   : > { %16099 = vst [vmem:[#allocation116_spill] sm:$0xff] %v12506_v20  ;;  %16100 = vst [vmem:[#allocation39_spill] sm:$0xff] %v12508_v51  ;;  %v2724_v42 = vrot.slane %v9506_v49, 6  ;;  %v2727_v19 = vrot.slane %v16103_v55, 6  ;;  %v2405_v4 = vshrl.u32 %v12528_v15, 16  ;;  %v2929_v57 = vrot.slane %v16104_v63, 6 }
 0x216   : > { %16101 = vst [vmem:[#allocation41_spill] sm:$0xff] %v12513_v44  ;;  %3757 = vst.msk [vmem:[#allocation3 + $0x2f0] sm:$0xff] %vm15665_vm10, %v12506_v20  ;;  %v2665_v32 = vsel %vm12167_vm1, %v2663_v40, %v2664_v62  ;;  %v16105_v0 = vld [vmem:[#allocation77_spill] sm:$0xff]  ;;  %v2933_v25 = vrot.slane %v16106_v61, 6  ;;  %v16107_v9 = vld [vmem:[#allocation71_spill] sm:$0xff]  ;;  %v8241_v14 = vrot.slane %v12093_v28, 11  ;;  %v2564_v62 = vpop.permute.xlu1 %2563 }
 0x217   : > { %5337 = vst.msk [vmem:[#allocation3 + $0x188] sm:$0xff] %vm15665_vm10, %v12506_v20  ;;  %2807 = vst.msk [vmem:[#allocation3 + $0x5b8] sm:$0xff] %vm15665_vm10, %v12508_v51  ;;  %v2930_v38 = vrot.slane %v16105_v0, 7  ;;  %v2934_v17 = vrot.slane %v16107_v9, 7  ;;  %v12545_v7 = vcombine.low %v2662_v35, %v2665_v32  ;;  %v2725_v50 = vsel %vm12167_vm1, %v8199_v11, %v2724_v42  ;;  %v16108_v49 = vld [vmem:[#allocation79_spill] sm:$0xff]  ;;  %v16109_v28 = vld [vmem:[#allocation40_spill] sm:$0xff] }
 0x218   : > { %5023 = vst.msk [vmem:[#allocation3 + $0x450] sm:$0xff] %vm15665_vm10, %v12508_v51  ;;  %5651 = vst.msk [vmem:[#allocation3 + $0x130] sm:$0xff] %vm15665_vm10, %v12513_v44  ;;  %v2726_v54 = vrot.slane %v2724_v42, 4  ;;  %v2938_v2 = vrot.slane %v2405_v4, 6  ;;  %v2939_v55 = vrot.slane %v16108_v49, 7  ;;  %3078 = vrot.lane.b32.xlu0 %v12320_v30, %s9703_s22  ;;  %v3200_v40 = vrot.slane %v12091_v3, 7  ;;  %3940 = vrot.lane.b32.xlu1 %v16109_v28, %s9704_s24 }
 0x219   : > { %4985 = vst.msk [vmem:[#allocation3 + $0x108] sm:$0xff] %vm15666_vm8, %v2562_v58  ;;  %v2931_v26 = vor.u32 %v2930_v38, %v2929_v57  ;;  %v2935_v58 = vor.u32 %v2934_v17, %v2933_v25  ;;  %v3203_v11 = vrot.slane %v12528_v15, 7  ;;  %v2396_v42 = vrot.slane %v16104_v63, 5  ;;  %2605 = vst.msk [vmem:[#allocation3 + $0x2d8] sm:$0xff] %vm15666_vm8, %v2564_v62 }
 0x21a   : > { %4311 = vst.msk [vmem:[#allocation3 + $0x298] sm:$0xff] %vm15665_vm10, %v12513_v44  ;;  %2799 = vst.msk [vmem:[#allocation3 + $0x278] sm:$0xff] %vm15665_vm10, %v12545_v7  ;;  %v2728_v35 = vsel %vm12167_vm1, %v2726_v54, %v2727_v19  ;;  %v2940_v25 = vor.u32 %v2939_v55, %v2938_v2  ;;  %v3201_v19 = vsel %vm11577_vm6, %v8241_v14, %v3200_v40  ;;  %v3202_v3 = vrot.slane %v3200_v40, 4 }
 0x21b   : > { %5015 = vst.msk [vmem:[#allocation3 + $0x110] sm:$0xff] %vm15665_vm10, %v12545_v7  ;;  %v12566_v57 = vcombine.low %v2725_v50, %v2728_v35  ;;  %v2932_v32 = vrot.slane %v2931_v26, 4  ;;  %v2937_v38 = vrot.slane %v2935_v58, 4  ;;  %v2397_v17 = vrot.slane %v16105_v0, 6  ;;  %v16111_v26 = vld [vmem:[#allocation135_spill] sm:$0xff]  ;;  %v2566_v0 = vpop.permute.xlu0 %2565 }
 0x21c   : > { %4986 = vst.msk [vmem:[#allocation3 + $0x170] sm:$0xff] %vm15666_vm8, %v2564_v62  ;;  %v2400_v63 = vrot.slane %v16106_v61, 5  ;;  %v2401_v2 = vrot.slane %v16107_v9, 6  ;;  %v2407_v14 = vrot.slane %v2405_v4, 5  ;;  %3374 = vrot.lane.b32.xlu0 %v16111_v26, %s9704_s24  ;;  %v3204_v55 = vsel %vm11577_vm6, %v3202_v3, %v3203_v11  ;;  %3080 = vrot.lane.b32.xlu1 %v12367_v56, %s9703_s22  ;;  %2606 = vst.msk [vmem:[#allocation3 + $0x340] sm:$0xff] %vm15666_vm8, %v2566_v0 }
 0x21d   : > { %16110 = vst [vmem:[#allocation43_spill] sm:$0xff] %v12566_v57  ;;  %2808 = vst.msk [vmem:[#allocation3 + $0x620] sm:$0xff] %vm15665_vm10, %v12566_v57  ;;  %v2936_v50 = vsel %vm9973_vm9, %v2932_v32, %v2935_v58  ;;  %v2941_v54 = vsel %vm9973_vm9, %v2937_v38, %v2940_v25  ;;  %v2398_v62 = vor.u32 %v2397_v17, %v2396_v42  ;;  %v2408_v35 = vrot.slane %v16108_v49, 6  ;;  %v12601_v32 = vld [vmem:[#allocation2 + $0x80] sm:$0x7]  ;;  %v16115_v17 = vld [vmem:[#allocation25_spill] sm:$0xff] }
 0x21e   : > { %5024 = vst.msk [vmem:[#allocation3 + $0x4b8] sm:$0xff] %vm15665_vm10, %v12566_v57  ;;  %v12583_v61 = vcombine.low %v2936_v50, %v2941_v54  ;;  %v12592_v4 = vcombine.low %v3201_v19, %v3204_v55  ;;  %v2402_v9 = vor.u32 %v2401_v2, %v2400_v63  ;;  %v8191_v58 = vrot.slane %v12071_v47, 10  ;;  %v16114_v19 = vld [vmem:[#allocation69_spill] sm:$0xff]  ;;  %v16117_v54 = vld [vmem:[#allocation70_spill] sm:$0xff]  ;;  %v16119_v55 = vld [vmem:[#allocation67_spill] sm:$0xff] }
 0x21f   : > { %4987 = vst.msk [vmem:[#allocation3 + $0x1d8] sm:$0xff] %vm15666_vm8, %v2566_v0  ;;  %v2668_v40 = vrot.slane %v12069_v53, 6  ;;  %v2399_v49 = vrot.slane %v2398_v62, 4  ;;  %v2409_v11 = vor.u32 %v2408_v35, %v2407_v14  ;;  %v2671_v42 = vrot.slane %v12416_v45, 6  ;;  %v3093_v45 = vpop.permute.xlu1 %3092  ;;  %v16116_v63 = vld [vmem:[#allocation121_spill] sm:$0xff]  ;;  %v16118_v14 = vld [vmem:[#allocation68_spill] sm:$0xff]  ;;  %v3320_v35 = vpop.permute.xlu0 %3319 }
 0x220   : > { %16112 = vst [vmem:[#allocation42_spill] sm:$0xff] %v12583_v61  ;;  %16113 = vst [vmem:[#allocation44_spill] sm:$0xff] %v12592_v4  ;;  %v2420_v38 = vshrl.u32 %v12601_v32, 16  ;;  %v2404_v53 = vrot.slane %v2402_v9, 4  ;;  %v2942_v3 = vrot.slane %v16114_v19, 6  ;;  %3502 = vrot.lane.b32.xlu0 %v16115_v17, %s9703_s22  ;;  %v2943_v2 = vrot.slane %v16117_v54, 7  ;;  %3376 = vrot.lane.b32.xlu1 %v12075_v59, %s9704_s24 }
 0x221   : > { %3758 = vst.msk [vmem:[#allocation3 + $0x358] sm:$0xff] %vm15665_vm10, %v12583_v61  ;;  %5338 = vst.msk [vmem:[#allocation3 + $0x1f0] sm:$0xff] %vm15665_vm10, %v12583_v61  ;;  %v2669_v47 = vsel %vm12167_vm1, %v8191_v58, %v2668_v40  ;;  %v2670_v25 = vrot.slane %v2668_v40, 4  ;;  %v2403_v50 = vsel %vm11266_vm11, %v2399_v49, %v2402_v9  ;;  %v2946_v0 = vrot.slane %v16118_v14, 6  ;;  %v16120_v49 = vld [vmem:[#allocation73_spill] sm:$0xff] }
 0x222   : > { %5652 = vst.msk [vmem:[#allocation3 + $0x198] sm:$0xff] %vm15665_vm10, %v12592_v4  ;;  %4312 = vst.msk [vmem:[#allocation3 + $0x300] sm:$0xff] %vm15665_vm10, %v12592_v4  ;;  %v2947_v62 = vrot.slane %v16119_v55, 7  ;;  %v2410_v58 = vsel %vm11266_vm11, %v2404_v53, %v2409_v11  ;;  %v2951_v40 = vrot.slane %v2420_v38, 6  ;;  %v2952_v13 = vrot.slane %v16120_v49, 7  ;;  %v16123_v53 = vld [vmem:[#allocation127_spill] sm:$0xff] }
 0x223   : > { %3128 = vst.msk [vmem:[#allocation3 + $0x4e8] sm:$0xff] %vm15673_vm7, %v3093_v45  ;;  %5065 = vst.msk [vmem:[#allocation3 + $0x380] sm:$0xff] %vm15673_vm7, %v3093_v45  ;;  %v2672_v9 = vsel %vm12167_vm1, %v2670_v25, %v2671_v42  ;;  %v12629_v57 = vcombine.low %v2403_v50, %v2410_v58  ;;  %v2944_v56 = vor.u32 %v2943_v2, %v2942_v3  ;;  %v8242_v30 = vrot.slane %v12085_v60, 11  ;;  %v3389_v25 = vpop.permute.xlu1 %3388  ;;  %v16124_v3 = vld [vmem:[#allocation24_spill] sm:$0xff] }
 0x224   : > { %3355 = vst.msk [vmem:[#allocation3 + $0x4e8] sm:$0xff] %vm15670_vm3, %v3320_v35  ;;  %5103 = vst.msk [vmem:[#allocation3 + $0x380] sm:$0xff] %vm15670_vm3, %v3320_v35  ;;  %v12631_v51 = vcombine.low %v2669_v47, %v2672_v9  ;;  %v2948_v45 = vor.u32 %v2947_v62, %v2946_v0  ;;  %v2953_v18 = vor.u32 %v2952_v13, %v2951_v40  ;;  %v3207_v11 = vrot.slane %v12083_v24, 7  ;;  %v2574_v62 = vpop.permute.xlu0 %2573 }
 0x225   : > { %16121 = vst [vmem:[#allocation131_spill] sm:$0xff] %v12629_v57  ;;  %v3210_v42 = vrot.slane %v12601_v32, 7  ;;  %3584 = vrot.lane.b32.xlu0 %v16123_v53, %s9702_s20  ;;  %4596 = vst.msk [vmem:[#allocation3 + $0x2a0] sm:$0xff] %vm15665_vm10, %v12629_v57  ;;  %v2945_v13 = vrot.slane %v2944_v56, 4  ;;  %v2411_v60 = vrot.slane %v16114_v19, 5  ;;  %v2412_v24 = vrot.slane %v16117_v54, 6  ;;  %3504 = vrot.lane.b32.xlu1 %v16124_v3, %s9703_s22 }
 0x226   : > { %16122 = vst [vmem:[#allocation109_spill] sm:$0xff] %v12631_v51  ;;  %2800 = vst.msk [vmem:[#allocation3 + $0x2e0] sm:$0xff] %vm15665_vm10, %v12631_v51  ;;  %v2950_v47 = vrot.slane %v2948_v45, 4  ;;  %v3208_v50 = vsel %vm11577_vm6, %v8242_v30, %v3207_v11  ;;  %v3209_v2 = vrot.slane %v3207_v11, 4  ;;  %v2415_v0 = vrot.slane %v16118_v14, 5  ;;  %v16127_v11 = vld [vmem:[#allocation128_spill] sm:$0xff] }
 0x227   : > { %5016 = vst.msk [vmem:[#allocation3 + $0x178] sm:$0xff] %vm15665_vm10, %v12631_v51  ;;  %v2416_v56 = vrot.slane %v16119_v55, 6  ;;  %v2949_v19 = vsel %vm9973_vm9, %v2945_v13, %v2948_v45  ;;  %v2413_v35 = vor.u32 %v2412_v24, %v2411_v60  ;;  %v2422_v58 = vrot.slane %v2420_v38, 5 }
 0x228   : > { %3424 = vst.msk [vmem:[#allocation3 + $0x4e8] sm:$0xff] %vm15666_vm8, %v3389_v25  ;;  %5136 = vst.msk [vmem:[#allocation3 + $0x380] sm:$0xff] %vm15666_vm8, %v3389_v25  ;;  %v2954_v54 = vsel %vm9973_vm9, %v2950_v47, %v2953_v18  ;;  %v3211_v30 = vsel %vm11577_vm6, %v3209_v2, %v3210_v42  ;;  %v2423_v55 = vrot.slane %v16120_v49, 6  ;;  %v8192_v38 = vrot.slane %v12063_v5, 10  ;;  %v3069_v25 = vpop.permute.xlu1 %3068  ;;  %v12678_v47 = vld [vmem:[#allocation2 + $0x8c] sm:$0x7] }
 0x229   : > { %2610 = vst.msk [vmem:[#allocation3 + $0x4e0] sm:$0xff] %vm15666_vm8, %v2574_v62  ;;  %4991 = vst.msk [vmem:[#allocation3 + $0x378] sm:$0xff] %vm15666_vm8, %v2574_v62  ;;  %v12660_v9 = vcombine.low %v2949_v19, %v2954_v54  ;;  %v2417_v14 = vor.u32 %v2416_v56, %v2415_v0  ;;  %3658 = vrot.lane.b32.xlu0 %v12337_v39, %s9704_s24  ;;  %v12667_v40 = vcombine.low %v3208_v50, %v3211_v30  ;;  %v16128_v50 = vld [vmem:[#allocation88_spill] sm:$0xff]  ;;  %v16129_v56 = vld [vmem:[#allocation89_spill] sm:$0xff] }
 0x22a   : > { %v2414_v18 = vrot.slane %v2413_v35, 4  ;;  %v2675_v45 = vrot.slane %v12061_v48, 6  ;;  %3586 = vrot.lane.b32.xlu1 %v16127_v11, %s9702_s20  ;;  %v2424_v42 = vor.u32 %v2423_v55, %v2422_v58  ;;  %v2678_v13 = vrot.slane %v12491_v10, 6  ;;  %3116 = vst.msk [vmem:[#allocation3 + $0x8] sm:$0xff] %vm15673_vm7, %v3069_v25  ;;  %v3296_v48 = vpop.permute.xlu0 %3295  ;;  %v16130_v19 = vld [vmem:[#allocation83_spill] sm:$0xff]  ;;  %v16131_v35 = vld [vmem:[#allocation82_spill] sm:$0xff] }
 0x22b   : > { %16125 = vst [vmem:[#allocation123_spill] sm:$0xff] %v12660_v9  ;;  %16126 = vst [vmem:[#allocation59_spill] sm:$0xff] %v12667_v40  ;;  %v2419_v49 = vrot.slane %v2417_v14, 4  ;;  %v2435_v5 = vshrl.u32 %v12678_v47, 16  ;;  %v2955_v2 = vrot.slane %v16128_v50, 6  ;;  %v2956_v62 = vrot.slane %v16129_v56, 7 }
 0x22c   : > { %3759 = vst.msk [vmem:[#allocation3 + $0x3c0] sm:$0xff] %vm15665_vm10, %v12660_v9  ;;  %5339 = vst.msk [vmem:[#allocation3 + $0x258] sm:$0xff] %vm15665_vm10, %v12660_v9  ;;  %v2418_v60 = vsel %vm11266_vm11, %v2414_v18, %v2417_v14  ;;  %v2676_v24 = vsel %vm12167_vm1, %v8192_v38, %v2675_v45  ;;  %v2677_v10 = vrot.slane %v2675_v45, 4  ;;  %v2959_v54 = vrot.slane %v16130_v19, 6  ;;  %v9296_v14 = vld [vmem:[#allocation7 + $0x80] sm:$0xff]   ;;  %v16135_v11 = vld [vmem:[#allocation137_spill] sm:$0xff] }
 0x22d   : > { %5653 = vst.msk [vmem:[#allocation3 + $0x200] sm:$0xff] %vm15665_vm10, %v12667_v40  ;;  %4313 = vst.msk [vmem:[#allocation3 + $0x368] sm:$0xff] %vm15665_vm10, %v12667_v40  ;;  %v2425_v0 = vsel %vm11266_vm11, %v2419_v49, %v2424_v42  ;;  %v2960_v58 = vrot.slane %v16131_v35, 7  ;;  %3307 = vrot.lane.b32.xlu0 %v12362_v36, %s9702_s20  ;;  %v2964_v38 = vrot.slane %v2435_v5, 6  ;;  %v16133_v45 = vld [vmem:[#allocation87_spill] sm:$0xff]  ;;  %v3365_v49 = vpop.permute.xlu1 %3364  ;;  %v9297_v42 = vld [vmem:[#allocation7 + $0xc8] sm:$0xff]   ;;  %v2957_v16 = vor.u32 %v2956_v62, %v2955_v2 }
 0x22e   : > { %3343 = vst.msk [vmem:[#allocation3 + $0x8] sm:$0xff] %vm15670_vm3, %v3296_v48  ;;  %v12699_v55 = vcombine.low %v2418_v60, %v2425_v0  ;;  %v2679_v18 = vsel %vm12167_vm1, %v2677_v10, %v2678_v13  ;;  %v2965_v25 = vrot.slane %v16133_v45, 7  ;;  %3660 = vrot.lane.b32.xlu1 %v12397_v1, %s9704_s24  ;;  %v8243_v3 = vrot.slane %v16135_v11, 11  ;;  %v16136_v10 = vld [vmem:[#allocation136_spill] sm:$0xff]  ;;  %v3095_v28 = vpop.permute.xlu0 %3094 }
 0x22f   : > { %v5822_v30 = vld [vmem:[#allocation3 + $0x4e8] sm:$0xff]  ;;  %v12706_v48 = vcombine.low %v2676_v24, %v2679_v18  ;;  %v2961_v52 = vor.u32 %v2960_v58, %v2959_v54  ;;  %3412 = vst.msk [vmem:[#allocation3 + $0x8] sm:$0xff] %vm15666_vm8, %v3365_v49  ;;  %v3214_v0 = vrot.slane %v16136_v10, 7  ;;  %v3217_v1 = vrot.slane %v12678_v47, 7  ;;  %v9510_v49 = vld [vmem:[#allocation2 + $0x6c] sm:$0xf] }
 0x230   : > { %16132 = vst [vmem:[#allocation60_spill] sm:$0xff] %v12699_v55  ;;  %6840 = vmatprep.mubr.bf16.mxu1 %v5822_v30  ;;  %v5821_v60 = vld [vmem:[#allocation3 + $0x4e0] sm:$0xff]  ;;  %4597 = vst.msk [vmem:[#allocation3 + $0x308] sm:$0xff] %vm15665_vm10, %v12699_v55  ;;  %v2966_v13 = vor.u32 %v2965_v25, %v2964_v38  ;;  %v2426_v30 = vrot.slane %v16128_v50, 5  ;;  %v2958_v11 = vrot.slane %v2957_v16, 4  ;;  %v2427_v2 = vrot.slane %v16129_v56, 6 }
 0x231   : > { %16134 = vst [vmem:[#allocation63_spill] sm:$0xff] %v12706_v48  ;;  %6841 = vmatmul.mubr.bf16.vlgmr.msra.gmra.mrb[0].mxu1 %v5821_v60  ;;  %2801 = vst.msk [vmem:[#allocation3 + $0x348] sm:$0xff] %vm15665_vm10, %v12706_v48  ;;  %v2963_v24 = vrot.slane %v2961_v52, 4  ;;  %v2430_v62 = vrot.slane %v16130_v19, 5  ;;  %3782 = vrot.lane.b32.xlu0 %v12260_v12, %s9703_s22  ;;  %v9298_v50 = vld [vmem:[#allocation7 + $0x88] sm:$0xff]   ;;  %v3215_v54 = vsel %vm11577_vm6, %v8243_v3, %v3214_v0  ;;  %v3216_v58 = vrot.slane %v3214_v0, 4  ;;  %v3322_v56 = vpop.permute.xlu1 %3321 }
 0x232   : > { %5017 = vst.msk [vmem:[#allocation3 + $0x1e0] sm:$0xff] %vm15665_vm10, %v12706_v48  ;;  %8559 = vmatpush3.bf16.msra.mxu1 %v9296_v14  ;;  %v2431_v16 = vrot.slane %v16131_v35, 6  ;;  %v2437_v18 = vrot.slane %v2435_v5, 5  ;;  %3309 = vrot.lane.b32.xlu1 %v12441_v27, %s9702_s20  ;;  %v9299_v19 = vld [vmem:[#allocation7 + $0xd0] sm:$0xff]   ;;  %v2962_v38 = vsel %vm9973_vm9, %v2958_v11, %v2961_v52  ;;  %v2428_v14 = vor.u32 %v2427_v2, %v2426_v30  ;;  %v3391_v60 = vpop.permute.xlu0 %3390  ;;  %v9511_v0 = vld [vmem:[#allocation2 + $0x70] sm:$0xf] }
 0x233   : > { %3129 = vst.msk [vmem:[#allocation3 + $0x550] sm:$0xff] %vm15673_vm7, %v3095_v28  ;;  %5066 = vst.msk [vmem:[#allocation3 + $0x3e8] sm:$0xff] %vm15673_vm7, %v3095_v28  ;;  %8560 = vmatprep.subr.bf16.mxu1 %v9297_v42  ;;  %v2967_v28 = vsel %vm9973_vm9, %v2963_v24, %v2966_v13  ;;  %v2438_v25 = vrot.slane %v16133_v45, 6  ;;  %v3218_v5 = vsel %vm11577_vm6, %v3216_v58, %v3217_v1  ;;  %v8193_v42 = vrot.slane %v9510_v49, 10  ;;  %v9300_v45 = vld [vmem:[#allocation7 + $0x90] sm:$0xff]  }
 0x234   : > { %3356 = vst.msk [vmem:[#allocation3 + $0x550] sm:$0xff] %vm15670_vm3, %v3322_v56  ;;  %5104 = vst.msk [vmem:[#allocation3 + $0x3e8] sm:$0xff] %vm15670_vm3, %v3322_v56  ;;  %v12737_v3 = vcombine.low %v2962_v38, %v2967_v28  ;;  %v2432_v35 = vor.u32 %v2431_v16, %v2430_v62  ;;  %v12741_v52 = vcombine.low %v3215_v54, %v3218_v5  ;;  %v2429_v10 = vrot.slane %v2428_v14, 4  ;;  %v9512_v24 = vld [vmem:[#allocation2 + $0x78] sm:$0xf] }
 0x235   : > { %v2439_v13 = vor.u32 %v2438_v25, %v2437_v18  ;;  %v2682_v30 = vrot.slane %v9511_v0, 6  ;;  %3851 = vrot.lane.b32.xlu0 %v12002_v23, %s9702_s20  ;;  %3425 = vst.msk [vmem:[#allocation3 + $0x550] sm:$0xff] %vm15666_vm8, %v3391_v60  ;;  %5137 = vst.msk [vmem:[#allocation3 + $0x3e8] sm:$0xff] %vm15666_vm8, %v3391_v60  ;;  %v2685_v11 = vrot.slane %v12528_v15, 6  ;;  %v8194_v2 = vrot.slane %v9512_v24, 10  ;;  %v2576_v58 = vpop.permute.xlu1 %2575 }
 0x236   : > { %16137 = vst [vmem:[#allocation61_spill] sm:$0xff] %v12737_v3  ;;  %16138 = vst [vmem:[#allocation64_spill] sm:$0xff] %v12741_v52  ;;  %8561 = vmatpush3.bf16.msra.mxu1 %v9298_v50  ;;  %v2434_v1 = vrot.slane %v2432_v35, 4  ;;  %v9513_v62 = vld [vmem:[#allocation2 + $0x7c] sm:$0xf]  ;;  %3784 = vrot.lane.b32.xlu1 %v12310_v33, %s9703_s22  ;;  %v5666_v16 = vld [vmem:[#allocation3 + $0x8] sm:$0xff]  ;;  %v2433_v15 = vsel %vm11266_vm11, %v2429_v10, %v2432_v35  ;;  %v3071_v49 = vpop.permute.xlu0 %3070 }
 0x237   : > { %3760 = vst.msk [vmem:[#allocation3 + $0x428] sm:$0xff] %vm15665_vm10, %v12737_v3  ;;  %5340 = vst.msk [vmem:[#allocation3 + $0x2c0] sm:$0xff] %vm15665_vm10, %v12737_v3  ;;  %v2689_v54 = vrot.slane %v9513_v62, 6  ;;  %8562 = vmatprep.subr.bf16.mxu1 %v9299_v19  ;;  %v9301_v50 = vld [vmem:[#allocation7 + $0xd8] sm:$0xff]   ;;  %v2683_v18 = vsel %vm12167_vm1, %v8193_v42, %v2682_v30  ;;  %v2684_v56 = vrot.slane %v2682_v30, 4  ;;  %v2692_v38 = vrot.slane %v12601_v32, 6  ;;  %6744 = vmatprep.mubr.bf16.mxu0 %v5666_v16 }
 0x238   : > { %5654 = vst.msk [vmem:[#allocation3 + $0x268] sm:$0xff] %vm15665_vm10, %v12741_v52  ;;  %4314 = vst.msk [vmem:[#allocation3 + $0x3d0] sm:$0xff] %vm15665_vm10, %v12741_v52  ;;  %v5665_v19 = vld [vmem:[#allocation3] sm:$0xff]  ;;  %v2440_v28 = vsel %vm11266_vm11, %v2434_v1, %v2439_v13  ;;  %v16140_v32 = vld [vmem:[#allocation62_spill] sm:$0xff] }
 0x239   : > { %2611 = vst.msk [vmem:[#allocation3 + $0x548] sm:$0xff] %vm15666_vm8, %v2576_v58  ;;  %4992 = vst.msk [vmem:[#allocation3 + $0x3e0] sm:$0xff] %vm15666_vm8, %v2576_v58  ;;  %v2690_v14 = vsel %vm12167_vm1, %v8194_v2, %v2689_v54  ;;  %v2691_v25 = vrot.slane %v2689_v54, 4  ;;  %6745 = vmatmul.mubr.bf16.vlgmr.msra.gmra.mrb[0].mxu0 %v5665_v19  ;;  %v12769_v5 = vcombine.low %v2433_v15, %v2440_v28  ;;  %3942 = vrot.lane.b32.xlu0 %v16140_v32, %s9704_s24  ;;  %v3298_v10 = vpop.permute.xlu1 %3297  ;;  %v9302_v13 = vld [vmem:[#allocation7 + $0x98] sm:$0xff]   ;;  %v9303_v30 = vld [vmem:[#allocation7 + $0xe0] sm:$0xff]  }
 0x23a   : > { %v2686_v35 = vsel %vm12167_vm1, %v2684_v56, %v2685_v11  ;;  %8563 = vmatpush3.bf16.msra.mxu1 %v9300_v45  ;;  %3853 = vrot.lane.b32.xlu1 %v16111_v26, %s9702_s20  ;;  %3117 = vst.msk [vmem:[#allocation3 + $0x70] sm:$0xff] %vm15673_vm7, %v3071_v49  ;;  %v3367_v1 = vpop.permute.xlu0 %3366  ;;  %v16143_v11 = vld [vmem:[#allocation55_spill] sm:$0xff]  ;;  %v9305_v54 = vld [vmem:[#allocation7 + $0xe8] sm:$0xff]   ;;  %v16162_v33 = vld [vmem:[#allocation106_spill] sm:$0xff] }
 0x23b   : > { %16139 = vst [vmem:[#allocation126_spill] sm:$0xff] %v12769_v5  ;;  %v12775_v42 = vcombine.low %v2683_v18, %v2686_v35  ;;  %v2693_v60 = vsel %vm12167_vm1, %v2691_v25, %v2692_v38  ;;  %8564 = vmatprep.subr.bf16.mxu1 %v9301_v50  ;;  %4598 = vst.msk [vmem:[#allocation3 + $0x370] sm:$0xff] %vm15665_vm10, %v12769_v5  ;;  %v9304_v62 = vld [vmem:[#allocation7 + $0xa0] sm:$0xff]   ;;  %v16144_v58 = vld [vmem:[#allocation33_spill] sm:$0xff] }
 0x23c   : > { %v12784_v0 = vcombine.low %v2690_v14, %v2693_v60  ;;  %3344 = vst.msk [vmem:[#allocation3 + $0x70] sm:$0xff] %vm15670_vm3, %v3298_v10  ;;  %v5835_v45 = vld [vmem:[#allocation3 + $0x550] sm:$0xff]  ;;  %v9306_v15 = vld [vmem:[#allocation7 + $0xa8] sm:$0xff]   ;;  %v9514_v18 = vld [vmem:[#allocation2 + $0x88] sm:$0xf]  ;;  %v2699_v60 = vrot.slane %v12678_v47, 6 }
 0x23d   : > { %16141 = vst [vmem:[#allocation133_spill] sm:$0xff] %v12775_v42  ;;  %2802 = vst.msk [vmem:[#allocation3 + $0x3b0] sm:$0xff] %vm15665_vm10, %v12775_v42  ;;  %3082 = vrot.lane.b32.xlu0 %v12435_v22, %s9703_s22  ;;  %6848 = vmatprep.mubr.bf16.mxu1 %v5835_v45  ;;  %v3097_v24 = vpop.permute.xlu1 %3096  ;;  %v2696_v56 = vrot.slane %v9514_v18, 6  ;;  %v9307_v38 = vld [vmem:[#allocation7 + $0xf0] sm:$0xff]   ;;  %v16145_v19 = vld [vmem:[#allocation35_spill] sm:$0xff] }
 0x23e   : > { %16142 = vst [vmem:[#allocation52_spill] sm:$0xff] %v12784_v0  ;;  %5018 = vst.msk [vmem:[#allocation3 + $0x248] sm:$0xff] %vm15665_vm10, %v12775_v42  ;;  %3944 = vrot.lane.b32.xlu1 %v16143_v11, %s9704_s24  ;;  %8565 = vmatpush3.bf16.msra.mxu1 %v9302_v13  ;;  %v3324_v16 = vpop.permute.xlu0 %3323  ;;  %v9515_v25 = vld [vmem:[#allocation2 + $0x84] sm:$0xf]  ;;  %v16146_v10 = vld [vmem:[#allocation34_spill] sm:$0xff] }
 0x23f   : > { %2803 = vst.msk [vmem:[#allocation3 + $0x418] sm:$0xff] %vm15665_vm10, %v12784_v0  ;;  %5019 = vst.msk [vmem:[#allocation3 + $0x2b0] sm:$0xff] %vm15665_vm10, %v12784_v0  ;;  %8566 = vmatprep.subr.bf16.mxu1 %v9303_v30  ;;  %v8195_v35 = vrot.slane %v9515_v25, 10  ;;  %v2698_v49 = vrot.slane %v2696_v56, 4  ;;  %v5678_v13 = vld [vmem:[#allocation3 + $0x68] sm:$0xff]  ;;  %v9308_v45 = vld [vmem:[#allocation7 + $0xb0] sm:$0xff]  }
 0x240   : > { %3413 = vst.msk [vmem:[#allocation3 + $0x70] sm:$0xff] %vm15666_vm8, %v3367_v1  ;;  %v5834_v2 = vld [vmem:[#allocation3 + $0x548] sm:$0xff]  ;;  %v9309_v47 = vld [vmem:[#allocation7 + $0xf8] sm:$0xff]  }
 0x241   : > { %3130 = vst.msk [vmem:[#allocation3 + $0x5b8] sm:$0xff] %vm15673_vm7, %v3097_v24  ;;  %5067 = vst.msk [vmem:[#allocation3 + $0x450] sm:$0xff] %vm15673_vm7, %v3097_v24  ;;  %6849 = vmatmul.mubr.bf16.gmra.mrb[4].mxu1 %v5834_v2  ;;  %3378 = vrot.lane.b32.xlu0 %v16144_v58, %s9704_s24  ;;  %v3393_v50 = vpop.permute.xlu1 %3392  ;;  %v2697_v1 = vsel %vm12167_vm1, %v8195_v35, %v2696_v56  ;;  %v2700_v24 = vsel %vm12167_vm1, %v2698_v49, %v2699_v60  ;;  %v9310_v18 = vld [vmem:[#allocation7 + $0xb8] sm:$0xff]   ;;  %v5691_v35 = vld [vmem:[#allocation3 + $0xd0] sm:$0xff] }
 0x242   : > { %3084 = vrot.lane.b32.xlu1 %v12506_v20, %s9703_s22  ;;  %3357 = vst.msk [vmem:[#allocation3 + $0x5b8] sm:$0xff] %vm15670_vm3, %v3324_v16  ;;  %5105 = vst.msk [vmem:[#allocation3 + $0x450] sm:$0xff] %vm15670_vm3, %v3324_v16  ;;  %8567 = vmatpush3.bf16.msra.mxu1 %v9304_v62  ;;  %v2578_v28 = vpop.permute.xlu0 %2577  ;;  %v12822_v2 = vcombine.low %v2697_v1, %v2700_v24  ;;  %v16148_v62 = vld [vmem:[#allocation129_spill] sm:$0xff]  ;;  %v16149_v16 = vld [vmem:[#allocation26_spill] sm:$0xff] }
 0x243   : > { %3426 = vst.msk [vmem:[#allocation3 + $0x5b8] sm:$0xff] %vm15666_vm8, %v3393_v50  ;;  %5138 = vst.msk [vmem:[#allocation3 + $0x450] sm:$0xff] %vm15666_vm8, %v3393_v50  ;;  %8568 = vmatprep.subr.bf16.mxu1 %v9305_v54  ;;  %v16153_v1 = vld [vmem:[#allocation134_spill] sm:$0xff] }
 0x244   : > { %2612 = vst.msk [vmem:[#allocation3 + $0x5b0] sm:$0xff] %vm15666_vm8, %v2578_v28  ;;  %4993 = vst.msk [vmem:[#allocation3 + $0x448] sm:$0xff] %vm15666_vm8, %v2578_v28  ;;  %v16150_v28 = vld [vmem:[#allocation130_spill] sm:$0xff] }
 0x245   : > { %3506 = vrot.lane.b32.xlu0 %v16145_v19, %s9703_s22  ;;  %v3073_v30 = vpop.permute.xlu1 %3072  ;;  %16147 = vst [vmem:[#allocation53_spill] sm:$0xff] %v12822_v2  ;;  %2804 = vst.msk [vmem:[#allocation3 + $0x480] sm:$0xff] %vm15665_vm10, %v12822_v2 }
 0x246   : > { %3380 = vrot.lane.b32.xlu1 %v16146_v10, %s9704_s24  ;;  %8569 = vmatpush3.bf16.msra.mxu1 %v9306_v15  ;;  %3118 = vst.msk [vmem:[#allocation3 + $0xd8] sm:$0xff] %vm15673_vm7, %v3073_v30  ;;  %v3300_v54 = vpop.permute.xlu0 %3299  ;;  %v16152_v30 = vld [vmem:[#allocation54_spill] sm:$0xff] }
 0x247   : > { %v5679_v14 = vld [vmem:[#allocation3 + $0x70] sm:$0xff]  ;;  %8570 = vmatprep.subr.bf16.mxu1 %v9307_v38  ;;  %3345 = vst.msk [vmem:[#allocation3 + $0xd8] sm:$0xff] %vm15670_vm3, %v3300_v54 }
 0x248   : > { %6752 = vmatprep.mubr.bf16.mxu0 %v5679_v14  ;;  %5020 = vst.msk [vmem:[#allocation3 + $0x318] sm:$0xff] %vm15665_vm10, %v12822_v2  ;;  %v16154_v54 = vld [vmem:[#allocation37_spill] sm:$0xff] }
 0x249   : > { %6753 = vmatmul.mubr.bf16.gmra.mrb[4].mxu0 %v5678_v13  ;;  %3588 = vrot.lane.b32.xlu0 %v16148_v62, %s9702_s20  ;;  %v3369_v15 = vpop.permute.xlu1 %3368  ;;  %v16151_v13 = vld [vmem:[#allocation66_spill] sm:$0xff] }
 0x24a   : > { %3508 = vrot.lane.b32.xlu1 %v16149_v16, %s9703_s22  ;;  %v5848_v50 = vld [vmem:[#allocation3 + $0x5b8] sm:$0xff]  ;;  %8571 = vmatpush3.bf16.msra.mxu1 %v9308_v45  ;;  %3414 = vst.msk [vmem:[#allocation3 + $0xd8] sm:$0xff] %vm15666_vm8, %v3369_v15  ;;  %v3099_v56 = vpop.permute.xlu0 %3098 }
 0x24b   : > { %6856 = vmatprep.mubr.bf16.mxu1 %v5848_v50  ;;  %8572 = vmatprep.subr.bf16.mxu1 %v9309_v47  ;;  %v5847_v38 = vld [vmem:[#allocation3 + $0x5b0] sm:$0xff]  ;;  %3131 = vst.msk [vmem:[#allocation3 + $0x620] sm:$0xff] %vm15673_vm7, %v3099_v56  ;;  %5068 = vst.msk [vmem:[#allocation3 + $0x4b8] sm:$0xff] %vm15673_vm7, %v3099_v56 }
 0x24c   : > { %6857 = vmatmul.mubr.bf16.gmra.mrb[8].mxu1 %v5847_v38 }
 0x24d   : > { %3662 = vrot.lane.b32.xlu0 %v12471_v34, %s9704_s24  ;;  %v3326_v14 = vpop.permute.xlu1 %3325 }
 0x24e   : > { %3590 = vrot.lane.b32.xlu1 %v16150_v28, %s9702_s20  ;;  %8573 = vmatpush3.bf16.msra.mxu1 %v9310_v18  ;;  %3358 = vst.msk [vmem:[#allocation3 + $0x620] sm:$0xff] %vm15670_vm3, %v3326_v14  ;;  %5106 = vst.msk [vmem:[#allocation3 + $0x4b8] sm:$0xff] %vm15670_vm3, %v3326_v14 }
 0x251   : > { %3311 = vrot.lane.b32.xlu0 %v12513_v44, %s9702_s20  ;;  %v5692_v25 = vld [vmem:[#allocation3 + $0xd8] sm:$0xff]  ;;  %v2580_v49 = vpop.permute.xlu1 %2579 }
 0x252   : > { %3664 = vrot.lane.b32.xlu1 %v12545_v7, %s9704_s24  ;;  %6760 = vmatprep.mubr.bf16.mxu0 %v5692_v25  ;;  %2613 = vst.msk [vmem:[#allocation3 + $0x618] sm:$0xff] %vm15666_vm8, %v2580_v49  ;;  %4994 = vst.msk [vmem:[#allocation3 + $0x4b0] sm:$0xff] %vm15666_vm8, %v2580_v49 }
 0x253   : > { %6761 = vmatmul.mubr.bf16.gmra.mrb[8].mxu0 %v5691_v35 }
 0x255   : > { %3786 = vrot.lane.b32.xlu0 %v12362_v36, %s9703_s22  ;;  %v3302_v60 = vpop.permute.xlu1 %3301  ;;  %v9316_v36 = vld [vmem:[#allocation7 + $0x110] sm:$0xff]  }
 0x256   : > { %3313 = vrot.lane.b32.xlu1 %v12592_v4, %s9702_s20 }
 0x259   : > { %3855 = vrot.lane.b32.xlu0 %v12075_v59, %s9702_s20  ;;  %v3777_v45 = vpop.permute.xlu1 %3776  ;;  %v5860_v18 = vld [vmem:[#allocation3 + $0x618] sm:$0xff] }
 0x25a   : > { %2567 = vrot.lane.b32.xlu1 %v12629_v57, %s9704_s24  ;;  %3824 = vst.msk [vmem:[#allocation3 + $0x18] sm:$0xff] %vm15673_vm7, %v3777_v45  ;;  %v16156_v45 = vld [vmem:[#allocation48_spill] sm:$0xff] }
 0x25c   : > { %v3395_v24 = vpop.permute.xlu0 %3394 }
 0x25d   : > { %3946 = vrot.lane.b32.xlu0 %v16151_v13, %s9704_s24  ;;  %3427 = vst.msk [vmem:[#allocation3 + $0x620] sm:$0xff] %vm15666_vm8, %v3395_v24  ;;  %5139 = vst.msk [vmem:[#allocation3 + $0x4b8] sm:$0xff] %vm15666_vm8, %v3395_v24  ;;  %v3846_v47 = vpop.permute.xlu1 %3845 }
 0x25e   : > { %3510 = vrot.lane.b32.xlu1 %v16152_v30, %s9703_s22  ;;  %3893 = vst.msk [vmem:[#allocation3 + $0x18] sm:$0xff] %vm15670_vm3, %v3846_v47 }
 0x260   : > { %v3075_v50 = vpop.permute.xlu0 %3074 }
 0x261   : > { %3086 = vrot.lane.b32.xlu0 %v12583_v61, %s9703_s22  ;;  %3119 = vst.msk [vmem:[#allocation3 + $0x140] sm:$0xff] %vm15673_vm7, %v3075_v50  ;;  %v5704_v50 = vld [vmem:[#allocation3 + $0x138] sm:$0xff] }
 0x262   : > { %3592 = vrot.lane.b32.xlu1 %v16153_v1, %s9702_s20  ;;  %3346 = vst.msk [vmem:[#allocation3 + $0x140] sm:$0xff] %vm15670_vm3, %v3302_v60  ;;  %v16155_v60 = vld [vmem:[#allocation65_spill] sm:$0xff] }
 0x264   : > { %v3371_v56 = vpop.permute.xlu0 %3370  ;;  %v5861_v38 = vld [vmem:[#allocation3 + $0x620] sm:$0xff] }
 0x265   : > { %3382 = vrot.lane.b32.xlu0 %v16154_v54, %s9704_s24  ;;  %3415 = vst.msk [vmem:[#allocation3 + $0x140] sm:$0xff] %vm15666_vm8, %v3371_v56  ;;  %6864 = vmatprep.mubr.bf16.mxu1 %v5861_v38 }
 0x266   : > { %3666 = vrot.lane.b32.xlu1 %v12631_v51, %s9704_s24  ;;  %v3937_v15 = vpop.permute.xlu1 %3936  ;;  %6865 = vmatmul.mubr.bf16.gmra.mrb[12].mxu1 %v5860_v18  ;;  %v16157_v18 = vld [vmem:[#allocation81_spill] sm:$0xff] }
 0x267   : > { %3984 = vst.msk [vmem:[#allocation3 + $0x18] sm:$0xff] %vm15666_vm8, %v3937_v15 }
 0x269   : > { %3788 = vrot.lane.b32.xlu0 %v12441_v27, %s9703_s22 }
 0x26a   : > { %3315 = vrot.lane.b32.xlu1 %v12667_v40, %s9702_s20  ;;  %v3077_v14 = vpop.permute.xlu1 %3076 }
 0x26b   : > { %3120 = vst.msk [vmem:[#allocation3 + $0x1a8] sm:$0xff] %vm15673_vm7, %v3077_v14  ;;  %5057 = vst.msk [vmem:[#allocation3 + $0x40] sm:$0xff] %vm15673_vm7, %v3077_v14  ;;  %v16158_v14 = vld [vmem:[#allocation138_spill] sm:$0xff] }
 0x26c   : > { %v3499_v25 = vpop.permute.xlu0 %3498  ;;  %v5705_v47 = vld [vmem:[#allocation3 + $0x140] sm:$0xff] }
 0x26d   : > { %3857 = vrot.lane.b32.xlu0 %v16144_v58, %s9702_s20  ;;  %3546 = vst.msk [vmem:[#allocation3 + $0x10] sm:$0xff] %vm15673_vm7, %v3499_v25  ;;  %6768 = vmatprep.mubr.bf16.mxu0 %v5705_v47  ;;  %v739_v58 = vld [vmem:[#allocation2 + $0xe0] sm:$0x3] }
 0x26e   : > { %2569 = vrot.lane.b32.xlu1 %v12699_v55, %s9704_s24  ;;  %v3373_v35 = vpop.permute.xlu1 %3372  ;;  %v5668_v49 = vld [vmem:[#allocation3 + $0x18] sm:$0xff]  ;;  %6769 = vmatmul.mubr.bf16.gmra.mrb[12].mxu0 %v5704_v50  ;;  %v9311_v50 = vld [vmem:[#allocation7 + $0x140] sm:$0xff]  }
 0x26f   : > { %6905 = vmatprep.mubr.bf16.mxu1 %v5668_v49  ;;  %8670 = vmatprep.subr.bf16.mxu0 %v9311_v50  ;;  %v16160_v50 = vld [vmem:[#allocation112_spill] sm:$0xff] }
 0x270   : > { %v3581_v24 = vpop.permute.xlu0 %3580 }
 0x271   : > { %3948 = vrot.lane.b32.xlu0 %v16155_v60, %s9704_s24  ;;  %3628 = vst.msk [vmem:[#allocation3 + $0x10] sm:$0xff] %vm15670_vm3, %v3581_v24 }
 0x272   : > { %3512 = vrot.lane.b32.xlu1 %v16156_v45, %s9703_s22  ;;  %v3501_v15 = vpop.permute.xlu1 %3500 }
 0x273   : > { %3547 = vst.msk [vmem:[#allocation3 + $0x78] sm:$0xff] %vm15673_vm7, %v3501_v15 }
 0x275   : > { %3088 = vrot.lane.b32.xlu0 %v12660_v9, %s9703_s22  ;;  %v3655_v56 = vpop.permute.xlu0 %3654  ;;  %v9326_v9 = vld [vmem:[#allocation7 + $0x138] sm:$0xff]  }
 0x276   : > { %3594 = vrot.lane.b32.xlu1 %v16157_v18, %s9702_s20  ;;  %3702 = vst.msk [vmem:[#allocation3 + $0x10] sm:$0xff] %vm15666_vm8, %v3655_v56  ;;  %v3583_v38 = vpop.permute.xlu1 %3582  ;;  %v9312_v56 = vld [vmem:[#allocation7 + $0x100] sm:$0xff]  }
 0x277   : > { %3629 = vst.msk [vmem:[#allocation3 + $0x78] sm:$0xff] %vm15670_vm3, %v3583_v38  ;;  %8671 = vmatpush3.bf16.msra.mxu0 %v9312_v56  ;;  %v9313_v38 = vld [vmem:[#allocation7 + $0x148] sm:$0xff]   ;;  %v9315_v56 = vld [vmem:[#allocation7 + $0x150] sm:$0xff]  }
 0x278   : > { %8672 = vmatprep.subr.bf16.mxu0 %v9313_v38 }
 0x279   : > { %3384 = vrot.lane.b32.xlu0 %v16158_v14, %s9704_s24  ;;  %v3304_v25 = vpop.permute.xlu0 %3303 }
 0x27a   : > { %3668 = vrot.lane.b32.xlu1 %v12706_v48, %s9704_s24  ;;  %3347 = vst.msk [vmem:[#allocation3 + $0x1a8] sm:$0xff] %vm15670_vm3, %v3304_v25  ;;  %5095 = vst.msk [vmem:[#allocation3 + $0x40] sm:$0xff] %vm15670_vm3, %v3304_v25  ;;  %v3657_v49 = vpop.permute.xlu1 %3656 }
 0x27b   : > { %3416 = vst.msk [vmem:[#allocation3 + $0x1a8] sm:$0xff] %vm15666_vm8, %v3373_v35  ;;  %5128 = vst.msk [vmem:[#allocation3 + $0x40] sm:$0xff] %vm15666_vm8, %v3373_v35 }
 0x27c   : > { %3703 = vst.msk [vmem:[#allocation3 + $0x78] sm:$0xff] %vm15666_vm8, %v3657_v49 }
 0x27d   : > { %3790 = vrot.lane.b32.xlu0 %v12513_v44, %s9703_s22  ;;  %v5667_v47 = vld [vmem:[#allocation3 + $0x10] sm:$0xff]  ;;  %v9314_v44 = vld [vmem:[#allocation7 + $0x108] sm:$0xff]  }
 0x27e   : > { %3317 = vrot.lane.b32.xlu1 %v12741_v52, %s9702_s20  ;;  %v3779_v24 = vpop.permute.xlu0 %3778  ;;  %6906 = vmatmul.mubr.bf16.vlgmr.msra.gmra.mrb[16].mxu1 %v5667_v47  ;;  %v3306_v15 = vpop.permute.xlu1 %3305  ;;  %v5717_v47 = vld [vmem:[#allocation3 + $0x1a0] sm:$0xff] }
 0x27f   : > { %3825 = vst.msk [vmem:[#allocation3 + $0x80] sm:$0xff] %vm15673_vm7, %v3779_v24  ;;  %v16159_v24 = vld [vmem:[#allocation84_spill] sm:$0xff]  ;;  %8673 = vmatpush3.bf16.msra.mxu0 %v9314_v44  ;;  %v16161_v44 = vld [vmem:[#allocation38_spill] sm:$0xff] }
 0x280   : > { %8674 = vmatprep.subr.bf16.mxu0 %v9315_v56 }
 0x281   : > { %3859 = vrot.lane.b32.xlu0 %v16146_v10, %s9702_s20 }
 0x282   : > { %2571 = vrot.lane.b32.xlu1 %v12769_v5, %s9704_s24  ;;  %v3848_v35 = vpop.permute.xlu0 %3847  ;;  %v5718_v25 = vld [vmem:[#allocation3 + $0x1a8] sm:$0xff]  ;;  %v3781_v49 = vpop.permute.xlu1 %3780 }
 0x283   : > { %3894 = vst.msk [vmem:[#allocation3 + $0x80] sm:$0xff] %vm15670_vm3, %v3848_v35  ;;  %6776 = vmatprep.mubr.bf16.mxu0 %v5718_v25  ;;  %8675 = vmatpush3.bf16.msra.mxu0 %v9316_v36 }
 0x284   : > { %3826 = vst.msk [vmem:[#allocation3 + $0xe8] sm:$0xff] %vm15673_vm7, %v3781_v49  ;;  %6777 = vmatmul.mubr.bf16.gmra.mrb[16].mxu0 %v5717_v47  ;;  %v9317_v49 = vld [vmem:[#allocation7 + $0x158] sm:$0xff]  }
 0x285   : > { %3950 = vrot.lane.b32.xlu0 %v16159_v24, %s9704_s24  ;;  %8676 = vmatprep.subr.bf16.mxu0 %v9317_v49  ;;  %v5680_v47 = vld [vmem:[#allocation3 + $0x78] sm:$0xff] }
 0x286   : > { %3514 = vrot.lane.b32.xlu1 %v16160_v50, %s9703_s22  ;;  %v3939_v27 = vpop.permute.xlu0 %3938  ;;  %v3850_v35 = vpop.permute.xlu1 %3849 }
 0x287   : > { %3985 = vst.msk [vmem:[#allocation3 + $0x80] sm:$0xff] %vm15666_vm8, %v3939_v27  ;;  %v9318_v27 = vld [vmem:[#allocation7 + $0x118] sm:$0xff]  }
 0x288   : > { %3895 = vst.msk [vmem:[#allocation3 + $0xe8] sm:$0xff] %vm15670_vm3, %v3850_v35  ;;  %8677 = vmatpush3.bf16.msra.mxu0 %v9318_v27  ;;  %v9322_v27 = vld [vmem:[#allocation7 + $0x128] sm:$0xff]  }
 0x289   : > { %3090 = vrot.lane.b32.xlu0 %v12737_v3, %s9703_s22  ;;  %v8069_v3 = vrot.slane %v16162_v33, 10  ;;  %v16163_v33 = vld [vmem:[#allocation78_spill] sm:$0xff] }
 0x28a   : > { %3596 = vrot.lane.b32.xlu1 %v12629_v57, %s9702_s20  ;;  %v3079_v25 = vpop.permute.xlu0 %3078  ;;  %v3941_v38 = vpop.permute.xlu1 %3940 }
 0x28b   : > { %3121 = vst.msk [vmem:[#allocation3 + $0x210] sm:$0xff] %vm15673_vm7, %v3079_v25  ;;  %5058 = vst.msk [vmem:[#allocation3 + $0xa8] sm:$0xff] %vm15673_vm7, %v3079_v25  ;;  %v9319_v25 = vld [vmem:[#allocation7 + $0x160] sm:$0xff]  }
 0x28c   : > { %3348 = vst.msk [vmem:[#allocation3 + $0x210] sm:$0xff] %vm15670_vm3, %v3306_v15  ;;  %5096 = vst.msk [vmem:[#allocation3 + $0xa8] sm:$0xff] %vm15670_vm3, %v3306_v15  ;;  %v9320_v15 = vld [vmem:[#allocation7 + $0x120] sm:$0xff]   ;;  %8678 = vmatprep.subr.bf16.mxu0 %v9319_v25  ;;  %v9323_v25 = vld [vmem:[#allocation7 + $0x170] sm:$0xff]  }
 0x28d   : > { %3386 = vrot.lane.b32.xlu0 %v16161_v44, %s9704_s24  ;;  %3986 = vst.msk [vmem:[#allocation3 + $0xe8] sm:$0xff] %vm15666_vm8, %v3941_v38  ;;  %v9321_v38 = vld [vmem:[#allocation7 + $0x168] sm:$0xff]   ;;  %8679 = vmatpush3.bf16.msra.mxu0 %v9320_v15  ;;  %v9324_v15 = vld [vmem:[#allocation7 + $0x130] sm:$0xff]  }
 0x28e   : > { %3670 = vrot.lane.b32.xlu1 %v12775_v42, %s9704_s24  ;;  %v3375_v56 = vpop.permute.xlu0 %3374  ;;  %v5681_v35 = vld [vmem:[#allocation3 + $0x80] sm:$0xff]  ;;  %v3081_v36 = vpop.permute.xlu1 %3080  ;;  %8680 = vmatprep.subr.bf16.mxu0 %v9321_v38 }
 0x28f   : > { %3417 = vst.msk [vmem:[#allocation3 + $0x210] sm:$0xff] %vm15666_vm8, %v3375_v56  ;;  %5129 = vst.msk [vmem:[#allocation3 + $0xa8] sm:$0xff] %vm15666_vm8, %v3375_v56  ;;  %6913 = vmatprep.mubr.bf16.mxu1 %v5681_v35 }
 0x290   : > { %6914 = vmatmul.mubr.bf16.gmra.mrb[20].mxu1 %v5680_v47  ;;  %3122 = vst.msk [vmem:[#allocation3 + $0x278] sm:$0xff] %vm15673_vm7, %v3081_v36  ;;  %5059 = vst.msk [vmem:[#allocation3 + $0x110] sm:$0xff] %vm15673_vm7, %v3081_v36  ;;  %v5730_v36 = vld [vmem:[#allocation3 + $0x208] sm:$0xff] }
 0x291   : > { %3792 = vrot.lane.b32.xlu0 %v12592_v4, %s9703_s22  ;;  %8681 = vmatpush3.bf16.msra.mxu0 %v9322_v27  ;;  %v930_v4 = vld [vmem:[#allocation2 + $0xc8] sm:$0x2] }
 0x292   : > { %4061 = vrot.lane.b32.xlu1 %v16084_v8, %s9703_s22  ;;  %v3503_v49 = vpop.permute.xlu0 %3502  ;;  %v3377_v56 = vpop.permute.xlu1 %3376  ;;  %v931_v38 = vsel %vm10046_vm0, %v8069_v3, %v930_v4  ;;  %8682 = vmatprep.subr.bf16.mxu0 %v9323_v25  ;;  %v12965_v4 = vld [vmem:[%s9927_s8 + $0x70] sm:$0xf]  ;;  %v16166_v3 = vld [vmem:[#allocation115_spill] sm:$0xff] }
 0x293   : > { %3548 = vst.msk [vmem:[#allocation3 + $0xe0] sm:$0xff] %vm15673_vm7, %v3503_v49  ;;  %932 = vst [vmem:[#allocation2 + $0xc8] sm:$0x2] %v931_v38  ;;  %v12969_v25 = vld [vmem:[#allocation2 + $0xc0] sm:$0xf] }
 0x294   : > { %v5694_v35 = vld [vmem:[#allocation3 + $0xe8] sm:$0xff] }
 0x295   : > { %3861 = vrot.lane.b32.xlu0 %v16154_v54, %s9702_s20  ;;  %6921 = vmatprep.mubr.bf16.mxu1 %v5694_v35  ;;  %v16165_v35 = vld [vmem:[#allocation110_spill] sm:$0xff] }
 0x296   : > { %4135 = vrot.lane.b32.xlu1 %v12282_v37, %s9702_s20  ;;  %v5731_v47 = vld [vmem:[#allocation3 + $0x210] sm:$0xff]  ;;  %8683 = vmatpush3.bf16.msra.mxu0 %v9324_v15  ;;  %v12977_v15 = vld [vmem:[#allocation2 + $0xc4] sm:$0xf] }
 0x297   : > { %v3585_v8 = vpop.permute.xlu0 %3584  ;;  %6784 = vmatprep.mubr.bf16.mxu0 %v5731_v47  ;;  %v3505_v49 = vpop.permute.xlu1 %3504  ;;  %v9325_v47 = vld [vmem:[#allocation7 + $0x178] sm:$0xff]   ;;  %v12983_v38 = vshrl.u32 %v12977_v15, 16 }
 0x298   : > { %3630 = vst.msk [vmem:[#allocation3 + $0xe0] sm:$0xff] %vm15670_vm3, %v3585_v8  ;;  %6785 = vmatmul.mubr.bf16.gmra.mrb[20].mxu0 %v5730_v36  ;;  %8684 = vmatprep.subr.bf16.mxu0 %v9325_v47  ;;  %v12972_v36 = vshrl.u32 %v12969_v25, 16  ;;  %v12987_v47 = vshrl.u32 %v12965_v4, 16 }
 0x299   : > { %3952 = vrot.lane.b32.xlu0 %v16163_v33, %s9704_s24  ;;  %3549 = vst.msk [vmem:[#allocation3 + $0x148] sm:$0xff] %vm15673_vm7, %v3505_v49  ;;  %v12975_v49 = vshll.u32 %v12969_v25, 16  ;;  %v3444_v61 = vrot.slane %v12983_v38, 4 }
 0x29a   : > { %4215 = vrot.lane.b32.xlu1 %v16165_v35, %s9704_s24  ;;  %8685 = vmatpush3.bf16.msra.mxu0 %v9326_v9  ;;  %v540_v9 = vrot.slane %v12987_v47, 6 }
 0x29b   : > { %v3659_v8 = vpop.permute.xlu0 %3658  ;;  %v3434_v33 = vrot.slane %v12975_v49, 5 }
 0x29c   : > { %3704 = vst.msk [vmem:[#allocation3 + $0xe0] sm:$0xff] %vm15666_vm8, %v3659_v8  ;;  %v3587_v27 = vpop.permute.xlu1 %3586  ;;  %v265_v8 = vld [vmem:[%s9927_s8 + $0x74] sm:$0xf] }
 0x29d   : > { %4326 = vrot.lane.b32.xlu0 %v16098_v31, %s9703_s22  ;;  %3631 = vst.msk [vmem:[#allocation3 + $0x148] sm:$0xff] %vm15670_vm3, %v3587_v27  ;;  %v12980_v31 = vshll.u32 %v12977_v15, 16  ;;  %v15658_v27 = vshll.u32 %v12965_v4, 16  ;;  %v547_v57 = vshrl.u32 %v265_v8, 16  ;;  %v13006_v50 = vshll.u32 %v265_v8, 16 }
 0x29e   : > { %3516 = vrot.lane.b32.xlu1 %v16166_v3, %s9703_s22  ;;  %v3431_v3 = vrot.slane %v12972_v36, 4 }
 0x29f   : > { %v3308_v35 = vpop.permute.xlu0 %3307  ;;  %v3440_v54 = vrot.slane %v12980_v31, 5  ;;  %v543_v42 = vrot.slane %v15658_v27, 7  ;;  %v549_v18 = vrot.slane %v547_v57, 6  ;;  %v552_v45 = vrot.slane %v13006_v50, 7  ;;  %v728_v27 = vld [vmem:[#allocation2 + $0xcc] sm:$0xe] }
 0x2a0   : > { %3349 = vst.msk [vmem:[#allocation3 + $0x278] sm:$0xff] %vm15670_vm3, %v3308_v35  ;;  %5097 = vst.msk [vmem:[#allocation3 + $0x110] sm:$0xff] %vm15670_vm3, %v3308_v35  ;;  %v3661_v12 = vpop.permute.xlu1 %3660  ;;  %v13001_v35 = vld [vmem:[#allocation2 + $0xc8] sm:$0x7]  ;;  %v3435_v24 = vor.u32 %v3434_v33, %v3431_v3  ;;  %v835_v33 = vld [vmem:[#allocation2 + $0xcc] sm:$0x1] }
 0x2a1   : > { %3418 = vst.msk [vmem:[#allocation3 + $0x278] sm:$0xff] %vm15666_vm8, %v3377_v56  ;;  %5130 = vst.msk [vmem:[#allocation3 + $0x110] sm:$0xff] %vm15666_vm8, %v3377_v56  ;;  %4417 = vrot.lane.b32.xlu0 %v16102_v21, %s9702_s20  ;;  %v3445_v56 = vor.u32 %v3444_v61, %v3440_v54  ;;  %v13011_v10 = vshll.u32 %v13001_v35, 16  ;;  %v544_v48 = vor.u32 %v543_v42, %v540_v9  ;;  %v9338_v9 = vld [vmem:[#allocation7 + $0x1e8] sm:$0xff]  }
 0x2a2   : > { %3705 = vst.msk [vmem:[#allocation3 + $0x148] sm:$0xff] %vm15666_vm8, %v3661_v12  ;;  %3598 = vrot.lane.b32.xlu1 %v12699_v55, %s9702_s20  ;;  %v8054_v12 = vrot.slane %v12987_v47, 9  ;;  %v3436_v60 = vrot.slane %v3435_v24, 4  ;;  %v553_v3 = vor.u32 %v552_v45, %v549_v18  ;;  %v732_v18 = vld [vmem:[#allocation2 + $0xd4] sm:$0x3] }
 0x2a3   : > { %v3783_v21 = vpop.permute.xlu0 %3782  ;;  %v5693_v20 = vld [vmem:[#allocation3 + $0xe0] sm:$0xff]  ;;  %v3446_v55 = vrot.slane %v3445_v56, 4  ;;  %v3450_v61 = vrot.slane %v13011_v10, 5  ;;  %v729_v42 = vsel %vm9960_vm15, %v544_v48, %v728_v27  ;;  %v1130_v27 = vld [vmem:[#allocation2 + $0xd4] sm:$0x4] }
 0x2a4   : > { %3827 = vst.msk [vmem:[#allocation3 + $0x150] sm:$0xff] %vm15673_vm7, %v3783_v21  ;;  %6922 = vmatmul.mubr.bf16.gmra.mrb[24].mxu1 %v5693_v20  ;;  %v3310_v8 = vpop.permute.xlu1 %3309  ;;  %v836_v22 = vsel %vm9953_vm14, %v8054_v12, %v835_v33  ;;  %v16169_v20 = vld [vmem:[#allocation36_spill] sm:$0xff]  ;;  %v3441_v24 = vsel %vm10318_vm13, %v3436_v60, %v3440_v54  ;;  %730 = vst [vmem:[#allocation2 + $0xcc] sm:$0xe] %v729_v42  ;;  %v555_v45 = vrot.slane %v553_v3, 4  ;;  %v545_v60 = vrot.slane %v544_v48, 4 }
 0x2a5   : > { %4492 = vrot.lane.b32.xlu0 %v16115_v17, %s9704_s24  ;;  %v3451_v56 = vsel %vm10318_vm13, %v3446_v55, %v3450_v61  ;;  %837 = vst [vmem:[#allocation2 + $0xcc] sm:$0x1] %v836_v22  ;;  %v5743_v55 = vld [vmem:[#allocation3 + $0x270] sm:$0xff]  ;;  %v16173_v61 = vshll.u32 %v12965_v4, 16 }
 0x2a6   : > { %3672 = vrot.lane.b32.xlu1 %v12784_v0, %s9704_s24  ;;  %v13029_v17 = vcombine.low %v3441_v24, %v3451_v56  ;;  %v1131_v0 = vsel %vm9945_vm12, %v547_v57, %v1130_v27  ;;  %v733_v54 = vsel %vm9982_vm2, %v555_v45, %v732_v18  ;;  %v1150_v24 = vrot.slane %v12987_v47, 7  ;;  %v16353_v22 = vld [vmem:[#allocation42_spill] sm:$0xff] }
 0x2a7   : > { %v3852_v21 = vpop.permute.xlu0 %3851  ;;  %1132 = vst [vmem:[#allocation2 + $0xd4] sm:$0x4] %v1131_v0  ;;  %734 = vst [vmem:[#allocation2 + $0xd4] sm:$0x3] %v733_v54  ;;  %v8086_v42 = vrot.slane %v16173_v61, 9  ;;  %v8070_v27 = vrot.slane %v13006_v50, 10 }
 0x2a8   : > { %16170 = vst [vmem:[#allocation57_spill] sm:$0xff] %v13029_v17  ;;  %3896 = vst.msk [vmem:[#allocation3 + $0x150] sm:$0xff] %vm15670_vm3, %v3852_v21  ;;  %v5744_v12 = vld [vmem:[#allocation3 + $0x278] sm:$0xff]  ;;  %v3785_v33 = vpop.permute.xlu1 %3784  ;;  %v3768_v61 = vrot.slane %v12977_v15, 7  ;;  %v16193_v21 = vld [vmem:[#allocation24_spill] sm:$0xff] }
 0x2a9   : > { %3794 = vrot.lane.b32.xlu0 %v12667_v40, %s9703_s22  ;;  %6792 = vmatprep.mubr.bf16.mxu0 %v5744_v12  ;;  %3828 = vst.msk [vmem:[#allocation3 + $0x1b8] sm:$0xff] %vm15673_vm7, %v3785_v33  ;;  %5372 = vst.msk [vmem:[#allocation3 + $0x50] sm:$0xff] %vm15673_vm7, %v3785_v33  ;;  %v16177_v33 = vld [vmem:[#allocation94_spill] sm:$0xff]  ;;  %v16178_v54 = vld [vmem:[#allocation19_spill] sm:$0xff] }
 0x2aa   : > { %3486 = vst.msk [vmem:[#allocation3 + $0x628] sm:$0xff] %vm15665_vm10, %v13029_v17  ;;  %5186 = vst.msk [vmem:[#allocation3 + $0x4c0] sm:$0xff] %vm15665_vm10, %v13029_v17  ;;  %6793 = vmatmul.mubr.bf16.gmra.mrb[24].mxu0 %v5743_v55  ;;  %4063 = vrot.lane.b32.xlu1 %v16123_v53, %s9703_s22  ;;  %v554_v53 = vsel %vm9973_vm9, %v545_v60, %v553_v3  ;;  %vm16174_vm10 = vcmask 257024   ;;  %v5706_v60 = vld [vmem:[#allocation3 + $0x148] sm:$0xff] }
 0x2ab   : > { %v3943_v57 = vpop.permute.xlu0 %3942  ;;  %v1211_v48 = vld [vmem:[#allocation2 + $0xcc] sm:$0x2]  ;;  %731 = vst.msk [vmem:[#allocation2 + $0xd0] sm:$0xf] %vm16174_vm10, %v554_v53  ;;  %vm16179_vm10 = vnez %v16178_v54  ;;  %v8272_v53 = vrot.slane %v12969_v25, 11 }
 0x2ac   : > { %3987 = vst.msk [vmem:[#allocation3 + $0x150] sm:$0xff] %vm15666_vm8, %v3943_v57  ;;  %v3854_v56 = vpop.permute.xlu1 %3853  ;;  %v1031_v0 = vld [vmem:[#allocation2 + $0xcc] sm:$0x1]  ;;  %v1212_v45 = vsel %vm10030_vm5, %v1150_v24, %v1211_v48  ;;  %v3771_v48 = vrot.slane %v13001_v35, 7 }
 0x2ad   : > { %3863 = vrot.lane.b32.xlu0 %v16158_v14, %s9702_s20  ;;  %3897 = vst.msk [vmem:[#allocation3 + $0x1b8] sm:$0xff] %vm15670_vm3, %v3854_v56  ;;  %5405 = vst.msk [vmem:[#allocation3 + $0x50] sm:$0xff] %vm15670_vm3, %v3854_v56  ;;  %v1032_v47 = vsel %vm10020_vm4, %v8086_v42, %v1031_v0  ;;  %v3490_v56 = vrot.slane %v12977_v15, 5  ;;  %v3770_v0 = vrot.slane %v3768_v61, 4 }
 0x2ae   : > { %4137 = vrot.lane.b32.xlu1 %v12337_v39, %s9702_s20  ;;  %1033 = vst [vmem:[#allocation2 + $0xcc] sm:$0x1] %v1032_v47  ;;  %1213 = vst [vmem:[#allocation2 + $0xcc] sm:$0x2] %v1212_v45  ;;  %v1277_v12 = vld [vmem:[#allocation2 + $0xd4] sm:$0x4] }
 0x2af   : > { %v3083_v18 = vpop.permute.xlu0 %3082  ;;  %v933_v55 = vld [vmem:[#allocation2 + $0xd4] sm:$0x2]  ;;  %v1278_v57 = vsel %vm16179_vm10, %v13006_v50, %v1277_v12  ;;  %v8266_v47 = vrot.slane %v12969_v25, 9  ;;  %v3492_v45 = vrot.slane %v3490_v56, 4  ;;  %v3769_v12 = vsel %vm11577_vm6, %v8272_v53, %v3768_v61 }
 0x2b0   : > { %3123 = vst.msk [vmem:[#allocation3 + $0x2e0] sm:$0xff] %vm15673_vm7, %v3083_v18  ;;  %5060 = vst.msk [vmem:[#allocation3 + $0x178] sm:$0xff] %vm15673_vm7, %v3083_v18  ;;  %v3945_v3 = vpop.permute.xlu1 %3944  ;;  %v3493_v18 = vrot.slane %v13001_v35, 5  ;;  %v3567_v53 = vrot.slane %v12980_v31, 6  ;;  %vm16202_vm10 = vcmask 261120  }
 0x2b1   : > { %3350 = vst.msk [vmem:[#allocation3 + $0x2e0] sm:$0xff] %vm15670_vm3, %v3310_v8  ;;  %5098 = vst.msk [vmem:[#allocation3 + $0x178] sm:$0xff] %vm15670_vm3, %v3310_v8  ;;  %3954 = vrot.lane.b32.xlu0 %v16177_v33, %s9704_s24  ;;  %v934_v8 = vsel %vm10046_vm0, %v8070_v27, %v933_v55  ;;  %v3562_v27 = vrot.slane %v12972_v36, 5  ;;  %vm16186_vm3 = vcmask 261120  }
 0x2b2   : > { %3988 = vst.msk [vmem:[#allocation3 + $0x1b8] sm:$0xff] %vm15666_vm8, %v3945_v3  ;;  %5460 = vst.msk [vmem:[#allocation3 + $0x50] sm:$0xff] %vm15666_vm8, %v3945_v3  ;;  %4217 = vrot.lane.b32.xlu1 %v12099_v29, %s9704_s24  ;;  %v16180_v3 = vld [vmem:[#allocation117_spill] sm:$0xff] }
 0x2b3   : > { %1279 = vst [vmem:[#allocation2 + $0xd4] sm:$0x4] %v1278_v57  ;;  %v3379_v42 = vpop.permute.xlu0 %3378  ;;  %v5707_v24 = vld [vmem:[#allocation3 + $0x150] sm:$0xff]  ;;  %935 = vst [vmem:[#allocation2 + $0xd4] sm:$0x2] %v934_v8  ;;  %v3566_v8 = vrot.slane %v12983_v38, 5 }
 0x2b4   : > { %3419 = vst.msk [vmem:[#allocation3 + $0x2e0] sm:$0xff] %vm15666_vm8, %v3379_v42  ;;  %5131 = vst.msk [vmem:[#allocation3 + $0x178] sm:$0xff] %vm15666_vm8, %v3379_v42  ;;  %6929 = vmatprep.mubr.bf16.mxu1 %v5707_v24  ;;  %v3085_v50 = vpop.permute.xlu1 %3084  ;;  %v13100_v57 = vld [vmem:[#allocation2 + $0xd0] sm:$0xf] }
 0x2b5   : > { %4328 = vrot.lane.b32.xlu0 %v11911_v43, %s9703_s22  ;;  %6930 = vmatmul.mubr.bf16.gmra.mrb[28].mxu1 %v5706_v60  ;;  %3124 = vst.msk [vmem:[#allocation3 + $0x348] sm:$0xff] %vm15673_vm7, %v3085_v50  ;;  %5061 = vst.msk [vmem:[#allocation3 + $0x1e0] sm:$0xff] %vm15673_vm7, %v3085_v50  ;;  %v3772_v43 = vsel %vm11577_vm6, %v3770_v0, %v3771_v48  ;;  %v13098_v55 = vld [vmem:[#allocation2 + $0xcc] sm:$0xf]  ;;  %v3563_v60 = vrot.slane %v12975_v49, 6  ;;  %v16182_v50 = vld [vmem:[#allocation23_spill] sm:$0xff] }
 0x2b6   : > { %3518 = vrot.lane.b32.xlu1 %v16180_v3, %s9703_s22  ;;  %v13104_v24 = vcombine.low %v3769_v12, %v3772_v43  ;;  %vm16183_vm8 = vnez %v16182_v50  ;;  %v3571_v12 = vshrl.u32 %v13001_v35, 16  ;;  %v3574_v43 = vrot.slane %v13011_v10, 6  ;;  %vm16187_vm6 = vmmov %vm16186_vm3 }
 0x2b7   : > { %v3507_v42 = vpop.permute.xlu0 %3506  ;;  %v3491_v40 = vsel %vm16183_vm8, %v8266_v47, %v3490_v56  ;;  %v3494_v61 = vsel %vm16183_vm8, %v3492_v45, %v3493_v18  ;;  %v3564_v3 = vor.u32 %v3563_v60, %v3562_v27  ;;  %v16185_v56 = vld [vmem:[#allocation40_spill] sm:$0xff]  ;;  %v3568_v47 = vor.u32 %v3567_v53, %v3566_v8 }
 0x2b8   : > { %16181 = vst [vmem:[#allocation56_spill] sm:$0xff] %v13104_v24  ;;  %3550 = vst.msk [vmem:[#allocation3 + $0x1b0] sm:$0xff] %vm15673_vm7, %v3507_v42  ;;  %v13113_v0 = vpop.permute.xlu1 %3380  ;;  %v13115_v41 = vcombine.low %v3491_v40, %v3494_v61  ;;  %v13126_v45 = vshrl.u32 %v13098_v55, 16  ;;  %v13129_v40 = vshll.u32 %v13098_v55, 16  ;;  %v13132_v18 = vshll.u32 %v13100_v57, 16 }
 0x2b9   : > { %5214 = vst.msk [vmem:[#allocation3 + $0x48] sm:$0xff] %vm15673_vm7, %v3507_v42  ;;  %v5720_v48 = vld [vmem:[#allocation3 + $0x1b8] sm:$0xff]  ;;  %4419 = vrot.lane.b32.xlu0 %v16185_v56, %s9702_s20  ;;  %vm16189_vm7 = vmmov %vm16186_vm3  ;;  %v3565_v27 = vrot.slane %v3564_v3, 4  ;;  %v3573_v60 = vrot.slane %v3571_v12, 5  ;;  %v13143_v42 = vshrl.u32 %v13100_v57, 16  ;;  %v3570_v56 = vrot.slane %v3568_v47, 4 }
 0x2ba   : > { %16184 = vst [vmem:[#allocation111_spill] sm:$0xff] %v13115_v41  ;;  %6937 = vmatprep.mubr.bf16.mxu1 %v5720_v48  ;;  %5659 = vst.msk [vmem:[#allocation3 + $0x470] sm:$0xff] %vm16186_vm3, %v13104_v24  ;;  %3600 = vrot.lane.b32.xlu1 %v12769_v5, %s9702_s20  ;;  %v13140_v8 = vld [vmem:[#allocation2 + $0xd4] sm:$0x7]  ;;  %v13147_v48 = vcombine.low %v13098_v55, %v13100_v57  ;;  %v3912_v5 = vrot.slane %v13126_v45, 4  ;;  %v3915_v39 = vrot.slane %v13129_v40, 5 }
 0x2bb   : > { %4319 = vst.msk [vmem:[#allocation3 + $0x5d8] sm:$0xff] %vm16187_vm6, %v13104_v24  ;;  %16188 = vst [vmem:[#allocation58_spill] sm:$0xff] %v13132_v18  ;;  %v3589_v61 = vpop.permute.xlu0 %3588  ;;  %v5757_v53 = vld [vmem:[#allocation3 + $0x2e0] sm:$0xff]  ;;  %vm16191_vm6 = vcmask 785920   ;;  %v5756_v3 = vld [vmem:[#allocation3 + $0x2d8] sm:$0xff]  ;;  %v3569_v14 = vsel %vm11266_vm11, %v3565_v27, %v3568_v47  ;;  %v3575_v54 = vor.u32 %v3574_v43, %v3573_v60  ;;  %v3921_v37 = vrot.slane %v13132_v18, 5 }
 0x2bc   : > { %4041 = vst.msk [vmem:[#allocation3 + $0x5d0] sm:$0xff] %vm16189_vm7, %v13115_v41  ;;  %16190 = vst [vmem:[#allocation98_spill] sm:$0xff] %v13147_v48  ;;  %6800 = vmatprep.mubr.bf16.mxu0 %v5757_v53  ;;  %v3509_v33 = vpop.permute.xlu1 %3508  ;;  %v3925_v50 = vrot.slane %v13143_v42, 4  ;;  %v3728_v53 = vrot.slane %v13011_v10, 7  ;;  %v3916_v47 = vor.u32 %v3915_v39, %v3912_v5  ;;  %v13165_v43 = vshll.u32 %v13140_v8, 16 }
 0x2bd   : > { %5501 = vst.msk [vmem:[#allocation3 + $0x468] sm:$0xff] %vm16186_vm3, %v13115_v41  ;;  %vm16192_vm7 = vmmov %vm16191_vm6  ;;  %4494 = vrot.lane.b32.xlu0 %v16193_v21, %s9704_s24  ;;  %6801 = vmatmul.mubr.bf16.gmra.mrb[28].mxu0 %v5756_v3  ;;  %vm16194_vm3 = vcmask 523520   ;;  %v3576_v21 = vsel %vm11266_vm11, %v3570_v56, %v3575_v54  ;;  %v8269_v60 = vrot.slane %v12969_v25, 10 }
 0x2be   : > { %3632 = vst.msk [vmem:[#allocation3 + $0x1b0] sm:$0xff] %vm16191_vm6, %v3589_v61  ;;  %vm16195_vm6 = vmmov %vm16194_vm3  ;;  %3674 = vrot.lane.b32.xlu1 %v12822_v2, %s9704_s24  ;;  %v3926_v27 = vor.u32 %v3925_v50, %v3921_v37  ;;  %v13173_v18 = vcombine.low %v3569_v14, %v3576_v21  ;;  %v3917_v39 = vrot.slane %v3916_v47, 4  ;;  %v3931_v5 = vrot.slane %v13165_v43, 5  ;;  %v16203_v50 = vld [vmem:[#allocation128_spill] sm:$0xff] }
 0x2bf   : > { %5260 = vst.msk [vmem:[#allocation3 + $0x48] sm:$0xff] %vm16192_vm7, %v3589_v61  ;;  %vm16196_vm7 = vcmask 261120   ;;  %v3727_v61 = vrot.slane %v3571_v12, 6  ;;  %v3663_v3 = vpop.permute.xlu0 %3662 }
 0x2c0   : > { %3551 = vst.msk [vmem:[#allocation3 + $0x218] sm:$0xff] %vm16194_vm3, %v3509_v33  ;;  %16197 = vst [vmem:[#allocation97_spill] sm:$0xff] %v13173_v18  ;;  %vm16198_vm3 = vcmask 1048320   ;;  %v3591_v10 = vpop.permute.xlu1 %3590  ;;  %v3927_v2 = vrot.slane %v3926_v27, 4  ;;  %v3922_v14 = vsel %vm10318_vm13, %v3917_v39, %v3921_v37 }
 0x2c1   : > { %5215 = vst.msk [vmem:[#allocation3 + $0xb0] sm:$0xff] %vm16195_vm6, %v3509_v33  ;;  %v3646_v33 = vrot.slane %v12977_v15, 6  ;;  %v13175_v12 = vor.u32 %v3728_v53, %v3727_v61  ;;  %vm16199_vm6 = vmmov %vm16198_vm3  ;;  %v3649_v15 = vrot.slane %v13001_v35, 6  ;;  %3796 = vrot.lane.b32.xlu0 %v12741_v52, %s9703_s22 }
 0x2c2   : > { %4856 = vst.msk [vmem:[#allocation3 + $0x580] sm:$0xff] %vm16196_vm7, %v13147_v48  ;;  %vm16200_vm7 = vcmask 785920   ;;  %4065 = vrot.lane.b32.xlu1 %v16203_v50, %s9703_s22  ;;  %v3932_v56 = vsel %vm10318_vm13, %v3927_v2, %v3931_v5  ;;  %vm16211_vm13 = vcmask 261120   ;;  %v16213_v2 = vld [vmem:[#allocation50_spill] sm:$0xff] }
 0x2c3   : > { %3706 = vst.msk [vmem:[#allocation3 + $0x1b0] sm:$0xff] %vm16198_vm3, %v3663_v3  ;;  %v3647_v54 = vsel %vm12167_vm1, %v8269_v60, %v3646_v33  ;;  %v3648_v25 = vrot.slane %v3646_v33, 4  ;;  %vm16201_vm11 = vmmov %vm16200_vm7  ;;  %v3312_v61 = vpop.permute.xlu0 %3311  ;;  %v13197_v53 = vcombine.low %v3922_v14, %v3932_v56  ;;  %v16216_v60 = vld [vmem:[#allocation86_spill] sm:$0xff]  ;;  %v16217_v33 = vld [vmem:[#allocation28_spill] sm:$0xff] }
 0x2c4   : > { %5298 = vst.msk [vmem:[#allocation3 + $0x48] sm:$0xff] %vm16199_vm6, %v3663_v3  ;;  %v3665_v21 = vpop.permute.xlu1 %3664  ;;  %vm16208_vm6 = vmmov %vm16198_vm3  ;;  %v16232_v56 = vld [vmem:[#allocation46_spill] sm:$0xff] }
 0x2c5   : > { %3633 = vst.msk [vmem:[#allocation3 + $0x218] sm:$0xff] %vm16200_vm7, %v3591_v10  ;;  %v3650_v35 = vsel %vm12167_vm1, %v3648_v25, %v3649_v15  ;;  %16204 = vst [vmem:[#allocation107_spill] sm:$0xff] %v13197_v53  ;;  %3865 = vrot.lane.b32.xlu0 %v16161_v44, %s9702_s20 }
 0x2c6   : > { %5261 = vst.msk [vmem:[#allocation3 + $0xb0] sm:$0xff] %vm16201_vm11, %v3591_v10  ;;  %v13199_v47 = vcombine.low %v3647_v54, %v3650_v35  ;;  %vm16206_vm11 = vmmov %vm16200_vm7  ;;  %4139 = vrot.lane.b32.xlu1 %v16213_v2, %s9702_s20  ;;  %v5769_v10 = vld [vmem:[#allocation3 + $0x340] sm:$0xff]  ;;  %v16221_v54 = vld [vmem:[#allocation118_spill] sm:$0xff] }
 0x2c7   : > { %4603 = vst.msk [vmem:[#allocation3 + $0x578] sm:$0xff] %vm16202_vm10, %v13173_v18  ;;  %vm16207_vm10 = vmmov %vm16200_vm7  ;;  %v3787_v37 = vpop.permute.xlu0 %3786 }
 0x2c8   : > { %16205 = vst [vmem:[#allocation91_spill] sm:$0xff] %v13199_v47  ;;  %3351 = vst.msk [vmem:[#allocation3 + $0x348] sm:$0xff] %vm16206_vm11, %v3312_v61 }
 0x2c9   : > { %5099 = vst.msk [vmem:[#allocation3 + $0x1e0] sm:$0xff] %vm16207_vm10, %v3312_v61  ;;  %vm16209_vm7 = vmmov %vm16198_vm3  ;;  %vm16214_vm10 = vcmask 523520   ;;  %3956 = vrot.lane.b32.xlu0 %v16216_v60, %s9704_s24 }
 0x2ca   : > { %3420 = vst.msk [vmem:[#allocation3 + $0x348] sm:$0xff] %vm16198_vm3, %v13113_v0  ;;  %vm16210_vm1 = vmmov %vm16198_vm3  ;;  %v5719_v27 = vld [vmem:[#allocation3 + $0x1b0] sm:$0xff]  ;;  %4219 = vrot.lane.b32.xlu1 %v16217_v33, %s9704_s24 }
 0x2cb   : > { %5132 = vst.msk [vmem:[#allocation3 + $0x1e0] sm:$0xff] %vm16208_vm6, %v13113_v0  ;;  %vm16212_vm11 = vmmov %vm16211_vm13  ;;  %6938 = vmatmul.mubr.bf16.gmra.mrb[32].mxu1 %v5719_v27  ;;  %v3314_v0 = vpop.permute.xlu1 %3313  ;;  %v3856_v3 = vpop.permute.xlu0 %3855 }
 0x2cc   : > { %3707 = vst.msk [vmem:[#allocation3 + $0x218] sm:$0xff] %vm16209_vm7, %v3665_v21  ;;  %vm16215_vm3 = vmmov %vm16214_vm10 }
 0x2cd   : > { %5299 = vst.msk [vmem:[#allocation3 + $0xb0] sm:$0xff] %vm16210_vm1, %v3665_v21  ;;  %vm16218_vm1 = vcmask 785920   ;;  %4330 = vrot.lane.b32.xlu0 %v12002_v23, %s9703_s22  ;;  %vm16220_vm7 = vmmov %vm16208_vm6  ;;  %v16225_v23 = vld [vmem:[#allocation92_spill] sm:$0xff] }
 0x2ce   : > { %5187 = vst.msk [vmem:[#allocation3 + $0x528] sm:$0xff] %vm16211_vm13, %v13197_v53  ;;  %vm16219_vm13 = vmmov %vm16218_vm1  ;;  %3520 = vrot.lane.b32.xlu1 %v16221_v54, %s9703_s22 }
 0x2cf   : > { %5025 = vst.msk [vmem:[#allocation3 + $0x520] sm:$0xff] %vm16212_vm11, %v13199_v47  ;;  %v2568_v5 = vpop.permute.xlu1 %2567  ;;  %v3947_v25 = vpop.permute.xlu0 %3946  ;;  %vm16222_vm11 = vmmov %vm16208_vm6 }
 0x2d0   : > { %3829 = vst.msk [vmem:[#allocation3 + $0x220] sm:$0xff] %vm16214_vm10, %v3787_v37  ;;  %vm16223_vm10 = vmmov %vm16208_vm6 }
 0x2d1   : > { %5373 = vst.msk [vmem:[#allocation3 + $0xb8] sm:$0xff] %vm16215_vm3, %v3787_v37  ;;  %v5770_v39 = vld [vmem:[#allocation3 + $0x348] sm:$0xff]  ;;  %4421 = vrot.lane.b32.xlu0 %v16140_v32, %s9702_s20 }
 0x2d2   : > { %3898 = vst.msk [vmem:[#allocation3 + $0x220] sm:$0xff] %vm16218_vm1, %v3856_v3  ;;  %6808 = vmatprep.mubr.bf16.mxu0 %v5770_v39  ;;  %vm16224_vm1 = vmmov %vm16215_vm3  ;;  %3602 = vrot.lane.b32.xlu1 %v16225_v23, %s9702_s20  ;;  %v16235_v37 = vld [vmem:[#allocation105_spill] sm:$0xff] }
 0x2d3   : > { %5406 = vst.msk [vmem:[#allocation3 + $0xb8] sm:$0xff] %vm16219_vm13, %v3856_v3  ;;  %6809 = vmatmul.mubr.bf16.gmra.mrb[32].mxu0 %v5769_v10  ;;  %v3511_v15 = vpop.permute.xlu1 %3510  ;;  %v3087_v14 = vpop.permute.xlu0 %3086  ;;  %vm16226_vm13 = vmmov %vm16224_vm1  ;;  %v5732_v32 = vld [vmem:[#allocation3 + $0x218] sm:$0xff]  ;;  %v16242_v10 = vld [vmem:[#allocation108_spill] sm:$0xff] }
 0x2d4   : > { %2607 = vst.msk [vmem:[#allocation3 + $0x3a8] sm:$0xff] %vm16208_vm6, %v2568_v5  ;;  %vm16227_vm6 = vmmov %vm16224_vm1 }
 0x2d5   : > { %4988 = vst.msk [vmem:[#allocation3 + $0x240] sm:$0xff] %vm16220_vm7, %v2568_v5  ;;  %vm16228_vm7 = vcmask 785920   ;;  %4496 = vrot.lane.b32.xlu0 %v16145_v19, %s9704_s24 }
 0x2d6   : > { %3989 = vst.msk [vmem:[#allocation3 + $0x220] sm:$0xff] %vm16222_vm11, %v3947_v25  ;;  %vm16229_vm11 = vmmov %vm16228_vm7  ;;  %3676 = vrot.lane.b32.xlu1 %v16232_v56, %s9704_s24 }
 0x2d7   : > { %5461 = vst.msk [vmem:[#allocation3 + $0xb8] sm:$0xff] %vm16223_vm10, %v3947_v25  ;;  %v3593_v50 = vpop.permute.xlu1 %3592  ;;  %vm16230_vm10 = vmmov %vm16228_vm7  ;;  %v3383_v35 = vpop.permute.xlu0 %3382  ;;  %v16244_v25 = vld [vmem:[#allocation125_spill] sm:$0xff] }
 0x2d8   : > { %3552 = vst.msk [vmem:[#allocation3 + $0x280] sm:$0xff] %vm16215_vm3, %v3511_v15  ;;  %vm16231_vm3 = vmmov %vm16228_vm7 }
 0x2d9   : > { %5216 = vst.msk [vmem:[#allocation3 + $0x118] sm:$0xff] %vm16224_vm1, %v3511_v15  ;;  %vm16233_vm1 = vcmask 1048320   ;;  %3798 = vrot.lane.b32.xlu0 %v16235_v37, %s9703_s22 }
 0x2da   : > { %3125 = vst.msk [vmem:[#allocation3 + $0x3b0] sm:$0xff] %vm16226_vm13, %v3087_v14  ;;  %vm16234_vm13 = vmmov %vm16233_vm1  ;;  %4067 = vrot.lane.b32.xlu1 %v16148_v62, %s9703_s22 }
 0x2db   : > { %5062 = vst.msk [vmem:[#allocation3 + $0x248] sm:$0xff] %vm16227_vm6, %v3087_v14  ;;  %v3667_v21 = vpop.permute.xlu1 %3666  ;;  %vm16236_vm6 = vmmov %vm16233_vm1  ;;  %v3789_v19 = vpop.permute.xlu0 %3788  ;;  %v5782_v3 = vld [vmem:[#allocation3 + $0x3a8] sm:$0xff] }
 0x2dc   : > { %3352 = vst.msk [vmem:[#allocation3 + $0x3b0] sm:$0xff] %vm16228_vm7, %v3314_v0  ;;  %vm16237_vm7 = vmmov %vm16233_vm1 }
 0x2dd   : > { %5100 = vst.msk [vmem:[#allocation3 + $0x248] sm:$0xff] %vm16229_vm11, %v3314_v0  ;;  %v5733_v61 = vld [vmem:[#allocation3 + $0x220] sm:$0xff]  ;;  %vm16238_vm11 = vcmask 523520   ;;  %v16240_v0 = vld [vmem:[#allocation74_spill] sm:$0xff] }
 0x2de   : > { %3634 = vst.msk [vmem:[#allocation3 + $0x280] sm:$0xff] %vm16230_vm10, %v3593_v50  ;;  %6945 = vmatprep.mubr.bf16.mxu1 %v5733_v61  ;;  %vm16239_vm10 = vmmov %vm16238_vm11  ;;  %3867 = vrot.lane.b32.xlu0 %v16240_v0, %s9702_s20  ;;  %v16255_v61 = vld [vmem:[#allocation102_spill] sm:$0xff] }
 0x2df   : > { %5262 = vst.msk [vmem:[#allocation3 + $0x118] sm:$0xff] %vm16231_vm3, %v3593_v50  ;;  %6946 = vmatmul.mubr.bf16.gmra.mrb[36].mxu1 %v5732_v32  ;;  %v3316_v27 = vpop.permute.xlu1 %3315  ;;  %4141 = vrot.lane.b32.xlu1 %v12471_v34, %s9702_s20  ;;  %v3858_v39 = vpop.permute.xlu0 %3857  ;;  %v16248_v50 = vld [vmem:[#allocation119_spill] sm:$0xff] }
 0x2e0   : > { %3421 = vst.msk [vmem:[#allocation3 + $0x3b0] sm:$0xff] %vm16233_vm1, %v3383_v35  ;;  %vm16241_vm1 = vmmov %vm16231_vm3 }
 0x2e1   : > { %5133 = vst.msk [vmem:[#allocation3 + $0x248] sm:$0xff] %vm16234_vm13, %v3383_v35  ;;  %vm16243_vm13 = vmmov %vm16236_vm6 }
 0x2e2   : > { %3708 = vst.msk [vmem:[#allocation3 + $0x280] sm:$0xff] %vm16236_vm6, %v3667_v21  ;;  %3958 = vrot.lane.b32.xlu0 %v16242_v10, %s9704_s24 }
 0x2e3   : > { %5300 = vst.msk [vmem:[#allocation3 + $0x118] sm:$0xff] %vm16237_vm7, %v3667_v21  ;;  %v2570_v62 = vpop.permute.xlu1 %2569  ;;  %4221 = vrot.lane.b32.xlu1 %v16244_v25, %s9704_s24  ;;  %v3949_v15 = vpop.permute.xlu0 %3948  ;;  %vm16245_vm7 = vmmov %vm16236_vm6 }
 0x2e4   : > { %3830 = vst.msk [vmem:[#allocation3 + $0x288] sm:$0xff] %vm16238_vm11, %v3789_v19  ;;  %vm16246_vm11 = vmmov %vm16236_vm6 }
 0x2e5   : > { %5374 = vst.msk [vmem:[#allocation3 + $0x120] sm:$0xff] %vm16239_vm10, %v3789_v19 }
 0x2e6   : > { %3899 = vst.msk [vmem:[#allocation3 + $0x288] sm:$0xff] %vm16231_vm3, %v3858_v39  ;;  %4332 = vrot.lane.b32.xlu0 %v16111_v26, %s9703_s22  ;;  %vm16247_vm3 = vmmov %vm16239_vm10 }
 0x2e7   : > { %v5783_v5 = vld [vmem:[#allocation3 + $0x3b0] sm:$0xff]  ;;  %5407 = vst.msk [vmem:[#allocation3 + $0x120] sm:$0xff] %vm16241_vm1, %v3858_v39  ;;  %v3513_v14 = vpop.permute.xlu1 %3512  ;;  %3522 = vrot.lane.b32.xlu1 %v16248_v50, %s9703_s22  ;;  %v3089_v32 = vpop.permute.xlu0 %3088  ;;  %vm16249_vm1 = vmmov %vm16247_vm3 }
 0x2e8   : > { %6816 = vmatprep.mubr.bf16.mxu0 %v5783_v5  ;;  %2608 = vst.msk [vmem:[#allocation3 + $0x410] sm:$0xff] %vm16243_vm13, %v2570_v62  ;;  %vm16250_vm13 = vmmov %vm16249_vm1  ;;  %v16263_v5 = vld [vmem:[#allocation101_spill] sm:$0xff] }
 0x2e9   : > { %6817 = vmatmul.mubr.bf16.gmra.mrb[36].mxu0 %v5782_v3  ;;  %4989 = vst.msk [vmem:[#allocation3 + $0x2a8] sm:$0xff] %vm16236_vm6, %v2570_v62  ;;  %vm16251_vm6 = vcmask 785920   ;;  %v5745_v26 = vld [vmem:[#allocation3 + $0x280] sm:$0xff] }
 0x2ea   : > { %3990 = vst.msk [vmem:[#allocation3 + $0x288] sm:$0xff] %vm16245_vm7, %v3949_v15  ;;  %vm16252_vm7 = vmmov %vm16251_vm6  ;;  %4423 = vrot.lane.b32.xlu0 %v16143_v11, %s9702_s20  ;;  %v16260_v11 = vld [vmem:[#allocation93_spill] sm:$0xff] }
 0x2eb   : > { %5462 = vst.msk [vmem:[#allocation3 + $0x120] sm:$0xff] %vm16246_vm11, %v3949_v15  ;;  %v3595_v35 = vpop.permute.xlu1 %3594  ;;  %vm16253_vm11 = vmmov %vm16251_vm6  ;;  %3604 = vrot.lane.b32.xlu1 %v16255_v61, %s9702_s20  ;;  %v3385_v21 = vpop.permute.xlu0 %3384 }
 0x2ec   : > { %3553 = vst.msk [vmem:[#allocation3 + $0x2e8] sm:$0xff] %vm16239_vm10, %v3513_v14  ;;  %vm16254_vm10 = vmmov %vm16251_vm6 }
 0x2ed   : > { %5217 = vst.msk [vmem:[#allocation3 + $0x180] sm:$0xff] %vm16247_vm3, %v3513_v14  ;;  %vm16256_vm3 = vcmask 1048320  }
 0x2ee   : > { %3126 = vst.msk [vmem:[#allocation3 + $0x418] sm:$0xff] %vm16249_vm1, %v3089_v32  ;;  %vm16257_vm1 = vmmov %vm16256_vm3  ;;  %4498 = vrot.lane.b32.xlu0 %v16149_v16, %s9704_s24 }
 0x2ef   : > { %5063 = vst.msk [vmem:[#allocation3 + $0x2b0] sm:$0xff] %vm16250_vm13, %v3089_v32  ;;  %v3669_v3 = vpop.permute.xlu1 %3668  ;;  %vm16258_vm13 = vmmov %vm16257_vm1  ;;  %3678 = vrot.lane.b32.xlu1 %v16260_v11, %s9704_s24  ;;  %v5795_v62 = vld [vmem:[#allocation3 + $0x410] sm:$0xff]  ;;  %v16265_v32 = vld [vmem:[#allocation100_spill] sm:$0xff] }
 0x2f0   : > { %3353 = vst.msk [vmem:[#allocation3 + $0x418] sm:$0xff] %vm16251_vm6, %v3316_v27  ;;  %vm16259_vm6 = vmmov %vm16257_vm1 }
 0x2f1   : > { %5101 = vst.msk [vmem:[#allocation3 + $0x2b0] sm:$0xff] %vm16252_vm7, %v3316_v27  ;;  %v5746_v19 = vld [vmem:[#allocation3 + $0x288] sm:$0xff]  ;;  %v3791_v27 = vpop.permute.xlu0 %3790  ;;  %vm16261_vm7 = vcmask 523520  }
 0x2f2   : > { %3635 = vst.msk [vmem:[#allocation3 + $0x2e8] sm:$0xff] %vm16253_vm11, %v3595_v35  ;;  %6953 = vmatprep.mubr.bf16.mxu1 %v5746_v19  ;;  %vm16262_vm11 = vmmov %vm16261_vm7  ;;  %3800 = vrot.lane.b32.xlu0 %v16263_v5, %s9703_s22 }
 0x2f3   : > { %5263 = vst.msk [vmem:[#allocation3 + $0x180] sm:$0xff] %vm16254_vm10, %v3595_v35  ;;  %6954 = vmatmul.mubr.bf16.gmra.mrb[40].mxu1 %v5745_v26  ;;  %v3318_v39 = vpop.permute.xlu1 %3317  ;;  %4069 = vrot.lane.b32.xlu1 %v16150_v28, %s9703_s22  ;;  %v16269_v26 = vld [vmem:[#allocation103_spill] sm:$0xff] }
 0x2f4   : > { %3422 = vst.msk [vmem:[#allocation3 + $0x418] sm:$0xff] %vm16256_vm3, %v3385_v21  ;;  %vm16264_vm3 = vmmov %vm16254_vm10 }
 0x2f5   : > { %5134 = vst.msk [vmem:[#allocation3 + $0x2b0] sm:$0xff] %vm16257_vm1, %v3385_v21  ;;  %v3860_v16 = vpop.permute.xlu0 %3859  ;;  %v16271_v21 = vld [vmem:[#allocation45_spill] sm:$0xff] }
 0x2f6   : > { %3709 = vst.msk [vmem:[#allocation3 + $0x2e8] sm:$0xff] %vm16258_vm13, %v3669_v3  ;;  %3869 = vrot.lane.b32.xlu0 %v16265_v32, %s9702_s20  ;;  %vm16266_vm13 = vmmov %vm16257_vm1 }
 0x2f7   : > { %5301 = vst.msk [vmem:[#allocation3 + $0x180] sm:$0xff] %vm16259_vm6, %v3669_v3  ;;  %v2572_v14 = vpop.permute.xlu1 %2571  ;;  %4143 = vrot.lane.b32.xlu1 %v12545_v7, %s9702_s20  ;;  %vm16267_vm6 = vmmov %vm16257_vm1 }
 0x2f8   : > { %3831 = vst.msk [vmem:[#allocation3 + $0x2f0] sm:$0xff] %vm16261_vm7, %v3791_v27  ;;  %vm16268_vm7 = vmmov %vm16257_vm1 }
 0x2f9   : > { %5375 = vst.msk [vmem:[#allocation3 + $0x188] sm:$0xff] %vm16262_vm11, %v3791_v27  ;;  %v3951_v28 = vpop.permute.xlu0 %3950 }
 0x2fa   : > { %3900 = vst.msk [vmem:[#allocation3 + $0x2f0] sm:$0xff] %vm16254_vm10, %v3860_v16  ;;  %3960 = vrot.lane.b32.xlu0 %v16269_v26, %s9704_s24  ;;  %vm16270_vm10 = vmmov %vm16262_vm11  ;;  %v9328_v26 = vld [vmem:[#allocation7 + $0x1c0] sm:$0xff]  }
 0x2fb   : > { %v5796_v15 = vld [vmem:[#allocation3 + $0x418] sm:$0xff]  ;;  %5408 = vst.msk [vmem:[#allocation3 + $0x188] sm:$0xff] %vm16264_vm3, %v3860_v16  ;;  %v3515_v35 = vpop.permute.xlu1 %3514  ;;  %4223 = vrot.lane.b32.xlu1 %v16271_v21, %s9704_s24  ;;  %vm16272_vm3 = vmmov %vm16270_vm10  ;;  %8782 = vmatprep.subr.bf16.mxu1 %v9328_v26 }
 0x2fc   : > { %6824 = vmatprep.mubr.bf16.mxu0 %v5796_v15  ;;  %2609 = vst.msk [vmem:[#allocation3 + $0x478] sm:$0xff] %vm16257_vm1, %v2572_v14  ;;  %vm16273_vm1 = vmmov %vm16272_vm3 }
 0x2fd   : > { %6825 = vmatmul.mubr.bf16.gmra.mrb[40].mxu0 %v5795_v62  ;;  %4990 = vst.msk [vmem:[#allocation3 + $0x310] sm:$0xff] %vm16266_vm13, %v2572_v14  ;;  %v3091_v19 = vpop.permute.xlu0 %3090  ;;  %vm16274_vm13 = vcmask 785920   ;;  %v5758_v27 = vld [vmem:[#allocation3 + $0x2e8] sm:$0xff] }
 0x2fe   : > { %3991 = vst.msk [vmem:[#allocation3 + $0x2f0] sm:$0xff] %vm16267_vm6, %v3951_v28  ;;  %vm16275_vm6 = vmmov %vm16274_vm13  ;;  %4334 = vrot.lane.b32.xlu0 %v12075_v59, %s9703_s22  ;;  %v16278_v62 = vld [vmem:[#allocation120_spill] sm:$0xff]  ;;  %v16283_v59 = vld [vmem:[#allocation90_spill] sm:$0xff] }
 0x2ff   : > { %5463 = vst.msk [vmem:[#allocation3 + $0x188] sm:$0xff] %vm16268_vm7, %v3951_v28  ;;  %v3597_v3 = vpop.permute.xlu1 %3596  ;;  %vm16276_vm7 = vmmov %vm16275_vm6  ;;  %3524 = vrot.lane.b32.xlu1 %v16278_v62, %s9703_s22 }
 0x300   : > { %3554 = vst.msk [vmem:[#allocation3 + $0x350] sm:$0xff] %vm16262_vm11, %v3515_v35  ;;  %vm16277_vm11 = vmmov %vm16275_vm6 }
 0x301   : > { %5218 = vst.msk [vmem:[#allocation3 + $0x1e8] sm:$0xff] %vm16270_vm10, %v3515_v35  ;;  %v3387_v16 = vpop.permute.xlu0 %3386  ;;  %vm16279_vm10 = vcmask 1048320  }
 0x302   : > { %3127 = vst.msk [vmem:[#allocation3 + $0x480] sm:$0xff] %vm16272_vm3, %v3091_v19  ;;  %vm16280_vm3 = vmmov %vm16279_vm10  ;;  %4425 = vrot.lane.b32.xlu0 %v16151_v13, %s9702_s20 }
 0x303   : > { %5064 = vst.msk [vmem:[#allocation3 + $0x318] sm:$0xff] %vm16273_vm1, %v3091_v19  ;;  %v3671_v14 = vpop.permute.xlu1 %3670  ;;  %vm16281_vm1 = vmmov %vm16280_vm3  ;;  %3606 = vrot.lane.b32.xlu1 %v16283_v59, %s9702_s20  ;;  %v16305_v59 = vld [vmem:[#allocation122_spill] sm:$0xff] }
 0x304   : > { %3354 = vst.msk [vmem:[#allocation3 + $0x480] sm:$0xff] %vm16274_vm13, %v3318_v39  ;;  %vm16282_vm13 = vmmov %vm16281_vm1  ;;  %v8534_v28 = vpop.f32.mrb[0].mxu1 }
 0x305   : > { %5102 = vst.msk [vmem:[#allocation3 + $0x318] sm:$0xff] %vm16275_vm6, %v3318_v39  ;;  %v5759_v15 = vld [vmem:[#allocation3 + $0x2f0] sm:$0xff]  ;;  %v3793_v39 = vpop.permute.xlu0 %3792  ;;  %vm16284_vm6 = vcmask 523520   ;;  %v8535_v19 = vpop.f32.mrb[1].mxu1 }
 0x306   : > { %3636 = vst.msk [vmem:[#allocation3 + $0x350] sm:$0xff] %vm16276_vm7, %v3597_v3  ;;  %6961 = vmatprep.mubr.bf16.mxu1 %v5759_v15  ;;  %vm16285_vm7 = vmmov %vm16284_vm6  ;;  %4500 = vrot.lane.b32.xlu0 %v16152_v30, %s9704_s24  ;;  %v13342_v13 = vadd.f32 %v8535_v19, %v8534_v28 }
 0x307   : > { %5264 = vst.msk [vmem:[#allocation3 + $0x1e8] sm:$0xff] %vm16277_vm11, %v3597_v3  ;;  %6962 = vmatmul.mubr.bf16.gmra.mrb[44].mxu1 %v5758_v27  ;;  %v4062_v35 = vpop.permute.xlu1 %4061  ;;  %vm16286_vm11 = vmmov %vm16284_vm6  ;;  %v8537_v3 = vpop.f32.mrb[2].mxu1  ;;  %v5808_v27 = vld [vmem:[#allocation3 + $0x478] sm:$0xff] }
 0x308   : > { %3423 = vst.msk [vmem:[#allocation3 + $0x480] sm:$0xff] %vm16279_vm10, %v3387_v16  ;;  %16287 = vst [vmem:[#allocation47_spill] sm:$0xff] %v13342_v13  ;;  %v8538_v15 = vpop.f32.mrb[3].mxu1  ;;  %vm16290_vm10 = vcmask 785920  }
 0x309   : > { %5135 = vst.msk [vmem:[#allocation3 + $0x318] sm:$0xff] %vm16280_vm3, %v3387_v16  ;;  %v16288_v16 = vld [vmem:[#allocation39_spill] sm:$0xff]  ;;  %v13346_v52 = vadd.f32 %v8538_v15, %v8537_v3  ;;  %vm16291_vm3 = vmmov %vm16290_vm10 }
 0x30a   : > { %3710 = vst.msk [vmem:[#allocation3 + $0x350] sm:$0xff] %vm16281_vm1, %v3671_v14  ;;  %3680 = vrot.lane.b32.xlu1 %v16288_v16, %s9704_s24  ;;  %vm16293_vm1 = vmmov %vm16291_vm3  ;;  %v16302_v16 = vld [vmem:[#allocation33_spill] sm:$0xff] }
 0x30b   : > { %5302 = vst.msk [vmem:[#allocation3 + $0x1e8] sm:$0xff] %vm16282_vm13, %v3671_v14  ;;  %v3862_v14 = vpop.permute.xlu0 %3861  ;;  %16289 = vst [vmem:[#allocation99_spill] sm:$0xff] %v13346_v52  ;;  %v4136_v30 = vpop.permute.xlu1 %4135  ;;  %v16297_v52 = vld [vmem:[#allocation114_spill] sm:$0xff] }
 0x30c   : > { %3832 = vst.msk [vmem:[#allocation3 + $0x358] sm:$0xff] %vm16284_vm6, %v3793_v39  ;;  %vm16294_vm6 = vmmov %vm16282_vm13 }
 0x30d   : > { %5376 = vst.msk [vmem:[#allocation3 + $0x1f0] sm:$0xff] %vm16285_vm7, %v3793_v39  ;;  %v16292_v39 = vld [vmem:[#allocation96_spill] sm:$0xff]  ;;  %vm16296_vm7 = vmmov %vm16294_vm6 }
 0x30e   : > { %4109 = vst.msk [vmem:[#allocation3 + $0x20] sm:$0xff] %vm16286_vm11, %v4062_v35  ;;  %3802 = vrot.lane.b32.xlu0 %v16292_v39, %s9703_s22  ;;  %4071 = vrot.lane.b32.xlu1 %v16153_v1, %s9703_s22  ;;  %v8462_v35 = vpop.f32.mrb[0].mxu0 }
 0x30f   : > { %v5809_v5 = vld [vmem:[#allocation3 + $0x480] sm:$0xff]  ;;  %3901 = vst.msk [vmem:[#allocation3 + $0x358] sm:$0xff] %vm16290_vm10, %v3862_v14  ;;  %v3953_v28 = vpop.permute.xlu0 %3952  ;;  %v4216_v19 = vpop.permute.xlu1 %4215  ;;  %vm16298_vm10 = vmmov %vm16286_vm11 }
 0x310   : > { %5409 = vst.msk [vmem:[#allocation3 + $0x1f0] sm:$0xff] %vm16291_vm3, %v3862_v14  ;;  %6832 = vmatprep.mubr.bf16.mxu0 %v5809_v5  ;;  %v8463_v3 = vpop.f32.mrb[1].mxu0  ;;  %v16295_v5 = vld [vmem:[#allocation104_spill] sm:$0xff]  ;;  %vm16299_vm3 = vmmov %vm16298_vm10 }
 0x311   : > { %6833 = vmatmul.mubr.bf16.gmra.mrb[44].mxu0 %v5808_v27  ;;  %4183 = vst.msk [vmem:[#allocation3 + $0x20] sm:$0xff] %vm16293_vm1, %v4136_v30  ;;  %v13360_v15 = vadd.f32 %v8463_v3, %v8462_v35  ;;  %v8465_v27 = vpop.f32.mrb[2].mxu0  ;;  %v5771_v35 = vld [vmem:[#allocation3 + $0x350] sm:$0xff] }
 0x312   : > { %3992 = vst.msk [vmem:[#allocation3 + $0x358] sm:$0xff] %vm16282_vm13, %v3953_v28  ;;  %3871 = vrot.lane.b32.xlu0 %v16295_v5, %s9702_s20  ;;  %4145 = vrot.lane.b32.xlu1 %v12631_v51, %s9702_s20  ;;  %v8466_v1 = vpop.f32.mrb[3].mxu0  ;;  %vm16303_vm13 = vmmov %vm16293_vm1 }
 0x313   : > { %5464 = vst.msk [vmem:[#allocation3 + $0x1f0] sm:$0xff] %vm16294_vm6, %v3953_v28  ;;  %v4327_v14 = vpop.permute.xlu0 %4326  ;;  %v13364_v30 = vadd.f32 %v8466_v1, %v8465_v27  ;;  %v3517_v28 = vpop.permute.xlu1 %3516  ;;  %vm16304_vm6 = vmmov %vm16293_vm1 }
 0x314   : > { %4263 = vst.msk [vmem:[#allocation3 + $0x20] sm:$0xff] %vm16296_vm7, %v4216_v19  ;;  %v16300_v19 = vld [vmem:[#allocation49_spill] sm:$0xff]  ;;  %v8540_v3 = vpop.f32.mrb[4].mxu1 }
 0x315   : > { %4374 = vst.msk [vmem:[#allocation3 + $0x28] sm:$0xff] %vm16286_vm11, %v4327_v14  ;;  %v8541_v37 = vpop.f32.mrb[5].mxu1  ;;  %vm16308_vm11 = vmmov %vm16296_vm7 }
 0x316   : > { %3962 = vrot.lane.b32.xlu0 %v16297_v52, %s9704_s24  ;;  %3555 = vst.msk [vmem:[#allocation3 + $0x3b8] sm:$0xff] %vm16298_vm10, %v3517_v28  ;;  %4225 = vrot.lane.b32.xlu1 %v16300_v19, %s9704_s24  ;;  %v13374_v1 = vadd.f32 %v8541_v37, %v8540_v3  ;;  %v8543_v14 = vpop.f32.mrb[6].mxu1  ;;  %vm16309_vm10 = vmmov %vm16296_vm7 }
 0x317   : > { %5219 = vst.msk [vmem:[#allocation3 + $0x250] sm:$0xff] %vm16299_vm3, %v3517_v28  ;;  %v4418_v13 = vpop.permute.xlu0 %4417  ;;  %v3599_v27 = vpop.permute.xlu1 %3598 }
 0x318   : > { %4465 = vst.msk [vmem:[#allocation3 + $0x28] sm:$0xff] %vm16293_vm1, %v4418_v13  ;;  %16301 = vst [vmem:[#allocation76_spill] sm:$0xff] %v13374_v1  ;;  %v8544_v28 = vpop.f32.mrb[7].mxu1  ;;  %v16314_v1 = vld [vmem:[#allocation43_spill] sm:$0xff] }
 0x319   : > { %v5772_v39 = vld [vmem:[#allocation3 + $0x358] sm:$0xff]  ;;  %3637 = vst.msk [vmem:[#allocation3 + $0x3b8] sm:$0xff] %vm16303_vm13, %v3599_v27  ;;  %v13382_v51 = vadd.f32 %v8544_v28, %v8543_v14  ;;  %vm16311_vm1 = vmmov %vm16299_vm3 }
 0x31a   : > { %6969 = vmatprep.mubr.bf16.mxu1 %v5772_v39  ;;  %4336 = vrot.lane.b32.xlu0 %v16302_v16, %s9703_s22  ;;  %5265 = vst.msk [vmem:[#allocation3 + $0x250] sm:$0xff] %vm16304_vm6, %v3599_v27  ;;  %v16307_v39 = vld [vmem:[#allocation65_spill] sm:$0xff]  ;;  %v16310_v16 = vld [vmem:[#allocation32_spill] sm:$0xff]  ;;  %vm16313_vm13 = vmmov %vm16311_vm1 }
 0x31b   : > { %6970 = vmatmul.mubr.bf16.gmra.mrb[48].mxu1 %v5771_v35  ;;  %3526 = vrot.lane.b32.xlu1 %v16305_v59, %s9703_s22  ;;  %16306 = vst [vmem:[#allocation77_spill] sm:$0xff] %v13382_v51  ;;  %v4493_v13 = vpop.permute.xlu0 %4492  ;;  %v3673_v37 = vpop.permute.xlu1 %3672  ;;  %v5669_v51 = vld [vmem:[#allocation3 + $0x20] sm:$0xff] }
 0x31c   : > { %4540 = vst.msk [vmem:[#allocation3 + $0x28] sm:$0xff] %vm16296_vm7, %v4493_v13  ;;  %v8468_v35 = vpop.f32.mrb[4].mxu0  ;;  %vm16315_vm7 = vmmov %vm16304_vm6 }
 0x31d   : > { %3711 = vst.msk [vmem:[#allocation3 + $0x3b8] sm:$0xff] %vm16308_vm11, %v3673_v37  ;;  %v8469_v27 = vpop.f32.mrb[5].mxu0  ;;  %vm16317_vm11 = vmmov %vm16304_vm6 }
 0x31e   : > { %4427 = vrot.lane.b32.xlu0 %v16307_v39, %s9702_s20  ;;  %5303 = vst.msk [vmem:[#allocation3 + $0x250] sm:$0xff] %vm16309_vm10, %v3673_v37  ;;  %v13393_v28 = vadd.f32 %v8469_v27, %v8468_v35  ;;  %v8471_v13 = vpop.f32.mrb[6].mxu0  ;;  %v16312_v39 = vld [vmem:[#allocation48_spill] sm:$0xff]  ;;  %v3723_v35 = vrot.slane %v12980_v31, 7 }
 0x31f   : > { %3608 = vrot.lane.b32.xlu1 %v16310_v16, %s9702_s20  ;;  %v3795_v3 = vpop.permute.xlu0 %3794  ;;  %v4064_v14 = vpop.permute.xlu1 %4063  ;;  %v16316_v27 = vld [vmem:[#allocation132_spill] sm:$0xff] }
 0x320   : > { %3833 = vst.msk [vmem:[#allocation3 + $0x3c0] sm:$0xff] %vm16299_vm3, %v3795_v3  ;;  %v8472_v37 = vpop.f32.mrb[7].mxu0  ;;  %vm16320_vm3 = vmmov %vm16309_vm10 }
 0x321   : > { %5377 = vst.msk [vmem:[#allocation3 + $0x258] sm:$0xff] %vm16311_vm1, %v3795_v3  ;;  %v13400_v16 = vadd.f32 %v8472_v37, %v8471_v13  ;;  %v16318_v13 = vld [vmem:[#allocation81_spill] sm:$0xff]  ;;  %v3718_v37 = vrot.slane %v12972_v36, 6  ;;  %vm16322_vm1 = vmmov %vm16320_vm3 }
 0x322   : > { %4502 = vrot.lane.b32.xlu0 %v16312_v39, %s9704_s24  ;;  %4110 = vst.msk [vmem:[#allocation3 + $0x88] sm:$0xff] %vm16313_vm13, %v4064_v14  ;;  %v8546_v14 = vpop.f32.mrb[8].mxu1 }
 0x323   : > { %3682 = vrot.lane.b32.xlu1 %v16314_v1, %s9704_s24  ;;  %v3864_v59 = vpop.permute.xlu0 %3863  ;;  %v5670_v52 = vld [vmem:[#allocation3 + $0x28] sm:$0xff]  ;;  %v4138_v3 = vpop.permute.xlu1 %4137  ;;  %v3719_v1 = vrot.slane %v12975_v49, 7  ;;  %v16324_v49 = vld [vmem:[#allocation63_spill] sm:$0xff] }
 0x324   : > { %3902 = vst.msk [vmem:[#allocation3 + $0x3c0] sm:$0xff] %vm16304_vm6, %v3864_v59  ;;  %7066 = vmatprep.mubr.bf16.mxu0 %v5670_v52  ;;  %v8547_v39 = vpop.f32.mrb[9].mxu1  ;;  %v3722_v52 = vrot.slane %v12983_v38, 6  ;;  %vm16325_vm6 = vmmov %vm16313_vm13 }
 0x325   : > { %5410 = vst.msk [vmem:[#allocation3 + $0x258] sm:$0xff] %vm16315_vm7, %v3864_v59  ;;  %7067 = vmatmul.mubr.bf16.vlgmr.msra.gmra.mrb[48].mxu0 %v5669_v51  ;;  %v13413_v31 = vadd.f32 %v8547_v39, %v8546_v14  ;;  %v8549_v62 = vpop.f32.mrb[10].mxu1  ;;  %vm16326_vm7 = vmmov %vm16325_vm6 }
 0x326   : > { %3804 = vrot.lane.b32.xlu0 %v16316_v27, %s9703_s22  ;;  %4184 = vst.msk [vmem:[#allocation3 + $0x88] sm:$0xff] %vm16317_vm11, %v4138_v3  ;;  %v8550_v3 = vpop.f32.mrb[11].mxu1  ;;  %v3720_v27 = vor.u32 %v3719_v1, %v3718_v37  ;;  %v3724_v5 = vor.u32 %v3723_v35, %v3722_v52  ;;  %v5784_v52 = vld [vmem:[#allocation3 + $0x3b8] sm:$0xff]  ;;  %vm16329_vm11 = vcmask 261120  }
 0x327   : > { %4073 = vrot.lane.b32.xlu1 %v16318_v13, %s9703_s22  ;;  %v3955_v59 = vpop.permute.xlu0 %3954  ;;  %16319 = vst [vmem:[#allocation72_spill] sm:$0xff] %v13413_v31  ;;  %v4218_v51 = vpop.permute.xlu1 %4217  ;;  %v16321_v13 = vld [vmem:[#allocation27_spill] sm:$0xff]  ;;  %v13420_v36 = vadd.f32 %v8550_v3, %v8549_v62 }
 0x328   : > { %3993 = vst.msk [vmem:[#allocation3 + $0x3c0] sm:$0xff] %vm16309_vm10, %v3955_v59  ;;  %v3721_v38 = vrot.slane %v3720_v27, 4  ;;  %v3726_v14 = vrot.slane %v3724_v5, 4  ;;  %v8474_v31 = vpop.f32.mrb[8].mxu0  ;;  %v9329_v27 = vld [vmem:[#allocation7 + $0x180] sm:$0xff]   ;;  %vm16330_vm10 = vmmov %vm16329_vm11 }
 0x329   : > { %5465 = vst.msk [vmem:[#allocation3 + $0x258] sm:$0xff] %vm16320_vm3, %v3955_v59  ;;  %16323 = vst [vmem:[#allocation71_spill] sm:$0xff] %v13420_v36  ;;  %v8475_v62 = vpop.f32.mrb[9].mxu0  ;;  %8783 = vmatpush3.bf16.msra.mxu1 %v9329_v27  ;;  %vm16331_vm3 = vcmask 785920  }
 0x32a   : > { %3873 = vrot.lane.b32.xlu0 %v16321_v13, %s9702_s20  ;;  %4264 = vst.msk [vmem:[#allocation3 + $0x88] sm:$0xff] %vm16322_vm1, %v4218_v51  ;;  %v3725_v1 = vsel %vm9973_vm9, %v3721_v38, %v3724_v5  ;;  %v3730_v35 = vsel %vm9973_vm9, %v3726_v14, %v13175_v12  ;;  %v16328_v51 = vld [vmem:[#allocation116_spill] sm:$0xff]  ;;  %v13438_v5 = vadd.f32 %v8475_v62, %v8474_v31  ;;  %v8477_v3 = vpop.f32.mrb[10].mxu0  ;;  %v16332_v31 = vld [vmem:[#allocation34_spill] sm:$0xff]  ;;  %vm16333_vm1 = vmmov %vm16331_vm3 }
 0x32b   : > { %4147 = vrot.lane.b32.xlu1 %v16324_v49, %s9702_s20  ;;  %v4329_v39 = vpop.permute.xlu0 %4328  ;;  %v3519_v59 = vpop.permute.xlu1 %3518  ;;  %v13434_v37 = vcombine.low %v3725_v1, %v3730_v35  ;;  %v16336_v35 = vld [vmem:[#allocation84_spill] sm:$0xff]  ;;  %v838_v13 = vld [vmem:[#allocation2 + $0xd8] sm:$0x1] }
 0x32c   : > { %4375 = vst.msk [vmem:[#allocation3 + $0x90] sm:$0xff] %vm16313_vm13, %v4329_v39  ;;  %v8478_v14 = vpop.f32.mrb[11].mxu0  ;;  %vm16334_vm13 = vmmov %vm16333_vm1  ;;  %v9330_v62 = vld [vmem:[#allocation7 + $0x1c8] sm:$0xff]  }
 0x32d   : > { %3556 = vst.msk [vmem:[#allocation3 + $0x420] sm:$0xff] %vm16325_vm6, %v3519_v59  ;;  %16327 = vst [vmem:[#allocation79_spill] sm:$0xff] %v13434_v37  ;;  %vm16335_vm6 = vcmask 1048320   ;;  %8784 = vmatprep.subr.bf16.mxu1 %v9330_v62  ;;  %v9333_v62 = vld [vmem:[#allocation7 + $0x190] sm:$0xff]  }
 0x32e   : > { %3964 = vrot.lane.b32.xlu0 %v13029_v17, %s9704_s24  ;;  %5220 = vst.msk [vmem:[#allocation3 + $0x2b8] sm:$0xff] %vm16326_vm7, %v3519_v59  ;;  %v13445_v59 = vadd.f32 %v8478_v14, %v8477_v3  ;;  %vm16337_vm7 = vmmov %vm16335_vm6  ;;  %v735_v17 = vld [vmem:[#allocation2 + $0xd8] sm:$0xe] }
 0x32f   : > { %4227 = vrot.lane.b32.xlu1 %v16328_v51, %s9704_s24  ;;  %v4420_v12 = vpop.permute.xlu0 %4419  ;;  %v5785_v38 = vld [vmem:[#allocation3 + $0x3c0] sm:$0xff]  ;;  %3765 = vst.msk [vmem:[#allocation3 + $0x630] sm:$0xff] %vm16329_vm11, %v13434_v37  ;;  %v3601_v39 = vpop.permute.xlu1 %3600  ;;  %vm16338_vm11 = vmmov %vm16335_vm6 }
 0x330   : > { %5345 = vst.msk [vmem:[#allocation3 + $0x4c8] sm:$0xff] %vm16330_vm10, %v13434_v37  ;;  %6977 = vmatprep.mubr.bf16.mxu1 %v5785_v38  ;;  %vm16339_vm10 = vcmask 523520   ;;  %v13466_v38 = vld [vmem:[%s9927_s8 + $0x78] sm:$0xf] }
 0x331   : > { %4466 = vst.msk [vmem:[#allocation3 + $0x90] sm:$0xff] %vm16331_vm3, %v4420_v12  ;;  %6978 = vmatmul.mubr.bf16.gmra.mrb[52].mxu1 %v5784_v52  ;;  %v9331_v52 = vld [vmem:[#allocation7 + $0x188] sm:$0xff]   ;;  %vm16340_vm3 = vmmov %vm16339_vm10 }
 0x332   : > { %4338 = vrot.lane.b32.xlu0 %v16332_v31, %s9703_s22  ;;  %3638 = vst.msk [vmem:[#allocation3 + $0x420] sm:$0xff] %vm16333_vm1, %v3601_v39  ;;  %v16341_v12 = vld [vmem:[#allocation112_spill] sm:$0xff]  ;;  %vm16342_vm1 = vmmov %vm16340_vm3  ;;  %8785 = vmatpush3.bf16.msra.mxu1 %v9331_v52  ;;  %v13471_v31 = vshrl.u32 %v13466_v38, 16 }
 0x333   : > { %5266 = vst.msk [vmem:[#allocation3 + $0x2b8] sm:$0xff] %vm16334_vm13, %v3601_v39  ;;  %3528 = vrot.lane.b32.xlu1 %v13115_v41, %s9703_s22  ;;  %v4495_v26 = vpop.permute.xlu0 %4494  ;;  %v3675_v1 = vpop.permute.xlu1 %3674  ;;  %v5682_v14 = vld [vmem:[#allocation3 + $0x88] sm:$0xff]  ;;  %v9332_v39 = vld [vmem:[#allocation7 + $0x1d0] sm:$0xff]   ;;  %v9335_v41 = vld [vmem:[#allocation7 + $0x198] sm:$0xff]  }
 0x334   : > { %4541 = vst.msk [vmem:[#allocation3 + $0x90] sm:$0xff] %vm16335_vm6, %v4495_v26  ;;  %v15697_v26 = vshll.u32 %v13466_v38, 16  ;;  %vm16343_vm6 = vmmov %vm16334_vm13  ;;  %8786 = vmatprep.subr.bf16.mxu1 %v9332_v39 }
 0x335   : > { %3712 = vst.msk [vmem:[#allocation3 + $0x420] sm:$0xff] %vm16337_vm7, %v3675_v1  ;;  %vm16344_vm7 = vmmov %vm16343_vm6 }
 0x336   : > { %4429 = vrot.lane.b32.xlu0 %v16336_v35, %s9702_s20  ;;  %5304 = vst.msk [vmem:[#allocation3 + $0x2b8] sm:$0xff] %vm16338_vm11, %v3675_v1  ;;  %8787 = vmatpush3.bf16.msra.mxu1 %v9333_v62 }
 0x337   : > { %3610 = vrot.lane.b32.xlu1 %v13173_v18, %s9702_s20  ;;  %v3797_v27 = vpop.permute.xlu0 %3796  ;;  %v4066_v3 = vpop.permute.xlu1 %4065 }
 0x338   : > { %3834 = vst.msk [vmem:[#allocation3 + $0x428] sm:$0xff] %vm16339_vm10, %v3797_v27  ;;  %vm16346_vm10 = vmmov %vm16338_vm11 }
 0x339   : > { %5378 = vst.msk [vmem:[#allocation3 + $0x2c0] sm:$0xff] %vm16340_vm3, %v3797_v27  ;;  %v267_v27 = vld [vmem:[%s9927_s8 + $0x7c] sm:$0xf]  ;;  %vm16348_vm3 = vmmov %vm16346_vm10 }
 0x33a   : > { %4504 = vrot.lane.b32.xlu0 %v16341_v12, %s9704_s24  ;;  %4111 = vst.msk [vmem:[#allocation3 + $0xf0] sm:$0xff] %vm16342_vm1, %v4066_v3  ;;  %v559_v3 = vrot.slane %v13471_v31, 6  ;;  %v562_v12 = vrot.slane %v15697_v26, 7  ;;  %v566_v36 = vshrl.u32 %v267_v27, 16  ;;  %v13480_v37 = vshll.u32 %v267_v27, 16 }
 0x33b   : > { %3684 = vrot.lane.b32.xlu1 %v13199_v47, %s9704_s24  ;;  %v3866_v1 = vpop.permute.xlu0 %3865  ;;  %v5683_v35 = vld [vmem:[#allocation3 + $0x90] sm:$0xff]  ;;  %v4140_v52 = vpop.permute.xlu1 %4139  ;;  %v16345_v47 = vld [vmem:[#allocation131_spill] sm:$0xff]  ;;  %v8055_v26 = vrot.slane %v13471_v31, 9 }
 0x33c   : > { %3903 = vst.msk [vmem:[#allocation3 + $0x428] sm:$0xff] %vm16334_vm13, %v3866_v1  ;;  %7074 = vmatprep.mubr.bf16.mxu0 %v5683_v35  ;;  %v13487_v39 = vor.u32 %v562_v12, %v559_v3  ;;  %v568_v35 = vrot.slane %v566_v36, 6  ;;  %v571_v18 = vrot.slane %v13480_v37, 7  ;;  %v16349_v12 = vld [vmem:[#allocation133_spill] sm:$0xff] }
 0x33d   : > { %5411 = vst.msk [vmem:[#allocation3 + $0x2c0] sm:$0xff] %vm16343_vm6, %v3866_v1  ;;  %7075 = vmatmul.mubr.bf16.gmra.mrb[52].mxu0 %v5682_v14  ;;  %v9334_v1 = vld [vmem:[#allocation7 + $0x1d8] sm:$0xff]   ;;  %v839_v3 = vsel %vm9953_vm14, %v8055_v26, %v838_v13  ;;  %v8552_v13 = vpop.f32.mrb[12].mxu1  ;;  %vm16351_vm14 = vmmov %vm16342_vm1 }
 0x33e   : > { %3806 = vrot.lane.b32.xlu0 %v13104_v24, %s9703_s22  ;;  %4185 = vst.msk [vmem:[#allocation3 + $0xf0] sm:$0xff] %vm16344_vm7, %v4140_v52  ;;  %8788 = vmatprep.subr.bf16.mxu1 %v9334_v1  ;;  %v736_v62 = vsel %vm9960_vm15, %v13487_v39, %v735_v17  ;;  %840 = vst [vmem:[#allocation2 + $0xd8] sm:$0x1] %v839_v3  ;;  %v9336_v1 = vld [vmem:[#allocation7 + $0x1e0] sm:$0xff]   ;;  %v1133_v17 = vld [vmem:[#allocation2 + $0xe0] sm:$0x4] }
 0x33f   : > { %4075 = vrot.lane.b32.xlu1 %v16345_v47, %s9703_s22  ;;  %v3957_v27 = vpop.permute.xlu0 %3956  ;;  %v4220_v14 = vpop.permute.xlu1 %4219  ;;  %v572_v47 = vor.u32 %v571_v18, %v568_v35  ;;  %737 = vst [vmem:[#allocation2 + $0xd8] sm:$0xe] %v736_v62  ;;  %8789 = vmatpush3.bf16.msra.mxu1 %v9335_v41  ;;  %vm16350_vm15 = vmmov %vm16342_vm1  ;;  %v1134_v62 = vsel %vm9945_vm12, %v566_v36, %v1133_v17  ;;  %v4003_v17 = vrot.slane %v13100_v57, 5  ;;  %v564_v24 = vrot.slane %v13487_v39, 4 }
 0x340   : > { %3994 = vst.msk [vmem:[#allocation3 + $0x428] sm:$0xff] %vm16338_vm11, %v3957_v27  ;;  %8790 = vmatprep.subr.bf16.mxu1 %v9336_v1  ;;  %v8553_v41 = vpop.f32.mrb[13].mxu1  ;;  %1135 = vst [vmem:[#allocation2 + $0xe0] sm:$0x4] %v1134_v62  ;;  %v5797_v1 = vld [vmem:[#allocation3 + $0x420] sm:$0xff]  ;;  %v8276_v57 = vrot.slane %v13098_v55, 9 }
 0x341   : > { %5466 = vst.msk [vmem:[#allocation3 + $0x2c0] sm:$0xff] %vm16346_vm10, %v3957_v27  ;;  %v574_v18 = vrot.slane %v572_v47, 4  ;;  %v9337_v27 = vld [vmem:[#allocation7 + $0x1a0] sm:$0xff]   ;;  %v13512_v52 = vadd.f32 %v8553_v41, %v8552_v13  ;;  %v8555_v3 = vpop.f32.mrb[14].mxu1  ;;  %vm16355_vm12 = vmmov %vm16343_vm6  ;;  %v1151_v41 = vrot.slane %v13471_v31, 7  ;;  %v4006_v39 = vrot.slane %v13140_v8, 5 }
 0x342   : > { %3875 = vrot.lane.b32.xlu0 %v13147_v48, %s9702_s20  ;;  %4265 = vst.msk [vmem:[#allocation3 + $0xf0] sm:$0xff] %vm16348_vm3, %v4220_v14  ;;  %v9340_v31 = vld [vmem:[#allocation7 + $0x1f0] sm:$0xff]   ;;  %v4004_v8 = vsel %vm16183_vm8, %v8276_v57, %v4003_v17  ;;  %vm16363_vm7 = vmmov %vm16348_vm3  ;;  %vm16372_vm10 = vcmask 261120  }
 0x343   : > { %4149 = vrot.lane.b32.xlu1 %v16349_v12, %s9702_s20  ;;  %v4331_v35 = vpop.permute.xlu0 %4330  ;;  %v3521_v26 = vpop.permute.xlu1 %3520  ;;  %v740_v14 = vsel %vm9982_vm2, %v574_v18, %v739_v58  ;;  %16352 = vst [vmem:[#allocation135_spill] sm:$0xff] %v13512_v52  ;;  %8791 = vmatpush3.bf16.msra.mxu1 %v9337_v27  ;;  %v9339_v58 = vld [vmem:[#allocation7 + $0x1a8] sm:$0xff]   ;;  %vm16358_vm2 = vmmov %vm16343_vm6  ;;  %vm16360_vm6 = vcmask 257024  }
 0x344   : > { %4376 = vst.msk [vmem:[#allocation3 + $0xf8] sm:$0xff] %vm16350_vm15, %v4331_v35  ;;  %741 = vst [vmem:[#allocation2 + $0xe0] sm:$0x3] %v740_v14  ;;  %v8556_v18 = vpop.f32.mrb[15].mxu1  ;;  %8792 = vmatprep.subr.bf16.mxu1 %v9338_v9  ;;  %v16357_v12 = vld [vmem:[#allocation37_spill] sm:$0xff] }
 0x345   : > { %3557 = vst.msk [vmem:[#allocation3 + $0x488] sm:$0xff] %vm16351_vm14, %v3521_v26  ;;  %v13521_v13 = vadd.f32 %v8556_v18, %v8555_v3  ;;  %v1034_v27 = vld [vmem:[#allocation2 + $0xd8] sm:$0x1]  ;;  %vm16359_vm13 = vmmov %vm16358_vm2  ;;  %v573_v3 = vsel %vm9973_vm9, %v564_v24, %v572_v47  ;;  %v8480_v47 = vpop.f32.mrb[12].mxu0 }
 0x346   : > { %3966 = vrot.lane.b32.xlu0 %v13197_v53, %s9704_s24  ;;  %5221 = vst.msk [vmem:[#allocation3 + $0x320] sm:$0xff] %vm16342_vm1, %v3521_v26  ;;  %v16354_v26 = vshll.u32 %v13466_v38, 16  ;;  %v1214_v52 = vld [vmem:[#allocation2 + $0xd8] sm:$0x2]  ;;  %v4005_v38 = vrot.slane %v4003_v17, 4  ;;  %v8481_v17 = vpop.f32.mrb[13].mxu0 }
 0x347   : > { %4229 = vrot.lane.b32.xlu1 %v16353_v22, %s9704_s24  ;;  %v4422_v36 = vpop.permute.xlu0 %4421  ;;  %v5798_v35 = vld [vmem:[#allocation3 + $0x428] sm:$0xff]  ;;  %16356 = vst [vmem:[#allocation69_spill] sm:$0xff] %v13521_v13  ;;  %v3603_v62 = vpop.permute.xlu1 %3602  ;;  %8793 = vmatpush3.bf16.msra.mxu1 %v9339_v58  ;;  %738 = vst.msk [vmem:[#allocation2 + $0xdc] sm:$0xf] %vm16360_vm6, %v573_v3  ;;  %v1215_v9 = vsel %vm10030_vm5, %v1151_v41, %v1214_v52  ;;  %v1280_v58 = vld [vmem:[#allocation2 + $0xe0] sm:$0x4]  ;;  %v13556_v57 = vadd.f32 %v8481_v17, %v8480_v47 }
 0x348   : > { %v8087_v14 = vrot.slane %v16354_v26, 9  ;;  %4467 = vst.msk [vmem:[#allocation3 + $0xf8] sm:$0xff] %vm16355_vm12, %v4422_v36  ;;  %6985 = vmatprep.mubr.bf16.mxu1 %v5798_v35  ;;  %v9341_v36 = vld [vmem:[#allocation7 + $0x1b0] sm:$0xff]   ;;  %v4007_v24 = vsel %vm16183_vm8, %v4005_v38, %v4006_v39  ;;  %1216 = vst [vmem:[#allocation2 + $0xd8] sm:$0x2] %v1215_v9  ;;  %8794 = vmatprep.subr.bf16.mxu1 %v9340_v31  ;;  %v8483_v38 = vpop.f32.mrb[14].mxu0 }
 0x349   : > { %6986 = vmatmul.mubr.bf16.gmra.mrb[56].mxu1 %v5797_v1  ;;  %3639 = vst.msk [vmem:[#allocation3 + $0x488] sm:$0xff] %vm16358_vm2, %v3603_v62  ;;  %v13545_v35 = vcombine.low %v4004_v8, %v4007_v24  ;;  %v16365_v26 = vld [vmem:[#allocation78_spill] sm:$0xff]  ;;  %vm16366_vm5 = vmmov %vm16348_vm3  ;;  %v4043_v8 = vrot.slane %v13126_v45, 5  ;;  %v4044_v24 = vrot.slane %v13129_v40, 6  ;;  %v13581_v17 = vld [vmem:[#allocation2 + $0xd4] sm:$0x7] }
 0x34a   : > { %4340 = vrot.lane.b32.xlu0 %v16357_v12, %s9703_s22  ;;  %5267 = vst.msk [vmem:[#allocation3 + $0x320] sm:$0xff] %vm16359_vm13, %v3603_v62  ;;  %v1035_v12 = vsel %vm10020_vm4, %v8087_v14, %v1034_v27  ;;  %vm16367_vm4 = vmmov %vm16348_vm3  ;;  %v16369_v27 = vld [vmem:[#allocation19_spill] sm:$0xff]  ;;  %v16371_v39 = vld [vmem:[#allocation138_spill] sm:$0xff]  ;;  %v15704_v14 = vshrl.u32 %v13581_v17, 16  ;;  %vm16388_vm13 = vnez %v16116_v63 }
 0x34b   : > { %4696 = vrot.lane.b32.xlu1 %v12099_v29, %s9702_s20  ;;  %v4497_v55 = vpop.permute.xlu0 %4496  ;;  %v8071_v29 = vrot.slane %v13480_v37, 10  ;;  %1036 = vst [vmem:[#allocation2 + $0xd8] sm:$0x1] %v1035_v12  ;;  %v3677_v4 = vpop.permute.xlu1 %3676  ;;  %16364 = vst [vmem:[#allocation25_spill] sm:$0xff] %v13545_v35  ;;  %v936_v52 = vld [vmem:[#allocation2 + $0xe0] sm:$0x2]  ;;  %vm16370_vm11 = vnez %v16369_v27  ;;  %8795 = vmatpush3.bf16.msra.mxu1 %v9341_v36 }
 0x34c   : > { %4542 = vst.msk [vmem:[#allocation3 + $0xf8] sm:$0xff] %vm16363_vm7, %v4497_v55  ;;  %v1281_v41 = vsel %vm16370_vm11, %v13480_v37, %v1280_v58  ;;  %vm16373_vm3 = vmmov %vm16372_vm10  ;;  %v9342_v3 = vld [vmem:[#allocation7 + $0x1f8] sm:$0xff]   ;;  %v8484_v12 = vpop.f32.mrb[15].mxu0  ;;  %vm16395_vm11 = vnez %v16169_v20 }
 0x34d   : > { %3713 = vst.msk [vmem:[#allocation3 + $0x488] sm:$0xff] %vm16366_vm5, %v3677_v4  ;;  %v937_v62 = vsel %vm10046_vm0, %v8071_v29, %v936_v52  ;;  %1282 = vst [vmem:[#allocation2 + $0xe0] sm:$0x4] %v1281_v41  ;;  %v9343_v1 = vld [vmem:[#allocation7 + $0x1b8] sm:$0xff]   ;;  %v13566_v37 = vadd.f32 %v8484_v12, %v8483_v38  ;;  %8796 = vmatprep.subr.bf16.mxu1 %v9342_v3  ;;  %v4047_v29 = vrot.slane %v13143_v42, 5  ;;  %v5695_v52 = vld [vmem:[#allocation3 + $0xf0] sm:$0xff] }
 0x34e   : > { %4431 = vrot.lane.b32.xlu0 %v16365_v26, %s9702_s20  ;;  %5305 = vst.msk [vmem:[#allocation3 + $0x320] sm:$0xff] %vm16367_vm4, %v3677_v4  ;;  %938 = vst [vmem:[#allocation2 + $0xe0] sm:$0x2] %v937_v62  ;;  %v16376_v55 = vld [vmem:[#allocation115_spill] sm:$0xff]  ;;  %v13571_v36 = vld [vmem:[#allocation2 + $0xdc] sm:$0xf] }
 0x34f   : > { %4342 = vrot.lane.b32.xlu1 %v16371_v39, %s9703_s22  ;;  %4042 = vst.msk [vmem:[#allocation3 + $0x638] sm:$0xff] %vm16372_vm10, %v13545_v35  ;;  %v3799_v31 = vpop.permute.xlu0 %3798  ;;  %vm16374_vm0 = vmmov %vm16342_vm1  ;;  %v4068_v9 = vpop.permute.xlu1 %4067  ;;  %v16378_v47 = vld [vmem:[#allocation58_spill] sm:$0xff]  ;;  %8797 = vmatpush3.bf16.msra.mxu1 %v9343_v1  ;;  %v13585_v62 = vshll.u32 %v13571_v36, 16  ;;  %v13588_v27 = vshrl.u32 %v13571_v36, 16  ;;  %v4045_v39 = vor.u32 %v4044_v24, %v4043_v8  ;;  %v13594_v1 = vld [vmem:[#allocation9] ss:$0 sm:$0xff] }
 0x350   : > { %5502 = vst.msk [vmem:[#allocation3 + $0x4d0] sm:$0xff] %vm16373_vm3, %v13545_v35  ;;  %vm16375_vm15 = vmmov %vm16374_vm0  ;;  %v4048_v4 = vrot.slane %v16378_v47, 6  ;;  %v16379_v58 = vld [vmem:[#allocation94_spill] sm:$0xff]  ;;  %v16387_v35 = vld [vmem:[#allocation117_spill] sm:$0xff] }
 0x351   : > { %3835 = vst.msk [vmem:[#allocation3 + $0x490] sm:$0xff] %vm16374_vm0, %v3799_v31  ;;  %vm16377_vm14 = vmmov %vm16374_vm0  ;;  %v4402_v8 = vrot.slane %v13585_v62, 5  ;;  %v4406_v24 = vrot.slane %v13588_v27, 4 }
 0x352   : > { %5379 = vst.msk [vmem:[#allocation3 + $0x328] sm:$0xff] %vm16375_vm15, %v3799_v31  ;;  %4506 = vrot.lane.b32.xlu0 %v16376_v55, %s9704_s24  ;;  %v13579_v26 = vld [vmem:[#allocation2 + $0xd8] sm:$0xf]  ;;  %16380 = vst [vmem:[#allocation70_spill] sm:$0xff] %v13585_v62  ;;  %v4049_v3 = vor.u32 %v4048_v4, %v4047_v29  ;;  %v4055_v31 = vrot.slane %v13165_v43, 6  ;;  %v4054_v55 = vrot.slane %v15704_v14, 5  ;;  %v6747_v29 = vadd.f32 %v13360_v15, %v13594_v1 }
 0x353   : > { %4112 = vst.msk [vmem:[#allocation3 + $0x158] sm:$0xff] %vm16377_vm14, %v4068_v9  ;;  %4433 = vrot.lane.b32.xlu1 %v16379_v58, %s9702_s20  ;;  %16381 = vst [vmem:[#allocation68_spill] sm:$0xff] %v13588_v27  ;;  %v3868_v41 = vpop.permute.xlu0 %3867  ;;  %v5696_v38 = vld [vmem:[#allocation3 + $0xf8] sm:$0xff]  ;;  %v13592_v12 = vshrl.u32 %v13579_v26, 16  ;;  %v4142_v9 = vpop.permute.xlu1 %4141  ;;  %v13601_v58 = vshll.u32 %v13579_v26, 16  ;;  %v4407_v22 = vor.u32 %v4406_v24, %v4402_v8 }
 0x354   : > { %vm16382_vm1 = vmmov %vm16358_vm2  ;;  %7082 = vmatprep.mubr.bf16.mxu0 %v5696_v38  ;;  %v16385_v4 = vld [vmem:[#allocation31_spill] sm:$0xff]  ;;  %v4051_v38 = vrot.slane %v4049_v3, 4  ;;  %v4056_v53 = vor.u32 %v4055_v31, %v4054_v55 }
 0x355   : > { %3904 = vst.msk [vmem:[#allocation3 + $0x490] sm:$0xff] %vm16382_vm1, %v3868_v41  ;;  %vm16383_vm12 = vmmov %vm16382_vm1  ;;  %7083 = vmatmul.mubr.bf16.gmra.mrb[56].mxu0 %v5695_v52  ;;  %v13610_v13 = vld [vmem:[#allocation2 + $0xe0] sm:$0x7]  ;;  %v4393_v14 = vrot.slane %v13592_v12, 4  ;;  %v4396_v48 = vrot.slane %v13601_v58, 5  ;;  %v6750_v52 = vadd.f32 %v13364_v30, %v13594_v1  ;;  %v4408_v62 = vrot.slane %v4407_v22, 4 }
 0x356   : > { %5412 = vst.msk [vmem:[#allocation3 + $0x328] sm:$0xff] %vm16383_vm12, %v3868_v41  ;;  %16384 = vst [vmem:[#allocation67_spill] sm:$0xff] %v13601_v58  ;;  %4616 = vrot.lane.b32.xlu0 %v16385_v4, %s9703_s22  ;;  %v4046_v41 = vrot.slane %v4045_v39, 4  ;;  %v13617_v15 = vshll.u32 %v13610_v13, 16  ;;  %v8574_v39 = vpop.f32.mrb[16].mxu1  ;;  %v13623_v4 = vcombine.low %v13579_v26, %v13571_v36  ;;  %v4057_v30 = vsel %vm16388_vm13, %v4051_v38, %v4056_v53 }
 0x357   : > { %vm16386_vm2 = vmmov %vm16382_vm1  ;;  %4508 = vrot.lane.b32.xlu1 %v16387_v35, %s9704_s24  ;;  %v13627_v35 = vld [vmem:[#allocation2 + $0xd0] sm:$0xf]  ;;  %v8575_v55 = vpop.f32.mrb[17].mxu1  ;;  %v4222_v24 = vpop.permute.xlu1 %4221  ;;  %v4397_v49 = vor.u32 %v4396_v48, %v4393_v14 }
 0x358   : > { %4186 = vst.msk [vmem:[#allocation3 + $0x158] sm:$0xff] %vm16386_vm2, %v4142_v9  ;;  %v3959_v9 = vpop.permute.xlu0 %3958  ;;  %v4050_v51 = vsel %vm16388_vm13, %v4046_v41, %v4049_v3  ;;  %16389 = vst [vmem:[#allocation73_spill] sm:$0xff] %v13627_v35  ;;  %v4127_v31 = vrot.slane %v13627_v35, 6  ;;  %v4412_v27 = vrot.slane %v13617_v15, 5  ;;  %v8576_v58 = vadd.f32 %v8575_v55, %v8574_v39  ;;  %v16392_v3 = vld [vmem:[#allocation124_spill] sm:$0xff]  ;;  %v8577_v41 = vpop.f32.mrb[18].mxu1 }
 0x359   : > { %vm16390_vm6 = vmmov %vm16367_vm4  ;;  %v13642_v35 = vld [vmem:[#allocation2 + $0xcc] sm:$0xf]  ;;  %v8578_v22 = vpop.f32.mrb[19].mxu1  ;;  %v4398_v14 = vrot.slane %v4397_v49, 4  ;;  %v4130_v39 = vrot.slane %v13581_v17, 6  ;;  %v4484_v55 = vrot.slane %v13571_v36, 5 }
 0x35a   : > { %3995 = vst.msk [vmem:[#allocation3 + $0x490] sm:$0xff] %vm16390_vm6, %v3959_v9  ;;  %vm16391_vm7 = vmmov %vm16367_vm4  ;;  %4770 = vrot.lane.b32.xlu0 %v16392_v3, %s9704_s24  ;;  %v8279_v53 = vrot.slane %v13642_v35, 10  ;;  %v4129_v48 = vrot.slane %v4127_v31, 4  ;;  %v4413_v38 = vsel %vm16395_vm11, %v4408_v62, %v4412_v27 }
 0x35b   : > { %5467 = vst.msk [vmem:[#allocation3 + $0x328] sm:$0xff] %vm16391_vm7, %v3959_v9  ;;  %vm16393_vm5 = vmmov %vm16367_vm4  ;;  %v13640_v9 = vcombine.low %v4050_v51, %v4057_v30  ;;  %4618 = vrot.lane.b32.xlu1 %v16213_v2, %s9703_s22  ;;  %v8579_v51 = vadd.f32 %v8578_v22, %v8577_v41  ;;  %v4199_v2 = vrot.slane %v13126_v45, 6  ;;  %v3523_v49 = vpop.permute.xlu1 %3522  ;;  %v4403_v62 = vsel %vm16395_vm11, %v4398_v14, %v4402_v8  ;;  %v16400_v22 = vld [vmem:[#allocation60_spill] sm:$0xff] }
 0x35c   : > { %4266 = vst.msk [vmem:[#allocation3 + $0x158] sm:$0xff] %vm16393_vm5, %v4222_v24  ;;  %vm16394_vm4 = vmmov %vm16373_vm3  ;;  %v13651_v24 = vadd.f32 %v8576_v58, %v6747_v29  ;;  %v4333_v30 = vpop.permute.xlu0 %4332  ;;  %v8286_v58 = vrot.slane %v13579_v26, 9  ;;  %v4486_v29 = vrot.slane %v4484_v55, 4  ;;  %v13670_v45 = vcombine.low %v4403_v62, %v4413_v38  ;;  %v5810_v14 = vld [vmem:[#allocation3 + $0x488] sm:$0xff] }
 0x35d   : > { %4857 = vst.msk [vmem:[#allocation3 + $0x5e8] sm:$0xff] %vm16394_vm4, %v13623_v4  ;;  %vm16397_vm10 = vmmov %vm16373_vm3  ;;  %vm16398_vm3 = vnez %v16045_v6  ;;  %v13664_v41 = vadd.f32 %v8579_v51, %v6750_v52  ;;  %v4487_v8 = vrot.slane %v13610_v13, 5  ;;  %v4200_v51 = vrot.slane %v13129_v40, 7 }
 0x35e   : > { %16396 = vst [vmem:[#allocation127_spill] sm:$0xff] %v13651_v24  ;;  %4604 = vst.msk [vmem:[#allocation3 + $0x5e0] sm:$0xff] %vm16397_vm10, %v13640_v9  ;;  %v4128_v3 = vsel %vm16398_vm3, %v8279_v53, %v4127_v31  ;;  %v4131_v27 = vsel %vm16398_vm3, %v4129_v48, %v4130_v39  ;;  %4077 = vrot.lane.b32.xlu0 %v16400_v22, %s9703_s22  ;;  %v8486_v31 = vpop.f32.mrb[16].mxu0  ;;  %v16403_v39 = vld [vmem:[#allocation30_spill] sm:$0xff]  ;;  %v4485_v52 = vsel %vm16183_vm8, %v8286_v58, %v4484_v55  ;;  %v16408_v24 = vld [vmem:[#allocation52_spill] sm:$0xff] }
 0x35f   : > { %4377 = vst.msk [vmem:[#allocation3 + $0x160] sm:$0xff] %vm16374_vm0, %v4333_v30  ;;  %16399 = vst [vmem:[#allocation88_spill] sm:$0xff] %v13664_v41  ;;  %v13672_v53 = vcombine.low %v4128_v3, %v4131_v27  ;;  %v8487_v48 = vpop.f32.mrb[17].mxu0  ;;  %4772 = vrot.lane.b32.xlu1 %v16403_v39, %s9704_s24  ;;  %v4203_v30 = vrot.slane %v13143_v42, 6  ;;  %v4488_v55 = vsel %vm16183_vm8, %v4486_v29, %v4487_v8  ;;  %v16406_v40 = vshrl.u32 %v13581_v17, 16  ;;  %v3605_v22 = vpop.permute.xlu1 %3604  ;;  %v16411_v29 = vld [vmem:[#allocation126_spill] sm:$0xff] }
 0x360   : > { %vm16401_vm15 = vmmov %vm16374_vm0  ;;  %v13682_v38 = vadd.f32 %v8487_v48, %v8486_v31  ;;  %v4424_v3 = vpop.permute.xlu0 %4423  ;;  %v8489_v62 = vpop.f32.mrb[18].mxu0  ;;  %v4209_v42 = vrot.slane %v13165_v43, 7  ;;  %v13694_v31 = vcombine.low %v4485_v52, %v4488_v55  ;;  %v4201_v48 = vor.u32 %v4200_v51, %v4199_v2 }
 0x361   : > { %3558 = vst.msk [vmem:[#allocation3 + $0x4f0] sm:$0xff] %vm16401_vm15, %v3523_v49  ;;  %vm16402_vm14 = vmmov %vm16374_vm0  ;;  %v5811_v27 = vld [vmem:[#allocation3 + $0x490] sm:$0xff]  ;;  %v4208_v58 = vrot.slane %v16406_v40, 6 }
 0x362   : > { %5222 = vst.msk [vmem:[#allocation3 + $0x388] sm:$0xff] %vm16402_vm14, %v3523_v49  ;;  %v4204_v49 = vrot.slane %v16378_v47, 7  ;;  %vm16404_vm1 = vmmov %vm16394_vm4  ;;  %6993 = vmatprep.mubr.bf16.mxu1 %v5811_v27  ;;  %v8490_v47 = vpop.f32.mrb[19].mxu0  ;;  %4151 = vrot.lane.b32.xlu0 %v16408_v24, %s9702_s20  ;;  %v4202_v8 = vrot.slane %v4201_v48, 4  ;;  %vm16413_vm4 = vcmask 1048320  }
 0x363   : > { %5188 = vst.msk [vmem:[#allocation3 + $0x590] sm:$0xff] %vm16404_vm1, %v13670_v45  ;;  %vm16405_vm12 = vmmov %vm16404_vm1  ;;  %v13696_v41 = vadd.f32 %v8490_v47, %v8489_v62  ;;  %6994 = vmatmul.mubr.bf16.gmra.mrb[60].mxu1 %v5810_v14  ;;  %v4210_v43 = vor.u32 %v4209_v42, %v4208_v58  ;;  %4079 = vrot.lane.b32.xlu1 %v16411_v29, %s9703_s22  ;;  %v3679_v51 = vpop.permute.xlu1 %3678  ;;  %v16417_v62 = vld [vmem:[#allocation53_spill] sm:$0xff]  ;;  %v8580_v55 = vpop.f32.mrb[20].mxu1  ;;  %v5708_v48 = vld [vmem:[#allocation3 + $0x158] sm:$0xff] }
 0x364   : > { %5026 = vst.msk [vmem:[#allocation3 + $0x588] sm:$0xff] %vm16405_vm12, %v13672_v53  ;;  %16407 = vst [vmem:[#allocation89_spill] sm:$0xff] %v13694_v31  ;;  %v4205_v39 = vor.u32 %v4204_v49, %v4203_v30  ;;  %v4499_v52 = vpop.permute.xlu0 %4498  ;;  %v16414_v49 = vld [vmem:[#allocation123_spill] sm:$0xff]  ;;  %v8581_v58 = vpop.f32.mrb[21].mxu1  ;;  %v6755_v42 = vadd.f32 %v13393_v28, %v13594_v1 }
 0x365   : > { %4468 = vst.msk [vmem:[#allocation3 + $0x160] sm:$0xff] %vm16386_vm2, %v4424_v3  ;;  %vm16409_vm6 = vmmov %vm16386_vm2  ;;  %v8582_v47 = vadd.f32 %v8581_v58, %v8580_v55 }
 0x366   : > { %3640 = vst.msk [vmem:[#allocation3 + $0x4f0] sm:$0xff] %vm16409_vm6, %v3605_v22  ;;  %vm16410_vm7 = vmmov %vm16386_vm2  ;;  %v4207_v2 = vrot.slane %v4205_v39, 4  ;;  %v4206_v14 = vsel %vm9973_vm9, %v4202_v8, %v4205_v39  ;;  %4231 = vrot.lane.b32.xlu0 %v16414_v49, %s9704_s24  ;;  %v16422_v39 = vld [vmem:[#allocation61_spill] sm:$0xff] }
 0x367   : > { %5268 = vst.msk [vmem:[#allocation3 + $0x388] sm:$0xff] %vm16410_vm7, %v3605_v22  ;;  %vm16412_vm5 = vmmov %vm16404_vm1  ;;  %4153 = vrot.lane.b32.xlu1 %v16417_v62, %s9702_s20  ;;  %v4070_v40 = vpop.permute.xlu1 %4069  ;;  %v8583_v22 = vpop.f32.mrb[22].mxu1 }
 0x368   : > { %5503 = vst.msk [vmem:[#allocation3 + $0x538] sm:$0xff] %vm16412_vm5, %v13694_v31  ;;  %v4211_v30 = vsel %vm9973_vm9, %v4207_v2, %v4210_v43  ;;  %vm16415_vm10 = vmmov %vm16413_vm4  ;;  %v3801_v27 = vpop.permute.xlu0 %3800  ;;  %v8584_v29 = vpop.f32.mrb[23].mxu1  ;;  %v13733_v2 = vadd.f32 %v8582_v47, %v6755_v42 }
 0x369   : > { %4543 = vst.msk [vmem:[#allocation3 + $0x160] sm:$0xff] %vm16413_vm4, %v4499_v52  ;;  %vm16416_vm0 = vmmov %vm16413_vm4  ;;  %v13715_v3 = vcombine.low %v4206_v14, %v4211_v30  ;;  %v8585_v52 = vadd.f32 %v8584_v29, %v8583_v22 }
 0x36a   : > { %3714 = vst.msk [vmem:[#allocation3 + $0x4f0] sm:$0xff] %vm16415_vm10, %v3679_v51  ;;  %vm16418_vm15 = vmmov %vm16404_vm1  ;;  %4698 = vrot.lane.b32.xlu0 %v16217_v33, %s9702_s20  ;;  %v6758_v33 = vadd.f32 %v13400_v16, %v13594_v1 }
 0x36b   : > { %5306 = vst.msk [vmem:[#allocation3 + $0x388] sm:$0xff] %vm16416_vm0, %v3679_v51  ;;  %vm16419_vm1 = vmmov %vm16402_vm14  ;;  %4233 = vrot.lane.b32.xlu1 %v16422_v39, %s9704_s24  ;;  %v4144_v28 = vpop.permute.xlu1 %4143  ;;  %v8492_v14 = vpop.f32.mrb[20].mxu0 }
 0x36c   : > { %5346 = vst.msk [vmem:[#allocation3 + $0x530] sm:$0xff] %vm16418_vm15, %v13715_v3  ;;  %vm16420_vm12 = vmmov %vm16419_vm1  ;;  %v3870_v43 = vpop.permute.xlu0 %3869  ;;  %v13741_v51 = vadd.f32 %v8585_v52, %v6758_v33  ;;  %v6763_v33 = vadd.f32 %v13438_v5, %v13594_v1 }
 0x36d   : > { %3836 = vst.msk [vmem:[#allocation3 + $0x4f8] sm:$0xff] %vm16402_vm14, %v3801_v27  ;;  %vm16421_vm2 = vmmov %vm16419_vm1 }
 0x36e   : > { %5380 = vst.msk [vmem:[#allocation3 + $0x390] sm:$0xff] %vm16419_vm1, %v3801_v27  ;;  %16423 = vst [vmem:[#allocation83_spill] sm:$0xff] %v13733_v2  ;;  %4344 = vrot.lane.b32.xlu0 %v16161_v44, %s9703_s22  ;;  %v8493_v44 = vpop.f32.mrb[21].mxu0 }
 0x36f   : > { %4113 = vst.msk [vmem:[#allocation3 + $0x1c0] sm:$0xff] %vm16420_vm12, %v4070_v40  ;;  %vm16424_vm7 = vmmov %vm16409_vm6  ;;  %4700 = vrot.lane.b32.xlu1 %v16244_v25, %s9702_s20  ;;  %v4224_v30 = vpop.permute.xlu1 %4223  ;;  %v13751_v27 = vadd.f32 %v8493_v44, %v8492_v14  ;;  %v8495_v55 = vpop.f32.mrb[22].mxu0  ;;  %v9345_v25 = vld [vmem:[#allocation7 + $0x240] sm:$0xff]  }
 0x370   : > { %5537 = vst.msk [vmem:[#allocation3 + $0x58] sm:$0xff] %vm16421_vm2, %v4070_v40  ;;  %v5709_v8 = vld [vmem:[#allocation3 + $0x160] sm:$0xff]  ;;  %vm16425_vm5 = vmmov %vm16409_vm6  ;;  %v3961_v16 = vpop.permute.xlu0 %3960  ;;  %v8496_v42 = vpop.f32.mrb[23].mxu0  ;;  %8894 = vmatprep.subr.bf16.mxu0 %v9345_v25 }
 0x371   : > { %3905 = vst.msk [vmem:[#allocation3 + $0x4f8] sm:$0xff] %vm16409_vm6, %v3870_v43  ;;  %7090 = vmatprep.mubr.bf16.mxu0 %v5709_v8  ;;  %vm16426_vm4 = vmmov %vm16425_vm5  ;;  %v9346_v40 = vld [vmem:[#allocation7 + $0x200] sm:$0xff]   ;;  %v13756_v47 = vadd.f32 %v8496_v42, %v8495_v55  ;;  %v5823_v22 = vld [vmem:[#allocation3 + $0x4f0] sm:$0xff] }
 0x372   : > { %5413 = vst.msk [vmem:[#allocation3 + $0x390] sm:$0xff] %vm16424_vm7, %v3870_v43  ;;  %7091 = vmatmul.mubr.bf16.gmra.mrb[60].mxu0 %v5708_v48  ;;  %16427 = vst [vmem:[#allocation82_spill] sm:$0xff] %v13741_v51  ;;  %4435 = vrot.lane.b32.xlu0 %v16216_v60, %s9702_s20  ;;  %v16444_v42 = vld [vmem:[#allocation80_spill] sm:$0xff] }
 0x373   : > { %4187 = vst.msk [vmem:[#allocation3 + $0x1c0] sm:$0xff] %vm16425_vm5, %v4144_v28  ;;  %vm16428_vm10 = vmmov %vm16416_vm0  ;;  %4346 = vrot.lane.b32.xlu1 %v16240_v0, %s9703_s22  ;;  %v3525_v60 = vpop.permute.xlu1 %3524  ;;  %8895 = vmatpush3.bf16.msra.mxu0 %v9346_v40 }
 0x374   : > { %5575 = vst.msk [vmem:[#allocation3 + $0x58] sm:$0xff] %vm16426_vm4, %v4144_v28  ;;  %vm16429_vm15 = vmmov %vm16416_vm0  ;;  %v4335_v58 = vpop.permute.xlu0 %4334 }
 0x375   : > { %3996 = vst.msk [vmem:[#allocation3 + $0x4f8] sm:$0xff] %vm16428_vm10, %v3961_v16  ;;  %vm16430_vm14 = vmmov %vm16416_vm0 }
 0x376   : > { %5468 = vst.msk [vmem:[#allocation3 + $0x390] sm:$0xff] %vm16416_vm0, %v3961_v16  ;;  %4510 = vrot.lane.b32.xlu0 %v16221_v54, %s9704_s24  ;;  %vm16431_vm12 = vmmov %vm16419_vm1 }
 0x377   : > { %4267 = vst.msk [vmem:[#allocation3 + $0x1c0] sm:$0xff] %vm16429_vm15, %v4224_v30  ;;  %vm16432_vm2 = vmmov %vm16419_vm1  ;;  %4437 = vrot.lane.b32.xlu1 %v16242_v10, %s9702_s20  ;;  %v3607_v43 = vpop.permute.xlu1 %3606  ;;  %v8586_v29 = vpop.f32.mrb[24].mxu1 }
 0x378   : > { %5619 = vst.msk [vmem:[#allocation3 + $0x58] sm:$0xff] %vm16430_vm14, %v4224_v30  ;;  %v4426_v0 = vpop.permute.xlu0 %4425  ;;  %vm16433_vm6 = vmmov %vm16426_vm4  ;;  %v8587_v10 = vpop.f32.mrb[25].mxu1 }
 0x379   : > { %4378 = vst.msk [vmem:[#allocation3 + $0x1c8] sm:$0xff] %vm16419_vm1, %v4335_v58  ;;  %vm16434_vm7 = vmmov %vm16426_vm4  ;;  %v8588_v52 = vadd.f32 %v8587_v10, %v8586_v29  ;;  %v8589_v28 = vpop.f32.mrb[26].mxu1 }
 0x37a   : > { %3559 = vst.msk [vmem:[#allocation3 + $0x558] sm:$0xff] %vm16431_vm12, %v3525_v60  ;;  %4620 = vrot.lane.b32.xlu0 %v12471_v34, %s9703_s22  ;;  %vm16435_vm5 = vmmov %vm16426_vm4  ;;  %v16437_v34 = vld [vmem:[#allocation29_spill] sm:$0xff]  ;;  %v8590_v16 = vpop.f32.mrb[27].mxu1 }
 0x37b   : > { %5223 = vst.msk [vmem:[#allocation3 + $0x3f0] sm:$0xff] %vm16432_vm2, %v3525_v60  ;;  %4512 = vrot.lane.b32.xlu1 %v16248_v50, %s9704_s24  ;;  %vm16436_vm4 = vmmov %vm16416_vm0  ;;  %v6766_v50 = vadd.f32 %v13445_v59, %v13594_v1  ;;  %v13782_v14 = vadd.f32 %v8588_v52, %v6763_v33  ;;  %v8591_v30 = vadd.f32 %v8590_v16, %v8589_v28  ;;  %v9348_v59 = vld [vmem:[#allocation7 + $0x208] sm:$0xff]   ;;  %v1292_v28 = vld [vmem:[#allocation2 + $0xcc] sm:$0xf] }
 0x37c   : > { %v5824_v48 = vld [vmem:[#allocation3 + $0x4f8] sm:$0xff]  ;;  %4469 = vst.msk [vmem:[#allocation3 + $0x1c8] sm:$0xff] %vm16433_vm6, %v4426_v0  ;;  %v4501_v54 = vpop.permute.xlu0 %4500  ;;  %v3681_v8 = vpop.permute.xlu1 %3680  ;;  %vm16438_vm10 = vmmov %vm16416_vm0  ;;  %v1293_v16 = vld [vmem:[#allocation2 + $0xd0] sm:$0xf] }
 0x37d   : > { %7001 = vmatprep.mubr.bf16.mxu1 %v5824_v48  ;;  %3641 = vst.msk [vmem:[#allocation3 + $0x558] sm:$0xff] %vm16434_vm7, %v3607_v43  ;;  %16439 = vst [vmem:[#allocation87_spill] sm:$0xff] %v13782_v14  ;;  %v13786_v55 = vadd.f32 %v8591_v30, %v6766_v50  ;;  %v8498_v25 = vpop.f32.mrb[24].mxu0  ;;  %v6771_v50 = vadd.f32 %v13556_v57, %v13594_v1 }
 0x37e   : > { %7002 = vmatmul.mubr.bf16.gmra.mrb[64].mxu1 %v5823_v22  ;;  %5269 = vst.msk [vmem:[#allocation3 + $0x3f0] sm:$0xff] %vm16435_vm5, %v3607_v43  ;;  %4774 = vrot.lane.b32.xlu0 %v16437_v34, %s9704_s24  ;;  %vm16440_vm15 = vmmov %vm16419_vm1  ;;  %v8499_v40 = vpop.f32.mrb[25].mxu0  ;;  %v5721_v58 = vld [vmem:[#allocation3 + $0x1c0] sm:$0xff] }
 0x37f   : > { %4544 = vst.msk [vmem:[#allocation3 + $0x1c8] sm:$0xff] %vm16436_vm4, %v4501_v54  ;;  %4622 = vrot.lane.b32.xlu1 %v12545_v7, %s9703_s22  ;;  %vm16441_vm14 = vmmov %vm16419_vm1  ;;  %v9347_v7 = vld [vmem:[#allocation7 + $0x248] sm:$0xff]   ;;  %v13794_v60 = vadd.f32 %v8499_v40, %v8498_v25  ;;  %v8501_v0 = vpop.f32.mrb[26].mxu0  ;;  %v6774_v40 = vadd.f32 %v13566_v37, %v13594_v1 }
 0x380   : > { %3715 = vst.msk [vmem:[#allocation3 + $0x558] sm:$0xff] %vm16438_vm10, %v3681_v8  ;;  %v3803_v5 = vpop.permute.xlu0 %3802  ;;  %v4072_v44 = vpop.permute.xlu1 %4071  ;;  %16442 = vst [vmem:[#allocation137_spill] sm:$0xff] %v13786_v55  ;;  %8896 = vmatprep.subr.bf16.mxu0 %v9347_v7  ;;  %v16455_v25 = vld [vmem:[#allocation17_spill] sm:$0xff] }
 0x381   : > { %5307 = vst.msk [vmem:[#allocation3 + $0x3f0] sm:$0xff] %vm16416_vm0, %v3681_v8  ;;  %vm16443_vm12 = vmmov %vm16419_vm1  ;;  %8897 = vmatpush3.bf16.msra.mxu0 %v9348_v59  ;;  %v16451_v8 = vld [vmem:[#allocation85_spill] sm:$0xff] }
 0x382   : > { %3837 = vst.msk [vmem:[#allocation3 + $0x560] sm:$0xff] %vm16440_vm15, %v3803_v5  ;;  %4081 = vrot.lane.b32.xlu0 %v16225_v23, %s9703_s22  ;;  %vm16445_vm2 = vmmov %vm16435_vm5  ;;  %v8502_v23 = vpop.f32.mrb[27].mxu0 }
 0x383   : > { %5381 = vst.msk [vmem:[#allocation3 + $0x3f8] sm:$0xff] %vm16441_vm14, %v3803_v5  ;;  %4776 = vrot.lane.b32.xlu1 %v16444_v42, %s9704_s24  ;;  %vm16446_vm6 = vmmov %vm16445_vm2  ;;  %v13798_v54 = vadd.f32 %v8502_v23, %v8501_v0  ;;  %v1294_v0 = vld [vmem:[#allocation2 + $0xd4] sm:$0x7] }
 0x384   : > { %4114 = vst.msk [vmem:[#allocation3 + $0x228] sm:$0xff] %vm16419_vm1, %v4072_v44  ;;  %v3872_v22 = vpop.permute.xlu0 %3871  ;;  %v4146_v43 = vpop.permute.xlu1 %4145  ;;  %vm16447_vm7 = vmmov %vm16445_vm2 }
 0x385   : > { %5538 = vst.msk [vmem:[#allocation3 + $0xc0] sm:$0xff] %vm16443_vm12, %v4072_v44  ;;  %vm16448_vm5 = vmmov %vm16445_vm2 }
 0x386   : > { %v5722_v48 = vld [vmem:[#allocation3 + $0x1c8] sm:$0xff]  ;;  %3906 = vst.msk [vmem:[#allocation3 + $0x560] sm:$0xff] %vm16445_vm2, %v3872_v22  ;;  %4155 = vrot.lane.b32.xlu0 %v16232_v56, %s9702_s20  ;;  %vm16449_vm4 = vmmov %vm16416_vm0  ;;  %vm16456_vm2 = vcmask 257024  }
 0x387   : > { %5414 = vst.msk [vmem:[#allocation3 + $0x3f8] sm:$0xff] %vm16446_vm6, %v3872_v22  ;;  %7098 = vmatprep.mubr.bf16.mxu0 %v5722_v48  ;;  %4083 = vrot.lane.b32.xlu1 %v16255_v61, %s9703_s22  ;;  %vm16450_vm10 = vmmov %vm16416_vm0  ;;  %v5836_v44 = vld [vmem:[#allocation3 + $0x558] sm:$0xff]  ;;  %v9349_v22 = vld [vmem:[#allocation7 + $0x250] sm:$0xff]  }
 0x388   : > { %7099 = vmatmul.mubr.bf16.gmra.mrb[64].mxu0 %v5721_v58  ;;  %4188 = vst.msk [vmem:[#allocation3 + $0x228] sm:$0xff] %vm16447_vm7, %v4146_v43  ;;  %v3963_v29 = vpop.permute.xlu0 %3962  ;;  %v4226_v10 = vpop.permute.xlu1 %4225  ;;  %vm16452_vm15 = vmmov %vm16416_vm0  ;;  %8898 = vmatprep.subr.bf16.mxu0 %v9349_v22 }
 0x389   : > { %5576 = vst.msk [vmem:[#allocation3 + $0xc0] sm:$0xff] %vm16448_vm5, %v4146_v43  ;;  %vm16453_vm14 = vmmov %vm16419_vm1  ;;  %v8592_v61 = vpop.f32.mrb[28].mxu1  ;;  %v9350_v43 = vld [vmem:[#allocation7 + $0x210] sm:$0xff]  }
 0x38a   : > { %3997 = vst.msk [vmem:[#allocation3 + $0x560] sm:$0xff] %vm16449_vm4, %v3963_v29  ;;  %4235 = vrot.lane.b32.xlu0 %v16451_v8, %s9704_s24  ;;  %v8593_v34 = vpop.f32.mrb[29].mxu1  ;;  %vm16454_vm12 = vmmov %vm16419_vm1  ;;  %8899 = vmatpush3.bf16.msra.mxu0 %v9350_v43  ;;  %v13867_v43 = vadd.f32 %v13682_v38, %v13594_v1  ;;  %v16490_v8 = vld [vmem:[#allocation51_spill] sm:$0xff] }
 0x38b   : > { %5469 = vst.msk [vmem:[#allocation3 + $0x3f8] sm:$0xff] %vm16450_vm10, %v3963_v29  ;;  %4157 = vrot.lane.b32.xlu1 %v16260_v11, %s9702_s20  ;;  %v8594_v30 = vadd.f32 %v8593_v34, %v8592_v61  ;;  %v8595_v5 = vpop.f32.mrb[30].mxu1  ;;  %vm16457_vm6 = vmmov %vm16456_vm2  ;;  %vm16462_vm10 = vcmask 256000   ;;  %v4556_v29 = vrot.slane %v13592_v12, 5  ;;  %v16464_v61 = vld [vmem:[#allocation68_spill] sm:$0xff]  ;;  %v16465_v34 = vld [vmem:[#allocation70_spill] sm:$0xff] }
 0x38c   : > { %4268 = vst.msk [vmem:[#allocation3 + $0x228] sm:$0xff] %vm16416_vm0, %v4226_v10  ;;  %v4337_v33 = vpop.permute.xlu0 %4336  ;;  %v8596_v7 = vpop.f32.mrb[31].mxu1  ;;  %vm16459_vm7 = vmmov %vm16448_vm5 }
 0x38d   : > { %5620 = vst.msk [vmem:[#allocation3 + $0xc0] sm:$0xff] %vm16452_vm15, %v4226_v10  ;;  %v3527_v52 = vpop.permute.xlu1 %3526  ;;  %v13827_v58 = vadd.f32 %v8594_v30, %v6771_v50  ;;  %v8597_v57 = vadd.f32 %v8596_v7, %v8595_v5  ;;  %vm16460_vm4 = vmmov %vm16448_vm5  ;;  %v16463_v10 = vld [vmem:[#allocation67_spill] sm:$0xff]  ;;  %v15718_v50 = vshrl.u32 %v13610_v13, 16 }
 0x38e   : > { %4379 = vst.msk [vmem:[#allocation3 + $0x230] sm:$0xff] %vm16453_vm14, %v4337_v33  ;;  %4702 = vrot.lane.b32.xlu0 %v16271_v21, %s9702_s20  ;;  %v4557_v33 = vrot.slane %v16463_v10, 6  ;;  %vm16467_vm15 = vmmov %vm16416_vm0 }
 0x38f   : > { %3560 = vst.msk [vmem:[#allocation3 + $0x5c0] sm:$0xff] %vm16419_vm1, %v3527_v52  ;;  %4237 = vrot.lane.b32.xlu1 %v16455_v25, %s9704_s24  ;;  %16458 = vst [vmem:[#allocation136_spill] sm:$0xff] %v13827_v58  ;;  %v13834_v48 = vadd.f32 %v8597_v57, %v6774_v40  ;;  %v4568_v40 = vrot.slane %v13617_v15, 6  ;;  %v4567_v22 = vrot.slane %v15718_v50, 5 }
 0x390   : > { %5224 = vst.msk [vmem:[#allocation3 + $0x458] sm:$0xff] %vm16454_vm12, %v3527_v52  ;;  %v4428_v21 = vpop.permute.xlu0 %4427  ;;  %v8504_v23 = vpop.f32.mrb[28].mxu0  ;;  %v4560_v52 = vrot.slane %v16464_v61, 5  ;;  %vm16468_vm14 = vmmov %vm16416_vm0  ;;  %v4558_v7 = vor.u32 %v4557_v33, %v4556_v29 }
 0x391   : > { %1296 = vst.msk [vmem:[#allocation2 + $0xe4] sm:$0xf] %vm16456_vm2, %v1292_v28  ;;  %v5837_v59 = vld [vmem:[#allocation3 + $0x560] sm:$0xff]  ;;  %v3609_v42 = vpop.permute.xlu1 %3608  ;;  %16461 = vst [vmem:[#allocation62_spill] sm:$0xff] %v13834_v48  ;;  %v4561_v28 = vrot.slane %v16465_v34, 6  ;;  %v4569_v38 = vor.u32 %v4568_v40, %v4567_v22 }
 0x392   : > { %1297 = vst.msk [vmem:[#allocation2 + $0xe8] sm:$0xf] %vm16457_vm6, %v1293_v16  ;;  %7009 = vmatprep.mubr.bf16.mxu1 %v5837_v59  ;;  %4348 = vrot.lane.b32.xlu0 %v16265_v32, %s9703_s22  ;;  %v16466_v16 = vld [vmem:[#allocation103_spill] sm:$0xff]  ;;  %vm16471_vm12 = vmmov %vm16419_vm1 }
 0x393   : > { %4470 = vst.msk [vmem:[#allocation3 + $0x230] sm:$0xff] %vm16459_vm7, %v4428_v21  ;;  %7010 = vmatmul.mubr.bf16.gmra.mrb[68].mxu1 %v5836_v44  ;;  %4704 = vrot.lane.b32.xlu1 %v16300_v19, %s9702_s20  ;;  %v8505_v19 = vpop.f32.mrb[29].mxu0  ;;  %v16469_v21 = vld [vmem:[#allocation104_spill] sm:$0xff]  ;;  %v4562_v59 = vor.u32 %v4561_v28, %v4560_v52  ;;  %v4559_v52 = vrot.slane %v4558_v7, 4  ;;  %vm16473_vm2 = vmmov %vm16419_vm1 }
 0x394   : > { %3642 = vst.msk [vmem:[#allocation3 + $0x5c0] sm:$0xff] %vm16448_vm5, %v3609_v42  ;;  %v4503_v37 = vpop.permute.xlu0 %4502  ;;  %v13851_v5 = vadd.f32 %v8505_v19, %v8504_v23  ;;  %v8507_v44 = vpop.f32.mrb[30].mxu0  ;;  %v16472_v19 = vld [vmem:[#allocation120_spill] sm:$0xff]  ;;  %vm16474_vm6 = vmmov %vm16419_vm1 }
 0x395   : > { %5270 = vst.msk [vmem:[#allocation3 + $0x458] sm:$0xff] %vm16460_vm4, %v3609_v42  ;;  %v3683_v32 = vpop.permute.xlu1 %3682  ;;  %v8508_v42 = vpop.f32.mrb[31].mxu0  ;;  %v4564_v28 = vrot.slane %v4562_v59, 4  ;;  %v5734_v7 = vld [vmem:[#allocation3 + $0x228] sm:$0xff]  ;;  %vm16478_vm5 = vmmov %vm16460_vm4 }
 0x396   : > { %1298 = vst.msk [vmem:[#allocation2 + $0xec] sm:$0x7] %vm16462_vm10, %v1294_v0  ;;  %4439 = vrot.lane.b32.xlu0 %v16466_v16, %s9702_s20  ;;  %v16470_v0 = vld [vmem:[#allocation73_spill] sm:$0xff]  ;;  %v13871_v29 = vadd.f32 %v8508_v42, %v8507_v44  ;;  %v13883_v44 = vadd.f32 %v13696_v41, %v13594_v1  ;;  %v16475_v42 = vld [vmem:[#allocation114_spill] sm:$0xff]  ;;  %v16476_v41 = vld [vmem:[#allocation75_spill] sm:$0xff] }
 0x397   : > { %4545 = vst.msk [vmem:[#allocation3 + $0x230] sm:$0xff] %vm16416_vm0, %v4503_v37  ;;  %4350 = vrot.lane.b32.xlu1 %v16469_v21, %s9703_s22  ;;  %v4281_v37 = vrot.slane %v16470_v0, 7  ;;  %v8282_v21 = vrot.slane %v13642_v35, 11  ;;  %vm16477_vm7 = vnez %v16476_v41  ;;  %vm16482_vm10 = vmmov %vm16460_vm4 }
 0x398   : > { %3716 = vst.msk [vmem:[#allocation3 + $0x5c0] sm:$0xff] %vm16467_vm15, %v3683_v32  ;;  %v13849_v30 = vld [vmem:[#allocation2 + $0xe4] sm:$0xf]  ;;  %v3805_v57 = vpop.permute.xlu0 %3804  ;;  %vm16483_vm0 = vmmov %vm16460_vm4  ;;  %vm16485_vm15 = vcmask 261120  }
 0x399   : > { %5308 = vst.msk [vmem:[#allocation3 + $0x458] sm:$0xff] %vm16468_vm14, %v3683_v32  ;;  %v13860_v32 = vshrl.u32 %v13849_v30, 16  ;;  %v13863_v23 = vshll.u32 %v13849_v30, 16  ;;  %v4074_v33 = vpop.permute.xlu1 %4073  ;;  %v13873_v16 = vld [vmem:[#allocation2 + $0xe8] sm:$0xf]  ;;  %v4283_v0 = vrot.slane %v4281_v37, 4  ;;  %v4282_v48 = vsel %vm16477_vm7, %v8282_v21, %v4281_v37  ;;  %vm16486_vm14 = vmmov %vm16485_vm15 }
 0x39a   : > { %3838 = vst.msk [vmem:[#allocation3 + $0x5c8] sm:$0xff] %vm16419_vm1, %v3805_v57  ;;  %4514 = vrot.lane.b32.xlu0 %v16472_v19, %s9704_s24  ;;  %v4563_v19 = vsel %vm16388_vm13, %v4559_v52, %v4562_v59  ;;  %v13900_v58 = vshll.u32 %v13873_v16, 16  ;;  %v16481_v37 = vld [vmem:[#allocation109_spill] sm:$0xff]  ;;  %vm16487_vm1 = vmmov %vm16486_vm14  ;;  %v8296_v2 = vrot.slane %v13849_v30, 9 }
 0x39b   : > { %5382 = vst.msk [vmem:[#allocation3 + $0x460] sm:$0xff] %vm16471_vm12, %v3805_v57  ;;  %v4284_v57 = vrot.slane %v13581_v17, 7  ;;  %4441 = vrot.lane.b32.xlu1 %v16475_v42, %s9702_s20  ;;  %v4862_v40 = vrot.slane %v13860_v32, 4  ;;  %v4865_v35 = vrot.slane %v13863_v23, 5  ;;  %v4570_v17 = vsel %vm16388_vm13, %v4564_v28, %v4569_v38 }
 0x39c   : > { %4115 = vst.msk [vmem:[#allocation3 + $0x290] sm:$0xff] %vm16473_vm2, %v4074_v33  ;;  %v3874_v22 = vpop.permute.xlu0 %3873  ;;  %v13904_v52 = vcombine.low %v4563_v19, %v4570_v17  ;;  %v13909_v38 = vshrl.u32 %v13873_v16, 16  ;;  %v4871_v21 = vrot.slane %v13900_v58, 5  ;;  %v16484_v19 = vld [vmem:[#allocation122_spill] sm:$0xff]  ;;  %vm16488_vm12 = vcmask 1048320  }
 0x39d   : > { %5539 = vst.msk [vmem:[#allocation3 + $0x128] sm:$0xff] %vm16474_vm6, %v4074_v33  ;;  %v13889_v50 = vld [vmem:[#allocation2 + $0xec] sm:$0x7]  ;;  %v4285_v42 = vsel %vm16477_vm7, %v4283_v0, %v4284_v57  ;;  %v4148_v59 = vpop.permute.xlu1 %4147  ;;  %v4866_v28 = vor.u32 %v4865_v35, %v4862_v40  ;;  %v4608_v57 = vrot.slane %v13571_v36, 6  ;;  %v4611_v35 = vrot.slane %v13610_v13, 6  ;;  %vm16489_vm2 = vmmov %vm16488_vm12 }
 0x39e   : > { %v5735_v33 = vld [vmem:[#allocation3 + $0x230] sm:$0xff]  ;;  %3907 = vst.msk [vmem:[#allocation3 + $0x5c8] sm:$0xff] %vm16478_vm5, %v3874_v22  ;;  %16479 = vst [vmem:[#allocation55_spill] sm:$0xff] %v13904_v52  ;;  %v13906_v55 = vcombine.low %v4282_v48, %v4285_v42  ;;  %4624 = vrot.lane.b32.xlu0 %v16481_v37, %s9703_s22  ;;  %v13917_v0 = vshll.u32 %v13889_v50, 16  ;;  %v8289_v48 = vrot.slane %v13579_v26, 10  ;;  %v4875_v40 = vrot.slane %v13909_v38, 4 }
 0x39f   : > { %5415 = vst.msk [vmem:[#allocation3 + $0x460] sm:$0xff] %vm16460_vm4, %v3874_v22  ;;  %7106 = vmatprep.mubr.bf16.mxu0 %v5735_v33  ;;  %4516 = vrot.lane.b32.xlu1 %v16484_v19, %s9704_s24  ;;  %v4917_v22 = vrot.slane %v13873_v16, 5  ;;  %v8598_v17 = vpop.f32.mrb[32].mxu1  ;;  %v4610_v37 = vrot.slane %v4608_v57, 4  ;;  %v4680_v19 = vrot.slane %v13592_v12, 6  ;;  %vm16491_vm6 = vmmov %vm16489_vm2  ;;  %vm16495_vm4 = vcmask 523520  }
 0x3a0   : > { %16480 = vst [vmem:[#allocation35_spill] sm:$0xff] %v13906_v55  ;;  %7107 = vmatmul.mubr.bf16.gmra.mrb[68].mxu0 %v5734_v7  ;;  %4189 = vst.msk [vmem:[#allocation3 + $0x290] sm:$0xff] %vm16482_vm10, %v4148_v59  ;;  %v4867_v7 = vrot.slane %v4866_v28, 4  ;;  %v3965_v33 = vpop.permute.xlu0 %3964  ;;  %v4881_v42 = vrot.slane %v13917_v0, 5  ;;  %v8599_v28 = vpop.f32.mrb[33].mxu1  ;;  %v4876_v51 = vor.u32 %v4875_v40, %v4871_v21  ;;  %v16493_v40 = vld [vmem:[#allocation63_spill] sm:$0xff] }
 0x3a1   : > { %5577 = vst.msk [vmem:[#allocation3 + $0x128] sm:$0xff] %vm16483_vm0, %v4148_v59  ;;  %v4609_v59 = vsel %vm16398_vm3, %v8289_v48, %v4608_v57  ;;  %v4228_v14 = vpop.permute.xlu1 %4227  ;;  %v8600_v11 = vadd.f32 %v8599_v28, %v8598_v17  ;;  %v8601_v48 = vpop.f32.mrb[34].mxu1  ;;  %vm16492_vm5 = vmmov %vm16489_vm2  ;;  %v4612_v12 = vsel %vm16398_vm3, %v4610_v37, %v4611_v35  ;;  %v4920_v57 = vrot.slane %v13889_v50, 5  ;;  %v9352_v28 = vld [vmem:[#allocation7 + $0x218] sm:$0xff]  }
 0x3a2   : > { %4605 = vst.msk [vmem:[#allocation3 + $0x648] sm:$0xff] %vm16485_vm15, %v13904_v52  ;;  %v4872_v52 = vsel %vm16395_vm11, %v4867_v7, %v4871_v21  ;;  %4778 = vrot.lane.b32.xlu0 %v16490_v8, %s9704_s24  ;;  %v4681_v7 = vrot.slane %v16463_v10, 7  ;;  %v8602_v21 = vpop.f32.mrb[35].mxu1  ;;  %v4877_v17 = vrot.slane %v4876_v51, 4  ;;  %v13951_v8 = vcombine.low %v4609_v59, %v4612_v12  ;;  %vm16496_vm10 = vmmov %vm16487_vm1  ;;  %v16504_v12 = vld [vmem:[#allocation41_spill] sm:$0xff] }
 0x3a3   : > { %5660 = vst.msk [vmem:[#allocation3 + $0x4d8] sm:$0xff] %vm16486_vm14, %v13906_v55  ;;  %4626 = vrot.lane.b32.xlu1 %v16493_v40, %s9703_s22  ;;  %v4918_v25 = vsel %vm16183_vm8, %v8296_v2, %v4917_v22  ;;  %v13957_v35 = vadd.f32 %v8600_v11, %v13867_v43  ;;  %v8603_v37 = vadd.f32 %v8602_v21, %v8601_v48  ;;  %v4685_v11 = vrot.slane %v16465_v34, 7  ;;  %vm16501_vm0 = vmmov %vm16495_vm4  ;;  %v5849_v48 = vld [vmem:[#allocation3 + $0x5c0] sm:$0xff] }
 0x3a4   : > { %4320 = vst.msk [vmem:[#allocation3 + $0x640] sm:$0xff] %vm16487_vm1, %v13906_v55  ;;  %v4919_v55 = vrot.slane %v4917_v22, 4  ;;  %v4339_v62 = vpop.permute.xlu0 %4338  ;;  %v4682_v31 = vor.u32 %v4681_v7, %v4680_v19  ;;  %v4882_v59 = vsel %vm16395_vm11, %v4877_v17, %v4881_v42  ;;  %vm16502_vm15 = vmmov %vm16501_vm0  ;;  %v4690_v34 = vrot.slane %v13617_v15, 7 }
 0x3a5   : > { %3998 = vst.msk [vmem:[#allocation3 + $0x5c8] sm:$0xff] %vm16488_vm12, %v3965_v33  ;;  %16494 = vst [vmem:[#allocation129_spill] sm:$0xff] %v13957_v35  ;;  %v3529_v51 = vpop.permute.xlu1 %3528  ;;  %v13978_v42 = vcombine.low %v4872_v52, %v4882_v59  ;;  %v4954_v7 = vrot.slane %v13863_v23, 6  ;;  %v4957_v52 = vrot.slane %v13909_v38, 5  ;;  %v4958_v17 = vrot.slane %v13900_v58, 6 }
 0x3a6   : > { %5470 = vst.msk [vmem:[#allocation3 + $0x460] sm:$0xff] %vm16489_vm2, %v3965_v33  ;;  %v9351_v33 = vld [vmem:[#allocation7 + $0x258] sm:$0xff]   ;;  %v4921_v10 = vsel %vm16183_vm8, %v4919_v55, %v4920_v57  ;;  %v13972_v55 = vadd.f32 %v8603_v37, %v13883_v44  ;;  %v8510_v22 = vpop.f32.mrb[32].mxu0  ;;  %vm16505_vm14 = vmmov %vm16487_vm1  ;;  %v4953_v57 = vrot.slane %v13860_v32, 5  ;;  %vm16506_vm12 = vcmask 785920  }
 0x3a7   : > { %4269 = vst.msk [vmem:[#allocation3 + $0x290] sm:$0xff] %vm16491_vm6, %v4228_v14  ;;  %8900 = vmatprep.subr.bf16.mxu0 %v9351_v33  ;;  %v13966_v2 = vcombine.low %v4918_v25, %v4921_v10  ;;  %16503 = vst [vmem:[#allocation66_spill] sm:$0xff] %v13978_v42  ;;  %v4683_v25 = vrot.slane %v4682_v31, 4  ;;  %v8511_v19 = vpop.f32.mrb[33].mxu0  ;;  %4780 = vrot.lane.b32.xlu1 %v16504_v12, %s9704_s24  ;;  %v8292_v12 = vrot.slane %v13579_v26, 11  ;;  %v16511_v26 = vld [vmem:[#allocation95_spill] sm:$0xff] }
 0x3a8   : > { %5621 = vst.msk [vmem:[#allocation3 + $0x128] sm:$0xff] %vm16492_vm5, %v4228_v14  ;;  %v4684_v14 = vrot.slane %v16464_v61, 6  ;;  %v16498_v61 = vshrl.u32 %v13610_v13, 16  ;;  %16499 = vst [vmem:[#allocation130_spill] sm:$0xff] %v13972_v55  ;;  %8901 = vmatpush3.bf16.msra.mxu0 %v9352_v28  ;;  %v13988_v21 = vadd.f32 %v8511_v19, %v8510_v22  ;;  %v4430_v31 = vpop.permute.xlu0 %4429  ;;  %v8513_v40 = vpop.f32.mrb[34].mxu0  ;;  %v15726_v28 = vshrl.u32 %v13889_v50, 16 }
 0x3a9   : > { %4380 = vst.msk [vmem:[#allocation3 + $0x298] sm:$0xff] %vm16495_vm4, %v4339_v62  ;;  %16497 = vst [vmem:[#allocation26_spill] sm:$0xff] %v13966_v2  ;;  %v16500_v62 = vld [vmem:[#allocation90_spill] sm:$0xff]  ;;  %v3611_v37 = vpop.permute.xlu1 %3610  ;;  %v4955_v59 = vor.u32 %v4954_v7, %v4953_v57  ;;  %v5030_v35 = vrot.slane %v13863_v23, 7  ;;  %v5685_v23 = vld [vmem:[#allocation3 + $0xa0] sm:$0xff] }
 0x3aa   : > { %5027 = vst.msk [vmem:[#allocation3 + $0x5f0] sm:$0xff] %vm16496_vm10, %v13951_v8  ;;  %v4689_v43 = vrot.slane %v16498_v61, 6  ;;  %4085 = vrot.lane.b32.xlu0 %v16500_v62, %s9703_s22  ;;  %v4686_v44 = vor.u32 %v4685_v11, %v4684_v14  ;;  %v8514_v14 = vpop.f32.mrb[35].mxu0  ;;  %v4965_v11 = vrot.slane %v13917_v0, 6  ;;  %vm16508_vm2 = vmmov %vm16506_vm12  ;;  %v4959_v62 = vor.u32 %v4958_v17, %v4957_v52 }
 0x3ab   : > { %3561 = vst.msk [vmem:[#allocation3 + $0x628] sm:$0xff] %vm16501_vm0, %v3529_v51  ;;  %v13998_v61 = vadd.f32 %v8514_v14, %v8513_v40  ;;  %vm16509_vm6 = vmmov %vm16508_vm2  ;;  %v4964_v22 = vrot.slane %v15726_v28, 5  ;;  %v4956_v19 = vrot.slane %v4955_v59, 4  ;;  %v4765_v17 = vrot.slane %v13610_v13, 7  ;;  %v16515_v14 = vld [vmem:[#allocation43_spill] sm:$0xff] }
 0x3ac   : > { %5225 = vst.msk [vmem:[#allocation3 + $0x4c0] sm:$0xff] %vm16502_vm15, %v3529_v51  ;;  %v5850_v15 = vld [vmem:[#allocation3 + $0x5c8] sm:$0xff]  ;;  %v4691_v33 = vor.u32 %v4690_v34, %v4689_v43  ;;  %v4687_v10 = vsel %vm9973_vm9, %v4683_v25, %v4686_v44  ;;  %v4688_v51 = vrot.slane %v4686_v44, 4  ;;  %v16507_v43 = vld [vmem:[#allocation39_spill] sm:$0xff]  ;;  %v4762_v44 = vrot.slane %v13571_v36, 7  ;;  %vm16512_vm4 = vmmov %vm16492_vm5 }
 0x3ad   : > { %5504 = vst.msk [vmem:[#allocation3 + $0x5a0] sm:$0xff] %vm16505_vm14, %v13966_v2  ;;  %7017 = vmatprep.mubr.bf16.mxu1 %v5850_v15  ;;  %v16510_v25 = vld [vmem:[#allocation32_spill] sm:$0xff]  ;;  %v4961_v7 = vrot.slane %v4959_v62, 4  ;;  %v3685_v52 = vpop.permute.xlu1 %3684  ;;  %v4960_v40 = vsel %vm16388_vm13, %v4956_v19, %v4959_v62  ;;  %vm16513_vm10 = vmmov %vm16512_vm4  ;;  %v5033_v2 = vrot.slane %v13909_v38, 6 }
 0x3ae   : > { %5189 = vst.msk [vmem:[#allocation3 + $0x5f8] sm:$0xff] %vm16487_vm1, %v13978_v42  ;;  %4159 = vrot.lane.b32.xlu0 %v16507_v43, %s9702_s20  ;;  %7018 = vmatmul.mubr.bf16.gmra.mrb[72].mxu1 %v5849_v48  ;;  %v4692_v34 = vsel %vm9973_vm9, %v4688_v51, %v4691_v33  ;;  %v4505_v48 = vpop.permute.xlu0 %4504  ;;  %v4763_v15 = vsel %vm16477_vm7, %v8292_v12, %v4762_v44  ;;  %v4764_v33 = vrot.slane %v4762_v44, 4  ;;  %vm16514_vm0 = vmmov %vm16487_vm1  ;;  %v5034_v42 = vrot.slane %v13900_v58, 7 }
 0x3af   : > { %4471 = vst.msk [vmem:[#allocation3 + $0x298] sm:$0xff] %vm16506_vm12, %v4430_v31  ;;  %4087 = vrot.lane.b32.xlu1 %v16510_v25, %s9703_s22  ;;  %v14012_v57 = vcombine.low %v4687_v10, %v4692_v34  ;;  %v4966_v31 = vor.u32 %v4965_v11, %v4964_v22  ;;  %v9353_v10 = vld [vmem:[#allocation7 + $0x2c0] sm:$0xff]   ;;  %vm16518_vm14 = vmmov %vm16502_vm15  ;;  %v6787_v12 = vadd.f32 %v13751_v27, %v13594_v1 }
 0x3b0   : > { %3643 = vst.msk [vmem:[#allocation3 + $0x628] sm:$0xff] %vm16508_vm2, %v3611_v37  ;;  %v4766_v13 = vsel %vm16477_vm7, %v4764_v33, %v4765_v17  ;;  %9006 = vmatprep.subr.bf16.mxu1 %v9353_v10  ;;  %v9355_v22 = vld [vmem:[#allocation7 + $0x260] sm:$0xff]   ;;  %vm16520_vm1 = vmmov %vm16518_vm14  ;;  %v6790_v33 = vadd.f32 %v13756_v47, %v13594_v1  ;;  %v16530_v1 = vld [vmem:[#allocation42_spill] sm:$0xff] }
 0x3b1   : > { %5271 = vst.msk [vmem:[#allocation3 + $0x4c0] sm:$0xff] %vm16509_vm6, %v3611_v37  ;;  %v4967_v36 = vsel %vm16388_vm13, %v4961_v7, %v4966_v31  ;;  %v14034_v59 = vcombine.low %v4763_v15, %v4766_v13  ;;  %v4076_v62 = vpop.permute.xlu1 %4075  ;;  %v9356_v25 = vld [vmem:[#allocation7 + $0x220] sm:$0xff]   ;;  %vm16521_vm12 = vmmov %vm16520_vm1  ;;  %v5747_v7 = vld [vmem:[#allocation3 + $0x290] sm:$0xff]  ;;  %8902 = vmatprep.subr.bf16.mxu0 %v9355_v22 }
 0x3b2   : > { %4546 = vst.msk [vmem:[#allocation3 + $0x298] sm:$0xff] %vm16492_vm5, %v4505_v48  ;;  %4239 = vrot.lane.b32.xlu0 %v16511_v26, %s9704_s24  ;;  %v14030_v37 = vcombine.low %v4960_v40, %v4967_v36  ;;  %v3807_v51 = vpop.permute.xlu0 %3806  ;;  %v8604_v11 = vpop.f32.mrb[36].mxu1  ;;  %v16519_v34 = vld [vmem:[#allocation116_spill] sm:$0xff]  ;;  %vm16522_vm2 = vmmov %vm16514_vm0  ;;  %v16523_v31 = vld [vmem:[#allocation113_spill] sm:$0xff]  ;;  %8903 = vmatpush3.bf16.msra.mxu0 %v9356_v25 }
 0x3b3   : > { %3717 = vst.msk [vmem:[#allocation3 + $0x628] sm:$0xff] %vm16512_vm4, %v3685_v52  ;;  %4161 = vrot.lane.b32.xlu1 %v16515_v14, %s9702_s20  ;;  %16517 = vst [vmem:[#allocation134_spill] sm:$0xff] %v14034_v59  ;;  %v8605_v19 = vpop.f32.mrb[37].mxu1  ;;  %v16526_v13 = vld [vmem:[#allocation27_spill] sm:$0xff] }
 0x3b4   : > { %5309 = vst.msk [vmem:[#allocation3 + $0x4c0] sm:$0xff] %vm16513_vm10, %v3685_v52  ;;  %16516 = vst [vmem:[#allocation54_spill] sm:$0xff] %v14030_v37  ;;  %v8606_v44 = vadd.f32 %v8605_v19, %v8604_v11  ;;  %v8607_v48 = vpop.f32.mrb[38].mxu1  ;;  %v16536_v19 = vld [vmem:[#allocation98_spill] sm:$0xff] }
 0x3b5   : > { %5347 = vst.msk [vmem:[#allocation3 + $0x598] sm:$0xff] %vm16514_vm0, %v14012_v57  ;;  %v8608_v40 = vpop.f32.mrb[39].mxu1  ;;  %vm16525_vm5 = vmmov %vm16509_vm6  ;;  %v4150_v36 = vpop.permute.xlu1 %4149  ;;  %vm16531_vm0 = vcmask 1048320  }
 0x3b6   : > { %3839 = vst.msk [vmem:[#allocation3 + $0x630] sm:$0xff] %vm16502_vm15, %v3807_v51  ;;  %4706 = vrot.lane.b32.xlu0 %v16519_v34, %s9702_s20  ;;  %v3876_v52 = vpop.permute.xlu0 %3875  ;;  %v14050_v17 = vadd.f32 %v8606_v44, %v6787_v12  ;;  %v8609_v27 = vadd.f32 %v8608_v40, %v8607_v48  ;;  %vm16527_vm4 = vmmov %vm16525_vm5 }
 0x3b7   : > { %5383 = vst.msk [vmem:[#allocation3 + $0x4c8] sm:$0xff] %vm16518_vm14, %v3807_v51  ;;  %4241 = vrot.lane.b32.xlu1 %v16523_v31, %s9704_s24  ;;  %vm16528_vm10 = vmmov %vm16527_vm4 }
 0x3b8   : > { %4116 = vst.msk [vmem:[#allocation3 + $0x2f8] sm:$0xff] %vm16520_vm1, %v4076_v62  ;;  %16524 = vst [vmem:[#allocation38_spill] sm:$0xff] %v14050_v17  ;;  %v14058_v10 = vadd.f32 %v8609_v27, %v6790_v33 }
 0x3b9   : > { %5540 = vst.msk [vmem:[#allocation3 + $0x190] sm:$0xff] %vm16521_vm12, %v4076_v62  ;;  %v5748_v15 = vld [vmem:[#allocation3 + $0x298] sm:$0xff]  ;;  %vm16532_vm15 = vmmov %vm16531_vm0  ;;  %v4230_v11 = vpop.permute.xlu1 %4229  ;;  %v16533_v62 = vld [vmem:[#allocation57_spill] sm:$0xff] }
 0x3ba   : > { %5661 = vst.msk [vmem:[#allocation3 + $0x540] sm:$0xff] %vm16522_vm2, %v14034_v59  ;;  %7114 = vmatprep.mubr.bf16.mxu0 %v5748_v15  ;;  %4352 = vrot.lane.b32.xlu0 %v16526_v13, %s9703_s22  ;;  %16529 = vst [vmem:[#allocation106_spill] sm:$0xff] %v14058_v10  ;;  %v3967_v47 = vpop.permute.xlu0 %3966  ;;  %v5862_v40 = vld [vmem:[#allocation3 + $0x628] sm:$0xff]  ;;  %v16538_v15 = vld [vmem:[#allocation107_spill] sm:$0xff] }
 0x3bb   : > { %3908 = vst.msk [vmem:[#allocation3 + $0x630] sm:$0xff] %vm16509_vm6, %v3876_v52  ;;  %7115 = vmatmul.mubr.bf16.gmra.mrb[72].mxu0 %v5747_v7  ;;  %4708 = vrot.lane.b32.xlu1 %v16530_v1, %s9702_s20  ;;  %vm16534_vm14 = vmmov %vm16531_vm0  ;;  %v9359_v13 = vld [vmem:[#allocation7 + $0x268] sm:$0xff]   ;;  %v16654_v41 = vld [vmem:[#allocation54_spill] sm:$0xff] }
 0x3bc   : > { %5416 = vst.msk [vmem:[#allocation3 + $0x4c8] sm:$0xff] %vm16525_vm5, %v3876_v52  ;;  %v8516_v51 = vpop.f32.mrb[36].mxu0  ;;  %vm16535_vm1 = vmmov %vm16531_vm0  ;;  %v16537_v52 = vld [vmem:[#allocation111_spill] sm:$0xff]  ;;  %v16540_v1 = vld [vmem:[#allocation133_spill] sm:$0xff]  ;;  %8904 = vmatprep.subr.bf16.mxu0 %v9359_v13 }
 0x3bd   : > { %4190 = vst.msk [vmem:[#allocation3 + $0x2f8] sm:$0xff] %vm16527_vm4, %v4150_v36  ;;  %v8517_v22 = vpop.f32.mrb[37].mxu0  ;;  %v4697_v7 = vpop.permute.xlu1 %4696  ;;  %vm16539_vm2 = vmmov %vm16527_vm4 }
 0x3be   : > { %5578 = vst.msk [vmem:[#allocation3 + $0x190] sm:$0xff] %vm16528_vm10, %v4150_v36  ;;  %4443 = vrot.lane.b32.xlu0 %v16533_v62, %s9702_s20  ;;  %v14068_v25 = vadd.f32 %v8517_v22, %v8516_v51  ;;  %v8519_v34 = vpop.f32.mrb[38].mxu0  ;;  %v4341_v12 = vpop.permute.xlu0 %4340  ;;  %vm16541_vm6 = vmmov %vm16521_vm12  ;;  %v16542_v51 = vld [vmem:[#allocation25_spill] sm:$0xff] }
 0x3bf   : > { %3999 = vst.msk [vmem:[#allocation3 + $0x630] sm:$0xff] %vm16531_vm0, %v3967_v47  ;;  %4354 = vrot.lane.b32.xlu1 %v16536_v19, %s9703_s22  ;;  %v8520_v44 = vpop.f32.mrb[39].mxu0  ;;  %vm16543_vm5 = vmmov %vm16531_vm0 }
 0x3c0   : > { %5471 = vst.msk [vmem:[#allocation3 + $0x4c8] sm:$0xff] %vm16532_vm15, %v3967_v47  ;;  %v14073_v48 = vadd.f32 %v8520_v44, %v8519_v34  ;;  %v5672_v47 = vld [vmem:[#allocation3 + $0x38] sm:$0xff]  ;;  %v16544_v44 = vld [vmem:[#allocation44_spill] sm:$0xff]  ;;  %vm16545_vm4 = vmmov %vm16539_vm2 }
 0x3c1   : > { %4270 = vst.msk [vmem:[#allocation3 + $0x2f8] sm:$0xff] %vm16534_vm14, %v4230_v11  ;;  %v4343_v36 = vpop.permute.xlu1 %4342  ;;  %vm16547_vm10 = vmmov %vm16541_vm6  ;;  %vm16553_vm14 = vcmask 257024  }
 0x3c2   : > { %5622 = vst.msk [vmem:[#allocation3 + $0x190] sm:$0xff] %vm16535_vm1, %v4230_v11  ;;  %4518 = vrot.lane.b32.xlu0 %v16537_v52, %s9704_s24  ;;  %v4432_v33 = vpop.permute.xlu0 %4431  ;;  %vm16548_vm0 = vmmov %vm16539_vm2 }
 0x3c3   : > { %4381 = vst.msk [vmem:[#allocation3 + $0x300] sm:$0xff] %vm16521_vm12, %v4341_v12  ;;  %4445 = vrot.lane.b32.xlu1 %v16538_v15, %s9702_s20  ;;  %v9360_v12 = vld [vmem:[#allocation7 + $0x228] sm:$0xff]   ;;  %vm16550_vm15 = vmmov %vm16535_vm1 }
 0x3c4   : > { %4472 = vst.msk [vmem:[#allocation3 + $0x300] sm:$0xff] %vm16539_vm2, %v4432_v33  ;;  %8905 = vmatpush3.bf16.msra.mxu0 %v9360_v12  ;;  %vm16554_vm1 = vmmov %vm16553_vm14  ;;  %vm16556_vm2 = vcmask 256000  }
 0x3c5   : > { %4382 = vst.msk [vmem:[#allocation3 + $0x368] sm:$0xff] %vm16541_vm6, %v4343_v36  ;;  %v4434_v34 = vpop.permute.xlu1 %4433  ;;  %vm16555_vm12 = vmmov %vm16543_vm5 }
 0x3c6   : > { %v5863_v27 = vld [vmem:[#allocation3 + $0x630] sm:$0xff]  ;;  %4628 = vrot.lane.b32.xlu0 %v16540_v1, %s9703_s22  ;;  %v4507_v11 = vpop.permute.xlu0 %4506  ;;  %v8610_v22 = vpop.f32.mrb[40].mxu1  ;;  %4473 = vst.msk [vmem:[#allocation3 + $0x368] sm:$0xff] %vm16545_vm4, %v4434_v34 }
 0x3c7   : > { %7025 = vmatprep.mubr.bf16.mxu1 %v5863_v27  ;;  %4520 = vrot.lane.b32.xlu1 %v16542_v51, %s9704_s24  ;;  %4547 = vst.msk [vmem:[#allocation3 + $0x300] sm:$0xff] %vm16543_vm5, %v4507_v11  ;;  %v8611_v33 = vpop.f32.mrb[41].mxu1  ;;  %vm16558_vm5 = vmmov %vm16541_vm6 }
 0x3c8   : > { %7026 = vmatmul.mubr.bf16.gmra.mrb[76].mxu1 %v5862_v40  ;;  %v14089_v40 = vld [vmem:[#allocation9] ss:$0 sm:$0xff]  ;;  %v8612_v36 = vadd.f32 %v8611_v33, %v8610_v22  ;;  %v8613_v1 = vpop.f32.mrb[42].mxu1  ;;  %v1309_v22 = vld [vmem:[#allocation2 + $0xc4] sm:$0xf]  ;;  %vm16559_vm4 = vmmov %vm16558_vm5 }
 0x3c9   : > { %7227 = vmatprep.mubr.bf16.mxu1 %v5672_v47  ;;  %v6795_v27 = vadd.f32 %v14089_v40, %v13794_v60  ;;  %v8614_v47 = vpop.f32.mrb[43].mxu1  ;;  %v6798_v11 = vadd.f32 %v14089_v40, %v13798_v54  ;;  %v4509_v28 = vpop.permute.xlu1 %4508  ;;  %v16549_v60 = vld [vmem:[#allocation97_spill] sm:$0xff]  ;;  %v5760_v33 = vld [vmem:[#allocation3 + $0x2f8] sm:$0xff]  ;;  %1313 = vst.msk [vmem:[#allocation2 + $0xf4] sm:$0xf] %vm16554_vm1, %v1309_v22  ;;  %vm16566_vm1 = vcmask 261120  }
 0x3ca   : > { %4782 = vrot.lane.b32.xlu0 %v16544_v44, %s9704_s24  ;;  %v4617_v13 = vpop.permute.xlu0 %4616  ;;  %v8615_v34 = vadd.f32 %v8614_v47, %v8613_v1  ;;  %4548 = vst.msk [vmem:[#allocation3 + $0x368] sm:$0xff] %vm16550_vm15, %v4509_v28  ;;  %v16552_v54 = vld [vmem:[#allocation59_spill] sm:$0xff]  ;;  %vm16564_vm15 = vmmov %vm16559_vm4 }
 0x3cb   : > { %4630 = vrot.lane.b32.xlu1 %v16408_v24, %s9703_s22  ;;  %v14097_v44 = vadd.f32 %v8612_v36, %v6795_v27  ;;  %4664 = vst.msk [vmem:[#allocation3 + $0x30] sm:$0xff] %vm16547_vm10, %v4617_v13  ;;  %v1308_v24 = vld [vmem:[#allocation2 + $0xc0] sm:$0xf]  ;;  %vm16563_vm10 = vmmov %vm16548_vm0 }
 0x3cc   : > { %4744 = vst.msk [vmem:[#allocation3 + $0x30] sm:$0xff] %vm16548_vm0, %v4697_v7  ;;  %v14104_v12 = vadd.f32 %v8615_v34, %v6798_v11  ;;  %v1310_v7 = vld [vmem:[#allocation2 + $0xc8] sm:$0x7] }
 0x3cd   : > { %16546 = vst [vmem:[#allocation110_spill] sm:$0xff] %v14097_v44  ;;  %1312 = vst.msk [vmem:[#allocation2 + $0xf0] sm:$0xf] %vm16553_vm14, %v1308_v24  ;;  %v4619_v28 = vpop.permute.xlu1 %4618  ;;  %v16557_v13 = vld [vmem:[#allocation91_spill] sm:$0xff]  ;;  %v5001_v24 = vrot.slane %v13873_v16, 6  ;;  %v5004_v44 = vrot.slane %v13889_v50, 6 }
 0x3ce   : > { %4089 = vrot.lane.b32.xlu0 %v16549_v60, %s9703_s22  ;;  %16551 = vst [vmem:[#allocation16_spill] sm:$0xff] %v14104_v12  ;;  %v4771_v27 = vpop.permute.xlu0 %4770  ;;  %v5761_v36 = vld [vmem:[#allocation3 + $0x300] sm:$0xff]  ;;  %1314 = vst.msk [vmem:[#allocation2 + $0xf8] sm:$0x7] %vm16556_vm2, %v1310_v7  ;;  %v8299_v7 = vrot.slane %v13849_v30, 10  ;;  %v9357_v12 = vld [vmem:[#allocation7 + $0x2c8] sm:$0xff]  }
 0x3cf   : > { %4784 = vrot.lane.b32.xlu1 %v16552_v54, %s9704_s24  ;;  %4818 = vst.msk [vmem:[#allocation3 + $0x30] sm:$0xff] %vm16555_vm12, %v4771_v27  ;;  %7122 = vmatprep.mubr.bf16.mxu0 %v5761_v36  ;;  %vm16565_vm14 = vmmov %vm16559_vm4  ;;  %vm16568_vm2 = vcmask 1048320  }
 0x3d0   : > { %v8522_v1 = vpop.f32.mrb[40].mxu0  ;;  %7123 = vmatmul.mubr.bf16.gmra.mrb[76].mxu0 %v5760_v33  ;;  %4665 = vst.msk [vmem:[#allocation3 + $0x98] sm:$0xff] %vm16541_vm6, %v4619_v28  ;;  %v16561_v28 = vld [vmem:[#allocation79_spill] sm:$0xff]  ;;  %v14130_v10 = vld [vmem:[#allocation2 + $0xf4] sm:$0xf]  ;;  %v5002_v17 = vsel %vm16398_vm3, %v8299_v7, %v5001_v24  ;;  %vm16567_vm12 = vmmov %vm16566_vm1 }
 0x3d1   : > { %v8523_v47 = vpop.f32.mrb[41].mxu0  ;;  %v14124_v36 = vpop.permute.xlu1 %4772  ;;  %v5774_v33 = vld [vmem:[#allocation3 + $0x368] sm:$0xff]  ;;  %vm16569_vm6 = vmmov %vm16568_vm2 }
 0x3d2   : > { %4163 = vrot.lane.b32.xlu0 %v16557_v13, %s9702_s20  ;;  %v14115_v11 = vadd.f32 %v8523_v47, %v8522_v1  ;;  %v8525_v34 = vpop.f32.mrb[42].mxu0  ;;  %v4078_v22 = vpop.permute.xlu0 %4077  ;;  %v5003_v1 = vrot.slane %v5001_v24, 4  ;;  %7130 = vmatprep.mubr.bf16.mxu0 %v5774_v33  ;;  %v9354_v47 = vld [vmem:[#allocation7 + $0x280] sm:$0xff]   ;;  %v5194_v33 = vrot.slane %v14130_v10, 5 }
 0x3d3   : > { %4091 = vrot.lane.b32.xlu1 %v13640_v9, %s9703_s22  ;;  %v8526_v54 = vpop.f32.mrb[43].mxu0  ;;  %4117 = vst.msk [vmem:[#allocation3 + $0x360] sm:$0xff] %vm16558_vm5, %v4078_v22  ;;  %vm16570_vm5 = vmmov %vm16548_vm0 }
 0x3d4   : > { %5541 = vst.msk [vmem:[#allocation3 + $0x1f8] sm:$0xff] %vm16559_vm4, %v4078_v22  ;;  %v14122_v27 = vadd.f32 %v8526_v54, %v8525_v34  ;;  %v5029_v22 = vrot.slane %v13860_v32, 6  ;;  %v9363_v34 = vld [vmem:[#allocation7 + $0x270] sm:$0xff]   ;;  %v14137_v55 = vld [vmem:[#allocation2 + $0xf0] sm:$0xf]  ;;  %v5005_v37 = vsel %vm16398_vm3, %v5003_v1, %v5004_v44  ;;  %v14155_v44 = vcombine.low %v13849_v30, %v13873_v16  ;;  %vm16571_vm4 = vmmov %vm16548_vm0 }
 0x3d5   : > { %v9364_v54 = vld [vmem:[#allocation7 + $0x230] sm:$0xff]   ;;  %v4080_v7 = vpop.permute.xlu1 %4079  ;;  %8906 = vmatprep.subr.bf16.mxu0 %v9363_v34  ;;  %v14151_v59 = vcombine.low %v5002_v17, %v5005_v37  ;;  %v8306_v38 = vrot.slane %v14137_v55, 9  ;;  %v5196_v58 = vrot.slane %v5194_v33, 4  ;;  %v5035_v37 = vor.u32 %v5034_v42, %v5033_v2 }
 0x3d6   : > { %16560 = vst [vmem:[#allocation36_spill] sm:$0xff] %v14122_v27  ;;  %4243 = vrot.lane.b32.xlu0 %v16561_v28, %s9704_s24  ;;  %v4152_v63 = vpop.permute.xlu0 %4151  ;;  %v5671_v19 = vld [vmem:[#allocation3 + $0x30] sm:$0xff]  ;;  %v16562_v27 = vshrl.u32 %v13889_v50, 16  ;;  %4118 = vst.msk [vmem:[#allocation3 + $0x3c8] sm:$0xff] %vm16564_vm15, %v4080_v7  ;;  %v5039_v17 = vrot.slane %v13917_v0, 7  ;;  %8907 = vmatpush3.bf16.msra.mxu0 %v9364_v54 }
 0x3d7   : > { %4165 = vrot.lane.b32.xlu1 %v13672_v53, %s9702_s20  ;;  %v14143_v32 = vld [vmem:[#allocation2 + $0xf8] sm:$0x7]  ;;  %4191 = vst.msk [vmem:[#allocation3 + $0x360] sm:$0xff] %vm16563_vm10, %v4152_v63  ;;  %7228 = vmatmul.mubr.bf16.vlgmr.msra.gmra.mrb[80].mxu1 %v5671_v19  ;;  %v5031_v19 = vor.u32 %v5030_v35, %v5029_v22  ;;  %v5037_v42 = vrot.slane %v5035_v37, 4  ;;  %vm16572_vm10 = vmmov %vm16566_vm1 }
 0x3d8   : > { %v5038_v24 = vrot.slane %v16562_v27, 6  ;;  %5579 = vst.msk [vmem:[#allocation3 + $0x1f8] sm:$0xff] %vm16548_vm0, %v4152_v63  ;;  %7235 = vmatprep.mubr.bf16.mxu1 %v5685_v23  ;;  %v5197_v63 = vrot.slane %v14143_v32, 5  ;;  %9007 = vmatpush3.bf16.msra.mxu1 %v9354_v47  ;;  %v9358_v27 = vld [vmem:[#allocation7 + $0x288] sm:$0xff]   ;;  %v9361_v35 = vld [vmem:[#allocation7 + $0x2d0] sm:$0xff]   ;;  %vm16573_vm15 = vmmov %vm16566_vm1 }
 0x3d9   : > { %5542 = vst.msk [vmem:[#allocation3 + $0x260] sm:$0xff] %vm16565_vm14, %v4080_v7  ;;  %9008 = vmatprep.subr.bf16.mxu1 %v9357_v12  ;;  %v5032_v2 = vrot.slane %v5031_v19, 4  ;;  %v4154_v34 = vpop.permute.xlu1 %4153  ;;  %vm16574_vm14 = vmmov %vm16568_vm2 }
 0x3da   : > { %4710 = vrot.lane.b32.xlu0 %v16414_v49, %s9702_s20  ;;  %5028 = vst.msk [vmem:[#allocation3 + $0x658] sm:$0xff] %vm16566_vm1, %v14151_v59  ;;  %v5195_v49 = vsel %vm16183_vm8, %v8306_v38, %v5194_v33  ;;  %v4232_v1 = vpop.permute.xlu0 %4231  ;;  %v5198_v0 = vsel %vm16183_vm8, %v5196_v58, %v5197_v63  ;;  %v5040_v47 = vor.u32 %v5039_v17, %v5038_v24  ;;  %v8616_v22 = vpop.f32.mrb[44].mxu1  ;;  %v9362_v58 = vld [vmem:[#allocation7 + $0x290] sm:$0xff]   ;;  %v8302_v17 = vrot.slane %v13849_v30, 11  ;;  %vm16575_vm1 = vmmov %vm16568_vm2 }
 0x3db   : > { %4245 = vrot.lane.b32.xlu1 %v13715_v3, %s9704_s24  ;;  %4858 = vst.msk [vmem:[#allocation3 + $0x650] sm:$0xff] %vm16567_vm12, %v14155_v44  ;;  %v14176_v23 = vcombine.low %v5195_v49, %v5198_v0  ;;  %v8617_v12 = vpop.f32.mrb[45].mxu1  ;;  %v5036_v54 = vsel %vm9973_vm9, %v5032_v2, %v5035_v37  ;;  %v6803_v24 = vadd.f32 %v14089_v40, %v13851_v5  ;;  %v5075_v49 = vrot.slane %v13873_v16, 7  ;;  %vm16576_vm12 = vmmov %vm16575_vm1  ;;  %v9366_v0 = vld [vmem:[#allocation7 + $0x298] sm:$0xff]  }
 0x3dc   : > { %4271 = vst.msk [vmem:[#allocation3 + $0x360] sm:$0xff] %vm16568_vm2, %v4232_v1  ;;  %v5041_v33 = vsel %vm9973_vm9, %v5037_v42, %v5040_v47  ;;  %v8618_v7 = vadd.f32 %v8617_v12, %v8616_v22  ;;  %v8619_v38 = vpop.f32.mrb[46].mxu1  ;;  %9009 = vmatpush3.bf16.msra.mxu1 %v9358_v27  ;;  %v6806_v5 = vadd.f32 %v14089_v40, %v13871_v29  ;;  %v5078_v16 = vrot.slane %v13889_v50, 7  ;;  %v9367_v22 = vld [vmem:[#allocation7 + $0x278] sm:$0xff]  }
 0x3dd   : > { %5623 = vst.msk [vmem:[#allocation3 + $0x1f8] sm:$0xff] %vm16569_vm6, %v4232_v1  ;;  %v14192_v63 = vcombine.low %v5036_v54, %v5041_v33  ;;  %v8620_v37 = vpop.f32.mrb[47].mxu1  ;;  %9010 = vmatprep.subr.bf16.mxu1 %v9361_v35  ;;  %v4234_v27 = vpop.permute.xlu1 %4233  ;;  %v5076_v30 = vsel %vm16477_vm7, %v8302_v17, %v5075_v49  ;;  %v5077_v29 = vrot.slane %v5075_v49, 4  ;;  %vm16577_vm2 = vcmask 523520   ;;  %v9368_v54 = vld [vmem:[#allocation7 + $0x238] sm:$0xff]   ;;  %8908 = vmatprep.subr.bf16.mxu0 %v9367_v22  ;;  %vm16580_vm6 = vmmov %vm16572_vm10 }
 0x3de   : > { %4356 = vrot.lane.b32.xlu0 %v13623_v4, %s9703_s22  ;;  %4192 = vst.msk [vmem:[#allocation3 + $0x3c8] sm:$0xff] %vm16570_vm5, %v4154_v34  ;;  %v4699_v19 = vpop.permute.xlu0 %4698  ;;  %v14198_v1 = vadd.f32 %v8618_v7, %v6803_v24  ;;  %8909 = vmatpush3.bf16.msra.mxu0 %v9368_v54  ;;  %vm16581_vm5 = vmmov %vm16548_vm0  ;;  %v6811_v54 = vadd.f32 %v14089_v40, %v13988_v21 }
 0x3df   : > { %5580 = vst.msk [vmem:[#allocation3 + $0x260] sm:$0xff] %vm16571_vm4, %v4154_v34  ;;  %4712 = vrot.lane.b32.xlu1 %v16422_v39, %s9702_s20  ;;  %v8621_v39 = vadd.f32 %v8620_v37, %v8619_v38  ;;  %v5079_v47 = vsel %vm16477_vm7, %v5077_v29, %v5078_v16  ;;  %v16579_v38 = vld [vmem:[#allocation105_spill] sm:$0xff]  ;;  %vm16583_vm4 = vmmov %vm16577_vm2  ;;  %v16586_v16 = vld [vmem:[#allocation64_spill] sm:$0xff] }
 0x3e0   : > { %5505 = vst.msk [vmem:[#allocation3 + $0x608] sm:$0xff] %vm16572_vm10, %v14176_v23  ;;  %9011 = vmatpush3.bf16.msra.mxu1 %v9362_v58  ;;  %v14219_v50 = vcombine.low %v5076_v30, %v5079_v47  ;;  %vm16585_vm10 = vmmov %vm16575_vm1  ;;  %v16589_v47 = vld [vmem:[#allocation85_spill] sm:$0xff] }
 0x3e1   : > { %4745 = vst.msk [vmem:[#allocation3 + $0x98] sm:$0xff] %vm16548_vm0, %v4699_v19  ;;  %v14212_v35 = vadd.f32 %v8621_v39, %v6806_v5  ;;  %v4701_v12 = vpop.permute.xlu1 %4700  ;;  %v16582_v5 = vld [vmem:[#allocation53_spill] sm:$0xff] }
 0x3e2   : > { %5348 = vst.msk [vmem:[#allocation3 + $0x600] sm:$0xff] %vm16573_vm15, %v14192_v63  ;;  %4447 = vrot.lane.b32.xlu0 %v13670_v45, %s9702_s20  ;;  %v4345_v2 = vpop.permute.xlu0 %4344  ;;  %v5698_v39 = vld [vmem:[#allocation3 + $0x108] sm:$0xff]  ;;  %vm16587_vm15 = vmmov %vm16577_vm2 }
 0x3e3   : > { %4819 = vst.msk [vmem:[#allocation3 + $0x98] sm:$0xff] %vm16574_vm14, %v14124_v36  ;;  %4634 = vrot.lane.b32.xlu1 %v16232_v56, %s9703_s22  ;;  %v9365_v36 = vld [vmem:[#allocation7 + $0x2d8] sm:$0xff]   ;;  %v5773_v42 = vld [vmem:[#allocation3 + $0x360] sm:$0xff]  ;;  %v16578_v56 = vld [vmem:[#allocation89_spill] sm:$0xff] }
 0x3e4   : > { %4272 = vst.msk [vmem:[#allocation3 + $0x3c8] sm:$0xff] %vm16575_vm1, %v4234_v27  ;;  %v8528_v34 = vpop.f32.mrb[44].mxu0  ;;  %7131 = vmatmul.mubr.bf16.gmra.mrb[80].mxu0 %v5773_v42  ;;  %9012 = vmatprep.subr.bf16.mxu1 %v9365_v36  ;;  %v9369_v42 = vld [vmem:[#allocation7 + $0x2e0] sm:$0xff]   ;;  %vm16588_vm14 = vmmov %vm16548_vm0 }
 0x3e5   : > { %5624 = vst.msk [vmem:[#allocation3 + $0x260] sm:$0xff] %vm16576_vm12, %v4234_v27  ;;  %v8529_v33 = vpop.f32.mrb[45].mxu0  ;;  %9013 = vmatpush3.bf16.msra.mxu1 %v9366_v0  ;;  %v4347_v49 = vpop.permute.xlu1 %4346  ;;  %v16584_v27 = vld [vmem:[#allocation17_spill] sm:$0xff]  ;;  %vm16591_vm12 = vmmov %vm16575_vm1 }
 0x3e6   : > { %4383 = vst.msk [vmem:[#allocation3 + $0x3d0] sm:$0xff] %vm16577_vm2, %v4345_v2  ;;  %4522 = vrot.lane.b32.xlu0 %v16578_v56, %s9704_s24  ;;  %v14223_v24 = vadd.f32 %v8529_v33, %v8528_v34  ;;  %v8531_v7 = vpop.f32.mrb[46].mxu0  ;;  %v4436_v58 = vpop.permute.xlu0 %4435  ;;  %v9370_v34 = vld [vmem:[#allocation7 + $0x2a0] sm:$0xff]   ;;  %9014 = vmatprep.subr.bf16.mxu1 %v9369_v42  ;;  %v5711_v42 = vld [vmem:[#allocation3 + $0x170] sm:$0xff] }
 0x3e7   : > { %4788 = vrot.lane.b32.xlu1 %v16579_v38, %s9704_s24  ;;  %5662 = vst.msk [vmem:[#allocation3 + $0x5a8] sm:$0xff] %vm16580_vm6, %v14219_v50  ;;  %v8532_v19 = vpop.f32.mrb[47].mxu0  ;;  %v16590_v38 = vld [vmem:[#allocation96_spill] sm:$0xff]  ;;  %vm16593_vm6 = vmmov %vm16577_vm2 }
 0x3e8   : > { %4474 = vst.msk [vmem:[#allocation3 + $0x3d0] sm:$0xff] %vm16581_vm5, %v4436_v58  ;;  %v14230_v37 = vadd.f32 %v8532_v19, %v8531_v7  ;;  %vm16594_vm5 = vmmov %vm16577_vm2 }
 0x3e9   : > { %4384 = vst.msk [vmem:[#allocation3 + $0x438] sm:$0xff] %vm16583_vm4, %v4347_v49  ;;  %v4438_v29 = vpop.permute.xlu1 %4437  ;;  %9015 = vmatpush3.bf16.msra.mxu1 %v9370_v34  ;;  %vm16596_vm4 = vmmov %vm16548_vm0 }
 0x3ea   : > { %v5684_v17 = vld [vmem:[#allocation3 + $0x98] sm:$0xff]  ;;  %4632 = vrot.lane.b32.xlu0 %v16582_v5, %s9703_s22  ;;  %v4511_v30 = vpop.permute.xlu0 %4510  ;;  %4475 = vst.msk [vmem:[#allocation3 + $0x438] sm:$0xff] %vm16548_vm0, %v4438_v29 }
 0x3eb   : > { %7236 = vmatmul.mubr.bf16.gmra.mrb[84].mxu1 %v5684_v17  ;;  %4716 = vrot.lane.b32.xlu1 %v16584_v27, %s9702_s20  ;;  %4549 = vst.msk [vmem:[#allocation3 + $0x3d0] sm:$0xff] %vm16585_vm10, %v4511_v30  ;;  %v5786_v7 = vld [vmem:[#allocation3 + $0x3c8] sm:$0xff]  ;;  %v6814_v17 = vadd.f32 %v14089_v40, %v13998_v61  ;;  %vm16597_vm10 = vmmov %vm16548_vm0 }
 0x3ec   : > { %7243 = vmatprep.mubr.bf16.mxu1 %v5698_v39  ;;  %v14257_v39 = vld [vmem:[#allocation7 + $0x300] sm:$0xff]   ;;  %v16592_v27 = vld [vmem:[#allocation93_spill] sm:$0xff]  ;;  %vm16598_vm0 = vmmov %vm16577_vm2 }
 0x3ed   : > { %v4513_v2 = vpop.permute.xlu1 %4512  ;;  %9136 = vmatprep.subr.bf16.mxu0 %v14257_v39 }
 0x3ee   : > { %4786 = vrot.lane.b32.xlu0 %v16586_v16, %s9704_s24  ;;  %v4621_v36 = vpop.permute.xlu0 %4620  ;;  %v8622_v0 = vpop.f32.mrb[48].mxu1  ;;  %4550 = vst.msk [vmem:[#allocation3 + $0x438] sm:$0xff] %vm16575_vm1, %v4513_v2 }
 0x3ef   : > { %4638 = vrot.lane.b32.xlu1 %v16507_v43, %s9703_s22  ;;  %4666 = vst.msk [vmem:[#allocation3 + $0x100] sm:$0xff] %vm16587_vm15, %v4621_v36  ;;  %v8623_v22 = vpop.f32.mrb[49].mxu1  ;;  %v16595_v36 = vld [vmem:[#allocation101_spill] sm:$0xff]  ;;  %vm16599_vm15 = vmmov %vm16598_vm0 }
 0x3f0   : > { %4746 = vst.msk [vmem:[#allocation3 + $0x100] sm:$0xff] %vm16588_vm14, %v4701_v12  ;;  %v8624_v33 = vadd.f32 %v8623_v22, %v8622_v0  ;;  %v8625_v43 = vpop.f32.mrb[50].mxu1  ;;  %vm16602_vm14 = vmmov %vm16575_vm1 }
 0x3f1   : > { %v8626_v19 = vpop.f32.mrb[51].mxu1  ;;  %v4623_v21 = vpop.permute.xlu1 %4622 }
 0x3f2   : > { %4714 = vrot.lane.b32.xlu0 %v16589_v47, %s9702_s20  ;;  %v4775_v58 = vpop.permute.xlu0 %4774  ;;  %v5787_v12 = vld [vmem:[#allocation3 + $0x3d0] sm:$0xff]  ;;  %v14254_v49 = vadd.f32 %v8624_v33, %v6811_v54  ;;  %v8627_v5 = vadd.f32 %v8626_v19, %v8625_v43  ;;  %4667 = vst.msk [vmem:[#allocation3 + $0x168] sm:$0xff] %vm16577_vm2, %v4623_v21  ;;  %v16600_v54 = vld [vmem:[#allocation132_spill] sm:$0xff]  ;;  %vm16604_vm2 = vmmov %vm16596_vm4 }
 0x3f3   : > { %4792 = vrot.lane.b32.xlu1 %v16590_v38, %s9704_s24  ;;  %4820 = vst.msk [vmem:[#allocation3 + $0x100] sm:$0xff] %vm16591_vm12, %v4775_v58  ;;  %7138 = vmatprep.mubr.bf16.mxu0 %v5787_v12  ;;  %v9372_v19 = vld [vmem:[#allocation7 + $0x2e8] sm:$0xff]   ;;  %vm16603_vm12 = vmmov %vm16596_vm4 }
 0x3f4   : > { %7139 = vmatmul.mubr.bf16.gmra.mrb[84].mxu0 %v5786_v7  ;;  %v14262_v30 = vadd.f32 %v8627_v5, %v6814_v17  ;;  %v16601_v7 = vld [vmem:[#allocation127_spill] sm:$0xff]  ;;  %v16605_v12 = vld [vmem:[#allocation88_spill] sm:$0xff]  ;;  %9016 = vmatprep.subr.bf16.mxu1 %v9372_v19 }
 0x3f5   : > { %v4777_v29 = vpop.permute.xlu1 %4776  ;;  %v5800_v16 = vld [vmem:[#allocation3 + $0x438] sm:$0xff] }
 0x3f6   : > { %4636 = vrot.lane.b32.xlu0 %v16592_v27, %s9703_s22  ;;  %v4082_v61 = vpop.permute.xlu0 %4081  ;;  %7146 = vmatprep.mubr.bf16.mxu0 %v5800_v16  ;;  %v9373_v27 = vld [vmem:[#allocation7 + $0x2a8] sm:$0xff]  }
 0x3f7   : > { %4640 = vrot.lane.b32.xlu1 %v16515_v14, %s9703_s22  ;;  %4119 = vst.msk [vmem:[#allocation3 + $0x430] sm:$0xff] %vm16593_vm6, %v4082_v61  ;;  %vm16606_vm6 = vmmov %vm16604_vm2  ;;  %9017 = vmatpush3.bf16.msra.mxu1 %v9373_v27 }
 0x3f8   : > { %5543 = vst.msk [vmem:[#allocation3 + $0x2c8] sm:$0xff] %vm16594_vm5, %v4082_v61  ;;  %v8686_v14 = vpop.f32.mrb[48].mxu0  ;;  %vm16607_vm5 = vmmov %vm16575_vm1 }
 0x3f9   : > { %v4084_v47 = vpop.permute.xlu1 %4083  ;;  %v8687_v22 = vpop.f32.mrb[49].mxu0 }
 0x3fa   : > { %4790 = vrot.lane.b32.xlu0 %v16595_v36, %s9704_s24  ;;  %v4156_v0 = vpop.permute.xlu0 %4155  ;;  %v5697_v2 = vld [vmem:[#allocation3 + $0x100] sm:$0xff]  ;;  %4120 = vst.msk [vmem:[#allocation3 + $0x498] sm:$0xff] %vm16598_vm0, %v4084_v47  ;;  %v8689_v34 = vpop.f32.mrb[50].mxu0 }
 0x3fb   : > { %4720 = vrot.lane.b32.xlu1 %v16523_v31, %s9702_s20  ;;  %4193 = vst.msk [vmem:[#allocation3 + $0x430] sm:$0xff] %vm16596_vm4, %v4156_v0  ;;  %7244 = vmatmul.mubr.bf16.gmra.mrb[88].mxu1 %v5697_v2  ;;  %v8688_v31 = vadd.f32 %v8687_v22, %v8686_v14  ;;  %v8690_v43 = vpop.f32.mrb[51].mxu0  ;;  %vm16608_vm4 = vmmov %vm16575_vm1  ;;  %v16610_v2 = vld [vmem:[#allocation56_spill] sm:$0xff] }
 0x3fc   : > { %5581 = vst.msk [vmem:[#allocation3 + $0x2c8] sm:$0xff] %vm16597_vm10, %v4156_v0  ;;  %7251 = vmatprep.mubr.bf16.mxu1 %v5711_v42  ;;  %vm16609_vm10 = vmmov %vm16575_vm1 }
 0x3fd   : > { %5544 = vst.msk [vmem:[#allocation3 + $0x330] sm:$0xff] %vm16599_vm15, %v4084_v47  ;;  %v14282_v38 = vadd.f32 %v8688_v31, %v16601_v7  ;;  %v4158_v58 = vpop.permute.xlu1 %4157  ;;  %v6822_v47 = vadd.f32 %v14089_v40, %v14073_v48  ;;  %vm16612_vm15 = vmmov %vm16604_vm2  ;;  %v1324_v7 = vld [vmem:[#allocation2 + $0xb4] sm:$0xf] }
 0x3fe   : > { %4718 = vrot.lane.b32.xlu0 %v16511_v26, %s9702_s20  ;;  %v4236_v33 = vpop.permute.xlu0 %4235  ;;  %v8691_v26 = vadd.f32 %v8690_v43, %v8689_v34  ;;  %4194 = vst.msk [vmem:[#allocation3 + $0x498] sm:$0xff] %vm16603_vm12, %v4158_v58  ;;  %vm16615_vm12 = vmmov %vm16604_vm2  ;;  %v9375_v43 = vld [vmem:[#allocation7 + $0x2b0] sm:$0xff]  }
 0x3ff   : > { %4794 = vrot.lane.b32.xlu1 %v16600_v54, %s9704_s24  ;;  %4273 = vst.msk [vmem:[#allocation3 + $0x430] sm:$0xff] %vm16602_vm14, %v4236_v33  ;;  %vm16613_vm14 = vmmov %vm16598_vm0 }
 0x400   : > { %5625 = vst.msk [vmem:[#allocation3 + $0x2c8] sm:$0xff] %vm16575_vm1, %v4236_v33  ;;  %v14291_v17 = vadd.f32 %v8691_v26, %v16605_v12 }
 0x401   : > { %5582 = vst.msk [vmem:[#allocation3 + $0x330] sm:$0xff] %vm16604_vm2, %v4158_v58  ;;  %v4238_v21 = vpop.permute.xlu1 %4237  ;;  %v1325_v58 = vld [vmem:[#allocation2 + $0xb8] sm:$0xf]  ;;  %vm16616_vm2 = vcmask 257024  }
 0x402   : > { %4886 = vrot.lane.b32.xlu0 %v16533_v62, %s9703_s22  ;;  %v4703_v5 = vpop.permute.xlu0 %4702  ;;  %4274 = vst.msk [vmem:[#allocation3 + $0x498] sm:$0xff] %vm16608_vm4, %v4238_v21  ;;  %vm16619_vm4 = vmmov %vm16615_vm12 }
 0x403   : > { %4642 = vrot.lane.b32.xlu1 %v16557_v13, %s9703_s22  ;;  %4747 = vst.msk [vmem:[#allocation3 + $0x168] sm:$0xff] %vm16606_vm6, %v4703_v5  ;;  %vm16617_vm6 = vmmov %vm16598_vm0  ;;  %v1326_v5 = vld [vmem:[#allocation2 + $0xbc] sm:$0x7] }
 0x404   : > { %4821 = vst.msk [vmem:[#allocation3 + $0x168] sm:$0xff] %vm16607_vm5, %v4777_v29  ;;  %v8628_v61 = vpop.f32.mrb[52].mxu1  ;;  %vm16618_vm5 = vmmov %vm16616_vm2 }
 0x405   : > { %5626 = vst.msk [vmem:[#allocation3 + $0x330] sm:$0xff] %vm16609_vm10, %v4238_v21  ;;  %v4705_v16 = vpop.permute.xlu1 %4704  ;;  %v8629_v29 = vpop.f32.mrb[53].mxu1  ;;  %vm16620_vm10 = vmmov %vm16575_vm1 }
 0x406   : > { %4925 = vrot.lane.b32.xlu0 %v16537_v52, %s9702_s20  ;;  %v4349_v62 = vpop.permute.xlu0 %4348  ;;  %v5799_v13 = vld [vmem:[#allocation3 + $0x430] sm:$0xff]  ;;  %v6819_v52 = vadd.f32 %v14089_v40, %v14068_v25  ;;  %v8630_v36 = vadd.f32 %v8629_v29, %v8628_v61  ;;  %v8631_v0 = vpop.f32.mrb[54].mxu1  ;;  %v5724_v25 = vld [vmem:[#allocation3 + $0x1d8] sm:$0xff]  ;;  %1328 = vst.msk [vmem:[#allocation2 + $0xfc] sm:$0xf] %vm16616_vm2, %v1324_v7  ;;  %vm16631_vm2 = vmmov %vm16619_vm4 }
 0x407   : > { %4722 = vrot.lane.b32.xlu1 %v16561_v28, %s9702_s20  ;;  %4385 = vst.msk [vmem:[#allocation3 + $0x4a0] sm:$0xff] %vm16598_vm0, %v4349_v62  ;;  %7147 = vmatmul.mubr.bf16.gmra.mrb[88].mxu0 %v5799_v13  ;;  %v8632_v42 = vpop.f32.mrb[55].mxu1  ;;  %vm16621_vm0 = vcmask 256000   ;;  %v16622_v61 = vld [vmem:[#allocation35_spill] sm:$0xff] }
 0x408   : > { %v14312_v22 = vadd.f32 %v8630_v36, %v6819_v52  ;;  %v8633_v31 = vadd.f32 %v8632_v42, %v8631_v0  ;;  %1329 = vst.msk [vmem:[#allocation2 + $0x100] sm:$0xf] %vm16618_vm5, %v1325_v58  ;;  %v14342_v0 = vshll.u32 %v14137_v55, 16  ;;  %v14348_v42 = vshrl.u32 %v14130_v10, 16 }
 0x409   : > { %v4351_v34 = vpop.permute.xlu1 %4350  ;;  %1330 = vst.msk [vmem:[#allocation2 + $0x104] sm:$0x7] %vm16621_vm0, %v1326_v5  ;;  %v5812_v13 = vld [vmem:[#allocation3 + $0x498] sm:$0xff] }
 0x40a   : > { %4971 = vrot.lane.b32.xlu0 %v16549_v60, %s9704_s24  ;;  %v4440_v14 = vpop.permute.xlu0 %4439  ;;  %16611 = vst [vmem:[#allocation14_spill] sm:$0xff] %v14312_v22  ;;  %4386 = vst.msk [vmem:[#allocation3 + $0x508] sm:$0xff] %vm16613_vm14, %v4351_v34  ;;  %v14318_v54 = vadd.f32 %v8633_v31, %v6822_v47  ;;  %v16623_v47 = vld [vmem:[#allocation83_spill] sm:$0xff]  ;;  %v16642_v22 = vld [vmem:[#allocation66_spill] sm:$0xff] }
 0x40b   : > { %4796 = vrot.lane.b32.xlu1 %v16610_v2, %s9704_s24  ;;  %4476 = vst.msk [vmem:[#allocation3 + $0x4a0] sm:$0xff] %vm16612_vm15, %v4440_v14  ;;  %v5710_v60 = vld [vmem:[#allocation3 + $0x168] sm:$0xff]  ;;  %v14345_v14 = vshll.u32 %v14130_v10, 16  ;;  %vm16625_vm15 = vmmov %vm16575_vm1 }
 0x40c   : > { %7252 = vmatmul.mubr.bf16.gmra.mrb[92].mxu1 %v5710_v60  ;;  %16614 = vst [vmem:[#allocation18_spill] sm:$0xff] %v14318_v54  ;;  %vm16626_vm14 = vmmov %vm16617_vm6 }
 0x40d   : > { %7259 = vmatprep.mubr.bf16.mxu1 %v5724_v25  ;;  %v4442_v33 = vpop.permute.xlu1 %4441  ;;  %v14355_v25 = vshll.u32 %v14143_v32, 16  ;;  %v5319_v7 = vrot.slane %v14345_v14, 7  ;;  %v5156_v5 = vrot.slane %v14345_v14, 5  ;;  %vm16640_vm0 = vmmov %vm16625_vm15 }
 0x40e   : > { %4888 = vrot.lane.b32.xlu0 %v16538_v15, %s9703_s22  ;;  %v4515_v48 = vpop.permute.xlu0 %4514  ;;  %4477 = vst.msk [vmem:[#allocation3 + $0x508] sm:$0xff] %vm16615_vm12, %v4442_v33  ;;  %v9374_v15 = vld [vmem:[#allocation7 + $0x2f0] sm:$0xff]  }
 0x40f   : > { %4644 = vrot.lane.b32.xlu1 %v13672_v53, %s9703_s22  ;;  %4551 = vst.msk [vmem:[#allocation3 + $0x4a0] sm:$0xff] %vm16575_vm1, %v4515_v48  ;;  %9018 = vmatprep.subr.bf16.mxu1 %v9374_v15  ;;  %v15735_v48 = vshrl.u32 %v14143_v32, 16  ;;  %v5315_v15 = vrot.slane %v14342_v0, 7  ;;  %vm16629_vm1 = vmmov %vm16617_vm6 }
 0x410   : > { %v8692_v19 = vpop.f32.mrb[52].mxu0  ;;  %9019 = vmatpush3.bf16.msra.mxu1 %v9375_v43  ;;  %v5318_v43 = vrot.slane %v14348_v42, 6  ;;  %vm16630_vm12 = vmmov %vm16629_vm1 }
 0x411   : > { %v4517_v12 = vpop.permute.xlu1 %4516  ;;  %v8693_v21 = vpop.f32.mrb[53].mxu0  ;;  %vm16634_vm5 = vmmov %vm16629_vm1 }
 0x412   : > { %4927 = vrot.lane.b32.xlu0 %v16542_v51, %s9702_s20  ;;  %v4625_v26 = vpop.permute.xlu0 %4624  ;;  %4552 = vst.msk [vmem:[#allocation3 + $0x508] sm:$0xff] %vm16620_vm10, %v4517_v12  ;;  %v8694_v27 = vadd.f32 %v8693_v21, %v8692_v19  ;;  %v8695_v62 = vpop.f32.mrb[54].mxu0  ;;  %v5150_v12 = vrot.slane %v14342_v0, 5  ;;  %vm16637_vm10 = vcmask 261120  }
 0x413   : > { %4724 = vrot.lane.b32.xlu1 %v13715_v3, %s9702_s20  ;;  %4668 = vst.msk [vmem:[#allocation3 + $0x1d0] sm:$0xff] %vm16617_vm6, %v4625_v26  ;;  %v8696_v52 = vpop.f32.mrb[55].mxu0  ;;  %v16627_v26 = vld [vmem:[#allocation82_spill] sm:$0xff]  ;;  %vm16632_vm6 = vmmov %vm16631_vm2 }
 0x414   : > { %4748 = vst.msk [vmem:[#allocation3 + $0x1d0] sm:$0xff] %vm16619_vm4, %v4705_v16  ;;  %v14339_v16 = vshrl.u32 %v14137_v55, 16  ;;  %v14351_v31 = vadd.f32 %v8694_v27, %v16623_v47  ;;  %v8697_v60 = vadd.f32 %v8696_v52, %v8695_v62  ;;  %v5320_v62 = vor.u32 %v5319_v7, %v5318_v43  ;;  %vm16635_vm4 = vmmov %vm16629_vm1 }
 0x415   : > { %v4627_v34 = vpop.permute.xlu1 %4626 }
 0x416   : > { %4973 = vrot.lane.b32.xlu0 %v13640_v9, %s9704_s24  ;;  %v4779_v29 = vpop.permute.xlu0 %4778  ;;  %v5813_v36 = vld [vmem:[#allocation3 + $0x4a0] sm:$0xff]  ;;  %16624 = vst [vmem:[#allocation20_spill] sm:$0xff] %v14351_v31  ;;  %4669 = vst.msk [vmem:[#allocation3 + $0x238] sm:$0xff] %vm16626_vm14, %v4627_v34  ;;  %v5314_v33 = vrot.slane %v14339_v16, 6  ;;  %v14366_v58 = vadd.f32 %v8697_v60, %v16627_v26  ;;  %v5147_v19 = vrot.slane %v14339_v16, 4  ;;  %v5160_v60 = vrot.slane %v14348_v42, 4 }
 0x417   : > { %4798 = vrot.lane.b32.xlu1 %v16622_v61, %s9704_s24  ;;  %4822 = vst.msk [vmem:[#allocation3 + $0x1d0] sm:$0xff] %vm16625_vm15, %v4779_v29  ;;  %7154 = vmatprep.mubr.bf16.mxu0 %v5813_v36  ;;  %v5324_v29 = vrot.slane %v14355_v25, 7  ;;  %v5166_v26 = vrot.slane %v14355_v25, 5  ;;  %vm16641_vm15 = vmmov %vm16640_vm0 }
 0x418   : > { %7155 = vmatmul.mubr.bf16.gmra.mrb[92].mxu0 %v5812_v13  ;;  %16628 = vst [vmem:[#allocation40_spill] sm:$0xff] %v14366_v58  ;;  %v5316_v27 = vor.u32 %v5315_v15, %v5314_v33  ;;  %v5323_v13 = vrot.slane %v15735_v48, 6  ;;  %v5151_v47 = vor.u32 %v5150_v12, %v5147_v19  ;;  %v5322_v33 = vrot.slane %v5320_v62, 4  ;;  %vm16643_vm14 = vmmov %vm16631_vm2 }
 0x419   : > { %v14378_v52 = vpop.permute.xlu1 %4780  ;;  %v5826_v36 = vld [vmem:[#allocation3 + $0x508] sm:$0xff]  ;;  %v5161_v7 = vor.u32 %v5160_v60, %v5156_v5  ;;  %v5355_v58 = vrot.slane %v14143_v32, 7 }
 0x41a   : > { %4890 = vrot.lane.b32.xlu0 %v13670_v45, %s9703_s22  ;;  %7162 = vmatprep.mubr.bf16.mxu0 %v5826_v36  ;;  %v5317_v34 = vrot.slane %v5316_v27, 4  ;;  %v5325_v15 = vor.u32 %v5324_v29, %v5323_v13  ;;  %v5152_v43 = vrot.slane %v5151_v47, 4  ;;  %v5737_v13 = vld [vmem:[#allocation3 + $0x240] sm:$0xff]  ;;  %v9376_v36 = vld [vmem:[#allocation7 + $0x2f8] sm:$0xff]  }
 0x41b   : > { %4646 = vrot.lane.b32.xlu1 %v13951_v8, %s9703_s22  ;;  %v5162_v54 = vrot.slane %v5161_v7, 4  ;;  %9020 = vmatprep.subr.bf16.mxu1 %v9376_v36 }
 0x41c   : > { %v4086_v21 = vpop.permute.xlu0 %4085  ;;  %v5321_v19 = vsel %vm9973_vm9, %v5317_v34, %v5320_v62  ;;  %v5326_v12 = vsel %vm9973_vm9, %v5322_v33, %v5325_v15  ;;  %v8634_v27 = vpop.f32.mrb[56].mxu1  ;;  %v5157_v60 = vsel %vm16395_vm11, %v5152_v43, %v5156_v5  ;;  %v16633_v62 = vld [vmem:[#allocation55_spill] sm:$0xff] }
 0x41d   : > { %4121 = vst.msk [vmem:[#allocation3 + $0x500] sm:$0xff] %vm16629_vm1, %v4086_v21  ;;  %v14392_v47 = vcombine.low %v5321_v19, %v5326_v12  ;;  %v8635_v34 = vpop.f32.mrb[57].mxu1  ;;  %v9377_v33 = vld [vmem:[#allocation7 + $0x2b8] sm:$0xff]   ;;  %v5167_v5 = vsel %vm16395_vm11, %v5162_v54, %v5166_v26  ;;  %vm16644_vm1 = vmmov %vm16631_vm2 }
 0x41e   : > { %5545 = vst.msk [vmem:[#allocation3 + $0x398] sm:$0xff] %vm16630_vm12, %v4086_v21  ;;  %4929 = vrot.lane.b32.xlu0 %v16578_v56, %s9702_s20  ;;  %v5723_v48 = vld [vmem:[#allocation3 + $0x1d0] sm:$0xff]  ;;  %v8636_v15 = vadd.f32 %v8635_v34, %v8634_v27  ;;  %9021 = vmatpush3.bf16.msra.mxu1 %v9377_v33  ;;  %v14408_v12 = vcombine.low %v5157_v60, %v5167_v5  ;;  %v5352_v27 = vrot.slane %v14130_v10, 7  ;;  %v14420_v33 = vld [vmem:[#allocation2 + $0x100] sm:$0xf]  ;;  %vm16645_vm12 = vmmov %vm16637_vm10 }
 0x41f   : > { %4726 = vrot.lane.b32.xlu1 %v14012_v57, %s9702_s20  ;;  %7260 = vmatmul.mubr.bf16.gmra.mrb[96].mxu1 %v5723_v48  ;;  %v6827_v48 = vadd.f32 %v14089_v40, %v14115_v11  ;;  %v16636_v19 = vld [vmem:[#allocation134_spill] sm:$0xff]  ;;  %5349 = vst.msk [vmem:[#allocation3 + $0x668] sm:$0xff] %vm16637_vm10, %v14392_v47  ;;  %v8312_v11 = vrot.slane %v14137_v55, 11  ;;  %v14422_v60 = vld [vmem:[#allocation2 + $0x104] sm:$0x7]  ;;  %vm16651_vm10 = vcmask 523520  }
 0x420   : > { %v4160_v21 = vpop.permute.xlu0 %4159  ;;  %7267 = vmatprep.mubr.bf16.mxu1 %v5737_v13  ;;  %v14410_v13 = vld [vmem:[#allocation2 + $0xfc] sm:$0xf]  ;;  %5190 = vst.msk [vmem:[#allocation3 + $0x660] sm:$0xff] %vm16645_vm12, %v14408_v12 }
 0x421   : > { %4195 = vst.msk [vmem:[#allocation3 + $0x500] sm:$0xff] %vm16631_vm2, %v4160_v21  ;;  %v4088_v29 = vpop.permute.xlu1 %4087  ;;  %v14416_v34 = vadd.f32 %v8636_v15, %v6827_v48  ;;  %v8322_v5 = vrot.slane %v14410_v13, 11  ;;  %v5637_v48 = vrot.slane %v14420_v33, 7  ;;  %v5640_v15 = vrot.slane %v14422_v60, 7  ;;  %vm16646_vm2 = vmmov %vm16644_vm1 }
 0x422   : > { %5583 = vst.msk [vmem:[#allocation3 + $0x398] sm:$0xff] %vm16632_vm6, %v4160_v21  ;;  %4975 = vrot.lane.b32.xlu0 %v16633_v62, %s9704_s24  ;;  %v8637_v21 = vpop.f32.mrb[58].mxu1  ;;  %vm16647_vm6 = vmmov %vm16640_vm0 }
 0x423   : > { %4122 = vst.msk [vmem:[#allocation3 + $0x568] sm:$0xff] %vm16634_vm5, %v4088_v29  ;;  %4800 = vrot.lane.b32.xlu1 %v16636_v19, %s9704_s24  ;;  %v8638_v7 = vpop.f32.mrb[59].mxu1  ;;  %16639 = vst [vmem:[#allocation24_spill] sm:$0xff] %v14416_v34  ;;  %v5639_v34 = vrot.slane %v5637_v48, 4 }
 0x424   : > { %5546 = vst.msk [vmem:[#allocation3 + $0x400] sm:$0xff] %vm16635_vm4, %v4088_v29  ;;  %v4240_v43 = vpop.permute.xlu0 %4239  ;;  %v16638_v29 = vld [vmem:[#allocation36_spill] sm:$0xff]  ;;  %v8639_v54 = vadd.f32 %v8638_v7, %v8637_v21  ;;  %vm16649_vm5 = vmmov %vm16640_vm0 }
 0x425   : > { %v6830_v36 = vadd.f32 %v14089_v40, %v16638_v29  ;;  %4275 = vst.msk [vmem:[#allocation3 + $0x500] sm:$0xff] %vm16640_vm0, %v4240_v43  ;;  %v4162_v26 = vpop.permute.xlu1 %4161  ;;  %v5638_v29 = vsel %vm16477_vm7, %v8322_v5, %v5637_v48  ;;  %vm16650_vm4 = vmmov %vm16640_vm0 }
 0x426   : > { %5627 = vst.msk [vmem:[#allocation3 + $0x398] sm:$0xff] %vm16641_vm15, %v4240_v43  ;;  %4892 = vrot.lane.b32.xlu0 %v16642_v22, %s9703_s22  ;;  %v5354_v43 = vrot.slane %v5352_v27, 4  ;;  %vm16652_vm0 = vmmov %vm16645_vm12 }
 0x427   : > { %4196 = vst.msk [vmem:[#allocation3 + $0x568] sm:$0xff] %vm16643_vm14, %v4162_v26  ;;  %v14433_v21 = vadd.f32 %v8639_v54, %v6830_v36  ;;  %5045 = vrot.lane.b32.xlu1 %v16561_v28, %s9703_s22  ;;  %v16648_v36 = vld [vmem:[#allocation26_spill] sm:$0xff]  ;;  %v5641_v28 = vsel %vm16477_vm7, %v5639_v34, %v5640_v15  ;;  %vm16653_vm15 = vmmov %vm16652_vm0 }
 0x428   : > { %5584 = vst.msk [vmem:[#allocation3 + $0x400] sm:$0xff] %vm16644_vm1, %v4162_v26  ;;  %v4707_v7 = vpop.permute.xlu0 %4706  ;;  %v5353_v26 = vsel %vm16477_vm7, %v8312_v11, %v5352_v27  ;;  %v5356_v11 = vsel %vm16477_vm7, %v5354_v43, %v5355_v58  ;;  %v8323_v27 = vcombine.low %v5638_v29, %v5641_v28  ;;  %v8698_v48 = vpop.f32.mrb[56].mxu0  ;;  %v16655_v34 = vld [vmem:[#allocation98_spill] sm:$0xff]  ;;  %v16656_v29 = vld [vmem:[#allocation87_spill] sm:$0xff]  ;;  %vm16657_vm7 = vmmov %vm16644_vm1 }
 0x429   : > { %4749 = vst.msk [vmem:[#allocation3 + $0x238] sm:$0xff] %vm16646_vm2, %v4707_v7  ;;  %v4242_v31 = vpop.permute.xlu1 %4241  ;;  %v14455_v54 = vcombine.low %v5353_v26, %v5356_v11  ;;  %vm16658_vm14 = vmmov %vm16651_vm10 }
 0x42a   : > { %4823 = vst.msk [vmem:[#allocation3 + $0x238] sm:$0xff] %vm16647_vm6, %v14378_v52  ;;  %4931 = vrot.lane.b32.xlu0 %v16648_v36, %s9702_s20  ;;  %vm16660_vm1 = vmmov %vm16650_vm4 }
 0x42b   : > { %4276 = vst.msk [vmem:[#allocation3 + $0x568] sm:$0xff] %vm16649_vm5, %v4242_v31  ;;  %5083 = vrot.lane.b32.xlu1 %v16610_v2, %s9702_s20  ;;  %vm16661_vm12 = vmmov %vm16646_vm2 }
 0x42c   : > { %5628 = vst.msk [vmem:[#allocation3 + $0x400] sm:$0xff] %vm16650_vm4, %v4242_v31  ;;  %v4353_v52 = vpop.permute.xlu0 %4352  ;;  %v5825_v5 = vld [vmem:[#allocation3 + $0x500] sm:$0xff]  ;;  %v8699_v31 = vpop.f32.mrb[57].mxu0  ;;  %vm16662_vm2 = vmmov %vm16651_vm10 }
 0x42d   : > { %4387 = vst.msk [vmem:[#allocation3 + $0x570] sm:$0xff] %vm16651_vm10, %v4353_v52  ;;  %7163 = vmatmul.mubr.bf16.gmra.mrb[96].mxu0 %v5825_v5  ;;  %v4709_v7 = vpop.permute.xlu1 %4708  ;;  %v8700_v2 = vadd.f32 %v8699_v31, %v8698_v48  ;;  %v8701_v58 = vpop.f32.mrb[58].mxu0  ;;  %v5750_v52 = vld [vmem:[#allocation3 + $0x2a8] sm:$0xff]  ;;  %vm16663_vm6 = vmmov %vm16657_vm7 }
 0x42e   : > { %5664 = vst.msk [vmem:[#allocation3 + $0x678] sm:$0xff] %vm16652_vm0, %v8323_v27  ;;  %4977 = vrot.lane.b32.xlu0 %v16654_v41, %s9704_s24  ;;  %v8702_v43 = vpop.f32.mrb[59].mxu0  ;;  %v16659_v5 = vld [vmem:[#allocation137_spill] sm:$0xff]  ;;  %vm16664_vm5 = vmmov %vm16660_vm1 }
 0x42f   : > { %5663 = vst.msk [vmem:[#allocation3 + $0x610] sm:$0xff] %vm16653_vm15, %v14455_v54  ;;  %5116 = vrot.lane.b32.xlu1 %v16655_v34, %s9704_s24  ;;  %v14466_v26 = vadd.f32 %v8700_v2, %v16656_v29  ;;  %v8703_v28 = vadd.f32 %v8702_v43, %v8701_v58  ;;  %vm16665_vm4 = vmmov %vm16660_vm1 }
 0x430   : > { %v4444_v15 = vpop.permute.xlu0 %4443  ;;  %vm16666_vm10 = vmmov %vm16662_vm2 }
 0x431   : > { %4478 = vst.msk [vmem:[#allocation3 + $0x570] sm:$0xff] %vm16657_vm7, %v4444_v15  ;;  %v5736_v11 = vld [vmem:[#allocation3 + $0x238] sm:$0xff]  ;;  %v4355_v27 = vpop.permute.xlu1 %4354  ;;  %v14473_v48 = vadd.f32 %v8703_v28, %v16659_v5  ;;  %vm16667_vm0 = vmmov %vm16662_vm2 }
 0x432   : > { %7268 = vmatmul.mubr.bf16.gmra.mrb[100].mxu1 %v5736_v11  ;;  %5202 = vrot.lane.b32.xlu0 %v16542_v51, %s9703_s22  ;;  %4388 = vst.msk [vmem:[#allocation3 + $0x5d8] sm:$0xff] %vm16658_vm14, %v4355_v27  ;;  %v5838_v29 = vld [vmem:[#allocation3 + $0x568] sm:$0xff]  ;;  %vm16668_vm15 = vmmov %vm16667_vm0 }
 0x433   : > { %7275 = vmatprep.mubr.bf16.mxu1 %v5750_v52  ;;  %5047 = vrot.lane.b32.xlu1 %v13715_v3, %s9703_s22  ;;  %vm16669_vm7 = vmmov %vm16663_vm6 }
 0x434   : > { %v4519_v31 = vpop.permute.xlu0 %4518  ;;  %vm16670_vm14 = vmmov %vm16663_vm6 }
 0x435   : > { %4553 = vst.msk [vmem:[#allocation3 + $0x570] sm:$0xff] %vm16660_vm1, %v4519_v31  ;;  %v4446_v2 = vpop.permute.xlu1 %4445  ;;  %vm16671_vm1 = vmmov %vm16667_vm0 }
 0x436   : > { %5248 = vrot.lane.b32.xlu0 %v13640_v9, %s9702_s20  ;;  %4479 = vst.msk [vmem:[#allocation3 + $0x5d8] sm:$0xff] %vm16661_vm12, %v4446_v2  ;;  %v8640_v58 = vpop.f32.mrb[60].mxu1  ;;  %v6835_v9 = vadd.f32 %v14089_v40, %v14223_v24  ;;  %vm16672_vm12 = vmmov %vm16667_vm0 }
 0x437   : > { %5085 = vrot.lane.b32.xlu1 %v16622_v61, %s9702_s20  ;;  %v8641_v3 = vpop.f32.mrb[61].mxu1 }
 0x438   : > { %v4629_v51 = vpop.permute.xlu0 %4628  ;;  %v8642_v15 = vadd.f32 %v8641_v3, %v8640_v58  ;;  %v8643_v43 = vpop.f32.mrb[62].mxu1  ;;  %v5763_v58 = vld [vmem:[#allocation3 + $0x310] sm:$0xff] }
 0x439   : > { %4670 = vst.msk [vmem:[#allocation3 + $0x2a0] sm:$0xff] %vm16662_vm2, %v4629_v51  ;;  %v4521_v34 = vpop.permute.xlu1 %4520  ;;  %v8644_v11 = vpop.f32.mrb[63].mxu1  ;;  %vm16674_vm2 = vmmov %vm16665_vm4 }
 0x43a   : > { %4750 = vst.msk [vmem:[#allocation3 + $0x2a0] sm:$0xff] %vm16663_vm6, %v4709_v7  ;;  %5286 = vrot.lane.b32.xlu0 %v13672_v53, %s9704_s24  ;;  %v6838_v7 = vadd.f32 %v14089_v40, %v14230_v37  ;;  %v14494_v52 = vadd.f32 %v8642_v15, %v6835_v9  ;;  %v8645_v53 = vadd.f32 %v8644_v11, %v8643_v43  ;;  %v5230_v9 = vrot.slane %v14339_v16, 5  ;;  %vm16675_vm6 = vmmov %vm16674_vm2 }
 0x43b   : > { %4554 = vst.msk [vmem:[#allocation3 + $0x5d8] sm:$0xff] %vm16664_vm5, %v4521_v34  ;;  %5118 = vrot.lane.b32.xlu1 %v13623_v4, %s9704_s24  ;;  %v5231_v15 = vrot.slane %v14342_v0, 6  ;;  %v5235_v11 = vrot.slane %v14345_v14, 6  ;;  %vm16676_vm5 = vmmov %vm16669_vm7  ;;  %v16678_v14 = vld [vmem:[#allocation62_spill] sm:$0xff] }
 0x43c   : > { %v4783_v28 = vpop.permute.xlu0 %4782  ;;  %v5839_v27 = vld [vmem:[#allocation3 + $0x570] sm:$0xff]  ;;  %v14500_v24 = vadd.f32 %v8645_v53, %v6838_v7  ;;  %v16673_v53 = vld [vmem:[#allocation136_spill] sm:$0xff] }
 0x43d   : > { %4824 = vst.msk [vmem:[#allocation3 + $0x2a0] sm:$0xff] %vm16665_vm4, %v4783_v28  ;;  %7170 = vmatprep.mubr.bf16.mxu0 %v5839_v27  ;;  %v4631_v5 = vpop.permute.xlu1 %4630  ;;  %v5234_v28 = vrot.slane %v14348_v42, 5  ;;  %vm16677_vm4 = vmmov %vm16676_vm5  ;;  %v5232_v42 = vor.u32 %v5231_v15, %v5230_v9  ;;  %v14550_v15 = vcombine.low %v14137_v55, %v14130_v10 }
 0x43e   : > { %7171 = vmatmul.mubr.bf16.gmra.mrb[100].mxu0 %v5838_v29  ;;  %5204 = vrot.lane.b32.xlu0 %v16578_v56, %s9703_s22  ;;  %4671 = vst.msk [vmem:[#allocation3 + $0x308] sm:$0xff] %vm16666_vm10, %v4631_v5  ;;  %vm16680_vm10 = vmmov %vm16677_vm4 }
 0x43f   : > { %5049 = vrot.lane.b32.xlu1 %v14012_v57, %s9703_s22 }
 0x440   : > { %v4090_v31 = vpop.permute.xlu0 %4089 }
 0x441   : > { %4123 = vst.msk [vmem:[#allocation3 + $0x5d0] sm:$0xff] %vm16667_vm0, %v4090_v31  ;;  %v4785_v40 = vpop.permute.xlu1 %4784  ;;  %vm16681_vm0 = vmmov %vm16674_vm2 }
 0x442   : > { %5547 = vst.msk [vmem:[#allocation3 + $0x468] sm:$0xff] %vm16668_vm15, %v4090_v31  ;;  %v5852_v37 = vld [vmem:[#allocation3 + $0x5d8] sm:$0xff]  ;;  %5250 = vrot.lane.b32.xlu0 %v16633_v62, %s9702_s20  ;;  %vm16682_vm15 = vmmov %vm16681_vm0 }
 0x443   : > { %7178 = vmatprep.mubr.bf16.mxu0 %v5852_v37  ;;  %5087 = vrot.lane.b32.xlu1 %v16636_v19, %s9702_s20  ;;  %v5236_v37 = vor.u32 %v5235_v11, %v5234_v28  ;;  %v14553_v11 = vld [vmem:[#allocation9] ss:$0 sm:$0xff] }
 0x444   : > { %v4164_v56 = vpop.permute.xlu0 %4163  ;;  %v5749_v2 = vld [vmem:[#allocation3 + $0x2a0] sm:$0xff] }
 0x445   : > { %4197 = vst.msk [vmem:[#allocation3 + $0x5d0] sm:$0xff] %vm16669_vm7, %v4164_v56  ;;  %7276 = vmatmul.mubr.bf16.gmra.mrb[104].mxu1 %v5749_v2  ;;  %v8704_v51 = vpop.f32.mrb[60].mxu0  ;;  %v4092_v34 = vpop.permute.xlu1 %4091  ;;  %vm16683_vm7 = vmmov %vm16681_vm0 }
 0x446   : > { %5585 = vst.msk [vmem:[#allocation3 + $0x468] sm:$0xff] %vm16670_vm14, %v4164_v56  ;;  %v8705_v3 = vpop.f32.mrb[61].mxu0  ;;  %7283 = vmatprep.mubr.bf16.mxu1 %v5763_v58  ;;  %5288 = vrot.lane.b32.xlu0 %v13951_v8, %s9704_s24  ;;  %v16679_v56 = vshrl.u32 %v14143_v32, 16  ;;  %vm16684_vm14 = vmmov %vm16671_vm1 }
 0x447   : > { %4124 = vst.msk [vmem:[#allocation3 + $0x638] sm:$0xff] %vm16671_vm1, %v4092_v34  ;;  %v8706_v43 = vadd.f32 %v8705_v3, %v8704_v51  ;;  %v8707_v29 = vpop.f32.mrb[62].mxu0  ;;  %5120 = vrot.lane.b32.xlu1 %v14155_v44, %s9704_s24  ;;  %v5242_v51 = vrot.slane %v14355_v25, 6  ;;  %v5238_v3 = vrot.slane %v5236_v37, 4  ;;  %v5278_v25 = vrot.slane %v14130_v10, 6  ;;  %vm16688_vm1 = vmmov %vm16677_vm4 }
 0x448   : > { %5548 = vst.msk [vmem:[#allocation3 + $0x4d0] sm:$0xff] %vm16672_vm12, %v4092_v34  ;;  %v4244_v27 = vpop.permute.xlu0 %4243  ;;  %v8708_v7 = vpop.f32.mrb[63].mxu0  ;;  %v5241_v2 = vrot.slane %v16679_v56, 5  ;;  %v5233_v34 = vrot.slane %v5232_v42, 4 }
 0x449   : > { %v14523_v5 = vadd.f32 %v8706_v43, %v16673_v53  ;;  %4277 = vst.msk [vmem:[#allocation3 + $0x5d0] sm:$0xff] %vm16674_vm2, %v4244_v27  ;;  %v8709_v16 = vadd.f32 %v8708_v7, %v8707_v29  ;;  %v4166_v0 = vpop.permute.xlu1 %4165  ;;  %vm16689_vm2 = vmmov %vm16681_vm0 }
 0x44a   : > { %5629 = vst.msk [vmem:[#allocation3 + $0x468] sm:$0xff] %vm16675_vm6, %v4244_v27  ;;  %5206 = vrot.lane.b32.xlu0 %v16648_v36, %s9703_s22  ;;  %v5243_v9 = vor.u32 %v5242_v51, %v5241_v2  ;;  %v16685_v27 = vld [vmem:[#allocation47_spill] sm:$0xff]  ;;  %v5237_v10 = vsel %vm16388_vm13, %v5233_v34, %v5236_v37  ;;  %v5280_v2 = vrot.slane %v5278_v25, 4  ;;  %v5281_v51 = vrot.slane %v14143_v32, 6  ;;  %vm16690_vm6 = vmmov %vm16672_vm12 }
 0x44b   : > { %4198 = vst.msk [vmem:[#allocation3 + $0x638] sm:$0xff] %vm16676_vm5, %v4166_v0  ;;  %v14532_v31 = vadd.f32 %v8709_v16, %v16678_v14  ;;  %5051 = vrot.lane.b32.xlu1 %v14192_v63, %s9703_s22  ;;  %v6843_v7 = vadd.f32 %v14553_v11, %v16685_v27  ;;  %vm16691_vm5 = vmmov %vm16688_vm1 }
 0x44c   : > { %5586 = vst.msk [vmem:[#allocation3 + $0x4d0] sm:$0xff] %vm16677_vm4, %v4166_v0  ;;  %v4711_v58 = vpop.permute.xlu0 %4710  ;;  %v8309_v0 = vrot.slane %v14137_v55, 10  ;;  %v5244_v56 = vsel %vm16388_vm13, %v5238_v3, %v5243_v9  ;;  %v5776_v3 = vld [vmem:[#allocation3 + $0x378] sm:$0xff]  ;;  %vm16693_vm4 = vmmov %vm16681_vm0 }
 0x44d   : > { %4751 = vst.msk [vmem:[#allocation3 + $0x308] sm:$0xff] %vm16680_vm10, %v4711_v58  ;;  %v4246_v36 = vpop.permute.xlu1 %4245  ;;  %v14575_v32 = vcombine.low %v5237_v10, %v5244_v56  ;;  %vm16694_vm10 = vmmov %vm16690_vm6 }
 0x44e   : > { %4825 = vst.msk [vmem:[#allocation3 + $0x308] sm:$0xff] %vm16681_vm0, %v4785_v40  ;;  %5252 = vrot.lane.b32.xlu0 %v16654_v41, %s9702_s20  ;;  %vm16696_vm0 = vmmov %vm16688_vm1 }
 0x44f   : > { %4278 = vst.msk [vmem:[#allocation3 + $0x638] sm:$0xff] %vm16682_vm15, %v4246_v36  ;;  %5089 = vrot.lane.b32.xlu1 %v14219_v50, %s9702_s20  ;;  %vm16697_vm15 = vmmov %vm16689_vm2 }
 0x450   : > { %5630 = vst.msk [vmem:[#allocation3 + $0x4d0] sm:$0xff] %vm16683_vm7, %v4246_v36  ;;  %v4357_v40 = vpop.permute.xlu0 %4356  ;;  %v5851_v43 = vld [vmem:[#allocation3 + $0x5d0] sm:$0xff]  ;;  %vm16698_vm7 = vmmov %vm16690_vm6 }
 0x451   : > { %4389 = vst.msk [vmem:[#allocation3 + $0x640] sm:$0xff] %vm16684_vm14, %v4357_v40  ;;  %v8646_v29 = vpop.f32.mrb[64].mxu1  ;;  %7179 = vmatmul.mubr.bf16.gmra.mrb[104].mxu0 %v5851_v43  ;;  %v4713_v28 = vpop.permute.xlu1 %4712  ;;  %v16687_v40 = vld [vmem:[#allocation99_spill] sm:$0xff]  ;;  %vm16699_vm14 = vmmov %vm16696_vm0 }
 0x452   : > { %v8647_v53 = vpop.f32.mrb[65].mxu1  ;;  %5290 = vrot.lane.b32.xlu0 %v14151_v59, %s9704_s24  ;;  %v6846_v43 = vadd.f32 %v14553_v11, %v16687_v40 }
 0x453   : > { %v8648_v42 = vadd.f32 %v8647_v53, %v8646_v29  ;;  %v8649_v14 = vpop.f32.mrb[66].mxu1  ;;  %5122 = vrot.lane.b32.xlu1 %v14550_v15, %s9704_s24  ;;  %v5279_v29 = vsel %vm16398_vm3, %v8309_v0, %v5278_v25 }
 0x454   : > { %v4448_v58 = vpop.permute.xlu0 %4447  ;;  %v8650_v36 = vpop.f32.mrb[67].mxu1 }
 0x455   : > { %v14569_v27 = vadd.f32 %v8648_v42, %v6843_v7  ;;  %4480 = vst.msk [vmem:[#allocation3 + $0x640] sm:$0xff] %vm16688_vm1, %v4448_v58  ;;  %v8651_v55 = vadd.f32 %v8650_v36, %v8649_v14  ;;  %v5762_v37 = vld [vmem:[#allocation3 + $0x308] sm:$0xff]  ;;  %v4635_v34 = vpop.permute.xlu1 %4634  ;;  %v5282_v7 = vsel %vm16398_vm3, %v5280_v2, %v5281_v51  ;;  %vm16700_vm1 = vmmov %vm16690_vm6 }
 0x456   : > { %7284 = vmatmul.mubr.bf16.gmra.mrb[108].mxu1 %v5762_v37  ;;  %5208 = vrot.lane.b32.xlu0 %v14176_v23, %s9703_s22  ;;  %4673 = vst.msk [vmem:[#allocation3 + $0x3d8] sm:$0xff] %vm16672_vm12, %v4635_v34  ;;  %v14588_v10 = vcombine.low %v5279_v29, %v5282_v7  ;;  %v5864_v2 = vld [vmem:[#allocation3 + $0x638] sm:$0xff]  ;;  %v16692_v36 = vld [vmem:[#allocation129_spill] sm:$0xff]  ;;  %vm16703_vm12 = vmmov %vm16689_vm2 }
 0x457   : > { %v14577_v9 = vadd.f32 %v8651_v55, %v6846_v43  ;;  %7291 = vmatprep.mubr.bf16.mxu1 %v5776_v3  ;;  %5360 = vrot.lane.b32.xlu1 %v16622_v61, %s9703_s22  ;;  %v5674_v55 = vld [vmem:[#allocation3 + $0x48] sm:$0xff]  ;;  %v16695_v37 = vld [vmem:[#allocation130_spill] sm:$0xff] }
 0x458   : > { %v4523_v53 = vpop.permute.xlu0 %4522 }
 0x459   : > { %4555 = vst.msk [vmem:[#allocation3 + $0x640] sm:$0xff] %vm16689_vm2, %v4523_v53  ;;  %v4789_v23 = vpop.permute.xlu1 %4788  ;;  %v5789_v53 = vld [vmem:[#allocation3 + $0x3e0] sm:$0xff]  ;;  %vm16704_vm2 = vmmov %vm16696_vm0 }
 0x45a   : > { %5254 = vrot.lane.b32.xlu0 %v14575_v32, %s9702_s20 }
 0x45b   : > { %5393 = vrot.lane.b32.xlu1 %v13623_v4, %s9702_s20  ;;  %v8710_v25 = vpop.f32.mrb[64].mxu0 }
 0x45c   : > { %v4633_v42 = vpop.permute.xlu0 %4632  ;;  %v8711_v61 = vpop.f32.mrb[65].mxu0 }
 0x45d   : > { %4672 = vst.msk [vmem:[#allocation3 + $0x370] sm:$0xff] %vm16690_vm6, %v4633_v42  ;;  %v4717_v0 = vpop.permute.xlu1 %4716  ;;  %v8712_v14 = vadd.f32 %v8711_v61, %v8710_v25  ;;  %v8713_v56 = vpop.f32.mrb[66].mxu0  ;;  %v9378_v25 = vld [vmem:[#allocation7 + $0x308] sm:$0xff]   ;;  %vm16705_vm6 = vmmov %vm16696_vm0 }
 0x45e   : > { %4752 = vst.msk [vmem:[#allocation3 + $0x370] sm:$0xff] %vm16691_vm5, %v4713_v28  ;;  %5292 = vrot.lane.b32.xlu0 %v14588_v10, %s9704_s24  ;;  %v8714_v58 = vpop.f32.mrb[67].mxu0  ;;  %vm16706_vm5 = vmmov %vm16693_vm4 }
 0x45f   : > { %5448 = vrot.lane.b32.xlu1 %v13670_v45, %s9704_s24  ;;  %v14599_v40 = vadd.f32 %v8712_v14, %v16692_v36  ;;  %v8715_v43 = vadd.f32 %v8714_v58, %v8713_v56 }
 0x460   : > { %v4787_v51 = vpop.permute.xlu0 %4786  ;;  %v5865_v4 = vld [vmem:[#allocation3 + $0x640] sm:$0xff] }
 0x461   : > { %4826 = vst.msk [vmem:[#allocation3 + $0x370] sm:$0xff] %vm16693_vm4, %v4787_v51  ;;  %7186 = vmatprep.mubr.bf16.mxu0 %v5865_v4  ;;  %v4639_v28 = vpop.permute.xlu1 %4638  ;;  %v14606_v45 = vadd.f32 %v8715_v43, %v16695_v37 }
 0x462   : > { %7187 = vmatmul.mubr.bf16.gmra.mrb[108].mxu0 %v5864_v2  ;;  %4675 = vst.msk [vmem:[#allocation3 + $0x4a8] sm:$0xff] %vm16694_vm10, %v4639_v28  ;;  %5525 = vrot.lane.b32.xlu0 %v16633_v62, %s9703_s22  ;;  %vm16707_vm10 = vmmov %vm16700_vm1 }
 0x463   : > { %7388 = vmatprep.mubr.bf16.mxu0 %v5674_v55  ;;  %5362 = vrot.lane.b32.xlu1 %v16636_v19, %s9703_s22  ;;  %v5673_v19 = vld [vmem:[#allocation3 + $0x40] sm:$0xff]  ;;  %v14644_v55 = vshrl.u32 %v14420_v33, 16 }
 0x464   : > { %v4715_v34 = vpop.permute.xlu0 %4714 }
 0x465   : > { %4753 = vst.msk [vmem:[#allocation3 + $0x3d8] sm:$0xff] %vm16696_vm0, %v4715_v34  ;;  %v4793_v3 = vpop.permute.xlu1 %4792  ;;  %vm16708_vm0 = vmmov %vm16700_vm1 }
 0x466   : > { %4827 = vst.msk [vmem:[#allocation3 + $0x3d8] sm:$0xff] %vm16697_vm15, %v4789_v23  ;;  %5563 = vrot.lane.b32.xlu0 %v13951_v8, %s9702_s20  ;;  %v8652_v7 = vpop.f32.mrb[68].mxu1  ;;  %v5687_v23 = vld [vmem:[#allocation3 + $0xb0] sm:$0xff]  ;;  %v16701_v8 = vld [vmem:[#allocation76_spill] sm:$0xff]  ;;  %vm16710_vm15 = vmmov %vm16704_vm2 }
 0x467   : > { %5395 = vrot.lane.b32.xlu1 %v14155_v44, %s9702_s20  ;;  %v8653_v61 = vpop.f32.mrb[69].mxu1  ;;  %v6851_v44 = vadd.f32 %v14553_v11, %v16701_v8  ;;  %v5511_v8 = vrot.slane %v14644_v55, 5 }
 0x468   : > { %v4637_v62 = vpop.permute.xlu0 %4636  ;;  %v5775_v29 = vld [vmem:[#allocation3 + $0x370] sm:$0xff]  ;;  %v8654_v14 = vadd.f32 %v8653_v61, %v8652_v7  ;;  %v8655_v56 = vpop.f32.mrb[70].mxu1 }
 0x469   : > { %4674 = vst.msk [vmem:[#allocation3 + $0x440] sm:$0xff] %vm16698_vm7, %v4637_v62  ;;  %7292 = vmatmul.mubr.bf16.gmra.mrb[112].mxu1 %v5775_v29  ;;  %v4641_v42 = vpop.permute.xlu1 %4640  ;;  %v8656_v51 = vpop.f32.mrb[71].mxu1  ;;  %v5802_v62 = vld [vmem:[#allocation3 + $0x448] sm:$0xff]  ;;  %vm16711_vm7 = vmmov %vm16704_vm2 }
 0x46a   : > { %4754 = vst.msk [vmem:[#allocation3 + $0x440] sm:$0xff] %vm16699_vm14, %v4717_v0  ;;  %7299 = vmatprep.mubr.bf16.mxu1 %v5789_v53  ;;  %7389 = vmatmul.mubr.bf16.vlgmr.msra.gmra.mrb[112].mxu0 %v5673_v19  ;;  %v16702_v0 = vld [vmem:[#allocation77_spill] sm:$0xff]  ;;  %v14628_v4 = vadd.f32 %v8654_v14, %v6851_v44  ;;  %v8657_v36 = vadd.f32 %v8656_v51, %v8655_v56  ;;  %v5516_v14 = vshrl.u32 %v14422_v60, 16  ;;  %vm16713_vm14 = vmmov %vm16693_vm4 }
 0x46b   : > { %4676 = vst.msk [vmem:[#allocation3 + $0x510] sm:$0xff] %vm16700_vm1, %v4641_v42  ;;  %7396 = vmatprep.mubr.bf16.mxu0 %v5687_v23  ;;  %9137 = vmatpush3.bf16.msra.mxu0 %v14257_v39  ;;  %v6854_v58 = vadd.f32 %v14553_v11, %v16702_v0  ;;  %v14633_v39 = vshrl.u32 %v14410_v13, 16  ;;  %v5686_v29 = vld [vmem:[#allocation3 + $0xa8] sm:$0xff]  ;;  %vm16714_vm1 = vmmov %vm16693_vm4 }
 0x46c   : > { %v4791_v2 = vpop.permute.xlu0 %4790  ;;  %5607 = vrot.lane.b32.xlu0 %v14012_v57, %s9704_s24  ;;  %5450 = vrot.lane.b32.xlu1 %v16642_v22, %s9704_s24  ;;  %v14638_v57 = vshll.u32 %v14410_v13, 16  ;;  %v14641_v22 = vshll.u32 %v14420_v33, 16  ;;  %v5600_v20 = vrot.slane %v5516_v14, 6 }
 0x46d   : > { %4828 = vst.msk [vmem:[#allocation3 + $0x440] sm:$0xff] %vm16703_vm12, %v4791_v2  ;;  %v4721_v43 = vpop.permute.xlu1 %4720  ;;  %9138 = vmatprep.subr.bf16.mxu0 %v9378_v25  ;;  %v14635_v28 = vadd.f32 %v8657_v36, %v6854_v58  ;;  %v5788_v34 = vld [vmem:[#allocation3 + $0x3d8] sm:$0xff]  ;;  %v5424_v53 = vrot.slane %v14633_v39, 4  ;;  %v5507_v61 = vrot.slane %v14633_v39, 5  ;;  %vm16719_vm12 = vmmov %vm16704_vm2 }
 0x46e   : > { %4756 = vst.msk [vmem:[#allocation3 + $0x510] sm:$0xff] %vm16704_vm2, %v4721_v43  ;;  %v5427_v19 = vrot.slane %v14638_v57, 5  ;;  %v5433_v42 = vrot.slane %v14641_v22, 5  ;;  %v5508_v23 = vrot.slane %v14638_v57, 6  ;;  %v5512_v44 = vrot.slane %v14641_v22, 6 }
 0x46f   : > { %9139 = vmatpush3.bf16.msra.mxu0 %v9378_v25  ;;  %v5437_v25 = vrot.slane %v14644_v55, 4 }
 0x470   : > { %v4719_v37 = vpop.permute.xlu0 %4718  ;;  %5527 = vrot.lane.b32.xlu0 %v16654_v41, %s9703_s22  ;;  %5364 = vrot.lane.b32.xlu1 %v14219_v50, %s9703_s22  ;;  %v5700_v41 = vld [vmem:[#allocation3 + $0x118] sm:$0xff]  ;;  %v14658_v50 = vshll.u32 %v14422_v60, 16  ;;  %v5428_v51 = vor.u32 %v5427_v19, %v5424_v53 }
 0x471   : > { %4755 = vst.msk [vmem:[#allocation3 + $0x4a8] sm:$0xff] %vm16705_vm6, %v4719_v37  ;;  %7300 = vmatmul.mubr.bf16.gmra.mrb[116].mxu1 %v5788_v34  ;;  %v4795_v7 = vpop.permute.xlu1 %4794  ;;  %v5438_v0 = vor.u32 %v5437_v25, %v5433_v42  ;;  %v5509_v34 = vor.u32 %v5508_v23, %v5507_v61  ;;  %v16709_v19 = vld [vmem:[#allocation38_spill] sm:$0xff]  ;;  %vm16721_vm6 = vmmov %vm16714_vm1 }
 0x472   : > { %4829 = vst.msk [vmem:[#allocation3 + $0x4a8] sm:$0xff] %vm16706_vm5, %v4793_v3  ;;  %7307 = vmatprep.mubr.bf16.mxu1 %v5802_v62  ;;  %7397 = vmatmul.mubr.bf16.gmra.mrb[116].mxu0 %v5686_v29  ;;  %v5519_v36 = vrot.slane %v14658_v50, 6  ;;  %v5443_v53 = vrot.slane %v14658_v50, 5  ;;  %v5815_v61 = vld [vmem:[#allocation3 + $0x4b0] sm:$0xff]  ;;  %vm16722_vm5 = vmmov %vm16708_vm0 }
 0x473   : > { %4830 = vst.msk [vmem:[#allocation3 + $0x510] sm:$0xff] %vm16693_vm4, %v4795_v7  ;;  %7404 = vmatprep.mubr.bf16.mxu0 %v5700_v41  ;;  %v8716_v56 = vpop.f32.mrb[68].mxu0  ;;  %v5699_v23 = vld [vmem:[#allocation3 + $0x110] sm:$0xff]  ;;  %vm16723_vm4 = vmmov %vm16708_vm0 }
 0x474   : > { %v4887_v3 = vpop.permute.xlu0 %4886  ;;  %5565 = vrot.lane.b32.xlu0 %v14151_v59, %s9702_s20  ;;  %5397 = vrot.lane.b32.xlu1 %v14550_v15, %s9702_s20  ;;  %v8717_v58 = vpop.f32.mrb[69].mxu0  ;;  %v5513_v59 = vor.u32 %v5512_v44, %v5511_v8  ;;  %v5518_v15 = vrot.slane %v5516_v14, 5  ;;  %v5801_v7 = vld [vmem:[#allocation3 + $0x440] sm:$0xff]  ;;  %v5429_v44 = vrot.slane %v5428_v51, 4  ;;  %v5555_v51 = vrot.slane %v14420_v33, 6 }
 0x475   : > { %4910 = vst.msk [vmem:[#allocation3 + $0x518] sm:$0xff] %vm16707_vm10, %v4887_v3  ;;  %v4643_v2 = vpop.permute.xlu1 %4642  ;;  %v8718_v43 = vadd.f32 %v8717_v58, %v8716_v56  ;;  %v8719_v37 = vpop.f32.mrb[70].mxu0  ;;  %v5439_v3 = vrot.slane %v5438_v0, 4  ;;  %v8314_v0 = vcombine.low %v14410_v13, %v14420_v33  ;;  %v16718_v14 = vld [vmem:[#allocation71_spill] sm:$0xff]  ;;  %vm16726_vm10 = vmmov %vm16704_vm2 }
 0x476   : > { %4677 = vst.msk [vmem:[#allocation3 + $0x578] sm:$0xff] %vm16708_vm0, %v4643_v2  ;;  %v8720_v29 = vpop.f32.mrb[71].mxu0  ;;  %v5510_v2 = vrot.slane %v5509_v34, 4  ;;  %v5515_v58 = vrot.slane %v5513_v59, 4 }
 0x477   : > { %v14682_v25 = vadd.f32 %v8718_v43, %v16709_v19  ;;  %v8721_v41 = vadd.f32 %v8720_v29, %v8719_v37  ;;  %v5520_v43 = vor.u32 %v5519_v36, %v5518_v15  ;;  %v5591_v37 = vrot.slane %v14633_v39, 6 }
 0x478   : > { %v4926_v62 = vpop.permute.xlu0 %4925  ;;  %5609 = vrot.lane.b32.xlu0 %v14192_v63, %s9704_s24  ;;  %5452 = vrot.lane.b32.xlu1 %v14408_v12, %s9704_s24  ;;  %v5713_v63 = vld [vmem:[#allocation3 + $0x180] sm:$0xff]  ;;  %v16712_v12 = vld [vmem:[#allocation106_spill] sm:$0xff]  ;;  %v5592_v29 = vrot.slane %v14638_v57, 7  ;;  %v5595_v36 = vrot.slane %v14644_v55, 6  ;;  %v5596_v15 = vrot.slane %v14641_v22, 7  ;;  %v5514_v39 = vsel %vm16388_vm13, %v5510_v2, %v5513_v59 }
 0x479   : > { %4949 = vst.msk [vmem:[#allocation3 + $0x518] sm:$0xff] %vm16710_vm15, %v4926_v62  ;;  %7308 = vmatmul.mubr.bf16.gmra.mrb[120].mxu1 %v5801_v7  ;;  %v4723_v8 = vpop.permute.xlu1 %4722  ;;  %v14687_v56 = vadd.f32 %v8721_v41, %v16712_v12  ;;  %v5521_v57 = vsel %vm16388_vm13, %v5515_v58, %v5520_v43  ;;  %v8319_v55 = vrot.slane %v14410_v13, 10  ;;  %v5558_v7 = vrot.slane %v14422_v60, 6  ;;  %v5814_v22 = vld [vmem:[#allocation3 + $0x4a8] sm:$0xff]  ;;  %v5712_v41 = vld [vmem:[#allocation3 + $0x178] sm:$0xff]  ;;  %vm16716_vm13 = vmmov %vm16708_vm0 }
 0x47a   : > { %7315 = vmatprep.mubr.bf16.mxu1 %v5815_v61  ;;  %7405 = vmatmul.mubr.bf16.gmra.mrb[120].mxu0 %v5699_v23  ;;  %4757 = vst.msk [vmem:[#allocation3 + $0x578] sm:$0xff] %vm16711_vm7, %v4723_v8  ;;  %v5601_v59 = vrot.slane %v14658_v50, 7  ;;  %v5593_v23 = vor.u32 %v5592_v29, %v5591_v37  ;;  %v5597_v8 = vor.u32 %v5596_v15, %v5595_v36  ;;  %vm16730_vm7 = vmmov %vm16723_vm4 }
 0x47b   : > { %7412 = vmatprep.mubr.bf16.mxu0 %v5713_v63  ;;  %v6862_v50 = vadd.f32 %v14553_v11, %v16718_v14  ;;  %v8318_v58 = vcombine.low %v5514_v39, %v5521_v57  ;;  %v5556_v37 = vsel %vm16398_vm3, %v8319_v55, %v5555_v51  ;;  %v5827_v57 = vld [vmem:[#allocation3 + $0x510] sm:$0xff]  ;;  %v5725_v55 = vld [vmem:[#allocation3 + $0x1e0] sm:$0xff] }
 0x47c   : > { %v4972_v62 = vpop.permute.xlu0 %4971  ;;  %5529 = vrot.lane.b32.xlu0 %v14575_v32, %s9703_s22  ;;  %5366 = vrot.lane.b32.xlu1 %v14455_v54, %s9703_s22  ;;  %v5434_v54 = vsel %vm16395_vm11, %v5429_v44, %v5433_v42  ;;  %v5444_v32 = vsel %vm16395_vm11, %v5439_v3, %v5443_v53  ;;  %v5557_v42 = vrot.slane %v5555_v51, 4  ;;  %vm16715_vm11 = vmmov %vm16708_vm0  ;;  %v16717_v3 = vld [vmem:[#allocation72_spill] sm:$0xff]  ;;  %v5599_v39 = vrot.slane %v5597_v8, 4 }
 0x47d   : > { %4995 = vst.msk [vmem:[#allocation3 + $0x518] sm:$0xff] %vm16713_vm14, %v4972_v62  ;;  %v4797_v34 = vpop.permute.xlu1 %4796  ;;  %v8315_v53 = vcombine.low %v5434_v54, %v5444_v32  ;;  %v6859_v63 = vadd.f32 %v14553_v11, %v16717_v3  ;;  %v5594_v32 = vrot.slane %v5593_v23, 4  ;;  %v16724_v3 = vld [vmem:[#allocation110_spill] sm:$0xff]  ;;  %vm16728_vm0 = vmmov %vm16714_vm1 }
 0x47e   : > { %4831 = vst.msk [vmem:[#allocation3 + $0x578] sm:$0xff] %vm16714_vm1, %v4797_v34  ;;  %v5559_v29 = vsel %vm16398_vm3, %v5557_v42, %v5558_v7  ;;  %v5602_v34 = vor.u32 %v5601_v59, %v5600_v20  ;;  %vm16720_vm3 = vmmov %vm16714_vm1  ;;  %v5739_v42 = vld [vmem:[#allocation3 + $0x250] sm:$0xff]  ;;  %vm16732_vm1 = vcmask 261120  }
 0x47f   : > { %v8320_v6 = vcombine.low %v5556_v37, %v5559_v29  ;;  %v8316_v29 = vrot.slane %v14410_v13, 9  ;;  %vm16729_vm15 = vmmov %vm16728_vm0  ;;  %v5765_v13 = vld [vmem:[#allocation3 + $0x320] sm:$0xff] }
 0x480   : > { %v4889_v19 = vpop.permute.xlu0 %4888  ;;  %5567 = vrot.lane.b32.xlu0 %v14588_v10, %s9702_s20  ;;  %5399 = vrot.lane.b32.xlu1 %v8314_v0, %s9702_s20  ;;  %v5726_v10 = vld [vmem:[#allocation3 + $0x1e8] sm:$0xff]  ;;  %vm16731_vm14 = vmmov %vm16723_vm4 }
 0x481   : > { %4911 = vst.msk [vmem:[#allocation3 + $0x580] sm:$0xff] %vm16715_vm11, %v4889_v19  ;;  %v8658_v16 = vpop.f32.mrb[72].mxu1  ;;  %7316 = vmatmul.mubr.bf16.gmra.mrb[124].mxu1 %v5814_v22  ;;  %v4645_v61 = vpop.permute.xlu1 %4644  ;;  %v5598_v19 = vsel %vm9973_vm9, %v5594_v32, %v5597_v8  ;;  %v5603_v22 = vsel %vm9973_vm9, %v5599_v39, %v5602_v34  ;;  %vm16725_vm9 = vmmov %vm16704_vm2 }
 0x482   : > { %v8659_v44 = vpop.f32.mrb[73].mxu1  ;;  %7413 = vmatmul.mubr.bf16.gmra.mrb[124].mxu0 %v5712_v41  ;;  %4678 = vst.msk [vmem:[#allocation3 + $0x5e0] sm:$0xff] %vm16716_vm13, %v4645_v61  ;;  %v8321_v59 = vcombine.low %v5598_v19, %v5603_v22  ;;  %vm16736_vm11 = vmmov %vm16704_vm2 }
 0x483   : > { %v8660_v12 = vadd.f32 %v8659_v44, %v8658_v16  ;;  %v8661_v2 = vpop.f32.mrb[74].mxu1  ;;  %7420 = vmatprep.mubr.bf16.mxu0 %v5726_v10  ;;  %vm16737_vm13 = vmmov %vm16728_vm0 }
 0x484   : > { %v4928_v43 = vpop.permute.xlu0 %4927  ;;  %v8662_v62 = vpop.f32.mrb[75].mxu1  ;;  %v5828_v0 = vld [vmem:[#allocation3 + $0x518] sm:$0xff]  ;;  %5611 = vrot.lane.b32.xlu0 %v14392_v47, %s9704_s24  ;;  %5454 = vrot.lane.b32.xlu1 %v8315_v53, %s9704_s24 }
 0x485   : > { %v14733_v36 = vadd.f32 %v8660_v12, %v6859_v63  ;;  %4950 = vst.msk [vmem:[#allocation3 + $0x580] sm:$0xff] %vm16719_vm12, %v4928_v43  ;;  %v8663_v15 = vadd.f32 %v8662_v62, %v8661_v2  ;;  %7323 = vmatprep.mubr.bf16.mxu1 %v5828_v0  ;;  %v4725_v54 = vpop.permute.xlu1 %4724  ;;  %v5840_v46 = vld [vmem:[#allocation3 + $0x578] sm:$0xff]  ;;  %v5479_v62 = vrot.slane %v14420_v33, 5  ;;  %vm16738_vm12 = vmmov %vm16728_vm0 }
 0x486   : > { %4758 = vst.msk [vmem:[#allocation3 + $0x5e0] sm:$0xff] %vm16704_vm2, %v4725_v54  ;;  %v5752_v2 = vld [vmem:[#allocation3 + $0x2b8] sm:$0xff] }
 0x487   : > { %v14737_v47 = vadd.f32 %v8663_v15, %v6862_v50  ;;  %v5738_v50 = vld [vmem:[#allocation3 + $0x248] sm:$0xff]  ;;  %v5481_v34 = vrot.slane %v5479_v62, 4  ;;  %v5482_v15 = vrot.slane %v14422_v60, 5  ;;  %v5480_v54 = vsel %vm16183_vm8, %v8316_v29, %v5479_v62  ;;  %v16733_v60 = vld [vmem:[#allocation135_spill] sm:$0xff] }
 0x488   : > { %v4974_v51 = vpop.permute.xlu0 %4973  ;;  %5531 = vrot.lane.b32.xlu0 %v8318_v58, %s9703_s22  ;;  %v16727_v58 = vld [vmem:[#allocation16_spill] sm:$0xff] }
 0x489   : > { %4996 = vst.msk [vmem:[#allocation3 + $0x580] sm:$0xff] %vm16720_vm3, %v4974_v51  ;;  %7324 = vmatmul.mubr.bf16.gmra.mrb[128].mxu1 %v5827_v57  ;;  %v4799_v7 = vpop.permute.xlu1 %4798  ;;  %v5483_v32 = vsel %vm16183_vm8, %v5481_v34, %v5482_v15  ;;  %v5751_v57 = vld [vmem:[#allocation3 + $0x2b0] sm:$0xff]  ;;  %vm16735_vm8 = vmmov %vm16704_vm2 }
 0x48a   : > { %7421 = vmatmul.mubr.bf16.gmra.mrb[128].mxu0 %v5725_v55  ;;  %4832 = vst.msk [vmem:[#allocation3 + $0x5e0] sm:$0xff] %vm16721_vm6, %v4799_v7  ;;  %v8317_v51 = vcombine.low %v5480_v54, %v5483_v32  ;;  %v6867_v7 = vadd.f32 %v14553_v11, %v16733_v60  ;;  %vm16739_vm2 = vmmov %vm16723_vm4  ;;  %v5777_v54 = vld [vmem:[#allocation3 + $0x380] sm:$0xff] }
 0x48b   : > { %7428 = vmatprep.mubr.bf16.mxu0 %v5739_v42  ;;  %vm16740_vm3 = vmmov %vm16739_vm2 }
 0x48c   : > { %v4891_v20 = vpop.permute.xlu0 %4890  ;;  %5569 = vrot.lane.b32.xlu0 %v8320_v6, %s9702_s20  ;;  %5506 = vst.msk [vmem:[#allocation3 + $0x670] sm:$0xff] %vm16732_vm1, %v8317_v51  ;;  %vm16741_vm6 = vmmov %vm16735_vm8  ;;  %v5676_v51 = vld [vmem:[#allocation3 + $0x58] sm:$0xff] }
 0x48d   : > { %4912 = vst.msk [vmem:[#allocation3 + $0x5e8] sm:$0xff] %vm16722_vm5, %v4891_v20  ;;  %v4647_v16 = vpop.permute.xlu1 %4646  ;;  %vm16742_vm5 = vmmov %vm16741_vm6 }
 0x48e   : > { %v8722_v53 = vpop.f32.mrb[72].mxu0  ;;  %4679 = vst.msk [vmem:[#allocation3 + $0x648] sm:$0xff] %vm16723_vm4, %v4647_v16  ;;  %vm16743_vm4 = vmmov %vm16728_vm0 }
 0x48f   : > { %v8723_v41 = vpop.f32.mrb[73].mxu0  ;;  %vm16750_vm1 = vmmov %vm16743_vm4 }
 0x490   : > { %v8724_v61 = vadd.f32 %v8723_v41, %v8722_v53  ;;  %v8725_v23 = vpop.f32.mrb[74].mxu0  ;;  %v4930_v8 = vpop.permute.xlu0 %4929  ;;  %v5841_v10 = vld [vmem:[#allocation3 + $0x580] sm:$0xff]  ;;  %5613 = vrot.lane.b32.xlu0 %v8321_v59, %s9704_s24  ;;  %v16734_v53 = vld [vmem:[#allocation69_spill] sm:$0xff] }
 0x491   : > { %v8726_v44 = vpop.f32.mrb[75].mxu0  ;;  %4951 = vst.msk [vmem:[#allocation3 + $0x5e8] sm:$0xff] %vm16725_vm9, %v4930_v8  ;;  %7331 = vmatprep.mubr.bf16.mxu1 %v5841_v10  ;;  %v4727_v12 = vpop.permute.xlu1 %4726  ;;  %v5853_v22 = vld [vmem:[#allocation3 + $0x5e0] sm:$0xff]  ;;  %v6870_v16 = vadd.f32 %v14553_v11, %v16734_v53  ;;  %vm16744_vm9 = vmmov %vm16728_vm0  ;;  %v5804_v53 = vld [vmem:[#allocation3 + $0x458] sm:$0xff] }
 0x492   : > { %v14751_v63 = vadd.f32 %v8724_v61, %v16724_v3  ;;  %v8727_v14 = vadd.f32 %v8726_v44, %v8725_v23  ;;  %7332 = vmatmul.mubr.bf16.gmra.mrb[132].mxu1 %v5840_v46  ;;  %7429 = vmatmul.mubr.bf16.gmra.mrb[132].mxu0 %v5738_v50  ;;  %4759 = vst.msk [vmem:[#allocation3 + $0x648] sm:$0xff] %vm16726_vm10, %v4727_v12  ;;  %v5764_v44 = vld [vmem:[#allocation3 + $0x318] sm:$0xff]  ;;  %v5778_v3 = vld [vmem:[#allocation3 + $0x388] sm:$0xff]  ;;  %vm16745_vm10 = vmmov %vm16739_vm2 }
 0x493   : > { %7436 = vmatprep.mubr.bf16.mxu0 %v5752_v2 }
 0x494   : > { %v14756_v43 = vadd.f32 %v8727_v14, %v16727_v58  ;;  %v4976_v0 = vpop.permute.xlu0 %4975 }
 0x495   : > { %4997 = vst.msk [vmem:[#allocation3 + $0x5e8] sm:$0xff] %vm16728_vm0, %v4976_v0  ;;  %v4801_v37 = vpop.permute.xlu1 %4800  ;;  %vm16746_vm0 = vmmov %vm16739_vm2 }
 0x496   : > { %4833 = vst.msk [vmem:[#allocation3 + $0x648] sm:$0xff] %vm16729_vm15, %v4801_v37  ;;  %vm16747_vm15 = vmmov %vm16742_vm5 }
 0x498   : > { %v4893_v39 = vpop.permute.xlu0 %4892 }
 0x499   : > { %4913 = vst.msk [vmem:[#allocation3 + $0x650] sm:$0xff] %vm16730_vm7, %v4893_v39  ;;  %v5046_v6 = vpop.permute.xlu1 %5045  ;;  %v5791_v39 = vld [vmem:[#allocation3 + $0x3f0] sm:$0xff]  ;;  %vm16748_vm7 = vmmov %vm16742_vm5 }
 0x49a   : > { %7437 = vmatmul.mubr.bf16.gmra.mrb[136].mxu0 %v5751_v57  ;;  %5069 = vst.msk [vmem:[#allocation3 + $0x520] sm:$0xff] %vm16731_vm14, %v5046_v6  ;;  %vm16749_vm14 = vmmov %vm16743_vm4 }
 0x49b   : > { %v8664_v33 = vpop.f32.mrb[76].mxu1  ;;  %7444 = vmatprep.mubr.bf16.mxu0 %v5765_v13 }
 0x49c   : > { %v8665_v55 = vpop.f32.mrb[77].mxu1  ;;  %v4932_v42 = vpop.permute.xlu0 %4931  ;;  %v5854_v59 = vld [vmem:[#allocation3 + $0x5e8] sm:$0xff] }
 0x49d   : > { %v8666_v19 = vadd.f32 %v8665_v55, %v8664_v33  ;;  %v8667_v18 = vpop.f32.mrb[78].mxu1  ;;  %4952 = vst.msk [vmem:[#allocation3 + $0x650] sm:$0xff] %vm16735_vm8, %v4932_v42  ;;  %7339 = vmatprep.mubr.bf16.mxu1 %v5854_v59  ;;  %v5084_v23 = vpop.permute.xlu1 %5083  ;;  %v5866_v62 = vld [vmem:[#allocation3 + $0x648] sm:$0xff]  ;;  %v5675_v42 = vld [vmem:[#allocation3 + $0x50] sm:$0xff]  ;;  %vm16751_vm8 = vmmov %vm16746_vm0 }
 0x49e   : > { %v8668_v20 = vpop.f32.mrb[79].mxu1  ;;  %7340 = vmatmul.mubr.bf16.gmra.mrb[136].mxu1 %v5853_v22  ;;  %5107 = vst.msk [vmem:[#allocation3 + $0x520] sm:$0xff] %vm16736_vm11, %v5084_v23  ;;  %vm16752_vm11 = vmmov %vm16746_vm0 }
 0x49f   : > { %v14774_v41 = vadd.f32 %v8666_v19, %v6867_v7  ;;  %v8669_v61 = vadd.f32 %v8668_v20, %v8667_v18 }
 0x4a0   : > { %v4978_v8 = vpop.permute.xlu0 %4977 }
 0x4a1   : > { %v14778_v46 = vadd.f32 %v8669_v61, %v6870_v16  ;;  %4998 = vst.msk [vmem:[#allocation3 + $0x650] sm:$0xff] %vm16737_vm13, %v4978_v8  ;;  %v5117_v10 = vpop.permute.xlu1 %5116  ;;  %v5689_v16 = vld [vmem:[#allocation3 + $0xc0] sm:$0xff]  ;;  %vm16754_vm13 = vmmov %vm16742_vm5 }
 0x4a2   : > { %7445 = vmatmul.mubr.bf16.gmra.mrb[140].mxu0 %v5764_v44  ;;  %5140 = vst.msk [vmem:[#allocation3 + $0x520] sm:$0xff] %vm16738_vm12, %v5117_v10  ;;  %v5803_v10 = vld [vmem:[#allocation3 + $0x450] sm:$0xff]  ;;  %vm16755_vm12 = vmmov %vm16742_vm5 }
 0x4a3   : > { %7452 = vmatprep.mubr.bf16.mxu0 %v5778_v3  ;;  %v8728_v14 = vpop.f32.mrb[76].mxu0 }
 0x4a4   : > { %v5203_v11 = vpop.permute.xlu0 %5202  ;;  %v8729_v12 = vpop.f32.mrb[77].mxu0 }
 0x4a5   : > { %5226 = vst.msk [vmem:[#allocation3 + $0x528] sm:$0xff] %vm16739_vm2, %v5203_v11  ;;  %v5048_v50 = vpop.permute.xlu1 %5047  ;;  %v8730_v2 = vadd.f32 %v8729_v12, %v8728_v14  ;;  %v8731_v58 = vpop.f32.mrb[78].mxu0  ;;  %v5702_v12 = vld [vmem:[#allocation3 + $0x128] sm:$0xff]  ;;  %vm16757_vm2 = vmmov %vm16750_vm1 }
 0x4a6   : > { %5070 = vst.msk [vmem:[#allocation3 + $0x588] sm:$0xff] %vm16740_vm3, %v5048_v50  ;;  %v8732_v0 = vpop.f32.mrb[79].mxu0  ;;  %v5817_v50 = vld [vmem:[#allocation3 + $0x4c0] sm:$0xff]  ;;  %vm16758_vm3 = vmmov %vm16750_vm1 }
 0x4a7   : > { %v14785_v34 = vadd.f32 %v8730_v2, %v14198_v1  ;;  %v8733_v15 = vadd.f32 %v8732_v0, %v8731_v58 }
 0x4a8   : > { %v5867_v37 = vld [vmem:[#allocation3 + $0x650] sm:$0xff]  ;;  %v5249_v29 = vpop.permute.xlu0 %5248 }
 0x4a9   : > { %7347 = vmatprep.mubr.bf16.mxu1 %v5867_v37  ;;  %5272 = vst.msk [vmem:[#allocation3 + $0x528] sm:$0xff] %vm16741_vm6, %v5249_v29  ;;  %v5086_v32 = vpop.permute.xlu1 %5085  ;;  %v14790_v33 = vadd.f32 %v8733_v15, %v14212_v35  ;;  %v5790_v35 = vld [vmem:[#allocation3 + $0x3e8] sm:$0xff]  ;;  %vm16759_vm6 = vmmov %vm16746_vm0 }
 0x4aa   : > { %7348 = vmatmul.mubr.bf16.gmra.mrb[140].mxu1 %v5866_v62  ;;  %7453 = vmatmul.mubr.bf16.gmra.mrb[144].mxu0 %v5777_v54  ;;  %5108 = vst.msk [vmem:[#allocation3 + $0x588] sm:$0xff] %vm16742_vm5, %v5086_v32  ;;  %v8798_v57 = vpop.f32.mrb[80].mxu1  ;;  %vm16760_vm5 = vmmov %vm16746_vm0 }
 0x4ab   : > { %7460 = vmatprep.mubr.bf16.mxu0 %v5791_v39  ;;  %7549 = vmatprep.mubr.bf16.mxu1 %v5676_v51  ;;  %v8799_v6 = vpop.f32.mrb[81].mxu1 }
 0x4ac   : > { %v5287_v1 = vpop.permute.xlu0 %5286  ;;  %v8800_v13 = vadd.f32 %v8799_v6, %v8798_v57  ;;  %v8801_v60 = vpop.f32.mrb[82].mxu1  ;;  %v16753_v6 = vld [vmem:[#allocation20_spill] sm:$0xff] }
 0x4ad   : > { %5310 = vst.msk [vmem:[#allocation3 + $0x528] sm:$0xff] %vm16743_vm4, %v5287_v1  ;;  %v5119_v55 = vpop.permute.xlu1 %5118  ;;  %v8802_v7 = vpop.f32.mrb[83].mxu1  ;;  %vm16762_vm4 = vmmov %vm16748_vm7 }
 0x4ae   : > { %5141 = vst.msk [vmem:[#allocation3 + $0x588] sm:$0xff] %vm16744_vm9, %v5119_v55  ;;  %v14795_v19 = vadd.f32 %v8800_v13, %v14282_v38  ;;  %v8803_v18 = vadd.f32 %v8802_v7, %v8801_v60  ;;  %v5816_v13 = vld [vmem:[#allocation3 + $0x4b8] sm:$0xff]  ;;  %v5701_v60 = vld [vmem:[#allocation3 + $0x120] sm:$0xff]  ;;  %vm16763_vm9 = vmmov %vm16762_vm4 }
 0x4b0   : > { %v5205_v22 = vpop.permute.xlu0 %5204  ;;  %v14799_v59 = vadd.f32 %v8803_v18, %v14291_v17  ;;  %v5688_v17 = vld [vmem:[#allocation3 + $0xb8] sm:$0xff]  ;;  %v16756_v18 = vld [vmem:[#allocation40_spill] sm:$0xff] }
 0x4b1   : > { %5227 = vst.msk [vmem:[#allocation3 + $0x590] sm:$0xff] %vm16745_vm10, %v5205_v22  ;;  %v5050_v20 = vpop.permute.xlu1 %5049  ;;  %vm16765_vm10 = vmmov %vm16750_vm1 }
 0x4b2   : > { %7461 = vmatmul.mubr.bf16.gmra.mrb[148].mxu0 %v5790_v35  ;;  %7550 = vmatmul.mubr.bf16.vlgmr.msra.gmra.mrb[144].mxu1 %v5675_v42  ;;  %5071 = vst.msk [vmem:[#allocation3 + $0x5f0] sm:$0xff] %vm16746_vm0, %v5050_v20  ;;  %v5829_v20 = vld [vmem:[#allocation3 + $0x520] sm:$0xff]  ;;  %vm16766_vm0 = vmmov %vm16750_vm1 }
 0x4b3   : > { %7468 = vmatprep.mubr.bf16.mxu0 %v5804_v53  ;;  %7557 = vmatprep.mubr.bf16.mxu1 %v5689_v16 }
 0x4b4   : > { %v5251_v38 = vpop.permute.xlu0 %5250  ;;  %v5830_v1 = vld [vmem:[#allocation3 + $0x528] sm:$0xff] }
 0x4b5   : > { %5273 = vst.msk [vmem:[#allocation3 + $0x590] sm:$0xff] %vm16747_vm15, %v5251_v38  ;;  %v5088_v61 = vpop.permute.xlu1 %5087  ;;  %vm16767_vm15 = vmmov %vm16760_vm5 }
 0x4b6   : > { %5109 = vst.msk [vmem:[#allocation3 + $0x5f0] sm:$0xff] %vm16748_vm7, %v5088_v61  ;;  %v5714_v61 = vld [vmem:[#allocation3 + $0x188] sm:$0xff]  ;;  %vm16768_vm7 = vmmov %vm16760_vm5 }
 0x4b7   : > { %v8734_v23 = vpop.f32.mrb[80].mxu0 }
 0x4b8   : > { %v5289_v8 = vpop.permute.xlu0 %5288  ;;  %v8735_v44 = vpop.f32.mrb[81].mxu0 }
 0x4b9   : > { %5311 = vst.msk [vmem:[#allocation3 + $0x590] sm:$0xff] %vm16749_vm14, %v5289_v8  ;;  %v5121_v3 = vpop.permute.xlu1 %5120  ;;  %v8736_v11 = vadd.f32 %v8735_v44, %v8734_v23  ;;  %v8737_v14 = vpop.f32.mrb[82].mxu0  ;;  %v5728_v44 = vld [vmem:[#allocation3 + $0x1f8] sm:$0xff]  ;;  %vm16769_vm14 = vmmov %vm16762_vm4 }
 0x4ba   : > { %7469 = vmatmul.mubr.bf16.gmra.mrb[152].mxu0 %v5803_v10  ;;  %7558 = vmatmul.mubr.bf16.gmra.mrb[148].mxu1 %v5688_v17  ;;  %5142 = vst.msk [vmem:[#allocation3 + $0x5f0] sm:$0xff] %vm16750_vm1, %v5121_v3  ;;  %v8738_v2 = vpop.f32.mrb[83].mxu0  ;;  %vm16770_vm1 = vmmov %vm16762_vm4 }
 0x4bb   : > { %7476 = vmatprep.mubr.bf16.mxu0 %v5817_v50  ;;  %7565 = vmatprep.mubr.bf16.mxu1 %v5702_v12  ;;  %v14807_v58 = vadd.f32 %v8736_v11, %v14254_v49  ;;  %v8739_v62 = vadd.f32 %v8738_v2, %v8737_v14  ;;  %v16761_v14 = vld [vmem:[#allocation14_spill] sm:$0xff] }
 0x4bc   : > { %v5207_v0 = vpop.permute.xlu0 %5206 }
 0x4bd   : > { %5228 = vst.msk [vmem:[#allocation3 + $0x5f8] sm:$0xff] %vm16751_vm8, %v5207_v0  ;;  %v5052_v29 = vpop.permute.xlu1 %5051  ;;  %v14811_v15 = vadd.f32 %v8739_v62, %v14262_v30  ;;  %v5715_v30 = vld [vmem:[#allocation3 + $0x190] sm:$0xff]  ;;  %vm16771_vm8 = vmmov %vm16766_vm0 }
 0x4be   : > { %v8804_v37 = vpop.f32.mrb[84].mxu1  ;;  %5072 = vst.msk [vmem:[#allocation3 + $0x658] sm:$0xff] %vm16752_vm11, %v5052_v29  ;;  %v16764_v62 = vld [vmem:[#allocation18_spill] sm:$0xff]  ;;  %vm16773_vm11 = vmmov %vm16766_vm0 }
 0x4bf   : > { %v8805_v54 = vpop.f32.mrb[85].mxu1 }
 0x4c0   : > { %v8806_v32 = vadd.f32 %v8805_v54, %v8804_v37  ;;  %v8807_v39 = vpop.f32.mrb[86].mxu1  ;;  %v5253_v57 = vpop.permute.xlu0 %5252  ;;  %v5843_v16 = vld [vmem:[#allocation3 + $0x590] sm:$0xff]  ;;  %v5842_v37 = vld [vmem:[#allocation3 + $0x588] sm:$0xff] }
 0x4c1   : > { %v8808_v51 = vpop.f32.mrb[87].mxu1  ;;  %5274 = vst.msk [vmem:[#allocation3 + $0x5f8] sm:$0xff] %vm16754_vm13, %v5253_v57  ;;  %v5090_v7 = vpop.permute.xlu1 %5089  ;;  %vm16774_vm13 = vcmask 261120  }
 0x4c2   : > { %v14815_v49 = vadd.f32 %v8806_v32, %v16753_v6  ;;  %v8809_v55 = vadd.f32 %v8808_v51, %v8807_v39  ;;  %7477 = vmatmul.mubr.bf16.gmra.mrb[156].mxu0 %v5816_v13  ;;  %7566 = vmatmul.mubr.bf16.gmra.mrb[152].mxu1 %v5701_v60  ;;  %5110 = vst.msk [vmem:[#allocation3 + $0x658] sm:$0xff] %vm16755_vm12, %v5090_v7  ;;  %v5727_v51 = vld [vmem:[#allocation3 + $0x1f0] sm:$0xff]  ;;  %vm16775_vm12 = vmmov %vm16760_vm5 }
 0x4c3   : > { %7573 = vmatprep.mubr.bf16.mxu1 %v5715_v30  ;;  %7484 = vmatprep.mubr.bf16.mxu0 %v5830_v1 }
 0x4c4   : > { %v14820_v22 = vadd.f32 %v8809_v55, %v16756_v18  ;;  %v5291_v35 = vpop.permute.xlu0 %5290  ;;  %v5741_v55 = vld [vmem:[#allocation3 + $0x260] sm:$0xff] }
 0x4c5   : > { %5312 = vst.msk [vmem:[#allocation3 + $0x5f8] sm:$0xff] %vm16757_vm2, %v5291_v35  ;;  %v5123_v42 = vpop.permute.xlu1 %5122  ;;  %vm16776_vm2 = vmmov %vm16760_vm5 }
 0x4c6   : > { %5143 = vst.msk [vmem:[#allocation3 + $0x658] sm:$0xff] %vm16758_vm3, %v5123_v42  ;;  %v5855_v42 = vld [vmem:[#allocation3 + $0x5f0] sm:$0xff]  ;;  %vm16777_vm3 = vmmov %vm16770_vm1 }
 0x4c7   : > { %v8740_v38 = vpop.f32.mrb[84].mxu0 }
 0x4c8   : > { %v5209_v53 = vpop.permute.xlu0 %5208  ;;  %v8741_v8 = vpop.f32.mrb[85].mxu0 }
 0x4c9   : > { %5229 = vst.msk [vmem:[#allocation3 + $0x660] sm:$0xff] %vm16759_vm6, %v5209_v53  ;;  %v5361_v23 = vpop.permute.xlu1 %5360  ;;  %v8742_v10 = vadd.f32 %v8741_v8, %v8740_v38  ;;  %v8743_v17 = vpop.f32.mrb[86].mxu0  ;;  %vm16778_vm6 = vmmov %vm16770_vm1 }
 0x4ca   : > { %7485 = vmatmul.mubr.bf16.gmra.mrb[160].mxu0 %v5829_v20  ;;  %7574 = vmatmul.mubr.bf16.gmra.mrb[156].mxu1 %v5714_v61  ;;  %5384 = vst.msk [vmem:[#allocation3 + $0x530] sm:$0xff] %vm16760_vm5, %v5361_v23  ;;  %v8744_v3 = vpop.f32.mrb[87].mxu0  ;;  %vm16779_vm5 = vmmov %vm16774_vm13 }
 0x4cb   : > { %7581 = vmatprep.mubr.bf16.mxu1 %v5728_v44  ;;  %7492 = vmatprep.mubr.bf16.mxu0 %v5843_v16  ;;  %v14827_v50 = vadd.f32 %v8742_v10, %v16761_v14  ;;  %v8745_v12 = vadd.f32 %v8744_v3, %v8743_v17  ;;  %v5740_v16 = vld [vmem:[#allocation3 + $0x258] sm:$0xff] }
 0x4cc   : > { %v5255_v11 = vpop.permute.xlu0 %5254  ;;  %v5856_v32 = vld [vmem:[#allocation3 + $0x5f8] sm:$0xff] }
 0x4cd   : > { %5275 = vst.msk [vmem:[#allocation3 + $0x660] sm:$0xff] %vm16762_vm4, %v5255_v11  ;;  %v5394_v2 = vpop.permute.xlu1 %5393  ;;  %v14832_v0 = vadd.f32 %v8745_v12, %v16764_v62  ;;  %v5868_v17 = vld [vmem:[#allocation3 + $0x658] sm:$0xff]  ;;  %v16772_v11 = vld [vmem:[#allocation24_spill] sm:$0xff]  ;;  %vm16780_vm4 = vmmov %vm16779_vm5 }
 0x4ce   : > { %5417 = vst.msk [vmem:[#allocation3 + $0x530] sm:$0xff] %vm16763_vm9, %v5394_v2  ;;  %v8810_v29 = vpop.f32.mrb[88].mxu1  ;;  %v5677_v2 = vld [vmem:[#allocation3 + $0x60] sm:$0xff]  ;;  %vm16781_vm9 = vmmov %vm16766_vm0 }
 0x4cf   : > { %v8811_v39 = vpop.f32.mrb[89].mxu1 }
 0x4d0   : > { %v5293_v54 = vpop.permute.xlu0 %5292  ;;  %v8812_v1 = vadd.f32 %v8811_v39, %v8810_v29  ;;  %v8813_v6 = vpop.f32.mrb[90].mxu1 }
 0x4d1   : > { %5313 = vst.msk [vmem:[#allocation3 + $0x660] sm:$0xff] %vm16765_vm10, %v5293_v54  ;;  %v5449_v57 = vpop.permute.xlu1 %5448  ;;  %v8814_v13 = vpop.f32.mrb[91].mxu1  ;;  %vm16782_vm10 = vmmov %vm16766_vm0 }
 0x4d2   : > { %7493 = vmatmul.mubr.bf16.gmra.mrb[164].mxu0 %v5842_v37  ;;  %7582 = vmatmul.mubr.bf16.gmra.mrb[160].mxu1 %v5727_v51  ;;  %5472 = vst.msk [vmem:[#allocation3 + $0x530] sm:$0xff] %vm16766_vm0, %v5449_v57  ;;  %v14837_v60 = vadd.f32 %v8812_v1, %v14466_v26  ;;  %v8815_v7 = vadd.f32 %v8814_v13, %v8813_v6  ;;  %v5754_v26 = vld [vmem:[#allocation3 + $0x2c8] sm:$0xff]  ;;  %v5753_v37 = vld [vmem:[#allocation3 + $0x2c0] sm:$0xff]  ;;  %vm16783_vm0 = vmmov %vm16776_vm2 }
 0x4d3   : > { %7589 = vmatprep.mubr.bf16.mxu1 %v5741_v55  ;;  %7500 = vmatprep.mubr.bf16.mxu0 %v5856_v32  ;;  %v5767_v32 = vld [vmem:[#allocation3 + $0x330] sm:$0xff] }
 0x4d4   : > { %v5526_v30 = vpop.permute.xlu0 %5525  ;;  %v14841_v35 = vadd.f32 %v8815_v7, %v14473_v48 }
 0x4d5   : > { %5549 = vst.msk [vmem:[#allocation3 + $0x538] sm:$0xff] %vm16767_vm15, %v5526_v30  ;;  %v5363_v18 = vpop.permute.xlu1 %5362  ;;  %v5690_v30 = vld [vmem:[#allocation3 + $0xc8] sm:$0xff]  ;;  %vm16784_vm15 = vmmov %vm16783_vm0 }
 0x4d6   : > { %5385 = vst.msk [vmem:[#allocation3 + $0x598] sm:$0xff] %vm16768_vm7, %v5363_v18  ;;  %vm16785_vm7 = vmmov %vm16780_vm4 }
 0x4d8   : > { %v5869_v20 = vld [vmem:[#allocation3 + $0x660] sm:$0xff]  ;;  %v5564_v53 = vpop.permute.xlu0 %5563 }
 0x4d9   : > { %5587 = vst.msk [vmem:[#allocation3 + $0x538] sm:$0xff] %vm16769_vm14, %v5564_v53  ;;  %v5396_v38 = vpop.permute.xlu1 %5395  ;;  %v5780_v53 = vld [vmem:[#allocation3 + $0x398] sm:$0xff]  ;;  %vm16786_vm14 = vmmov %vm16780_vm4 }
 0x4da   : > { %7501 = vmatmul.mubr.bf16.gmra.mrb[168].mxu0 %v5855_v42  ;;  %7590 = vmatmul.mubr.bf16.gmra.mrb[164].mxu1 %v5740_v16  ;;  %5418 = vst.msk [vmem:[#allocation3 + $0x598] sm:$0xff] %vm16770_vm1, %v5396_v38  ;;  %v8746_v61 = vpop.f32.mrb[88].mxu0  ;;  %v5703_v42 = vld [vmem:[#allocation3 + $0x130] sm:$0xff] }
 0x4db   : > { %7597 = vmatprep.mubr.bf16.mxu1 %v5754_v26  ;;  %7508 = vmatprep.mubr.bf16.mxu0 %v5869_v20  ;;  %v8747_v23 = vpop.f32.mrb[89].mxu0  ;;  %v5766_v20 = vld [vmem:[#allocation3 + $0x328] sm:$0xff] }
 0x4dc   : > { %v8748_v48 = vadd.f32 %v8747_v23, %v8746_v61  ;;  %v8749_v8 = vpop.f32.mrb[90].mxu0 }
 0x4dd   : > { %v8750_v10 = vpop.f32.mrb[91].mxu0 }
 0x4de   : > { %v5608_v44 = vpop.permute.xlu0 %5607  ;;  %v5451_v3 = vpop.permute.xlu1 %5450  ;;  %v14848_v14 = vadd.f32 %v8748_v48, %v16772_v11  ;;  %v8751_v12 = vadd.f32 %v8750_v10, %v8749_v8  ;;  %v5716_v48 = vld [vmem:[#allocation3 + $0x198] sm:$0xff]  ;;  %v5729_v10 = vld [vmem:[#allocation3 + $0x200] sm:$0xff]  ;;  %v5779_v11 = vld [vmem:[#allocation3 + $0x390] sm:$0xff] }
 0x4df   : > { %5631 = vst.msk [vmem:[#allocation3 + $0x538] sm:$0xff] %vm16771_vm8, %v5608_v44  ;;  %v8816_v62 = vpop.f32.mrb[92].mxu1  ;;  %vm16787_vm8 = vmmov %vm16770_vm1 }
 0x4e0   : > { %5473 = vst.msk [vmem:[#allocation3 + $0x598] sm:$0xff] %vm16773_vm11, %v5451_v3  ;;  %v14852_v29 = vadd.f32 %v8751_v12, %v14433_v21  ;;  %v8817_v54 = vpop.f32.mrb[93].mxu1  ;;  %v5793_v12 = vld [vmem:[#allocation3 + $0x400] sm:$0xff]  ;;  %vm16788_vm11 = vmmov %vm16781_vm9 }
 0x4e1   : > { %v8818_v51 = vadd.f32 %v8817_v54, %v8816_v62  ;;  %v8819_v57 = vpop.f32.mrb[94].mxu1 }
 0x4e2   : > { %7509 = vmatmul.mubr.bf16.gmra.mrb[172].mxu0 %v5868_v17  ;;  %7598 = vmatmul.mubr.bf16.gmra.mrb[168].mxu1 %v5753_v37  ;;  %v5528_v39 = vpop.permute.xlu0 %5527  ;;  %v5365_v1 = vpop.permute.xlu1 %5364 }
 0x4e3   : > { %7605 = vmatprep.mubr.bf16.mxu1 %v5767_v32  ;;  %9140 = vmatprep.mubr.msk.bf16.mxu0 %vm16774_vm13, %v5677_v2  ;;  %5550 = vst.msk [vmem:[#allocation3 + $0x5a0] sm:$0xff] %vm16775_vm12, %v5528_v39  ;;  %v8820_v6 = vpop.f32.mrb[95].mxu1  ;;  %v14858_v55 = vadd.f32 %v8818_v51, %v14523_v5  ;;  %vm16789_vm13 = vmmov %vm16781_vm9 }
 0x4e4   : > { %5386 = vst.msk [vmem:[#allocation3 + $0x600] sm:$0xff] %vm16776_vm2, %v5365_v1  ;;  %v8821_v21 = vadd.f32 %v8820_v6, %v8819_v57  ;;  %v5742_v1 = vld [vmem:[#allocation3 + $0x268] sm:$0xff]  ;;  %vm16790_vm12 = vmmov %vm16780_vm4 }
 0x4e5   : > { %vm16791_vm2 = vmmov %vm16780_vm4 }
 0x4e6   : > { %v5566_v13 = vpop.permute.xlu0 %5565  ;;  %v14861_v7 = vadd.f32 %v8821_v21, %v14532_v31  ;;  %v5398_v18 = vpop.permute.xlu1 %5397 }
 0x4e7   : > { %5588 = vst.msk [vmem:[#allocation3 + $0x5a0] sm:$0xff] %vm16777_vm3, %v5566_v13  ;;  %v5755_v13 = vld [vmem:[#allocation3 + $0x2d0] sm:$0xff]  ;;  %vm16792_vm3 = vmmov %vm16783_vm0 }
 0x4e8   : > { %5419 = vst.msk [vmem:[#allocation3 + $0x600] sm:$0xff] %vm16778_vm6, %v5398_v18  ;;  %vm16793_vm6 = vmmov %vm16770_vm1 }
 0x4ea   : > { %7606 = vmatmul.mubr.bf16.gmra.mrb[172].mxu1 %v5766_v20  ;;  %9141 = vmatmul.mubr.msk.bf16.vlgmr.msra.gmra.mrb[176].mxu0 %vm16779_vm5, %v5690_v30  ;;  %v5610_v16 = vpop.permute.xlu0 %5609  ;;  %v5453_v5 = vpop.permute.xlu1 %5452  ;;  %v5792_v30 = vld [vmem:[#allocation3 + $0x3f8] sm:$0xff]  ;;  %vm16794_vm5 = vmmov %vm16791_vm2 }
 0x4eb   : > { %7613 = vmatprep.mubr.bf16.mxu1 %v5780_v53  ;;  %9144 = vmatprep.mubr.msk.bf16.mxu0 %vm16780_vm4, %v5703_v42  ;;  %5632 = vst.msk [vmem:[#allocation3 + $0x5a0] sm:$0xff] %vm16781_vm9, %v5610_v16  ;;  %v8752_v31 = vpop.f32.mrb[92].mxu0  ;;  %v5806_v42 = vld [vmem:[#allocation3 + $0x468] sm:$0xff]  ;;  %v5768_v53 = vld [vmem:[#allocation3 + $0x338] sm:$0xff]  ;;  %vm16795_vm4 = vmmov %vm16791_vm2 }
 0x4ec   : > { %5474 = vst.msk [vmem:[#allocation3 + $0x600] sm:$0xff] %vm16782_vm10, %v5453_v5  ;;  %v8753_v38 = vpop.f32.mrb[93].mxu0  ;;  %v5781_v5 = vld [vmem:[#allocation3 + $0x3a0] sm:$0xff]  ;;  %vm16796_vm10 = vmmov %vm16791_vm2 }
 0x4ed   : > { %v8754_v61 = vadd.f32 %v8753_v38, %v8752_v31  ;;  %v8755_v23 = vpop.f32.mrb[94].mxu0  ;;  %v5805_v38 = vld [vmem:[#allocation3 + $0x460] sm:$0xff] }
 0x4ee   : > { %v5530_v26 = vpop.permute.xlu0 %5529  ;;  %v5367_v8 = vpop.permute.xlu1 %5366 }
 0x4ef   : > { %5551 = vst.msk [vmem:[#allocation3 + $0x608] sm:$0xff] %vm16783_vm0, %v5530_v26  ;;  %v8756_v44 = vpop.f32.mrb[95].mxu0  ;;  %v14872_v17 = vadd.f32 %v8754_v61, %v14494_v52  ;;  %v5819_v61 = vld [vmem:[#allocation3 + $0x4d0] sm:$0xff]  ;;  %vm16797_vm0 = vmmov %vm16791_vm2 }
 0x4f0   : > { %5387 = vst.msk [vmem:[#allocation3 + $0x668] sm:$0xff] %vm16784_vm15, %v5367_v8  ;;  %v8757_v3 = vadd.f32 %v8756_v44, %v8755_v23  ;;  %vm16798_vm15 = vmmov %vm16797_vm0 }
 0x4f2   : > { %7614 = vmatmul.mubr.bf16.gmra.mrb[176].mxu1 %v5779_v11  ;;  %9145 = vmatmul.mubr.msk.bf16.gmra.mrb[180].mxu0 %vm16785_vm7, %v5716_v48  ;;  %v5568_v2 = vpop.permute.xlu0 %5567  ;;  %v14876_v62 = vadd.f32 %v8757_v3, %v14500_v24  ;;  %v5400_v37 = vpop.permute.xlu1 %5399  ;;  %vm16799_vm7 = vmmov %vm16797_vm0 }
 0x4f3   : > { %7621 = vmatprep.mubr.bf16.mxu1 %v5793_v12  ;;  %9148 = vmatprep.mubr.msk.bf16.mxu0 %vm16786_vm14, %v5729_v10  ;;  %5589 = vst.msk [vmem:[#allocation3 + $0x608] sm:$0xff] %vm16770_vm1, %v5568_v2  ;;  %v8822_v54 = vpop.f32.mrb[96].mxu1  ;;  %vm16800_vm14 = vmmov %vm16797_vm0 }
 0x4f4   : > { %5420 = vst.msk [vmem:[#allocation3 + $0x668] sm:$0xff] %vm16787_vm8, %v5400_v37  ;;  %v8823_v52 = vpop.f32.mrb[97].mxu1  ;;  %v5794_v37 = vld [vmem:[#allocation3 + $0x408] sm:$0xff]  ;;  %vm16801_vm1 = vmmov %vm16797_vm0 }
 0x4f5   : > { %v8824_v32 = vadd.f32 %v8823_v52, %v8822_v54  ;;  %v8825_v39 = vpop.f32.mrb[98].mxu1  ;;  %v5807_v52 = vld [vmem:[#allocation3 + $0x470] sm:$0xff]  ;;  %vm16802_vm8 = vmmov %vm16797_vm0 }
 0x4f6   : > { %v5612_v51 = vpop.permute.xlu0 %5611  ;;  %v8826_v57 = vpop.f32.mrb[99].mxu1 }
 0x4f7   : > { %5633 = vst.msk [vmem:[#allocation3 + $0x608] sm:$0xff] %vm16788_vm11, %v5612_v51  ;;  %v5455_v6 = vpop.permute.xlu1 %5454  ;;  %v14883_v24 = vadd.f32 %v8824_v32, %v14599_v40  ;;  %v8827_v21 = vadd.f32 %v8826_v57, %v8825_v39  ;;  %v5818_v51 = vld [vmem:[#allocation3 + $0x4c8] sm:$0xff]  ;;  %vm7871_vm11 = vcmask 23552  }
 0x4f8   : > { %5475 = vst.msk [vmem:[#allocation3 + $0x668] sm:$0xff] %vm16789_vm13, %v5455_v6 }
 0x4f9   : > { %v14887_v18 = vadd.f32 %v8827_v21, %v14606_v45  ;;  %v5831_v21 = vld [vmem:[#allocation3 + $0x530] sm:$0xff] }
 0x4fa   : > { %7622 = vmatmul.mubr.bf16.gmra.mrb[180].mxu1 %v5792_v30  ;;  %9149 = vmatmul.mubr.msk.bf16.gmra.mrb[184].mxu0 %vm16790_vm12, %v5742_v1  ;;  %v5532_v20 = vpop.permute.xlu0 %5531  ;;  %v5833_v1 = vld [vmem:[#allocation3 + $0x540] sm:$0xff] }
 0x4fb   : > { %7629 = vmatprep.mubr.bf16.mxu1 %v5806_v42  ;;  %9152 = vmatprep.mubr.msk.bf16.mxu0 %vm16791_vm2, %v5755_v13  ;;  %5552 = vst.msk [vmem:[#allocation3 + $0x670] sm:$0xff] %vm16792_vm3, %v5532_v20 }
 0x4fe   : > { %v5570_v40 = vpop.permute.xlu0 %5569 }
 0x4ff   : > { %5590 = vst.msk [vmem:[#allocation3 + $0x670] sm:$0xff] %vm16793_vm6, %v5570_v40 }
 0x500   : > { %v8758_v16 = vpop.f32.mrb[96].mxu0 }
 0x501   : > { %v8759_v31 = vpop.f32.mrb[97].mxu0 }
 0x502   : > { %v8760_v45 = vadd.f32 %v8759_v31, %v8758_v16  ;;  %v8761_v26 = vpop.f32.mrb[98].mxu0  ;;  %7630 = vmatmul.mubr.bf16.gmra.mrb[184].mxu1 %v5805_v38  ;;  %9153 = vmatmul.mubr.msk.bf16.gmra.mrb[188].mxu0 %vm16794_vm5, %v5768_v53  ;;  %v5614_v23 = vpop.permute.xlu0 %5613  ;;  %v5846_v16 = vld [vmem:[#allocation3 + $0x5a8] sm:$0xff]  ;;  %v5859_v38 = vld [vmem:[#allocation3 + $0x610] sm:$0xff] }
 0x503   : > { %v8762_v48 = vpop.f32.mrb[99].mxu0  ;;  %7637 = vmatprep.mubr.bf16.mxu1 %v5819_v61  ;;  %9156 = vmatprep.mubr.msk.bf16.mxu0 %vm16795_vm4, %v5781_v5  ;;  %5634 = vst.msk [vmem:[#allocation3 + $0x670] sm:$0xff] %vm16781_vm9, %v5614_v23  ;;  %v5858_v31 = vld [vmem:[#allocation3 + $0x608] sm:$0xff] }
 0x504   : > { %v14897_v8 = vadd.f32 %v8760_v45, %v14569_v27  ;;  %v8763_v44 = vadd.f32 %v8762_v48, %v8761_v26  ;;  %v5832_v27 = vld [vmem:[#allocation3 + $0x538] sm:$0xff] }
 0x505   : > { %v8828_v10 = vpop.f32.mrb[100].mxu1  ;;  %v5844_v26 = vld [vmem:[#allocation3 + $0x598] sm:$0xff] }
 0x506   : > { %v14900_v3 = vadd.f32 %v8763_v44, %v14577_v9  ;;  %v8829_v11 = vpop.f32.mrb[101].mxu1  ;;  %v5820_v9 = vld [vmem:[#allocation3 + $0x4d8] sm:$0xff] }
 0x507   : > { %v8830_v12 = vadd.f32 %v8829_v11, %v8828_v10  ;;  %v8831_v2 = vpop.f32.mrb[102].mxu1  ;;  %v5872_v10 = vld [vmem:[#allocation3 + $0x678] sm:$0xff] }
 0x508   : > { %v8832_v54 = vpop.f32.mrb[103].mxu1 }
 0x509   : > { %v14903_v32 = vadd.f32 %v8830_v12, %v14682_v25  ;;  %v8833_v39 = vadd.f32 %v8832_v54, %v8831_v2  ;;  %v5845_v25 = vld [vmem:[#allocation3 + $0x5a0] sm:$0xff] }
 0x50a   : > { %7638 = vmatmul.mubr.bf16.gmra.mrb[188].mxu1 %v5818_v51  ;;  %9157 = vmatmul.mubr.msk.bf16.gmra.mrb[192].mxu0 %vm16796_vm10, %v5794_v37  ;;  %v5871_v11 = vld [vmem:[#allocation3 + $0x670] sm:$0xff]  ;;  %v5857_v12 = vld [vmem:[#allocation3 + $0x600] sm:$0xff]  ;;  %v5870_v51 = vld [vmem:[#allocation3 + $0x668] sm:$0xff] }
 0x50b   : > { %v14907_v57 = vadd.f32 %v8833_v39, %v14687_v56  ;;  %7645 = vmatprep.mubr.bf16.mxu1 %v5832_v27  ;;  %9160 = vmatprep.mubr.msk.bf16.mxu0 %vm16797_vm0, %v5807_v52 }
 0x511   : > { %v8764_v6 = vpop.f32.mrb[100].mxu0 }
 0x512   : > { %v8765_v13 = vpop.f32.mrb[101].mxu0  ;;  %7646 = vmatmul.mubr.bf16.gmra.mrb[192].mxu1 %v5831_v21  ;;  %9161 = vmatmul.mubr.msk.bf16.gmra.mrb[196].mxu0 %vm16798_vm15, %v5820_v9 }
 0x513   : > { %v8766_v30 = vadd.f32 %v8765_v13, %v8764_v6  ;;  %v8767_v42 = vpop.f32.mrb[102].mxu0  ;;  %7653 = vmatprep.mubr.bf16.mxu1 %v5845_v25  ;;  %9164 = vmatprep.mubr.msk.bf16.mxu0 %vm16799_vm7, %v5833_v1 }
 0x514   : > { %v8768_v20 = vpop.f32.mrb[103].mxu0 }
 0x515   : > { %v14913_v56 = vadd.f32 %v8766_v30, %v14628_v4  ;;  %v8769_v40 = vadd.f32 %v8768_v20, %v8767_v42 }
 0x517   : > { %v14916_v53 = vadd.f32 %v8769_v40, %v14635_v28 }
 0x518   : > { %v8834_v5 = vpop.f32.mrb[104].mxu1 }
 0x519   : > { %v8835_v45 = vpop.f32.mrb[105].mxu1 }
 0x51a   : > { %v8836_v61 = vadd.f32 %v8835_v45, %v8834_v5  ;;  %v8837_v23 = vpop.f32.mrb[106].mxu1  ;;  %7654 = vmatmul.mubr.bf16.gmra.mrb[196].mxu1 %v5844_v26  ;;  %9165 = vmatmul.mubr.msk.bf16.gmra.mrb[200].mxu0 %vm16800_vm14, %v5846_v16 }
 0x51b   : > { %v8838_v48 = vpop.f32.mrb[107].mxu1  ;;  %7661 = vmatprep.mubr.bf16.mxu1 %v5858_v31  ;;  %9168 = vmatprep.mubr.msk.bf16.mxu0 %vm16801_vm1, %v5859_v38 }
 0x51c   : > { %v14921_v4 = vadd.f32 %v8836_v61, %v14751_v63  ;;  %v8839_v28 = vadd.f32 %v8838_v48, %v8837_v23 }
 0x51e   : > { %v14924_v44 = vadd.f32 %v8839_v28, %v14756_v43 }
 0x522   : > { %7662 = vmatmul.mubr.bf16.gmra.mrb[200].mxu1 %v5857_v12  ;;  %9169 = vmatmul.mubr.msk.bf16.gmra.mrb[204].mxu0 %vm16802_vm8, %v5872_v10 }
 0x523   : > { %7669 = vmatprep.mubr.bf16.mxu1 %v5871_v11 }
 0x524   : > { %v8770_v2 = vpop.f32.mrb[104].mxu0 }
 0x525   : > { %v8771_v37 = vpop.f32.mrb[105].mxu0 }
 0x526   : > { %v8772_v54 = vadd.f32 %v8771_v37, %v8770_v2  ;;  %v8773_v52 = vpop.f32.mrb[106].mxu0 }
 0x527   : > { %v8774_v39 = vpop.f32.mrb[107].mxu0 }
 0x528   : > { %v14928_v63 = vadd.f32 %v8772_v54, %v14733_v36  ;;  %v8775_v27 = vadd.f32 %v8774_v39, %v8773_v52 }
 0x529   : > { %v8840_v9 = vpop.f32.mrb[108].mxu1 }
 0x52a   : > { %v14931_v43 = vadd.f32 %v8775_v27, %v14737_v47  ;;  %v8841_v1 = vpop.f32.mrb[109].mxu1  ;;  %7670 = vmatmul.mubr.bf16.gmra.mrb[204].mxu1 %v5870_v51 }
 0x52b   : > { %v8842_v6 = vadd.f32 %v8841_v1, %v8840_v9  ;;  %v8843_v21 = vpop.f32.mrb[110].mxu1 }
 0x52c   : > { %v8844_v13 = vpop.f32.mrb[111].mxu1 }
 0x52d   : > { %v14934_v25 = vadd.f32 %v8842_v6, %v14785_v34  ;;  %v8845_v30 = vadd.f32 %v8844_v13, %v8843_v21 }
 0x52f   : > { %v14937_v42 = vadd.f32 %v8845_v30, %v14790_v33 }
 0x535   : > { %v8776_v20 = vpop.f32.mrb[108].mxu0 }
 0x536   : > { %v8777_v36 = vpop.f32.mrb[109].mxu0 }
 0x537   : > { %v8778_v40 = vadd.f32 %v8777_v36, %v8776_v20  ;;  %v8779_v16 = vpop.f32.mrb[110].mxu0 }
 0x538   : > { %v8780_v5 = vpop.f32.mrb[111].mxu0 }
 0x539   : > { %v14940_v47 = vadd.f32 %v8778_v40, %v14774_v41  ;;  %v8781_v31 = vadd.f32 %v8780_v5, %v8779_v16 }
 0x53b   : > { %v14943_v38 = vadd.f32 %v8781_v31, %v14778_v46 }
 0x53c   : > { %v8846_v45 = vpop.f32.mrb[112].mxu1 }
 0x53d   : > { %v8847_v26 = vpop.f32.mrb[113].mxu1  ;;  %v8910_v34 = vpop.f32.mrb[112].mxu0 }
 0x53e   : > { %v8848_v61 = vadd.f32 %v8847_v26, %v8846_v45  ;;  %v8849_v23 = vpop.f32.mrb[114].mxu1  ;;  %v8911_v48 = vpop.f32.mrb[113].mxu0 }
 0x53f   : > { %v8912_v33 = vadd.f32 %v8911_v48, %v8910_v34  ;;  %v8850_v28 = vpop.f32.mrb[115].mxu1  ;;  %v8913_v10 = vpop.f32.mrb[114].mxu0 }
 0x540   : > { %v14946_v11 = vadd.f32 %v8848_v61, %v14807_v58  ;;  %v8851_v12 = vadd.f32 %v8850_v28, %v8849_v23  ;;  %v8914_v2 = vpop.f32.mrb[115].mxu0 }
 0x541   : > { %v14949_v41 = vadd.f32 %v8912_v33, %v14795_v19  ;;  %v8915_v37 = vadd.f32 %v8914_v2, %v8913_v10 }
 0x542   : > { %v14952_v46 = vadd.f32 %v8851_v12, %v14811_v15 }
 0x543   : > { %v14955_v54 = vadd.f32 %v8915_v37, %v14799_v59 }
 0x544   : > { %v8852_v52 = vpop.f32.mrb[116].mxu1 }
 0x545   : > { %v8853_v39 = vpop.f32.mrb[117].mxu1  ;;  %v8916_v51 = vpop.f32.mrb[116].mxu0 }
 0x546   : > { %v8854_v27 = vadd.f32 %v8853_v39, %v8852_v52  ;;  %v8855_v9 = vpop.f32.mrb[118].mxu1  ;;  %v8917_v1 = vpop.f32.mrb[117].mxu0 }
 0x547   : > { %v8918_v58 = vadd.f32 %v8917_v1, %v8916_v51  ;;  %v8856_v6 = vpop.f32.mrb[119].mxu1  ;;  %v8919_v21 = vpop.f32.mrb[118].mxu0 }
 0x548   : > { %v14958_v13 = vadd.f32 %v8854_v27, %v14827_v50  ;;  %v8857_v19 = vadd.f32 %v8856_v6, %v8855_v9  ;;  %v8920_v30 = vpop.f32.mrb[119].mxu0 }
 0x549   : > { %v14961_v15 = vadd.f32 %v8918_v58, %v14815_v49  ;;  %v8921_v20 = vadd.f32 %v8920_v30, %v8919_v21 }
 0x54a   : > { %v14964_v59 = vadd.f32 %v8857_v19, %v14832_v0 }
 0x54b   : > { %v14967_v36 = vadd.f32 %v8921_v20, %v14820_v22 }
 0x54c   : > { %v8858_v40 = vpop.f32.mrb[120].mxu1 }
 0x54d   : > { %v8859_v16 = vpop.f32.mrb[121].mxu1  ;;  %v8922_v5 = vpop.f32.mrb[120].mxu0 }
 0x54e   : > { %v8860_v31 = vadd.f32 %v8859_v16, %v8858_v40  ;;  %v8861_v45 = vpop.f32.mrb[122].mxu1  ;;  %v8923_v26 = vpop.f32.mrb[121].mxu0 }
 0x54f   : > { %v8924_v50 = vadd.f32 %v8923_v26, %v8922_v5  ;;  %v8862_v34 = vpop.f32.mrb[123].mxu1  ;;  %v8925_v61 = vpop.f32.mrb[122].mxu0 }
 0x550   : > { %v14970_v23 = vadd.f32 %v8860_v31, %v14848_v14  ;;  %v8863_v49 = vadd.f32 %v8862_v34, %v8861_v45  ;;  %v8926_v48 = vpop.f32.mrb[123].mxu0 }
 0x551   : > { %v14973_v0 = vadd.f32 %v8924_v50, %v14837_v60  ;;  %v8927_v33 = vadd.f32 %v8926_v48, %v8925_v61 }
 0x552   : > { %v14976_v22 = vadd.f32 %v8863_v49, %v14852_v29 }
 0x553   : > { %v14979_v28 = vadd.f32 %v8927_v33, %v14841_v35 }
 0x554   : > { %v8864_v10 = vpop.f32.mrb[124].mxu1 }
 0x555   : > { %v8865_v12 = vpop.f32.mrb[125].mxu1  ;;  %v8928_v2 = vpop.f32.mrb[124].mxu0 }
 0x556   : > { %v8866_v37 = vadd.f32 %v8865_v12, %v8864_v10  ;;  %v8867_v52 = vpop.f32.mrb[126].mxu1  ;;  %v8929_v39 = vpop.f32.mrb[125].mxu0 }
 0x557   : > { %v8930_v14 = vadd.f32 %v8929_v39, %v8928_v2  ;;  %v8868_v51 = vpop.f32.mrb[127].mxu1  ;;  %v8931_v27 = vpop.f32.mrb[126].mxu0 }
 0x558   : > { %v14982_v9 = vadd.f32 %v8866_v37, %v14872_v17  ;;  %v8869_v60 = vadd.f32 %v8868_v51, %v8867_v52  ;;  %v8932_v1 = vpop.f32.mrb[127].mxu0 }
 0x559   : > { %v14985_v29 = vadd.f32 %v8930_v14, %v14858_v55  ;;  %v8933_v58 = vadd.f32 %v8932_v1, %v8931_v27 }
 0x55a   : > { %v14988_v35 = vadd.f32 %v8869_v60, %v14876_v62 }
 0x55b   : > { %v14991_v6 = vadd.f32 %v8933_v58, %v14861_v7 }
 0x55c   : > { %v8870_v21 = vpop.f32.mrb[128].mxu1 }
 0x55d   : > { %v8871_v19 = vpop.f32.mrb[129].mxu1  ;;  %v8934_v30 = vpop.f32.mrb[128].mxu0 }
 0x55e   : > { %v8872_v20 = vadd.f32 %v8871_v19, %v8870_v21  ;;  %v8873_v40 = vpop.f32.mrb[130].mxu1  ;;  %v8935_v16 = vpop.f32.mrb[129].mxu0 }
 0x55f   : > { %v8936_v17 = vadd.f32 %v8935_v16, %v8934_v30  ;;  %v8874_v5 = vpop.f32.mrb[131].mxu1  ;;  %v8937_v31 = vpop.f32.mrb[130].mxu0 }
 0x560   : > { %v14994_v45 = vadd.f32 %v8872_v20, %v14897_v8  ;;  %v8875_v55 = vadd.f32 %v8874_v5, %v8873_v40  ;;  %v8938_v26 = vpop.f32.mrb[131].mxu0 }
 0x561   : > { %v14997_v62 = vadd.f32 %v8936_v17, %v14883_v24  ;;  %v8939_v50 = vadd.f32 %v8938_v26, %v8937_v31 }
 0x562   : > { %v15000_v7 = vadd.f32 %v8875_v55, %v14900_v3 }
 0x563   : > { %v15003_v34 = vadd.f32 %v8939_v50, %v14887_v18 }
 0x565   : > { %v8876_v61 = vpop.f32.mrb[132].mxu1  ;;  %v8940_v49 = vpop.f32.mrb[132].mxu0 }
 0x566   : > { %v8877_v48 = vpop.f32.mrb[133].mxu1  ;;  %v8941_v33 = vpop.f32.mrb[133].mxu0 }
 0x567   : > { %v8878_v10 = vadd.f32 %v8877_v48, %v8876_v61  ;;  %v8942_v12 = vadd.f32 %v8941_v33, %v8940_v49  ;;  %v8879_v8 = vpop.f32.mrb[134].mxu1  ;;  %v8943_v2 = vpop.f32.mrb[134].mxu0 }
 0x568   : > { %v8880_v37 = vpop.f32.mrb[135].mxu1  ;;  %v8944_v52 = vpop.f32.mrb[135].mxu0 }
 0x569   : > { %v15006_v24 = vadd.f32 %v8878_v10, %v14913_v56  ;;  %v15009_v39 = vadd.f32 %v8942_v12, %v14903_v32  ;;  %v8881_v3 = vadd.f32 %v8880_v37, %v8879_v8  ;;  %v8945_v14 = vadd.f32 %v8944_v52, %v8943_v2 }
 0x56b   : > { %v15012_v18 = vadd.f32 %v8881_v3, %v14916_v53  ;;  %v15015_v51 = vadd.f32 %v8945_v14, %v14907_v57 }
 0x56d   : > { %v8946_v27 = vpop.f32.mrb[136].mxu0 }
 0x56e   : > { %v8947_v60 = vpop.f32.mrb[137].mxu0 }
 0x56f   : > { %v8948_v1 = vadd.f32 %v8947_v60, %v8946_v27  ;;  %v8949_v58 = vpop.f32.mrb[138].mxu0 }
 0x570   : > { %v8950_v21 = vpop.f32.mrb[139].mxu0 }
 0x571   : > { %v15018_v19 = vadd.f32 %v8948_v1, %v14921_v4  ;;  %v8951_v56 = vadd.f32 %v8950_v21, %v8949_v58  ;;  %v8882_v30 = vpop.f32.mrb[136].mxu1 }
 0x572   : > { %v8883_v32 = vpop.f32.mrb[137].mxu1 }
 0x573   : > { %v15021_v20 = vadd.f32 %v8951_v56, %v14924_v44  ;;  %v8884_v40 = vadd.f32 %v8883_v32, %v8882_v30  ;;  %v8885_v53 = vpop.f32.mrb[138].mxu1 }
 0x574   : > { %v8886_v16 = vpop.f32.mrb[139].mxu1 }
 0x575   : > { %v15024_v57 = vadd.f32 %v8884_v40, %v14928_v63  ;;  %v8887_v17 = vadd.f32 %v8886_v16, %v8885_v53  ;;  %v8952_v5 = vpop.f32.mrb[140].mxu0 }
 0x576   : > { %v8953_v31 = vpop.f32.mrb[141].mxu0 }
 0x577   : > { %v15027_v55 = vadd.f32 %v8887_v17, %v14931_v43  ;;  %v8954_v4 = vadd.f32 %v8953_v31, %v8952_v5  ;;  %v8955_v26 = vpop.f32.mrb[142].mxu0 }
 0x578   : > { %v8956_v50 = vpop.f32.mrb[143].mxu0 }
 0x579   : > { %v15030_v61 = vadd.f32 %v8954_v4, %v14934_v25  ;;  %v8957_v44 = vadd.f32 %v8956_v50, %v8955_v26 }
 0x57b   : > { %v15033_v49 = vadd.f32 %v8957_v44, %v14937_v42 }
 0x57d   : > { %v8888_v48 = vpop.f32.mrb[140].mxu1  ;;  %v8958_v33 = vpop.f32.mrb[144].mxu0 }
 0x57e   : > { %v8889_v63 = vpop.f32.mrb[141].mxu1  ;;  %v8959_v10 = vpop.f32.mrb[145].mxu0 }
 0x57f   : > { %v8890_v12 = vadd.f32 %v8889_v63, %v8888_v48  ;;  %v8960_v8 = vadd.f32 %v8959_v10, %v8958_v33  ;;  %v8891_v2 = vpop.f32.mrb[142].mxu1  ;;  %v8961_v37 = vpop.f32.mrb[146].mxu0 }
 0x580   : > { %v8892_v43 = vpop.f32.mrb[143].mxu1  ;;  %v8962_v52 = vpop.f32.mrb[147].mxu0 }
 0x581   : > { %v15036_v3 = vadd.f32 %v8890_v12, %v14940_v47  ;;  %v15039_v25 = vadd.f32 %v8960_v8, %v14946_v11  ;;  %v8893_v14 = vadd.f32 %v8892_v43, %v8891_v2  ;;  %v8963_v27 = vadd.f32 %v8962_v52, %v8961_v37 }
 0x583   : > { %v15042_v42 = vadd.f32 %v8893_v14, %v14943_v38  ;;  %v15045_v60 = vadd.f32 %v8963_v27, %v14952_v46 }
 0x585   : > { %v8964_v1 = vpop.f32.mrb[148].mxu0  ;;  %v9022_v58 = vpop.f32.mrb[144].mxu1 }
 0x586   : > { %v8965_v21 = vpop.f32.mrb[149].mxu0  ;;  %v9023_v56 = vpop.f32.mrb[145].mxu1 }
 0x587   : > { %v8966_v30 = vadd.f32 %v8965_v21, %v8964_v1  ;;  %v9024_v32 = vadd.f32 %v9023_v56, %v9022_v58  ;;  %v8967_v40 = vpop.f32.mrb[150].mxu0  ;;  %v9025_v47 = vpop.f32.mrb[146].mxu1 }
 0x588   : > { %v8968_v53 = vpop.f32.mrb[151].mxu0  ;;  %v9026_v16 = vpop.f32.mrb[147].mxu1 }
 0x589   : > { %v15048_v11 = vadd.f32 %v8966_v30, %v14958_v13  ;;  %v8969_v17 = vadd.f32 %v8968_v53, %v8967_v40  ;;  %v9027_v5 = vadd.f32 %v9026_v16, %v9025_v47  ;;  %v15051_v38 = vadd.f32 %v9024_v32, %v14949_v41 }
 0x58b   : > { %v15054_v46 = vadd.f32 %v8969_v17, %v14964_v59  ;;  %v15057_v31 = vadd.f32 %v9027_v5, %v14955_v54 }
 0x58d   : > { %v8970_v4 = vpop.f32.mrb[152].mxu0  ;;  %v9028_v26 = vpop.f32.mrb[148].mxu1 }
 0x58e   : > { %v8971_v50 = vpop.f32.mrb[153].mxu0  ;;  %v9029_v44 = vpop.f32.mrb[149].mxu1 }
 0x58f   : > { %v8972_v48 = vadd.f32 %v8971_v50, %v8970_v4  ;;  %v9030_v33 = vadd.f32 %v9029_v44, %v9028_v26  ;;  %v8973_v63 = vpop.f32.mrb[154].mxu0  ;;  %v9031_v13 = vpop.f32.mrb[150].mxu1 }
 0x590   : > { %v8974_v10 = vpop.f32.mrb[155].mxu0  ;;  %v9032_v12 = vpop.f32.mrb[151].mxu1 }
 0x591   : > { %v15060_v8 = vadd.f32 %v8972_v48, %v14970_v23  ;;  %v8975_v41 = vadd.f32 %v8974_v10, %v8973_v63  ;;  %v9033_v2 = vadd.f32 %v9032_v12, %v9031_v13  ;;  %v15063_v59 = vadd.f32 %v9030_v33, %v14961_v15 }
 0x593   : > { %v15066_v54 = vadd.f32 %v8975_v41, %v14976_v22  ;;  %v15069_v37 = vadd.f32 %v9033_v2, %v14967_v36 }
 0x595   : > { %v8976_v43 = vpop.f32.mrb[156].mxu0  ;;  %v9034_v52 = vpop.f32.mrb[152].mxu1 }
 0x596   : > { %v8977_v14 = vpop.f32.mrb[157].mxu0  ;;  %v9035_v27 = vpop.f32.mrb[153].mxu1 }
 0x597   : > { %v8978_v1 = vadd.f32 %v8977_v14, %v8976_v43  ;;  %v9036_v58 = vadd.f32 %v9035_v27, %v9034_v52  ;;  %v8979_v21 = vpop.f32.mrb[158].mxu0  ;;  %v9037_v23 = vpop.f32.mrb[154].mxu1 }
 0x598   : > { %v8980_v56 = vpop.f32.mrb[159].mxu0  ;;  %v9038_v30 = vpop.f32.mrb[155].mxu1 }
 0x599   : > { %v15072_v32 = vadd.f32 %v8978_v1, %v14982_v9  ;;  %v8981_v15 = vadd.f32 %v8980_v56, %v8979_v21  ;;  %v9039_v40 = vadd.f32 %v9038_v30, %v9037_v23  ;;  %v15075_v22 = vadd.f32 %v9036_v58, %v14973_v0 }
 0x59b   : > { %v15078_v36 = vadd.f32 %v8981_v15, %v14988_v35  ;;  %v15081_v47 = vadd.f32 %v9039_v40, %v14979_v28 }
 0x59d   : > { %v8982_v53 = vpop.f32.mrb[160].mxu0  ;;  %v9040_v16 = vpop.f32.mrb[156].mxu1 }
 0x59e   : > { %v8983_v17 = vpop.f32.mrb[161].mxu0  ;;  %v9041_v5 = vpop.f32.mrb[157].mxu1 }
 0x59f   : > { %v8984_v4 = vadd.f32 %v8983_v17, %v8982_v53  ;;  %v9042_v26 = vadd.f32 %v9041_v5, %v9040_v16  ;;  %v8985_v50 = vpop.f32.mrb[162].mxu0  ;;  %v9043_v9 = vpop.f32.mrb[158].mxu1 }
 0x5a0   : > { %v8986_v44 = vpop.f32.mrb[163].mxu0  ;;  %v9044_v48 = vpop.f32.mrb[159].mxu1 }
 0x5a1   : > { %v15084_v33 = vadd.f32 %v8984_v4, %v14994_v45  ;;  %v8987_v0 = vadd.f32 %v8986_v44, %v8985_v50  ;;  %v9045_v63 = vadd.f32 %v9044_v48, %v9043_v9  ;;  %v15087_v35 = vadd.f32 %v9042_v26, %v14985_v29 }
 0x5a3   : > { %v15090_v28 = vadd.f32 %v8987_v0, %v15000_v7  ;;  %v15093_v13 = vadd.f32 %v9045_v63, %v14991_v6 }
 0x5a5   : > { %v8988_v10 = vpop.f32.mrb[164].mxu0  ;;  %v9046_v12 = vpop.f32.mrb[160].mxu1 }
 0x5a6   : > { %v8989_v41 = vpop.f32.mrb[165].mxu0  ;;  %v9047_v2 = vpop.f32.mrb[161].mxu1 }
 0x5a7   : > { %v8990_v43 = vadd.f32 %v8989_v41, %v8988_v10  ;;  %v9048_v52 = vadd.f32 %v9047_v2, %v9046_v12  ;;  %v8991_v14 = vpop.f32.mrb[166].mxu0  ;;  %v9049_v45 = vpop.f32.mrb[162].mxu1 }
 0x5a8   : > { %v8992_v27 = vpop.f32.mrb[167].mxu0  ;;  %v9050_v1 = vpop.f32.mrb[163].mxu1 }
 0x5a9   : > { %v15096_v58 = vadd.f32 %v8990_v43, %v15006_v24  ;;  %v8993_v29 = vadd.f32 %v8992_v27, %v8991_v14  ;;  %v9051_v21 = vadd.f32 %v9050_v1, %v9049_v45  ;;  %v15099_v7 = vadd.f32 %v9048_v52, %v14997_v62 }
 0x5ab   : > { %v15102_v6 = vadd.f32 %v8993_v29, %v15012_v18  ;;  %v15105_v23 = vadd.f32 %v9051_v21, %v15003_v34 }
 0x5ad   : > { %v8994_v56 = vpop.f32.mrb[168].mxu0  ;;  %v9052_v30 = vpop.f32.mrb[164].mxu1 }
 0x5ae   : > { %v8995_v15 = vpop.f32.mrb[169].mxu0  ;;  %v9053_v40 = vpop.f32.mrb[165].mxu1 }
 0x5af   : > { %v8996_v53 = vadd.f32 %v8995_v15, %v8994_v56  ;;  %v9054_v16 = vadd.f32 %v9053_v40, %v9052_v30  ;;  %v8997_v17 = vpop.f32.mrb[170].mxu0  ;;  %v9055_v24 = vpop.f32.mrb[166].mxu1 }
 0x5b0   : > { %v8998_v5 = vpop.f32.mrb[171].mxu0  ;;  %v9056_v4 = vpop.f32.mrb[167].mxu1 }
 0x5b1   : > { %v15108_v26 = vadd.f32 %v8996_v53, %v15024_v57  ;;  %v8999_v62 = vadd.f32 %v8998_v5, %v8997_v17  ;;  %v9057_v50 = vadd.f32 %v9056_v4, %v9055_v24  ;;  %v15111_v18 = vadd.f32 %v9054_v16, %v15009_v39 }
 0x5b3   : > { %v15114_v34 = vadd.f32 %v8999_v62, %v15027_v55  ;;  %v15117_v9 = vadd.f32 %v9057_v50, %v15015_v51 }
 0x5b5   : > { %v9000_v44 = vpop.f32.mrb[172].mxu0  ;;  %v9058_v48 = vpop.f32.mrb[168].mxu1 }
 0x5b6   : > { %v9001_v0 = vpop.f32.mrb[173].mxu0  ;;  %v9059_v63 = vpop.f32.mrb[169].mxu1 }
 0x5b7   : > { %v9002_v10 = vadd.f32 %v9001_v0, %v9000_v44  ;;  %v9060_v12 = vadd.f32 %v9059_v63, %v9058_v48  ;;  %v9003_v41 = vpop.f32.mrb[174].mxu0  ;;  %v9061_v57 = vpop.f32.mrb[170].mxu1 }
 0x5b8   : > { %v9004_v2 = vpop.f32.mrb[175].mxu0  ;;  %v9062_v43 = vpop.f32.mrb[171].mxu1 }
 0x5b9   : > { %v15120_v52 = vadd.f32 %v9002_v10, %v15036_v3  ;;  %v9005_v39 = vadd.f32 %v9004_v2, %v9003_v41  ;;  %v9063_v14 = vadd.f32 %v9062_v43, %v9061_v57  ;;  %v15123_v55 = vadd.f32 %v9060_v12, %v15018_v19 }
 0x5bb   : > { %v15126_v51 = vadd.f32 %v9005_v39, %v15042_v42  ;;  %v15129_v45 = vadd.f32 %v9063_v14, %v15021_v20 }
 0x5bd   : > { %v9064_v27 = vpop.f32.mrb[172].mxu1  ;;  %v9142_v1 = vpop.f32.mrb[176].mxu0 }
 0x5be   : > { %v7721_v29 = vadd.f32 %v9142_v1, %v15063_v59  ;;  %v9065_v21 = vpop.f32.mrb[173].mxu1  ;;  %v7712_v56 = vpop.f32.mrb[177].mxu0 }
 0x5bf   : > { %v9066_v3 = vadd.f32 %v9065_v21, %v9064_v27  ;;  %v7713_v30 = vadd.f32 %v7712_v56, %v15051_v38  ;;  %v9067_v15 = vpop.f32.mrb[174].mxu1  ;;  %v9143_v40 = vpop.f32.mrb[178].mxu0 }
 0x5c0   : > { %9379 = vtanh.f32 %v7721_v29  ;;  %v7724_v19 = vadd.f32 %v9143_v40, %v15069_v37  ;;  %v9068_v42 = vpop.f32.mrb[175].mxu1  ;;  %v7715_v53 = vpop.f32.mrb[179].mxu0 }
 0x5c1   : > { %9381 = vtanh.f32 %v7713_v30  ;;  %v9069_v20 = vadd.f32 %v9068_v42, %v9067_v15  ;;  %v7716_v16 = vadd.f32 %v7715_v53, %v15057_v31  ;;  %v15136_v17 = vadd.f32 %v9066_v3, %v15030_v61 }
 0x5c2   : > { %9383 = vtanh.f32 %v7724_v19 }
 0x5c3   : > { %9385 = vtanh.f32 %v7716_v16  ;;  %v15139_v59 = vadd.f32 %v9069_v20, %v15033_v49 }
 0x5c5   : > { %v9070_v38 = vpop.f32.mrb[176].mxu1  ;;  %v9146_v24 = vpop.f32.mrb[180].mxu0 }
 0x5c6   : > { %v7737_v5 = vadd.f32 %v9146_v24, %v15087_v35  ;;  %v9071_v37 = vpop.f32.mrb[177].mxu1  ;;  %v7728_v4 = vpop.f32.mrb[181].mxu0 }
 0x5c7   : > { %v9072_v62 = vadd.f32 %v9071_v37, %v9070_v38  ;;  %v7729_v50 = vadd.f32 %v7728_v4, %v15075_v22  ;;  %v9073_v44 = vpop.f32.mrb[178].mxu1  ;;  %v9147_v31 = vpop.f32.mrb[182].mxu0 }
 0x5c8   : > { %9387 = vtanh.f32 %v7737_v5  ;;  %v7740_v61 = vadd.f32 %v9147_v31, %v15093_v13  ;;  %v9074_v48 = vpop.f32.mrb[179].mxu1  ;;  %v7731_v0 = vpop.f32.mrb[183].mxu0 }
 0x5c9   : > { %9389 = vtanh.f32 %v7729_v50  ;;  %v9075_v49 = vadd.f32 %v9074_v48, %v9073_v44  ;;  %v7732_v63 = vadd.f32 %v7731_v0, %v15081_v47  ;;  %v15147_v10 = vadd.f32 %v9072_v62, %v15039_v25 }
 0x5ca   : > { %v9380_v35 = vpop.eup %9379  ;;  %9391 = vtanh.f32 %v7740_v61 }
 0x5cb   : > { %v9382_v12 = vpop.eup %9381  ;;  %7874 = vst.msk [vmem:[%s15149_s18 + $0x10] sm:$0xff] %vm7871_vm11, %v9380_v35  ;;  %9393 = vtanh.f32 %v7732_v63  ;;  %v15154_v22 = vadd.f32 %v9075_v49, %v15045_v60 }
 0x5cc   : > { %v9384_v13 = vpop.eup %9383  ;;  %7872 = vst.msk [vmem:[%s15149_s18] sm:$0xff] %vm7871_vm11, %v9382_v12 }
 0x5cd   : > { %v9386_v25 = vpop.eup %9385  ;;  %7875 = vst.msk [vmem:[%s15149_s18 + $0x18] sm:$0xff] %vm7871_vm11, %v9384_v13  ;;  %v9076_v47 = vpop.f32.mrb[180].mxu1 }
 0x5ce   : > { %v9150_v41 = vpop.f32.mrb[184].mxu0  ;;  %7873 = vst.msk [vmem:[%s15149_s18 + $0x8] sm:$0xff] %vm7871_vm11, %v9386_v25  ;;  %v9077_v2 = vpop.f32.mrb[181].mxu1 }
 0x5cf   : > { %v7753_v57 = vadd.f32 %v9150_v41, %v15111_v18  ;;  %v7744_v43 = vpop.f32.mrb[185].mxu0  ;;  %v9078_v39 = vadd.f32 %v9077_v2, %v9076_v47  ;;  %v9079_v60 = vpop.f32.mrb[182].mxu1 }
 0x5d0   : > { %v7745_v14 = vadd.f32 %v7744_v43, %v15099_v7  ;;  %v9151_v27 = vpop.f32.mrb[186].mxu0  ;;  %v9080_v29 = vpop.f32.mrb[183].mxu1 }
 0x5d1   : > { %9395 = vtanh.f32 %v7753_v57  ;;  %v7756_v1 = vadd.f32 %v9151_v27, %v15117_v9  ;;  %v7747_v21 = vpop.f32.mrb[187].mxu0  ;;  %v9081_v56 = vadd.f32 %v9080_v29, %v9079_v60  ;;  %v7624_v3 = vadd.f32 %v9078_v39, %v15048_v11 }
 0x5d2   : > { %9397 = vtanh.f32 %v7745_v14  ;;  %v7748_v18 = vadd.f32 %v7747_v21, %v15105_v23  ;;  %v9388_v30 = vpop.eup %9387 }
 0x5d3   : > { %9399 = vtanh.f32 %v7756_v1  ;;  %v9390_v15 = vpop.eup %9389  ;;  %7878 = vst.msk [vmem:[%s15149_s18 + $0x30] sm:$0xff] %vm7871_vm11, %v9388_v30  ;;  %v7627_v7 = vadd.f32 %v9081_v56, %v15054_v46 }
 0x5d4   : > { %9401 = vtanh.f32 %v7748_v18  ;;  %v9392_v40 = vpop.eup %9391  ;;  %7876 = vst.msk [vmem:[%s15149_s18 + $0x20] sm:$0xff] %vm7871_vm11, %v9390_v15 }
 0x5d5   : > { %v9394_v9 = vpop.eup %9393  ;;  %7879 = vst.msk [vmem:[%s15149_s18 + $0x38] sm:$0xff] %vm7871_vm11, %v9392_v40  ;;  %v9082_v19 = vpop.f32.mrb[184].mxu1 }
 0x5d6   : > { %v9154_v42 = vpop.f32.mrb[188].mxu0  ;;  %7877 = vst.msk [vmem:[%s15149_s18 + $0x28] sm:$0xff] %vm7871_vm11, %v9394_v9  ;;  %v9083_v23 = vpop.f32.mrb[185].mxu1 }
 0x5d7   : > { %v7769_v11 = vadd.f32 %v9154_v42, %v15136_v17  ;;  %v7760_v53 = vpop.f32.mrb[189].mxu0  ;;  %v9084_v20 = vadd.f32 %v9083_v23, %v9082_v19  ;;  %v9085_v38 = vpop.f32.mrb[186].mxu1 }
 0x5d8   : > { %v7761_v16 = vadd.f32 %v7760_v53, %v15123_v55  ;;  %v9155_v46 = vpop.f32.mrb[190].mxu0  ;;  %v9086_v5 = vpop.f32.mrb[187].mxu1 }
 0x5d9   : > { %9403 = vtanh.f32 %v7769_v11  ;;  %v7772_v24 = vadd.f32 %v9155_v46, %v15139_v59  ;;  %v7763_v37 = vpop.f32.mrb[191].mxu0  ;;  %v9087_v4 = vadd.f32 %v9086_v5, %v9085_v38  ;;  %v7632_v62 = vadd.f32 %v9084_v20, %v15060_v8 }
 0x5da   : > { %9405 = vtanh.f32 %v7761_v16  ;;  %v7764_v17 = vadd.f32 %v7763_v37, %v15129_v45 }
 0x5db   : > { %v9396_v50 = vpop.eup %9395  ;;  %9407 = vtanh.f32 %v7772_v24  ;;  %v7635_v55 = vadd.f32 %v9087_v4, %v15066_v54 }
 0x5dc   : > { %v9398_v44 = vpop.eup %9397  ;;  %7882 = vst.msk [vmem:[%s15149_s18 + $0x50] sm:$0xff] %vm7871_vm11, %v9396_v50  ;;  %9409 = vtanh.f32 %v7764_v17 }
 0x5dd   : > { %v9400_v31 = vpop.eup %9399  ;;  %7880 = vst.msk [vmem:[%s15149_s18 + $0x40] sm:$0xff] %vm7871_vm11, %v9398_v44  ;;  %v9088_v61 = vpop.f32.mrb[188].mxu1 }
 0x5de   : > { %v9402_v59 = vpop.eup %9401  ;;  %7883 = vst.msk [vmem:[%s15149_s18 + $0x58] sm:$0xff] %vm7871_vm11, %v9400_v31  ;;  %v9158_v48 = vpop.f32.mrb[192].mxu0 }
 0x5df   : > { %7881 = vst.msk [vmem:[%s15149_s18 + $0x48] sm:$0xff] %vm7871_vm11, %v9402_v59  ;;  %v7785_v45 = vadd.f32 %v9158_v48, %v7624_v3  ;;  %v9089_v8 = vpop.f32.mrb[189].mxu1  ;;  %v7776_v0 = vpop.f32.mrb[193].mxu0 }
 0x5e0   : > { %v9090_v49 = vadd.f32 %v9089_v8, %v9088_v61  ;;  %v7777_v63 = vadd.f32 %v7776_v0, %v15147_v10  ;;  %v9091_v35 = vpop.f32.mrb[190].mxu1  ;;  %v9159_v12 = vpop.f32.mrb[194].mxu0 }
 0x5e1   : > { %9411 = vtanh.f32 %v7785_v45  ;;  %v7788_v54 = vadd.f32 %v9159_v12, %v7627_v7  ;;  %v9092_v13 = vpop.f32.mrb[191].mxu1  ;;  %v7779_v25 = vpop.f32.mrb[195].mxu0 }
 0x5e2   : > { %9413 = vtanh.f32 %v7777_v63  ;;  %v9093_v47 = vadd.f32 %v9092_v13, %v9091_v35  ;;  %v7780_v41 = vadd.f32 %v7779_v25, %v15154_v22  ;;  %v7640_v57 = vadd.f32 %v9090_v49, %v15072_v32 }
 0x5e3   : > { %v9404_v2 = vpop.eup %9403  ;;  %9415 = vtanh.f32 %v7788_v54 }
 0x5e4   : > { %v9406_v43 = vpop.eup %9405  ;;  %7886 = vst.msk [vmem:[%s15149_s18 + $0x70] sm:$0xff] %vm7871_vm11, %v9404_v2  ;;  %9417 = vtanh.f32 %v7780_v41  ;;  %v7643_v10 = vadd.f32 %v9093_v47, %v15078_v36 }
 0x5e5   : > { %v9408_v39 = vpop.eup %9407  ;;  %7884 = vst.msk [vmem:[%s15149_s18 + $0x60] sm:$0xff] %vm7871_vm11, %v9406_v43  ;;  %v9094_v60 = vpop.f32.mrb[192].mxu1 }
 0x5e6   : > { %v9410_v14 = vpop.eup %9409  ;;  %7887 = vst.msk [vmem:[%s15149_s18 + $0x78] sm:$0xff] %vm7871_vm11, %v9408_v39  ;;  %v9162_v27 = vpop.f32.mrb[196].mxu0 }
 0x5e7   : > { %7885 = vst.msk [vmem:[%s15149_s18 + $0x68] sm:$0xff] %vm7871_vm11, %v9410_v14  ;;  %v7801_v22 = vadd.f32 %v9162_v27, %v7640_v57  ;;  %v9095_v32 = vpop.f32.mrb[193].mxu1  ;;  %v7792_v1 = vpop.f32.mrb[197].mxu0 }
 0x5e8   : > { %v9096_v29 = vadd.f32 %v9095_v32, %v9094_v60  ;;  %v7793_v21 = vadd.f32 %v7792_v1, %v7632_v62  ;;  %v9097_v56 = vpop.f32.mrb[194].mxu1  ;;  %v9163_v18 = vpop.f32.mrb[198].mxu0 }
 0x5e9   : > { %9419 = vtanh.f32 %v7801_v22  ;;  %v7804_v36 = vadd.f32 %v9163_v18, %v7643_v10  ;;  %v9098_v3 = vpop.f32.mrb[195].mxu1  ;;  %v7795_v30 = vpop.f32.mrb[199].mxu0 }
 0x5ea   : > { %9421 = vtanh.f32 %v7793_v21  ;;  %v9099_v15 = vadd.f32 %v9098_v3, %v9097_v56  ;;  %v7796_v7 = vadd.f32 %v7795_v30, %v7635_v55  ;;  %v7648_v40 = vadd.f32 %v9096_v29, %v15084_v33 }
 0x5eb   : > { %v9412_v9 = vpop.eup %9411  ;;  %9423 = vtanh.f32 %v7804_v36 }
 0x5ec   : > { %v9414_v19 = vpop.eup %9413  ;;  %7890 = vst.msk [vmem:[%s15149_s18 + $0x90] sm:$0xff] %vm7871_vm11, %v9412_v9  ;;  %9425 = vtanh.f32 %v7796_v7  ;;  %v7651_v42 = vadd.f32 %v9099_v15, %v15090_v28 }
 0x5ed   : > { %v9416_v11 = vpop.eup %9415  ;;  %7888 = vst.msk [vmem:[%s15149_s18 + $0x80] sm:$0xff] %vm7871_vm11, %v9414_v19  ;;  %v9100_v53 = vpop.f32.mrb[196].mxu1 }
 0x5ee   : > { %v9418_v23 = vpop.eup %9417  ;;  %7891 = vst.msk [vmem:[%s15149_s18 + $0x98] sm:$0xff] %vm7871_vm11, %v9416_v11  ;;  %v9166_v20 = vpop.f32.mrb[200].mxu0 }
 0x5ef   : > { %7889 = vst.msk [vmem:[%s15149_s18 + $0x88] sm:$0xff] %vm7871_vm11, %v9418_v23  ;;  %v9101_v33 = vpop.f32.mrb[197].mxu1  ;;  %v7808_v16 = vpop.f32.mrb[201].mxu0 }
 0x5f0   : > { %v9102_v38 = vadd.f32 %v9101_v33, %v9100_v53  ;;  %v7809_v46 = vadd.f32 %v7808_v16, %v7648_v40  ;;  %v9103_v24 = vpop.f32.mrb[198].mxu1  ;;  %v9167_v5 = vpop.f32.mrb[202].mxu0 }
 0x5f1   : > { %v9104_v28 = vpop.f32.mrb[199].mxu1  ;;  %v7811_v37 = vpop.f32.mrb[203].mxu0 }
 0x5f2   : > { %v7656_v4 = vadd.f32 %v9102_v38, %v15096_v58  ;;  %9427 = vtanh.f32 %v7809_v46  ;;  %v9105_v17 = vadd.f32 %v9104_v28, %v9103_v24  ;;  %v7812_v62 = vadd.f32 %v7811_v37, %v7651_v42 }
 0x5f3   : > { %v9420_v50 = vpop.eup %9419 }
 0x5f4   : > { %v9422_v44 = vpop.eup %9421  ;;  %7894 = vst.msk [vmem:[%s15149_s18 + $0xb0] sm:$0xff] %vm7871_vm11, %v9420_v50  ;;  %v7817_v55 = vadd.f32 %v9166_v20, %v7656_v4  ;;  %v7659_v31 = vadd.f32 %v9105_v17, %v15102_v6  ;;  %9429 = vtanh.f32 %v7812_v62 }
 0x5f5   : > { %v9424_v59 = vpop.eup %9423  ;;  %7892 = vst.msk [vmem:[%s15149_s18 + $0xa0] sm:$0xff] %vm7871_vm11, %v9422_v44  ;;  %v9106_v48 = vpop.f32.mrb[200].mxu1 }
 0x5f6   : > { %v9426_v61 = vpop.eup %9425  ;;  %7895 = vst.msk [vmem:[%s15149_s18 + $0xb8] sm:$0xff] %vm7871_vm11, %v9424_v59  ;;  %9431 = vtanh.f32 %v7817_v55  ;;  %v7820_v58 = vadd.f32 %v9167_v5, %v7659_v31  ;;  %v9170_v45 = vpop.f32.mrb[204].mxu0 }
 0x5f7   : > { %7893 = vst.msk [vmem:[%s15149_s18 + $0xa8] sm:$0xff] %vm7871_vm11, %v9426_v61  ;;  %v9107_v8 = vpop.f32.mrb[201].mxu1  ;;  %v7824_v0 = vpop.f32.mrb[205].mxu0 }
 0x5f8   : > { %9433 = vtanh.f32 %v7820_v58  ;;  %v9108_v49 = vadd.f32 %v9107_v8, %v9106_v48  ;;  %v9109_v6 = vpop.f32.mrb[202].mxu1  ;;  %v9171_v63 = vpop.f32.mrb[206].mxu0 }
 0x5f9   : > { %v9110_v35 = vpop.f32.mrb[203].mxu1  ;;  %v7827_v12 = vpop.f32.mrb[207].mxu0 }
 0x5fa   : > { %v9111_v54 = vadd.f32 %v9110_v35, %v9109_v6  ;;  %v7664_v13 = vadd.f32 %v9108_v49, %v15108_v26 }
 0x5fc   : > { %v9428_v25 = vpop.eup %9427  ;;  %v7825_v47 = vadd.f32 %v7824_v0, %v7664_v13  ;;  %v7667_v41 = vadd.f32 %v9111_v54, %v15114_v34 }
 0x5fd   : > { %7896 = vst.msk [vmem:[%s15149_s18 + $0xc0] sm:$0xff] %vm7871_vm11, %v9428_v25  ;;  %v9112_v43 = vpop.f32.mrb[204].mxu1 }
 0x5fe   : > { %v9430_v57 = vpop.eup %9429  ;;  %9435 = vtanh.f32 %v7825_v47  ;;  %v7828_v2 = vadd.f32 %v7827_v12, %v7667_v41  ;;  %v9113_v10 = vpop.f32.mrb[205].mxu1 }
 0x5ff   : > { %7897 = vst.msk [vmem:[%s15149_s18 + $0xc8] sm:$0xff] %vm7871_vm11, %v9430_v57  ;;  %v9114_v14 = vadd.f32 %v9113_v10, %v9112_v43  ;;  %v9115_v26 = vpop.f32.mrb[206].mxu1 }
 0x600   : > { %v9432_v39 = vpop.eup %9431  ;;  %9437 = vtanh.f32 %v7828_v2  ;;  %v9116_v34 = vpop.f32.mrb[207].mxu1 }
 0x601   : > { %7898 = vst.msk [vmem:[%s15149_s18 + $0xd0] sm:$0xff] %vm7871_vm11, %v9432_v39  ;;  %v7672_v27 = vadd.f32 %v9114_v14, %v15120_v52  ;;  %v9117_v22 = vadd.f32 %v9116_v34, %v9115_v26 }
 0x602   : > { %v9434_v60 = vpop.eup %9433 }
 0x603   : > { %7899 = vst.msk [vmem:[%s15149_s18 + $0xd8] sm:$0xff] %vm7871_vm11, %v9434_v60  ;;  %v7833_v32 = vadd.f32 %v9170_v45, %v7672_v27  ;;  %v7675_v1 = vadd.f32 %v9117_v22, %v15126_v51 }
 0x605   : > { %9439 = vtanh.f32 %v7833_v32  ;;  %v7836_v29 = vadd.f32 %v9171_v63, %v7675_v1 }
 0x607   : > { %9441 = vtanh.f32 %v7836_v29 }
 0x608   : > { %v9436_v21 = vpop.eup %9435 }
 0x609   : > { %7900 = vst.msk [vmem:[%s15149_s18 + $0xe0] sm:$0xff] %vm7871_vm11, %v9436_v21 }
 0x60a   : > { %v9438_v56 = vpop.eup %9437 }
 0x60b   : > { %7901 = vst.msk [vmem:[%s15149_s18 + $0xe8] sm:$0xff] %vm7871_vm11, %v9438_v56 }
 0x60f   : > { %v9440_v52 = vpop.eup %9439 }
 0x610   : > { %7902 = vst.msk [vmem:[%s15149_s18 + $0xf0] sm:$0xff] %vm7871_vm11, %v9440_v52 }
 0x611   : > { %v9442_v51 = vpop.eup %9441 }
 0x612   : > { %7903 = vst.msk [vmem:[%s15149_s18 + $0xf8] sm:$0xff] %vm7871_vm11, %v9442_v51 }
 0x613   : > { %9622 = shalt.err (!%p9619_p11)
}
 0x614   : > { %s9623_s7 = scalar_lea.hbm %s15243_s4, 4096  ;;  %s9627_s22 = scalar_lea.hbm %s15301_s3, 8192 }
 0x615   : > { %p9624_p0 = scmp.ne.s32.totalorder %s15243_s4, %s9623_s7  ;;  %p9628_p6 = scmp.lt.u32.totalorder %s15243_s4, %s15301_s3 }
 0x616   : > { %p9629_p7 = scmp.lt.u32.totalorder %s9627_s22, %s9623_s7  ;;  %p9631_p8 = scmp.lt.u32.totalorder %s9623_s7, %s15243_s4 }
 0x617   : > { %p9625_p4 = pnand %p9624_p0, %p16803_p12 }
 0x618   : > { %p9630_p2 = por %p9629_p7, %p9628_p6 }
 0x619   : > { %p9626_p13 = pneg %p9625_p4 }
 0x61a   : > { %p9632_p1 = por %p9631_p8, %p9630_p2 }
 0x61c   : > { %p9633_p10 = pnand %p9632_p1, %p9626_p13 }
 0x61e   : > { %9636 = shalt.err (!%p9633_p10)
}
 0x61f   : > { %s9706_s18 = smov 128   ;;  %s9707_s26 = smov 8  }
 0x620   : > { %9198 = dma.vmem_to_hbm [thread:$0]  (%p16803_p12), %s15245_s9, 4096, %s15243_s4, %s7905_s21, %s9706_s18, %s9706_s18, %s9707_s26  }
 0x621 PF: > { %s7936_s10 = sand.u32 1, %s9675_s12   ;;  %p16804_p3 = scmp.ne.s32.totalorder %s15739_s23, 0 }
 0x622   : > { %p16805_p5 = scmp.ge.s32.totalorder %s9695_s17, 2  ;;  %s7937_s19 = scalar_lea.sflag [#allocation6], %s7936_s10 }
 0x624   : > { %p9212_p9 = pnand %p16805_p5, %p16804_p3 }
 0x626   : > { %9670 = dma.done.wait (!%p9212_p9), %s7937_s19, 4096  }
 0x627   : > { %9672 = vsyncadd (!%p9212_p9), %s7937_s19, 4294963200  ;;  %s20_s17 = sadd.s32 1, %s9695_s17   ;;  %s16806_s12 = smov %s9679_s13 }
 0x628   : > { %p17_p11 = scmp.ge.s32.totalorder %s20_s17, 4   ;;  %s16807_s13 = smov %s9683_s14 }
 0x629   : > { %s16808_s14 = smov %s9874_s6  ;;  %s16809_s15 = smov %s9691_s16 }
 0x62a   : > { %s16810_s16 = smov %s16812_s25  ;;  %19 = sbr.rel (!%p17_p11) target bundleno = 7 (0x7), region = 102 }
 0x631   :  { %7942 = vsyncpa [#allocation5], 1 }
 0x632   :  { %7944 = vsyncpa [#allocation5 + $0x1], 1 }
 0x633   :  { %7945 = vsyncpa [#allocation8], 1 }
 0x634   :  { %7946 = vsyncpa [#allocation6], 1 }
 0x635   :  { %7948 = vsyncpa [#allocation6 + $0x1], 1 }

</bundles_post_ra>
